<compile_context>
chip_gen: v7x
topology: tpu7x:2x2x1
jax: 0.10.0
libtpu: 0.0.40
codegen_flags: <defaults>
</compile_context>

<pallas_src>
import functools

import jax
import jax.numpy as jnp
from jax import lax
from jax.experimental import pallas as pl
from jax.experimental.pallas import tpu as pltpu


VMEM_SPEC = pl.BlockSpec(memory_space=pltpu.MemorySpace.VMEM)


# --------------------------------------------------------------------------
# Fused bidirectional LSTM layer (optionally with mean/max pooling epilogue).
#   x_flat : (L*B, D_in)                     (seq-major: row t*B + b)
#   w_ih   : (D_in, 8H)  = [W_ih_fwd | W_ih_rev]
#   w_hh   : (H,    8H)  = [W_hh_fwd | W_hh_rev]
#   b      : (1,    8H)  = [b_fwd    | b_rev   ]
# PyTorch gate order inside each 4H block: i, f, g, o.
#   pool=False -> out (L, B, 2H)   concat([h_fwd_t, h_rev_t]) per timestep
#   pool=True  -> out (B, 4H)      [sum_f/L^2, sum_r/L^2, max_f, max_r]
#                 (matches torch.mean(v,0)/L and torch.max(v,0) of the spec)
# --------------------------------------------------------------------------
def _bilstm_kernel(x_ref, wih_ref, whh_ref, b_ref, out_ref,
                   *, seq_len, batch, hidden, pool):
    H, B = hidden, batch

    # Hoisted input projection for BOTH directions: one big MXU matmul.
    gx = (jnp.dot(x_ref[...], wih_ref[...], preferred_element_type=jnp.float32)
          + b_ref[...])                                   # (L*B, 8H)
    whh = whh_ref[...]
    whh_f, whh_r = whh[:, 0:4 * H], whh[:, 4 * H:8 * H]

    h_f = jnp.zeros((B, H), jnp.float32)
    h_r = jnp.zeros((B, H), jnp.float32)
    c_f = jnp.zeros((B, H), jnp.float32)
    c_r = jnp.zeros((B, H), jnp.float32)
    if pool:
        s_f = jnp.zeros((B, H), jnp.float32)
        s_r = jnp.zeros((B, H), jnp.float32)
        m_f = jnp.full((B, H), -jnp.inf, jnp.float32)
        m_r = jnp.full((B, H), -jnp.inf, jnp.float32)

    def cell(gates, c_prev):
        sig = jax.nn.sigmoid(gates)                       # covers i, f, o slices
        g = jnp.tanh(gates[:, 2 * H:3 * H])
        c = sig[:, H:2 * H] * c_prev + sig[:, 0:H] * g
        h = sig[:, 3 * H:4 * H] * jnp.tanh(c)
        return h, c

    # Statically unrolled recurrence (seq_len is small & static); forward and
    # reverse directions advance in the same iteration, only the h @ W_hh
    # recurrent matmuls remain on the serial critical path.
    for i in range(seq_len):
        tf, tr = i, seq_len - 1 - i
        g_f = (gx[tf * B:(tf + 1) * B, 0:4 * H]
               + jnp.dot(h_f, whh_f, preferred_element_type=jnp.float32))
        g_r = (gx[tr * B:(tr + 1) * B, 4 * H:8 * H]
               + jnp.dot(h_r, whh_r, preferred_element_type=jnp.float32))
        h_f, c_f = cell(g_f, c_f)
        h_r, c_r = cell(g_r, c_r)
        if pool:
            s_f = s_f + h_f
            s_r = s_r + h_r
            m_f = jnp.maximum(m_f, h_f)
            m_r = jnp.maximum(m_r, h_r)
        else:
            out_ref[tf, :, 0:H] = h_f
            out_ref[tr, :, H:2 * H] = h_r

    if pool:
        inv = 1.0 / float(seq_len * seq_len)   # mean(v, 0) / L of the reference
        out_ref[:, 0:H] = s_f * inv
        out_ref[:, H:2 * H] = s_r * inv
        out_ref[:, 2 * H:3 * H] = m_f
        out_ref[:, 3 * H:4 * H] = m_r


def pallas_bilstm_layer(x, p, pool):
    # x: (L, B, D_in)
    L, B, d_in = x.shape
    H = p["w_hh_f"].shape[0]
    wih = jnp.concatenate([p["w_ih_f"], p["w_ih_r"]], axis=1)     # (D_in, 8H)
    whh = jnp.concatenate([p["w_hh_f"], p["w_hh_r"]], axis=1)     # (H, 8H)
    b = jnp.concatenate([p["b_f"], p["b_r"]]).reshape(1, 8 * H)
    out_shape = (jax.ShapeDtypeStruct((B, 4 * H), jnp.float32) if pool
                 else jax.ShapeDtypeStruct((L, B, 2 * H), jnp.float32))
    return pl.pallas_call(
        functools.partial(_bilstm_kernel, seq_len=L, batch=B, hidden=H, pool=pool),
        out_shape=out_shape,
        in_specs=[VMEM_SPEC] * 4,
        out_specs=VMEM_SPEC,
    )(x.reshape(L * B, d_in), wih, whh, b)


def bilstm(x, layers):
    # x: (L, B, D_in) -> (L, B, 2H); multi-layer bidirectional, full sequence out.
    for p in layers:
        x = pallas_bilstm_layer(x, p, pool=False)
    return x


def bilstm_pool(x, layers):
    # Last layer fuses the pooling epilogue and emits only (B, 4H) = [avg, max].
    for p in layers[:-1]:
        x = pallas_bilstm_layer(x, p, pool=False)
    return pallas_bilstm_layer(x, layers[-1], pool=True)


# --------------------------------------------------------------------------
# Co-attention: both ESIM attention directions from a single score matrix.
#   a_wave = softmax(A @ B^T, rows) @ B      (L1, B, D)
#   b_wave = softmax(B @ A^T, rows) @ A      (L2, B, D)   (score^T reuse)
# Works directly on the (L, B, D) layout — no wrapper HBM transposes.
# --------------------------------------------------------------------------
def _co_attention_kernel(a_ref, b_ref, aw_ref, bw_ref, *, batch):
    for bb in range(batch):                       # static unroll over tiny batch
        a = a_ref[:, bb, :]                       # (L1, D)
        bm = b_ref[:, bb, :]                      # (L2, D)
        score = lax.dot_general(a, bm, (((1,), (1,)), ((), ())),
                                preferred_element_type=jnp.float32)   # A @ B^T
        # softmax over L2 -> a_wave ; EUP reciprocal keeps divide off the VPU
        e1 = jnp.exp(score - jnp.max(score, axis=-1, keepdims=True))
        w1 = e1 * pl.reciprocal(jnp.sum(e1, axis=-1, keepdims=True), approx=True)
        aw_ref[:, bb, :] = jnp.dot(w1, bm, preferred_element_type=jnp.float32)
        # softmax over L1 (rows of score^T) -> b_wave
        st = score.T                                                  # (L2, L1)
        e2 = jnp.exp(st - jnp.max(st, axis=-1, keepdims=True))
        w2 = e2 * pl.reciprocal(jnp.sum(e2, axis=-1, keepdims=True), approx=True)
        bw_ref[:, bb, :] = jnp.dot(w2, a, preferred_element_type=jnp.float32)


def pallas_co_attention(a_bar, b_bar):
    L1, B, D = a_bar.shape
    L2 = b_bar.shape[0]
    return pl.pallas_call(
        functools.partial(_co_attention_kernel, batch=B),
        out_shape=(jax.ShapeDtypeStruct((L1, B, D), jnp.float32),
                   jax.ShapeDtypeStruct((L2, B, D), jnp.float32)),
        in_specs=[VMEM_SPEC, VMEM_SPEC],
        out_specs=(VMEM_SPEC, VMEM_SPEC),
    )(a_bar, b_bar)


# --------------------------------------------------------------------------
# ESIM enhancement + projection with folded weights (no 4-way concat):
#   relu( a@(W1+W3) + w@(W2-W3) + (a*w)@W4 + b )
#     == relu( cat([a, w, a-w, a*w], -1) @ W + b )
# --------------------------------------------------------------------------
def _esim_proj_kernel(bar_ref, wave_ref, wa_ref, ww_ref, wp_ref, b_ref, o_ref):
    a = bar_ref[...]
    w = wave_ref[...]
    y = (jnp.dot(a, wa_ref[...], preferred_element_type=jnp.float32)
         + jnp.dot(w, ww_ref[...], preferred_element_type=jnp.float32)
         + jnp.dot(a * w, wp_ref[...], preferred_element_type=jnp.float32)
         + b_ref[...])
    o_ref[...] = jnp.maximum(y, 0.0)


def pallas_esim_proj(bar, wave, w_t, b):
    # bar, wave: (L, B, D) ; w_t: (4D, d_proj) -> (L, B, d_proj)
    L, B, D = bar.shape
    d_proj = w_t.shape[1]
    wa = w_t[0:D] + w_t[2 * D:3 * D]
    ww = w_t[D:2 * D] - w_t[2 * D:3 * D]
    wp = w_t[3 * D:4 * D]
    out2 = pl.pallas_call(
        _esim_proj_kernel,
        out_shape=jax.ShapeDtypeStruct((L * B, d_proj), jnp.float32),
        in_specs=[VMEM_SPEC] * 6,
        out_specs=VMEM_SPEC,
    )(bar.reshape(L * B, D), wave.reshape(L * B, D), wa, ww, wp,
      b.reshape(1, d_proj))
    return out2.reshape(L, B, d_proj)


# --------------------------------------------------------------------------
# Fused prediction head: logits = tanh(v @ W1 + b1) @ W2 + b2
# --------------------------------------------------------------------------
def _pred_kernel(v_ref, w1_ref, b1_ref, w2_ref, b2_ref, o_ref):
    hid = jnp.tanh(jnp.dot(v_ref[...], w1_ref[...],
                           preferred_element_type=jnp.float32) + b1_ref[...])
    o_ref[...] = (jnp.dot(hid, w2_ref[...], preferred_element_type=jnp.float32)
                  + b2_ref[...])


def pallas_pred(v, w1, b1, w2, b2):
    B = v.shape[0]
    n_out = w2.shape[1]
    return pl.pallas_call(
        _pred_kernel,
        out_shape=jax.ShapeDtypeStruct((B, n_out), jnp.float32),
        in_specs=[VMEM_SPEC] * 5,
        out_specs=VMEM_SPEC,
    )(v, w1, b1.reshape(1, -1), w2, b2.reshape(1, -1))


# --------------------------------------------------------------------------
# Full ESIM forward
# --------------------------------------------------------------------------
def esim_forward(params, premise, hypos):
    # premise: (L_pre, B) int32, hypos: (L_hyp, B) int32
    # TODO(synk): embedding gather kept as jnp.take (plain JAX glue); a
    # scalar-prefetch Pallas gather is overkill at these sizes.
    pre_emb = jnp.take(params["embed"], premise, axis=0)     # (L_pre, B, d_embed)
    hyp_emb = jnp.take(params["embed"], hypos, axis=0)       # (L_hyp, B, d_embed)

    # TODO(synk): premise/hypothesis stay as separate encoder calls; stacking
    # them on the batch axis would need length padding, which changes the
    # reverse-direction LSTM states (different semantics from the reference).
    a_bar = bilstm(pre_emb, params["enc"])                   # (L_pre, B, 2*d_hidden)
    b_bar = bilstm(hyp_emb, params["enc"])                   # shared encoder weights

    a_wave, b_wave = pallas_co_attention(a_bar, b_bar)       # both directions, one kernel

    proj_a = pallas_esim_proj(a_bar, a_wave, params["proj_w"], params["proj_b"])
    proj_b = pallas_esim_proj(b_bar, b_wave, params["proj_w"], params["proj_b"])

    pooled_a = bilstm_pool(proj_a, params["cmp"])            # (B, 4*d_v) = [avg_a, max_a]
    pooled_b = bilstm_pool(proj_b, params["cmp"])            # (B, 4*d_v) = [avg_b, max_b]
    v = jnp.concatenate([pooled_a, pooled_b], axis=-1)       # (B, 8*d_v)

    return pallas_pred(v, params["pred_w"], params["pred_b"],
                       params["out_w"], params["out_b"])     # (B, 3)


# --------------------------------------------------------------------------
# Deterministic parameter construction
# --------------------------------------------------------------------------
def init_lstm_params(key, input_size, hidden, n_layers):
    layers = []
    for layer in range(n_layers):
        d_in = input_size if layer == 0 else 2 * hidden
        key, *ks = jax.random.split(key, 7)
        s = 1.0 / float(hidden) ** 0.5

        def u(k, shape):
            return jax.random.uniform(k, shape, jnp.float32, -s, s)

        layers.append({
            "w_ih_f": u(ks[0], (d_in, 4 * hidden)),
            "w_hh_f": u(ks[1], (hidden, 4 * hidden)),
            "b_f":    u(ks[2], (4 * hidden,)),
            "w_ih_r": u(ks[3], (d_in, 4 * hidden)),
            "w_hh_r": u(ks[4], (hidden, 4 * hidden)),
            "b_r":    u(ks[5], (4 * hidden,)),
        })
    return layers, key


if __name__ == "__main__":
    n_vocab, d_embed, d_hidden = 50, 16, 16
    n_layers, d_proj, d_v, n_layers_cmp, d_pred = 1, 32, 16, 1, 32
    L_pre, L_hyp, B = 8, 6, 2

    key = jax.random.PRNGKey(0)
    key, k_emb, k_tok1, k_tok2 = jax.random.split(key, 4)

    params = {}
    params["embed"] = jax.random.normal(k_emb, (n_vocab, d_embed), jnp.float32)
    params["enc"], key = init_lstm_params(key, d_embed, d_hidden, n_layers)
    params["cmp"], key = init_lstm_params(key, d_proj, d_v, n_layers_cmp)
    key, k1, k2, k3, k4, k5, k6 = jax.random.split(key, 7)
    params["proj_w"] = jax.random.uniform(k1, (d_hidden * 4 * 2, d_proj), jnp.float32, -0.1, 0.1)
    params["proj_b"] = jax.random.uniform(k2, (d_proj,), jnp.float32, -0.1, 0.1)
    params["pred_w"] = jax.random.uniform(k3, (d_v * 4 * 2, d_pred), jnp.float32, -0.1, 0.1)
    params["pred_b"] = jax.random.uniform(k4, (d_pred,), jnp.float32, -0.1, 0.1)
    params["out_w"] = jax.random.uniform(k5, (d_pred, 3), jnp.float32, -0.1, 0.1)
    params["out_b"] = jax.random.uniform(k6, (3,), jnp.float32, -0.1, 0.1)

    premise = jax.random.randint(k_tok1, (L_pre, B), 0, n_vocab, jnp.int32)
    hypos = jax.random.randint(k_tok2, (L_hyp, B), 0, n_vocab, jnp.int32)

    logits = jax.jit(esim_forward)(params, premise, hypos)
    jax.block_until_ready(logits)
    assert logits.shape == (B, 3)
    print("KERNEL_OK")
</pallas_src>

<mosaic_0001>
module attributes {stable_mosaic.version = 11 : i64} {
  func.func @_bilstm_kernel(%arg0: memref<16x16xf32, #tpu.memory_space<vmem>>, %arg1: memref<16x128xf32, #tpu.memory_space<vmem>>, %arg2: memref<16x128xf32, #tpu.memory_space<vmem>>, %arg3: memref<1x128xf32, #tpu.memory_space<vmem>>, %arg4: memref<8x2x32xf32, #tpu.memory_space<vmem>>) attributes {dimension_semantics = [], scalar_prefetch = 0 : i64, scratch_operands = 0 : i64, tpu.core_type = #tpu.core_type<tc>} {
    %c0 = arith.constant 0 : index
    %c0_0 = arith.constant 0 : index
    %0 = vector.load %arg0[%c0, %c0_0] : memref<16x16xf32, #tpu.memory_space<vmem>>, vector<16x16xf32>
    %c0_1 = arith.constant 0 : index
    %c0_2 = arith.constant 0 : index
    %1 = vector.load %arg1[%c0_1, %c0_2] : memref<16x128xf32, #tpu.memory_space<vmem>>, vector<16x128xf32>
    %cst = arith.constant dense<0.000000e+00> : vector<16x128xf32>
    %2 = tpu.matmul %0, %1, %cst {dimension_numbers = #tpu.dot_dimension_numbers<[1], [0], [0], [1], [0, 0, 1, 1], [], []>} : vector<16x16xf32>, vector<16x128xf32>, vector<16x128xf32> -> vector<16x128xf32>
    %c0_3 = arith.constant 0 : index
    %c0_4 = arith.constant 0 : index
    %3 = vector.load %arg3[%c0_3, %c0_4] : memref<1x128xf32, #tpu.memory_space<vmem>>, vector<1x128xf32>
    %4 = vector.broadcast %3 : vector<1x128xf32> to vector<16x128xf32>
    %5 = arith.addf %2, %4 : vector<16x128xf32>
    %c0_5 = arith.constant 0 : index
    %c0_6 = arith.constant 0 : index
    %6 = vector.load %arg2[%c0_5, %c0_6] : memref<16x128xf32, #tpu.memory_space<vmem>>, vector<16x128xf32>
    %7 = vector.extract_strided_slice %6 {offsets = [0, 0], sizes = [16, 64], strides = [1, 1]} : vector<16x128xf32> to vector<16x64xf32>
    %8 = vector.extract_strided_slice %6 {offsets = [0, 64], sizes = [16, 64], strides = [1, 1]} : vector<16x128xf32> to vector<16x64xf32>
    %cst_7 = arith.constant 0.000000e+00 : f32
    %9 = vector.broadcast %cst_7 : f32 to vector<2x16xf32>
    %cst_8 = arith.constant 0.000000e+00 : f32
    %10 = vector.broadcast %cst_8 : f32 to vector<2x16xf32>
    %cst_9 = arith.constant 0.000000e+00 : f32
    %11 = vector.broadcast %cst_9 : f32 to vector<2x16xf32>
    %cst_10 = arith.constant 0.000000e+00 : f32
    %12 = vector.broadcast %cst_10 : f32 to vector<2x16xf32>
    %13 = vector.extract_strided_slice %5 {offsets = [0, 0], sizes = [2, 64], strides = [1, 1]} : vector<16x128xf32> to vector<2x64xf32>
    %cst_11 = arith.constant dense<0.000000e+00> : vector<2x64xf32>
    %14 = tpu.matmul %9, %7, %cst_11 {dimension_numbers = #tpu.dot_dimension_numbers<[1], [0], [0], [1], [0, 0, 1, 1], [], []>} : vector<2x16xf32>, vector<16x64xf32>, vector<2x64xf32> -> vector<2x64xf32>
    %15 = arith.addf %13, %14 : vector<2x64xf32>
    %16 = vector.extract_strided_slice %5 {offsets = [14, 64], sizes = [2, 64], strides = [1, 1]} : vector<16x128xf32> to vector<2x64xf32>
    %cst_12 = arith.constant dense<0.000000e+00> : vector<2x64xf32>
    %17 = tpu.matmul %10, %8, %cst_12 {dimension_numbers = #tpu.dot_dimension_numbers<[1], [0], [0], [1], [0, 0, 1, 1], [], []>} : vector<2x16xf32>, vector<16x64xf32>, vector<2x64xf32> -> vector<2x64xf32>
    %18 = arith.addf %16, %17 : vector<2x64xf32>
    %19 = arith.negf %15 : vector<2x64xf32>
    %20 = math.exp %19 : vector<2x64xf32>
    %cst_13 = arith.constant 1.000000e+00 : f32
    %21 = vector.broadcast %cst_13 : f32 to vector<2x64xf32>
    %22 = arith.addf %21, %20 : vector<2x64xf32>
    %23 = arith.divf %21, %22 : vector<2x64xf32>
    %24 = vector.extract_strided_slice %15 {offsets = [0, 32], sizes = [2, 16], strides = [1, 1]} : vector<2x64xf32> to vector<2x16xf32>
    %25 = math.tanh %24 : vector<2x16xf32>
    %26 = vector.extract_strided_slice %23 {offsets = [0, 16], sizes = [2, 16], strides = [1, 1]} : vector<2x64xf32> to vector<2x16xf32>
    %27 = arith.mulf %26, %11 : vector<2x16xf32>
    %28 = vector.extract_strided_slice %23 {offsets = [0, 0], sizes = [2, 16], strides = [1, 1]} : vector<2x64xf32> to vector<2x16xf32>
    %29 = arith.mulf %28, %25 : vector<2x16xf32>
    %30 = arith.addf %27, %29 : vector<2x16xf32>
    %31 = vector.extract_strided_slice %23 {offsets = [0, 48], sizes = [2, 16], strides = [1, 1]} : vector<2x64xf32> to vector<2x16xf32>
    %32 = math.tanh %30 : vector<2x16xf32>
    %33 = arith.mulf %31, %32 : vector<2x16xf32>
    %34 = arith.negf %18 : vector<2x64xf32>
    %35 = math.exp %34 : vector<2x64xf32>
    %cst_14 = arith.constant 1.000000e+00 : f32
    %36 = vector.broadcast %cst_14 : f32 to vector<2x64xf32>
    %37 = arith.addf %36, %35 : vector<2x64xf32>
    %38 = arith.divf %36, %37 : vector<2x64xf32>
    %39 = vector.extract_strided_slice %18 {offsets = [0, 32], sizes = [2, 16], strides = [1, 1]} : vector<2x64xf32> to vector<2x16xf32>
    %40 = math.tanh %39 : vector<2x16xf32>
    %41 = vector.extract_strided_slice %38 {offsets = [0, 16], sizes = [2, 16], strides = [1, 1]} : vector<2x64xf32> to vector<2x16xf32>
    %42 = arith.mulf %41, %12 : vector<2x16xf32>
    %43 = vector.extract_strided_slice %38 {offsets = [0, 0], sizes = [2, 16], strides = [1, 1]} : vector<2x64xf32> to vector<2x16xf32>
    %44 = arith.mulf %43, %40 : vector<2x16xf32>
    %45 = arith.addf %42, %44 : vector<2x16xf32>
    %46 = vector.extract_strided_slice %38 {offsets = [0, 48], sizes = [2, 16], strides = [1, 1]} : vector<2x64xf32> to vector<2x16xf32>
    %47 = math.tanh %45 : vector<2x16xf32>
    %48 = arith.mulf %46, %47 : vector<2x16xf32>
    %c0_15 = arith.constant 0 : index
    %c0_16 = arith.constant 0 : index
    %c0_17 = arith.constant 0 : index
    %49 = vector.load %arg4[%c0_15, %c0_16, %c0_17] : memref<8x2x32xf32, #tpu.memory_space<vmem>>, vector<1x2x16xf32>
    %50 = vector.shape_cast %49 : vector<1x2x16xf32> to vector<2x16xf32>
    %51 = vector.shape_cast %33 : vector<2x16xf32> to vector<1x2x16xf32>
    tpu.vector_store %arg4[%c0_15, %c0_16, %c0_17], %51 {strides = array<i32>} : memref<8x2x32xf32, #tpu.memory_space<vmem>>, vector<1x2x16xf32>,
    %c7 = arith.constant 7 : index
    %c0_18 = arith.constant 0 : index
    %c16 = arith.constant 16 : index
    %52 = vector.load %arg4[%c7, %c0_18, %c16] : memref<8x2x32xf32, #tpu.memory_space<vmem>>, vector<1x2x16xf32>
    %53 = vector.shape_cast %52 : vector<1x2x16xf32> to vector<2x16xf32>
    %54 = vector.shape_cast %48 : vector<2x16xf32> to vector<1x2x16xf32>
    tpu.vector_store %arg4[%c7, %c0_18, %c16], %54 {strides = array<i32>} : memref<8x2x32xf32, #tpu.memory_space<vmem>>, vector<1x2x16xf32>,
    %55 = vector.extract_strided_slice %5 {offsets = [2, 0], sizes = [2, 64], strides = [1, 1]} : vector<16x128xf32> to vector<2x64xf32>
    %cst_19 = arith.constant dense<0.000000e+00> : vector<2x64xf32>
    %56 = tpu.matmul %33, %7, %cst_19 {dimension_numbers = #tpu.dot_dimension_numbers<[1], [0], [0], [1], [0, 0, 1, 1], [], []>} : vector<2x16xf32>, vector<16x64xf32>, vector<2x64xf32> -> vector<2x64xf32>
    %57 = arith.addf %55, %56 : vector<2x64xf32>
    %58 = vector.extract_strided_slice %5 {offsets = [12, 64], sizes = [2, 64], strides = [1, 1]} : vector<16x128xf32> to vector<2x64xf32>
    %cst_20 = arith.constant dense<0.000000e+00> : vector<2x64xf32>
    %59 = tpu.matmul %48, %8, %cst_20 {dimension_numbers = #tpu.dot_dimension_numbers<[1], [0], [0], [1], [0, 0, 1, 1], [], []>} : vector<2x16xf32>, vector<16x64xf32>, vector<2x64xf32> -> vector<2x64xf32>
    %60 = arith.addf %58, %59 : vector<2x64xf32>
    %61 = arith.negf %57 : vector<2x64xf32>
    %62 = math.exp %61 : vector<2x64xf32>
    %cst_21 = arith.constant 1.000000e+00 : f32
    %63 = vector.broadcast %cst_21 : f32 to vector<2x64xf32>
    %64 = arith.addf %63, %62 : vector<2x64xf32>
    %65 = arith.divf %63, %64 : vector<2x64xf32>
    %66 = vector.extract_strided_slice %57 {offsets = [0, 32], sizes = [2, 16], strides = [1, 1]} : vector<2x64xf32> to vector<2x16xf32>
    %67 = math.tanh %66 : vector<2x16xf32>
    %68 = vector.extract_strided_slice %65 {offsets = [0, 16], sizes = [2, 16], strides = [1, 1]} : vector<2x64xf32> to vector<2x16xf32>
    %69 = arith.mulf %68, %30 : vector<2x16xf32>
    %70 = vector.extract_strided_slice %65 {offsets = [0, 0], sizes = [2, 16], strides = [1, 1]} : vector<2x64xf32> to vector<2x16xf32>
    %71 = arith.mulf %70, %67 : vector<2x16xf32>
    %72 = arith.addf %69, %71 : vector<2x16xf32>
    %73 = vector.extract_strided_slice %65 {offsets = [0, 48], sizes = [2, 16], strides = [1, 1]} : vector<2x64xf32> to vector<2x16xf32>
    %74 = math.tanh %72 : vector<2x16xf32>
    %75 = arith.mulf %73, %74 : vector<2x16xf32>
    %76 = arith.negf %60 : vector<2x64xf32>
    %77 = math.exp %76 : vector<2x64xf32>
    %cst_22 = arith.constant 1.000000e+00 : f32
    %78 = vector.broadcast %cst_22 : f32 to vector<2x64xf32>
    %79 = arith.addf %78, %77 : vector<2x64xf32>
    %80 = arith.divf %78, %79 : vector<2x64xf32>
    %81 = vector.extract_strided_slice %60 {offsets = [0, 32], sizes = [2, 16], strides = [1, 1]} : vector<2x64xf32> to vector<2x16xf32>
    %82 = math.tanh %81 : vector<2x16xf32>
    %83 = vector.extract_strided_slice %80 {offsets = [0, 16], sizes = [2, 16], strides = [1, 1]} : vector<2x64xf32> to vector<2x16xf32>
    %84 = arith.mulf %83, %45 : vector<2x16xf32>
    %85 = vector.extract_strided_slice %80 {offsets = [0, 0], sizes = [2, 16], strides = [1, 1]} : vector<2x64xf32> to vector<2x16xf32>
    %86 = arith.mulf %85, %82 : vector<2x16xf32>
    %87 = arith.addf %84, %86 : vector<2x16xf32>
    %88 = vector.extract_strided_slice %80 {offsets = [0, 48], sizes = [2, 16], strides = [1, 1]} : vector<2x64xf32> to vector<2x16xf32>
    %89 = math.tanh %87 : vector<2x16xf32>
    %90 = arith.mulf %88, %89 : vector<2x16xf32>
    %c1 = arith.constant 1 : index
    %c0_23 = arith.constant 0 : index
    %c0_24 = arith.constant 0 : index
    %91 = vector.load %arg4[%c1, %c0_23, %c0_24] : memref<8x2x32xf32, #tpu.memory_space<vmem>>, vector<1x2x16xf32>
    %92 = vector.shape_cast %91 : vector<1x2x16xf32> to vector<2x16xf32>
    %93 = vector.shape_cast %75 : vector<2x16xf32> to vector<1x2x16xf32>
    tpu.vector_store %arg4[%c1, %c0_23, %c0_24], %93 {strides = array<i32>} : memref<8x2x32xf32, #tpu.memory_space<vmem>>, vector<1x2x16xf32>,
    %c6 = arith.constant 6 : index
    %c0_25 = arith.constant 0 : index
    %c16_26 = arith.constant 16 : index
    %94 = vector.load %arg4[%c6, %c0_25, %c16_26] : memref<8x2x32xf32, #tpu.memory_space<vmem>>, vector<1x2x16xf32>
    %95 = vector.shape_cast %94 : vector<1x2x16xf32> to vector<2x16xf32>
    %96 = vector.shape_cast %90 : vector<2x16xf32> to vector<1x2x16xf32>
    tpu.vector_store %arg4[%c6, %c0_25, %c16_26], %96 {strides = array<i32>} : memref<8x2x32xf32, #tpu.memory_space<vmem>>, vector<1x2x16xf32>,
    %97 = vector.extract_strided_slice %5 {offsets = [4, 0], sizes = [2, 64], strides = [1, 1]} : vector<16x128xf32> to vector<2x64xf32>
    %cst_27 = arith.constant dense<0.000000e+00> : vector<2x64xf32>
    %98 = tpu.matmul %75, %7, %cst_27 {dimension_numbers = #tpu.dot_dimension_numbers<[1], [0], [0], [1], [0, 0, 1, 1], [], []>} : vector<2x16xf32>, vector<16x64xf32>, vector<2x64xf32> -> vector<2x64xf32>
    %99 = arith.addf %97, %98 : vector<2x64xf32>
    %100 = vector.extract_strided_slice %5 {offsets = [10, 64], sizes = [2, 64], strides = [1, 1]} : vector<16x128xf32> to vector<2x64xf32>
    %cst_28 = arith.constant dense<0.000000e+00> : vector<2x64xf32>
    %101 = tpu.matmul %90, %8, %cst_28 {dimension_numbers = #tpu.dot_dimension_numbers<[1], [0], [0], [1], [0, 0, 1, 1], [], []>} : vector<2x16xf32>, vector<16x64xf32>, vector<2x64xf32> -> vector<2x64xf32>
    %102 = arith.addf %100, %101 : vector<2x64xf32>
    %103 = arith.negf %99 : vector<2x64xf32>
    %104 = math.exp %103 : vector<2x64xf32>
    %cst_29 = arith.constant 1.000000e+00 : f32
    %105 = vector.broadcast %cst_29 : f32 to vector<2x64xf32>
    %106 = arith.addf %105, %104 : vector<2x64xf32>
    %107 = arith.divf %105, %106 : vector<2x64xf32>
    %108 = vector.extract_strided_slice %99 {offsets = [0, 32], sizes = [2, 16], strides = [1, 1]} : vector<2x64xf32> to vector<2x16xf32>
    %109 = math.tanh %108 : vector<2x16xf32>
    %110 = vector.extract_strided_slice %107 {offsets = [0, 16], sizes = [2, 16], strides = [1, 1]} : vector<2x64xf32> to vector<2x16xf32>
    %111 = arith.mulf %110, %72 : vector<2x16xf32>
    %112 = vector.extract_strided_slice %107 {offsets = [0, 0], sizes = [2, 16], strides = [1, 1]} : vector<2x64xf32> to vector<2x16xf32>
    %113 = arith.mulf %112, %109 : vector<2x16xf32>
    %114 = arith.addf %111, %113 : vector<2x16xf32>
    %115 = vector.extract_strided_slice %107 {offsets = [0, 48], sizes = [2, 16], strides = [1, 1]} : vector<2x64xf32> to vector<2x16xf32>
    %116 = math.tanh %114 : vector<2x16xf32>
    %117 = arith.mulf %115, %116 : vector<2x16xf32>
    %118 = arith.negf %102 : vector<2x64xf32>
    %119 = math.exp %118 : vector<2x64xf32>
    %cst_30 = arith.constant 1.000000e+00 : f32
    %120 = vector.broadcast %cst_30 : f32 to vector<2x64xf32>
    %121 = arith.addf %120, %119 : vector<2x64xf32>
    %122 = arith.divf %120, %121 : vector<2x64xf32>
    %123 = vector.extract_strided_slice %102 {offsets = [0, 32], sizes = [2, 16], strides = [1, 1]} : vector<2x64xf32> to vector<2x16xf32>
    %124 = math.tanh %123 : vector<2x16xf32>
    %125 = vector.extract_strided_slice %122 {offsets = [0, 16], sizes = [2, 16], strides = [1, 1]} : vector<2x64xf32> to vector<2x16xf32>
    %126 = arith.mulf %125, %87 : vector<2x16xf32>
    %127 = vector.extract_strided_slice %122 {offsets = [0, 0], sizes = [2, 16], strides = [1, 1]} : vector<2x64xf32> to vector<2x16xf32>
    %128 = arith.mulf %127, %124 : vector<2x16xf32>
    %129 = arith.addf %126, %128 : vector<2x16xf32>
    %130 = vector.extract_strided_slice %122 {offsets = [0, 48], sizes = [2, 16], strides = [1, 1]} : vector<2x64xf32> to vector<2x16xf32>
    %131 = math.tanh %129 : vector<2x16xf32>
    %132 = arith.mulf %130, %131 : vector<2x16xf32>
    %c2 = arith.constant 2 : index
    %c0_31 = arith.constant 0 : index
    %c0_32 = arith.constant 0 : index
    %133 = vector.load %arg4[%c2, %c0_31, %c0_32] : memref<8x2x32xf32, #tpu.memory_space<vmem>>, vector<1x2x16xf32>
    %134 = vector.shape_cast %133 : vector<1x2x16xf32> to vector<2x16xf32>
    %135 = vector.shape_cast %117 : vector<2x16xf32> to vector<1x2x16xf32>
    tpu.vector_store %arg4[%c2, %c0_31, %c0_32], %135 {strides = array<i32>} : memref<8x2x32xf32, #tpu.memory_space<vmem>>, vector<1x2x16xf32>,
    %c5 = arith.constant 5 : index
    %c0_33 = arith.constant 0 : index
    %c16_34 = arith.constant 16 : index
    %136 = vector.load %arg4[%c5, %c0_33, %c16_34] : memref<8x2x32xf32, #tpu.memory_space<vmem>>, vector<1x2x16xf32>
    %137 = vector.shape_cast %136 : vector<1x2x16xf32> to vector<2x16xf32>
    %138 = vector.shape_cast %132 : vector<2x16xf32> to vector<1x2x16xf32>
    tpu.vector_store %arg4[%c5, %c0_33, %c16_34], %138 {strides = array<i32>} : memref<8x2x32xf32, #tpu.memory_space<vmem>>, vector<1x2x16xf32>,
    %139 = vector.extract_strided_slice %5 {offsets = [6, 0], sizes = [2, 64], strides = [1, 1]} : vector<16x128xf32> to vector<2x64xf32>
    %cst_35 = arith.constant dense<0.000000e+00> : vector<2x64xf32>
    %140 = tpu.matmul %117, %7, %cst_35 {dimension_numbers = #tpu.dot_dimension_numbers<[1], [0], [0], [1], [0, 0, 1, 1], [], []>} : vector<2x16xf32>, vector<16x64xf32>, vector<2x64xf32> -> vector<2x64xf32>
    %141 = arith.addf %139, %140 : vector<2x64xf32>
    %142 = vector.extract_strided_slice %5 {offsets = [8, 64], sizes = [2, 64], strides = [1, 1]} : vector<16x128xf32> to vector<2x64xf32>
    %cst_36 = arith.constant dense<0.000000e+00> : vector<2x64xf32>
    %143 = tpu.matmul %132, %8, %cst_36 {dimension_numbers = #tpu.dot_dimension_numbers<[1], [0], [0], [1], [0, 0, 1, 1], [], []>} : vector<2x16xf32>, vector<16x64xf32>, vector<2x64xf32> -> vector<2x64xf32>
    %144 = arith.addf %142, %143 : vector<2x64xf32>
    %145 = arith.negf %141 : vector<2x64xf32>
    %146 = math.exp %145 : vector<2x64xf32>
    %cst_37 = arith.constant 1.000000e+00 : f32
    %147 = vector.broadcast %cst_37 : f32 to vector<2x64xf32>
    %148 = arith.addf %147, %146 : vector<2x64xf32>
    %149 = arith.divf %147, %148 : vector<2x64xf32>
    %150 = vector.extract_strided_slice %141 {offsets = [0, 32], sizes = [2, 16], strides = [1, 1]} : vector<2x64xf32> to vector<2x16xf32>
    %151 = math.tanh %150 : vector<2x16xf32>
    %152 = vector.extract_strided_slice %149 {offsets = [0, 16], sizes = [2, 16], strides = [1, 1]} : vector<2x64xf32> to vector<2x16xf32>
    %153 = arith.mulf %152, %114 : vector<2x16xf32>
    %154 = vector.extract_strided_slice %149 {offsets = [0, 0], sizes = [2, 16], strides = [1, 1]} : vector<2x64xf32> to vector<2x16xf32>
    %155 = arith.mulf %154, %151 : vector<2x16xf32>
    %156 = arith.addf %153, %155 : vector<2x16xf32>
    %157 = vector.extract_strided_slice %149 {offsets = [0, 48], sizes = [2, 16], strides = [1, 1]} : vector<2x64xf32> to vector<2x16xf32>
    %158 = math.tanh %156 : vector<2x16xf32>
    %159 = arith.mulf %157, %158 : vector<2x16xf32>
    %160 = arith.negf %144 : vector<2x64xf32>
    %161 = math.exp %160 : vector<2x64xf32>
    %cst_38 = arith.constant 1.000000e+00 : f32
    %162 = vector.broadcast %cst_38 : f32 to vector<2x64xf32>
    %163 = arith.addf %162, %161 : vector<2x64xf32>
    %164 = arith.divf %162, %163 : vector<2x64xf32>
    %165 = vector.extract_strided_slice %144 {offsets = [0, 32], sizes = [2, 16], strides = [1, 1]} : vector<2x64xf32> to vector<2x16xf32>
    %166 = math.tanh %165 : vector<2x16xf32>
    %167 = vector.extract_strided_slice %164 {offsets = [0, 16], sizes = [2, 16], strides = [1, 1]} : vector<2x64xf32> to vector<2x16xf32>
    %168 = arith.mulf %167, %129 : vector<2x16xf32>
    %169 = vector.extract_strided_slice %164 {offsets = [0, 0], sizes = [2, 16], strides = [1, 1]} : vector<2x64xf32> to vector<2x16xf32>
    %170 = arith.mulf %169, %166 : vector<2x16xf32>
    %171 = arith.addf %168, %170 : vector<2x16xf32>
    %172 = vector.extract_strided_slice %164 {offsets = [0, 48], sizes = [2, 16], strides = [1, 1]} : vector<2x64xf32> to vector<2x16xf32>
    %173 = math.tanh %171 : vector<2x16xf32>
    %174 = arith.mulf %172, %173 : vector<2x16xf32>
    %c3 = arith.constant 3 : index
    %c0_39 = arith.constant 0 : index
    %c0_40 = arith.constant 0 : index
    %175 = vector.load %arg4[%c3, %c0_39, %c0_40] : memref<8x2x32xf32, #tpu.memory_space<vmem>>, vector<1x2x16xf32>
    %176 = vector.shape_cast %175 : vector<1x2x16xf32> to vector<2x16xf32>
    %177 = vector.shape_cast %159 : vector<2x16xf32> to vector<1x2x16xf32>
    tpu.vector_store %arg4[%c3, %c0_39, %c0_40], %177 {strides = array<i32>} : memref<8x2x32xf32, #tpu.memory_space<vmem>>, vector<1x2x16xf32>,
    %c4 = arith.constant 4 : index
    %c0_41 = arith.constant 0 : index
    %c16_42 = arith.constant 16 : index
    %178 = vector.load %arg4[%c4, %c0_41, %c16_42] : memref<8x2x32xf32, #tpu.memory_space<vmem>>, vector<1x2x16xf32>
    %179 = vector.shape_cast %178 : vector<1x2x16xf32> to vector<2x16xf32>
    %180 = vector.shape_cast %174 : vector<2x16xf32> to vector<1x2x16xf32>
    tpu.vector_store %arg4[%c4, %c0_41, %c16_42], %180 {strides = array<i32>} : memref<8x2x32xf32, #tpu.memory_space<vmem>>, vector<1x2x16xf32>,
    %181 = vector.extract_strided_slice %5 {offsets = [8, 0], sizes = [2, 64], strides = [1, 1]} : vector<16x128xf32> to vector<2x64xf32>
    %cst_43 = arith.constant dense<0.000000e+00> : vector<2x64xf32>
    %182 = tpu.matmul %159, %7, %cst_43 {dimension_numbers = #tpu.dot_dimension_numbers<[1], [0], [0], [1], [0, 0, 1, 1], [], []>} : vector<2x16xf32>, vector<16x64xf32>, vector<2x64xf32> -> vector<2x64xf32>
    %183 = arith.addf %181, %182 : vector<2x64xf32>
    %184 = vector.extract_strided_slice %5 {offsets = [6, 64], sizes = [2, 64], strides = [1, 1]} : vector<16x128xf32> to vector<2x64xf32>
    %cst_44 = arith.constant dense<0.000000e+00> : vector<2x64xf32>
    %185 = tpu.matmul %174, %8, %cst_44 {dimension_numbers = #tpu.dot_dimension_numbers<[1], [0], [0], [1], [0, 0, 1, 1], [], []>} : vector<2x16xf32>, vector<16x64xf32>, vector<2x64xf32> -> vector<2x64xf32>
    %186 = arith.addf %184, %185 : vector<2x64xf32>
    %187 = arith.negf %183 : vector<2x64xf32>
    %188 = math.exp %187 : vector<2x64xf32>
    %cst_45 = arith.constant 1.000000e+00 : f32
    %189 = vector.broadcast %cst_45 : f32 to vector<2x64xf32>
    %190 = arith.addf %189, %188 : vector<2x64xf32>
    %191 = arith.divf %189, %190 : vector<2x64xf32>
    %192 = vector.extract_strided_slice %183 {offsets = [0, 32], sizes = [2, 16], strides = [1, 1]} : vector<2x64xf32> to vector<2x16xf32>
    %193 = math.tanh %192 : vector<2x16xf32>
    %194 = vector.extract_strided_slice %191 {offsets = [0, 16], sizes = [2, 16], strides = [1, 1]} : vector<2x64xf32> to vector<2x16xf32>
    %195 = arith.mulf %194, %156 : vector<2x16xf32>
    %196 = vector.extract_strided_slice %191 {offsets = [0, 0], sizes = [2, 16], strides = [1, 1]} : vector<2x64xf32> to vector<2x16xf32>
    %197 = arith.mulf %196, %193 : vector<2x16xf32>
    %198 = arith.addf %195, %197 : vector<2x16xf32>
    %199 = vector.extract_strided_slice %191 {offsets = [0, 48], sizes = [2, 16], strides = [1, 1]} : vector<2x64xf32> to vector<2x16xf32>
    %200 = math.tanh %198 : vector<2x16xf32>
    %201 = arith.mulf %199, %200 : vector<2x16xf32>
    %202 = arith.negf %186 : vector<2x64xf32>
    %203 = math.exp %202 : vector<2x64xf32>
    %cst_46 = arith.constant 1.000000e+00 : f32
    %204 = vector.broadcast %cst_46 : f32 to vector<2x64xf32>
    %205 = arith.addf %204, %203 : vector<2x64xf32>
    %206 = arith.divf %204, %205 : vector<2x64xf32>
    %207 = vector.extract_strided_slice %186 {offsets = [0, 32], sizes = [2, 16], strides = [1, 1]} : vector<2x64xf32> to vector<2x16xf32>
    %208 = math.tanh %207 : vector<2x16xf32>
    %209 = vector.extract_strided_slice %206 {offsets = [0, 16], sizes = [2, 16], strides = [1, 1]} : vector<2x64xf32> to vector<2x16xf32>
    %210 = arith.mulf %209, %171 : vector<2x16xf32>
    %211 = vector.extract_strided_slice %206 {offsets = [0, 0], sizes = [2, 16], strides = [1, 1]} : vector<2x64xf32> to vector<2x16xf32>
    %212 = arith.mulf %211, %208 : vector<2x16xf32>
    %213 = arith.addf %210, %212 : vector<2x16xf32>
    %214 = vector.extract_strided_slice %206 {offsets = [0, 48], sizes = [2, 16], strides = [1, 1]} : vector<2x64xf32> to vector<2x16xf32>
    %215 = math.tanh %213 : vector<2x16xf32>
    %216 = arith.mulf %214, %215 : vector<2x16xf32>
    %c4_47 = arith.constant 4 : index
    %c0_48 = arith.constant 0 : index
    %c0_49 = arith.constant 0 : index
    %217 = vector.load %arg4[%c4_47, %c0_48, %c0_49] : memref<8x2x32xf32, #tpu.memory_space<vmem>>, vector<1x2x16xf32>
    %218 = vector.shape_cast %217 : vector<1x2x16xf32> to vector<2x16xf32>
    %219 = vector.shape_cast %201 : vector<2x16xf32> to vector<1x2x16xf32>
    tpu.vector_store %arg4[%c4_47, %c0_48, %c0_49], %219 {strides = array<i32>} : memref<8x2x32xf32, #tpu.memory_space<vmem>>, vector<1x2x16xf32>,
    %c3_50 = arith.constant 3 : index
    %c0_51 = arith.constant 0 : index
    %c16_52 = arith.constant 16 : index
    %220 = vector.load %arg4[%c3_50, %c0_51, %c16_52] : memref<8x2x32xf32, #tpu.memory_space<vmem>>, vector<1x2x16xf32>
    %221 = vector.shape_cast %220 : vector<1x2x16xf32> to vector<2x16xf32>
    %222 = vector.shape_cast %216 : vector<2x16xf32> to vector<1x2x16xf32>
    tpu.vector_store %arg4[%c3_50, %c0_51, %c16_52], %222 {strides = array<i32>} : memref<8x2x32xf32, #tpu.memory_space<vmem>>, vector<1x2x16xf32>,
    %223 = vector.extract_strided_slice %5 {offsets = [10, 0], sizes = [2, 64], strides = [1, 1]} : vector<16x128xf32> to vector<2x64xf32>
    %cst_53 = arith.constant dense<0.000000e+00> : vector<2x64xf32>
    %224 = tpu.matmul %201, %7, %cst_53 {dimension_numbers = #tpu.dot_dimension_numbers<[1], [0], [0], [1], [0, 0, 1, 1], [], []>} : vector<2x16xf32>, vector<16x64xf32>, vector<2x64xf32> -> vector<2x64xf32>
    %225 = arith.addf %223, %224 : vector<2x64xf32>
    %226 = vector.extract_strided_slice %5 {offsets = [4, 64], sizes = [2, 64], strides = [1, 1]} : vector<16x128xf32> to vector<2x64xf32>
    %cst_54 = arith.constant dense<0.000000e+00> : vector<2x64xf32>
    %227 = tpu.matmul %216, %8, %cst_54 {dimension_numbers = #tpu.dot_dimension_numbers<[1], [0], [0], [1], [0, 0, 1, 1], [], []>} : vector<2x16xf32>, vector<16x64xf32>, vector<2x64xf32> -> vector<2x64xf32>
    %228 = arith.addf %226, %227 : vector<2x64xf32>
    %229 = arith.negf %225 : vector<2x64xf32>
    %230 = math.exp %229 : vector<2x64xf32>
    %cst_55 = arith.constant 1.000000e+00 : f32
    %231 = vector.broadcast %cst_55 : f32 to vector<2x64xf32>
    %232 = arith.addf %231, %230 : vector<2x64xf32>
    %233 = arith.divf %231, %232 : vector<2x64xf32>
    %234 = vector.extract_strided_slice %225 {offsets = [0, 32], sizes = [2, 16], strides = [1, 1]} : vector<2x64xf32> to vector<2x16xf32>
    %235 = math.tanh %234 : vector<2x16xf32>
    %236 = vector.extract_strided_slice %233 {offsets = [0, 16], sizes = [2, 16], strides = [1, 1]} : vector<2x64xf32> to vector<2x16xf32>
    %237 = arith.mulf %236, %198 : vector<2x16xf32>
    %238 = vector.extract_strided_slice %233 {offsets = [0, 0], sizes = [2, 16], strides = [1, 1]} : vector<2x64xf32> to vector<2x16xf32>
    %239 = arith.mulf %238, %235 : vector<2x16xf32>
    %240 = arith.addf %237, %239 : vector<2x16xf32>
    %241 = vector.extract_strided_slice %233 {offsets = [0, 48], sizes = [2, 16], strides = [1, 1]} : vector<2x64xf32> to vector<2x16xf32>
    %242 = math.tanh %240 : vector<2x16xf32>
    %243 = arith.mulf %241, %242 : vector<2x16xf32>
    %244 = arith.negf %228 : vector<2x64xf32>
    %245 = math.exp %244 : vector<2x64xf32>
    %cst_56 = arith.constant 1.000000e+00 : f32
    %246 = vector.broadcast %cst_56 : f32 to vector<2x64xf32>
    %247 = arith.addf %246, %245 : vector<2x64xf32>
    %248 = arith.divf %246, %247 : vector<2x64xf32>
    %249 = vector.extract_strided_slice %228 {offsets = [0, 32], sizes = [2, 16], strides = [1, 1]} : vector<2x64xf32> to vector<2x16xf32>
    %250 = math.tanh %249 : vector<2x16xf32>
    %251 = vector.extract_strided_slice %248 {offsets = [0, 16], sizes = [2, 16], strides = [1, 1]} : vector<2x64xf32> to vector<2x16xf32>
    %252 = arith.mulf %251, %213 : vector<2x16xf32>
    %253 = vector.extract_strided_slice %248 {offsets = [0, 0], sizes = [2, 16], strides = [1, 1]} : vector<2x64xf32> to vector<2x16xf32>
    %254 = arith.mulf %253, %250 : vector<2x16xf32>
    %255 = arith.addf %252, %254 : vector<2x16xf32>
    %256 = vector.extract_strided_slice %248 {offsets = [0, 48], sizes = [2, 16], strides = [1, 1]} : vector<2x64xf32> to vector<2x16xf32>
    %257 = math.tanh %255 : vector<2x16xf32>
    %258 = arith.mulf %256, %257 : vector<2x16xf32>
    %c5_57 = arith.constant 5 : index
    %c0_58 = arith.constant 0 : index
    %c0_59 = arith.constant 0 : index
    %259 = vector.load %arg4[%c5_57, %c0_58, %c0_59] : memref<8x2x32xf32, #tpu.memory_space<vmem>>, vector<1x2x16xf32>
    %260 = vector.shape_cast %259 : vector<1x2x16xf32> to vector<2x16xf32>
    %261 = vector.shape_cast %243 : vector<2x16xf32> to vector<1x2x16xf32>
    tpu.vector_store %arg4[%c5_57, %c0_58, %c0_59], %261 {strides = array<i32>} : memref<8x2x32xf32, #tpu.memory_space<vmem>>, vector<1x2x16xf32>,
    %c2_60 = arith.constant 2 : index
    %c0_61 = arith.constant 0 : index
    %c16_62 = arith.constant 16 : index
    %262 = vector.load %arg4[%c2_60, %c0_61, %c16_62] : memref<8x2x32xf32, #tpu.memory_space<vmem>>, vector<1x2x16xf32>
    %263 = vector.shape_cast %262 : vector<1x2x16xf32> to vector<2x16xf32>
    %264 = vector.shape_cast %258 : vector<2x16xf32> to vector<1x2x16xf32>
    tpu.vector_store %arg4[%c2_60, %c0_61, %c16_62], %264 {strides = array<i32>} : memref<8x2x32xf32, #tpu.memory_space<vmem>>, vector<1x2x16xf32>,
    %265 = vector.extract_strided_slice %5 {offsets = [12, 0], sizes = [2, 64], strides = [1, 1]} : vector<16x128xf32> to vector<2x64xf32>
    %cst_63 = arith.constant dense<0.000000e+00> : vector<2x64xf32>
    %266 = tpu.matmul %243, %7, %cst_63 {dimension_numbers = #tpu.dot_dimension_numbers<[1], [0], [0], [1], [0, 0, 1, 1], [], []>} : vector<2x16xf32>, vector<16x64xf32>, vector<2x64xf32> -> vector<2x64xf32>
    %267 = arith.addf %265, %266 : vector<2x64xf32>
    %268 = vector.extract_strided_slice %5 {offsets = [2, 64], sizes = [2, 64], strides = [1, 1]} : vector<16x128xf32> to vector<2x64xf32>
    %cst_64 = arith.constant dense<0.000000e+00> : vector<2x64xf32>
    %269 = tpu.matmul %258, %8, %cst_64 {dimension_numbers = #tpu.dot_dimension_numbers<[1], [0], [0], [1], [0, 0, 1, 1], [], []>} : vector<2x16xf32>, vector<16x64xf32>, vector<2x64xf32> -> vector<2x64xf32>
    %270 = arith.addf %268, %269 : vector<2x64xf32>
    %271 = arith.negf %267 : vector<2x64xf32>
    %272 = math.exp %271 : vector<2x64xf32>
    %cst_65 = arith.constant 1.000000e+00 : f32
    %273 = vector.broadcast %cst_65 : f32 to vector<2x64xf32>
    %274 = arith.addf %273, %272 : vector<2x64xf32>
    %275 = arith.divf %273, %274 : vector<2x64xf32>
    %276 = vector.extract_strided_slice %267 {offsets = [0, 32], sizes = [2, 16], strides = [1, 1]} : vector<2x64xf32> to vector<2x16xf32>
    %277 = math.tanh %276 : vector<2x16xf32>
    %278 = vector.extract_strided_slice %275 {offsets = [0, 16], sizes = [2, 16], strides = [1, 1]} : vector<2x64xf32> to vector<2x16xf32>
    %279 = arith.mulf %278, %240 : vector<2x16xf32>
    %280 = vector.extract_strided_slice %275 {offsets = [0, 0], sizes = [2, 16], strides = [1, 1]} : vector<2x64xf32> to vector<2x16xf32>
    %281 = arith.mulf %280, %277 : vector<2x16xf32>
    %282 = arith.addf %279, %281 : vector<2x16xf32>
    %283 = vector.extract_strided_slice %275 {offsets = [0, 48], sizes = [2, 16], strides = [1, 1]} : vector<2x64xf32> to vector<2x16xf32>
    %284 = math.tanh %282 : vector<2x16xf32>
    %285 = arith.mulf %283, %284 : vector<2x16xf32>
    %286 = arith.negf %270 : vector<2x64xf32>
    %287 = math.exp %286 : vector<2x64xf32>
    %cst_66 = arith.constant 1.000000e+00 : f32
    %288 = vector.broadcast %cst_66 : f32 to vector<2x64xf32>
    %289 = arith.addf %288, %287 : vector<2x64xf32>
    %290 = arith.divf %288, %289 : vector<2x64xf32>
    %291 = vector.extract_strided_slice %270 {offsets = [0, 32], sizes = [2, 16], strides = [1, 1]} : vector<2x64xf32> to vector<2x16xf32>
    %292 = math.tanh %291 : vector<2x16xf32>
    %293 = vector.extract_strided_slice %290 {offsets = [0, 16], sizes = [2, 16], strides = [1, 1]} : vector<2x64xf32> to vector<2x16xf32>
    %294 = arith.mulf %293, %255 : vector<2x16xf32>
    %295 = vector.extract_strided_slice %290 {offsets = [0, 0], sizes = [2, 16], strides = [1, 1]} : vector<2x64xf32> to vector<2x16xf32>
    %296 = arith.mulf %295, %292 : vector<2x16xf32>
    %297 = arith.addf %294, %296 : vector<2x16xf32>
    %298 = vector.extract_strided_slice %290 {offsets = [0, 48], sizes = [2, 16], strides = [1, 1]} : vector<2x64xf32> to vector<2x16xf32>
    %299 = math.tanh %297 : vector<2x16xf32>
    %300 = arith.mulf %298, %299 : vector<2x16xf32>
    %c6_67 = arith.constant 6 : index
    %c0_68 = arith.constant 0 : index
    %c0_69 = arith.constant 0 : index
    %301 = vector.load %arg4[%c6_67, %c0_68, %c0_69] : memref<8x2x32xf32, #tpu.memory_space<vmem>>, vector<1x2x16xf32>
    %302 = vector.shape_cast %301 : vector<1x2x16xf32> to vector<2x16xf32>
    %303 = vector.shape_cast %285 : vector<2x16xf32> to vector<1x2x16xf32>
    tpu.vector_store %arg4[%c6_67, %c0_68, %c0_69], %303 {strides = array<i32>} : memref<8x2x32xf32, #tpu.memory_space<vmem>>, vector<1x2x16xf32>,
    %c1_70 = arith.constant 1 : index
    %c0_71 = arith.constant 0 : index
    %c16_72 = arith.constant 16 : index
    %304 = vector.load %arg4[%c1_70, %c0_71, %c16_72] : memref<8x2x32xf32, #tpu.memory_space<vmem>>, vector<1x2x16xf32>
    %305 = vector.shape_cast %304 : vector<1x2x16xf32> to vector<2x16xf32>
    %306 = vector.shape_cast %300 : vector<2x16xf32> to vector<1x2x16xf32>
    tpu.vector_store %arg4[%c1_70, %c0_71, %c16_72], %306 {strides = array<i32>} : memref<8x2x32xf32, #tpu.memory_space<vmem>>, vector<1x2x16xf32>,
    %307 = vector.extract_strided_slice %5 {offsets = [14, 0], sizes = [2, 64], strides = [1, 1]} : vector<16x128xf32> to vector<2x64xf32>
    %cst_73 = arith.constant dense<0.000000e+00> : vector<2x64xf32>
    %308 = tpu.matmul %285, %7, %cst_73 {dimension_numbers = #tpu.dot_dimension_numbers<[1], [0], [0], [1], [0, 0, 1, 1], [], []>} : vector<2x16xf32>, vector<16x64xf32>, vector<2x64xf32> -> vector<2x64xf32>
    %309 = arith.addf %307, %308 : vector<2x64xf32>
    %310 = vector.extract_strided_slice %5 {offsets = [0, 64], sizes = [2, 64], strides = [1, 1]} : vector<16x128xf32> to vector<2x64xf32>
    %cst_74 = arith.constant dense<0.000000e+00> : vector<2x64xf32>
    %311 = tpu.matmul %300, %8, %cst_74 {dimension_numbers = #tpu.dot_dimension_numbers<[1], [0], [0], [1], [0, 0, 1, 1], [], []>} : vector<2x16xf32>, vector<16x64xf32>, vector<2x64xf32> -> vector<2x64xf32>
    %312 = arith.addf %310, %311 : vector<2x64xf32>
    %313 = arith.negf %309 : vector<2x64xf32>
    %314 = math.exp %313 : vector<2x64xf32>
    %cst_75 = arith.constant 1.000000e+00 : f32
    %315 = vector.broadcast %cst_75 : f32 to vector<2x64xf32>
    %316 = arith.addf %315, %314 : vector<2x64xf32>
    %317 = arith.divf %315, %316 : vector<2x64xf32>
    %318 = vector.extract_strided_slice %309 {offsets = [0, 32], sizes = [2, 16], strides = [1, 1]} : vector<2x64xf32> to vector<2x16xf32>
    %319 = math.tanh %318 : vector<2x16xf32>
    %320 = vector.extract_strided_slice %317 {offsets = [0, 16], sizes = [2, 16], strides = [1, 1]} : vector<2x64xf32> to vector<2x16xf32>
    %321 = arith.mulf %320, %282 : vector<2x16xf32>
    %322 = vector.extract_strided_slice %317 {offsets = [0, 0], sizes = [2, 16], strides = [1, 1]} : vector<2x64xf32> to vector<2x16xf32>
    %323 = arith.mulf %322, %319 : vector<2x16xf32>
    %324 = arith.addf %321, %323 : vector<2x16xf32>
    %325 = vector.extract_strided_slice %317 {offsets = [0, 48], sizes = [2, 16], strides = [1, 1]} : vector<2x64xf32> to vector<2x16xf32>
    %326 = math.tanh %324 : vector<2x16xf32>
    %327 = arith.mulf %325, %326 : vector<2x16xf32>
    %328 = arith.negf %312 : vector<2x64xf32>
    %329 = math.exp %328 : vector<2x64xf32>
    %cst_76 = arith.constant 1.000000e+00 : f32
    %330 = vector.broadcast %cst_76 : f32 to vector<2x64xf32>
    %331 = arith.addf %330, %329 : vector<2x64xf32>
    %332 = arith.divf %330, %331 : vector<2x64xf32>
    %333 = vector.extract_strided_slice %312 {offsets = [0, 32], sizes = [2, 16], strides = [1, 1]} : vector<2x64xf32> to vector<2x16xf32>
    %334 = math.tanh %333 : vector<2x16xf32>
    %335 = vector.extract_strided_slice %332 {offsets = [0, 16], sizes = [2, 16], strides = [1, 1]} : vector<2x64xf32> to vector<2x16xf32>
    %336 = arith.mulf %335, %297 : vector<2x16xf32>
    %337 = vector.extract_strided_slice %332 {offsets = [0, 0], sizes = [2, 16], strides = [1, 1]} : vector<2x64xf32> to vector<2x16xf32>
    %338 = arith.mulf %337, %334 : vector<2x16xf32>
    %339 = arith.addf %336, %338 : vector<2x16xf32>
    %340 = vector.extract_strided_slice %332 {offsets = [0, 48], sizes = [2, 16], strides = [1, 1]} : vector<2x64xf32> to vector<2x16xf32>
    %341 = math.tanh %339 : vector<2x16xf32>
    %342 = arith.mulf %340, %341 : vector<2x16xf32>
    %c7_77 = arith.constant 7 : index
    %c0_78 = arith.constant 0 : index
    %c0_79 = arith.constant 0 : index
    %343 = vector.load %arg4[%c7_77, %c0_78, %c0_79] : memref<8x2x32xf32, #tpu.memory_space<vmem>>, vector<1x2x16xf32>
    %344 = vector.shape_cast %343 : vector<1x2x16xf32> to vector<2x16xf32>
    %345 = vector.shape_cast %327 : vector<2x16xf32> to vector<1x2x16xf32>
    tpu.vector_store %arg4[%c7_77, %c0_78, %c0_79], %345 {strides = array<i32>} : memref<8x2x32xf32, #tpu.memory_space<vmem>>, vector<1x2x16xf32>,
    %c0_80 = arith.constant 0 : index
    %c0_81 = arith.constant 0 : index
    %c16_82 = arith.constant 16 : index
    %346 = vector.load %arg4[%c0_80, %c0_81, %c16_82] : memref<8x2x32xf32, #tpu.memory_space<vmem>>, vector<1x2x16xf32>
    %347 = vector.shape_cast %346 : vector<1x2x16xf32> to vector<2x16xf32>
    %348 = vector.shape_cast %342 : vector<2x16xf32> to vector<1x2x16xf32>
    tpu.vector_store %arg4[%c0_80, %c0_81, %c16_82], %348 {strides = array<i32>} : memref<8x2x32xf32, #tpu.memory_space<vmem>>, vector<1x2x16xf32>,
    return
  }
}

module attributes {stable_mosaic.version = 11 : i64} {
  func.func @_esim_proj_kernel(%arg0: memref<16x32xf32, #tpu.memory_space<vmem>>, %arg1: memref<16x32xf32, #tpu.memory_space<vmem>>, %arg2: memref<32x32xf32, #tpu.memory_space<vmem>>, %arg3: memref<32x32xf32, #tpu.memory_space<vmem>>, %arg4: memref<32x32xf32, #tpu.memory_space<vmem>>, %arg5: memref<1x32xf32, #tpu.memory_space<vmem>>, %arg6: memref<16x32xf32, #tpu.memory_space<vmem>>) attributes {dimension_semantics = [], scalar_prefetch = 0 : i64, scratch_operands = 0 : i64, tpu.core_type = #tpu.core_type<tc>} {
    %c0 = arith.constant 0 : index
    %c0_0 = arith.constant 0 : index
    %0 = vector.load %arg0[%c0, %c0_0] : memref<16x32xf32, #tpu.memory_space<vmem>>, vector<16x32xf32>
    %c0_1 = arith.constant 0 : index
    %c0_2 = arith.constant 0 : index
    %1 = vector.load %arg1[%c0_1, %c0_2] : memref<16x32xf32, #tpu.memory_space<vmem>>, vector<16x32xf32>
    %c0_3 = arith.constant 0 : index
    %c0_4 = arith.constant 0 : index
    %2 = vector.load %arg2[%c0_3, %c0_4] : memref<32x32xf32, #tpu.memory_space<vmem>>, vector<32x32xf32>
    %cst = arith.constant dense<0.000000e+00> : vector<16x32xf32>
    %3 = tpu.matmul %0, %2, %cst {dimension_numbers = #tpu.dot_dimension_numbers<[1], [0], [0], [1], [0, 0, 1, 1], [], []>} : vector<16x32xf32>, vector<32x32xf32>, vector<16x32xf32> -> vector<16x32xf32>
    %c0_5 = arith.constant 0 : index
    %c0_6 = arith.constant 0 : index
    %4 = vector.load %arg3[%c0_5, %c0_6] : memref<32x32xf32, #tpu.memory_space<vmem>>, vector<32x32xf32>
    %cst_7 = arith.constant dense<0.000000e+00> : vector<16x32xf32>
    %5 = tpu.matmul %1, %4, %cst_7 {dimension_numbers = #tpu.dot_dimension_numbers<[1], [0], [0], [1], [0, 0, 1, 1], [], []>} : vector<16x32xf32>, vector<32x32xf32>, vector<16x32xf32> -> vector<16x32xf32>
    %6 = arith.addf %3, %5 : vector<16x32xf32>
    %7 = arith.mulf %0, %1 : vector<16x32xf32>
    %c0_8 = arith.constant 0 : index
    %c0_9 = arith.constant 0 : index
    %8 = vector.load %arg4[%c0_8, %c0_9] : memref<32x32xf32, #tpu.memory_space<vmem>>, vector<32x32xf32>
    %cst_10 = arith.constant dense<0.000000e+00> : vector<16x32xf32>
    %9 = tpu.matmul %7, %8, %cst_10 {dimension_numbers = #tpu.dot_dimension_numbers<[1], [0], [0], [1], [0, 0, 1, 1], [], []>} : vector<16x32xf32>, vector<32x32xf32>, vector<16x32xf32> -> vector<16x32xf32>
    %10 = arith.addf %6, %9 : vector<16x32xf32>
    %c0_11 = arith.constant 0 : index
    %c0_12 = arith.constant 0 : index
    %11 = vector.load %arg5[%c0_11, %c0_12] : memref<1x32xf32, #tpu.memory_space<vmem>>, vector<1x32xf32>
    %12 = vector.broadcast %11 : vector<1x32xf32> to vector<16x32xf32>
    %13 = arith.addf %10, %12 : vector<16x32xf32>
    %cst_13 = arith.constant 0.000000e+00 : f32
    %14 = vector.broadcast %cst_13 : f32 to vector<16x32xf32>
    %15 = arith.maximumf %13, %14 : vector<16x32xf32>
    %c0_14 = arith.constant 0 : index
    %c0_15 = arith.constant 0 : index
    %16 = vector.load %arg6[%c0_14, %c0_15] : memref<16x32xf32, #tpu.memory_space<vmem>>, vector<16x32xf32>
    tpu.vector_store %arg6[%c0_14, %c0_15], %15 {strides = array<i32>} : memref<16x32xf32, #tpu.memory_space<vmem>>, vector<16x32xf32>,
    return
  }
}

module attributes {stable_mosaic.version = 11 : i64} {
  func.func @_co_attention_kernel(%arg0: memref<8x2x32xf32, #tpu.memory_space<vmem>>, %arg1: memref<6x2x32xf32, #tpu.memory_space<vmem>>, %arg2: memref<8x2x32xf32, #tpu.memory_space<vmem>>, %arg3: memref<6x2x32xf32, #tpu.memory_space<vmem>>) attributes {dimension_semantics = [], scalar_prefetch = 0 : i64, scratch_operands = 0 : i64, tpu.core_type = #tpu.core_type<tc>} {
    %c0 = arith.constant 0 : index
    %c0_0 = arith.constant 0 : index
    %c0_1 = arith.constant 0 : index
    %0 = vector.load %arg0[%c0, %c0_0, %c0_1] : memref<8x2x32xf32, #tpu.memory_space<vmem>>, vector<8x1x32xf32>
    %1 = vector.shape_cast %0 : vector<8x1x32xf32> to vector<8x32xf32>
    %c0_2 = arith.constant 0 : index
    %c0_3 = arith.constant 0 : index
    %c0_4 = arith.constant 0 : index
    %2 = vector.load %arg1[%c0_2, %c0_3, %c0_4] : memref<6x2x32xf32, #tpu.memory_space<vmem>>, vector<6x1x32xf32>
    %3 = vector.shape_cast %2 : vector<6x1x32xf32> to vector<6x32xf32>
    %cst = arith.constant dense<0.000000e+00> : vector<8x6xf32>
    %4 = tpu.matmul %1, %3, %cst {dimension_numbers = #tpu.dot_dimension_numbers<[1], [1], [0], [0], [0, 0, 1, 0], [], []>} : vector<8x32xf32>, vector<6x32xf32>, vector<8x6xf32> -> vector<8x6xf32>
    %cst_5 = arith.constant dense<0xFF800000> : vector<8xf32>
    %5 = vector.multi_reduction <maximumf>, %4, %cst_5 [1] : vector<8x6xf32> to vector<8xf32>
    %6 = vector.shape_cast %5 : vector<8xf32> to vector<8x1xf32>
    %7 = vector.broadcast %6 : vector<8x1xf32> to vector<8x6xf32>
    %8 = arith.subf %4, %7 : vector<8x6xf32>
    %9 = math.exp %8 : vector<8x6xf32>
    %cst_6 = arith.constant dense<0.000000e+00> : vector<8xf32>
    %10 = vector.multi_reduction <add>, %9, %cst_6 [1] : vector<8x6xf32> to vector<8xf32>
    %11 = vector.shape_cast %10 : vector<8xf32> to vector<8x1xf32>
    %12 = tpu.reciprocal %11 {approx = true} : vector<8x1xf32> -> vector<8x1xf32>
    %13 = vector.broadcast %12 : vector<8x1xf32> to vector<8x6xf32>
    %14 = arith.mulf %9, %13 : vector<8x6xf32>
    %cst_7 = arith.constant dense<0.000000e+00> : vector<8x32xf32>
    %15 = tpu.matmul %14, %3, %cst_7 {dimension_numbers = #tpu.dot_dimension_numbers<[1], [0], [0], [1], [0, 0, 1, 1], [], []>} : vector<8x6xf32>, vector<6x32xf32>, vector<8x32xf32> -> vector<8x32xf32>
    %c0_8 = arith.constant 0 : index
    %c0_9 = arith.constant 0 : index
    %c0_10 = arith.constant 0 : index
    %16 = vector.load %arg2[%c0_8, %c0_9, %c0_10] : memref<8x2x32xf32, #tpu.memory_space<vmem>>, vector<8x1x32xf32>
    %17 = vector.shape_cast %16 : vector<8x1x32xf32> to vector<8x32xf32>
    %18 = vector.shape_cast %15 : vector<8x32xf32> to vector<8x1x32xf32>
    tpu.vector_store %arg2[%c0_8, %c0_9, %c0_10], %18 {strides = array<i32>} : memref<8x2x32xf32, #tpu.memory_space<vmem>>, vector<8x1x32xf32>,
    %19 = tpu.transpose %4, [1, 0] : vector<8x6xf32> -> vector<6x8xf32>
    %cst_11 = arith.constant dense<0xFF800000> : vector<6xf32>
    %20 = vector.multi_reduction <maximumf>, %19, %cst_11 [1] : vector<6x8xf32> to vector<6xf32>
    %21 = vector.shape_cast %20 : vector<6xf32> to vector<6x1xf32>
    %22 = vector.broadcast %21 : vector<6x1xf32> to vector<6x8xf32>
    %23 = arith.subf %19, %22 : vector<6x8xf32>
    %24 = math.exp %23 : vector<6x8xf32>
    %cst_12 = arith.constant dense<0.000000e+00> : vector<6xf32>
    %25 = vector.multi_reduction <add>, %24, %cst_12 [1] : vector<6x8xf32> to vector<6xf32>
    %26 = vector.shape_cast %25 : vector<6xf32> to vector<6x1xf32>
    %27 = tpu.reciprocal %26 {approx = true} : vector<6x1xf32> -> vector<6x1xf32>
    %28 = vector.broadcast %27 : vector<6x1xf32> to vector<6x8xf32>
    %29 = arith.mulf %24, %28 : vector<6x8xf32>
    %cst_13 = arith.constant dense<0.000000e+00> : vector<6x32xf32>
    %30 = tpu.matmul %29, %1, %cst_13 {dimension_numbers = #tpu.dot_dimension_numbers<[1], [0], [0], [1], [0, 0, 1, 1], [], []>} : vector<6x8xf32>, vector<8x32xf32>, vector<6x32xf32> -> vector<6x32xf32>
    %c0_14 = arith.constant 0 : index
    %c0_15 = arith.constant 0 : index
    %c0_16 = arith.constant 0 : index
    %31 = vector.load %arg3[%c0_14, %c0_15, %c0_16] : memref<6x2x32xf32, #tpu.memory_space<vmem>>, vector<6x1x32xf32>
    %32 = vector.shape_cast %31 : vector<6x1x32xf32> to vector<6x32xf32>
    %33 = vector.shape_cast %30 : vector<6x32xf32> to vector<6x1x32xf32>
    tpu.vector_store %arg3[%c0_14, %c0_15, %c0_16], %33 {strides = array<i32>} : memref<6x2x32xf32, #tpu.memory_space<vmem>>, vector<6x1x32xf32>,
    %c0_17 = arith.constant 0 : index
    %c1 = arith.constant 1 : index
    %c0_18 = arith.constant 0 : index
    %34 = vector.load %arg0[%c0_17, %c1, %c0_18] : memref<8x2x32xf32, #tpu.memory_space<vmem>>, vector<8x1x32xf32>
    %35 = vector.shape_cast %34 : vector<8x1x32xf32> to vector<8x32xf32>
    %c0_19 = arith.constant 0 : index
    %c1_20 = arith.constant 1 : index
    %c0_21 = arith.constant 0 : index
    %36 = vector.load %arg1[%c0_19, %c1_20, %c0_21] : memref<6x2x32xf32, #tpu.memory_space<vmem>>, vector<6x1x32xf32>
    %37 = vector.shape_cast %36 : vector<6x1x32xf32> to vector<6x32xf32>
    %cst_22 = arith.constant dense<0.000000e+00> : vector<8x6xf32>
    %38 = tpu.matmul %35, %37, %cst_22 {dimension_numbers = #tpu.dot_dimension_numbers<[1], [1], [0], [0], [0, 0, 1, 0], [], []>} : vector<8x32xf32>, vector<6x32xf32>, vector<8x6xf32> -> vector<8x6xf32>
    %cst_23 = arith.constant dense<0xFF800000> : vector<8xf32>
    %39 = vector.multi_reduction <maximumf>, %38, %cst_23 [1] : vector<8x6xf32> to vector<8xf32>
    %40 = vector.shape_cast %39 : vector<8xf32> to vector<8x1xf32>
    %41 = vector.broadcast %40 : vector<8x1xf32> to vector<8x6xf32>
    %42 = arith.subf %38, %41 : vector<8x6xf32>
    %43 = math.exp %42 : vector<8x6xf32>
    %cst_24 = arith.constant dense<0.000000e+00> : vector<8xf32>
    %44 = vector.multi_reduction <add>, %43, %cst_24 [1] : vector<8x6xf32> to vector<8xf32>
    %45 = vector.shape_cast %44 : vector<8xf32> to vector<8x1xf32>
    %46 = tpu.reciprocal %45 {approx = true} : vector<8x1xf32> -> vector<8x1xf32>
    %47 = vector.broadcast %46 : vector<8x1xf32> to vector<8x6xf32>
    %48 = arith.mulf %43, %47 : vector<8x6xf32>
    %cst_25 = arith.constant dense<0.000000e+00> : vector<8x32xf32>
    %49 = tpu.matmul %48, %37, %cst_25 {dimension_numbers = #tpu.dot_dimension_numbers<[1], [0], [0], [1], [0, 0, 1, 1], [], []>} : vector<8x6xf32>, vector<6x32xf32>, vector<8x32xf32> -> vector<8x32xf32>
    %c0_26 = arith.constant 0 : index
    %c1_27 = arith.constant 1 : index
    %c0_28 = arith.constant 0 : index
    %50 = vector.load %arg2[%c0_26, %c1_27, %c0_28] : memref<8x2x32xf32, #tpu.memory_space<vmem>>, vector<8x1x32xf32>
    %51 = vector.shape_cast %50 : vector<8x1x32xf32> to vector<8x32xf32>
    %52 = vector.shape_cast %49 : vector<8x32xf32> to vector<8x1x32xf32>
    tpu.vector_store %arg2[%c0_26, %c1_27, %c0_28], %52 {strides = array<i32>} : memref<8x2x32xf32, #tpu.memory_space<vmem>>, vector<8x1x32xf32>,
    %53 = tpu.transpose %38, [1, 0] : vector<8x6xf32> -> vector<6x8xf32>
    %cst_29 = arith.constant dense<0xFF800000> : vector<6xf32>
    %54 = vector.multi_reduction <maximumf>, %53, %cst_29 [1] : vector<6x8xf32> to vector<6xf32>
    %55 = vector.shape_cast %54 : vector<6xf32> to vector<6x1xf32>
    %56 = vector.broadcast %55 : vector<6x1xf32> to vector<6x8xf32>
    %57 = arith.subf %53, %56 : vector<6x8xf32>
    %58 = math.exp %57 : vector<6x8xf32>
    %cst_30 = arith.constant dense<0.000000e+00> : vector<6xf32>
    %59 = vector.multi_reduction <add>, %58, %cst_30 [1] : vector<6x8xf32> to vector<6xf32>
    %60 = vector.shape_cast %59 : vector<6xf32> to vector<6x1xf32>
    %61 = tpu.reciprocal %60 {approx = true} : vector<6x1xf32> -> vector<6x1xf32>
    %62 = vector.broadcast %61 : vector<6x1xf32> to vector<6x8xf32>
    %63 = arith.mulf %58, %62 : vector<6x8xf32>
    %cst_31 = arith.constant dense<0.000000e+00> : vector<6x32xf32>
    %64 = tpu.matmul %63, %35, %cst_31 {dimension_numbers = #tpu.dot_dimension_numbers<[1], [0], [0], [1], [0, 0, 1, 1], [], []>} : vector<6x8xf32>, vector<8x32xf32>, vector<6x32xf32> -> vector<6x32xf32>
    %c0_32 = arith.constant 0 : index
    %c1_33 = arith.constant 1 : index
    %c0_34 = arith.constant 0 : index
    %65 = vector.load %arg3[%c0_32, %c1_33, %c0_34] : memref<6x2x32xf32, #tpu.memory_space<vmem>>, vector<6x1x32xf32>
    %66 = vector.shape_cast %65 : vector<6x1x32xf32> to vector<6x32xf32>
    %67 = vector.shape_cast %64 : vector<6x32xf32> to vector<6x1x32xf32>
    tpu.vector_store %arg3[%c0_32, %c1_33, %c0_34], %67 {strides = array<i32>} : memref<6x2x32xf32, #tpu.memory_space<vmem>>, vector<6x1x32xf32>,
    return
  }
}

module attributes {stable_mosaic.version = 11 : i64} {
  func.func @_bilstm_kernel(%arg0: memref<12x16xf32, #tpu.memory_space<vmem>>, %arg1: memref<16x128xf32, #tpu.memory_space<vmem>>, %arg2: memref<16x128xf32, #tpu.memory_space<vmem>>, %arg3: memref<1x128xf32, #tpu.memory_space<vmem>>, %arg4: memref<6x2x32xf32, #tpu.memory_space<vmem>>) attributes {dimension_semantics = [], scalar_prefetch = 0 : i64, scratch_operands = 0 : i64, tpu.core_type = #tpu.core_type<tc>} {
    %c0 = arith.constant 0 : index
    %c0_0 = arith.constant 0 : index
    %0 = vector.load %arg0[%c0, %c0_0] : memref<12x16xf32, #tpu.memory_space<vmem>>, vector<12x16xf32>
    %c0_1 = arith.constant 0 : index
    %c0_2 = arith.constant 0 : index
    %1 = vector.load %arg1[%c0_1, %c0_2] : memref<16x128xf32, #tpu.memory_space<vmem>>, vector<16x128xf32>
    %cst = arith.constant dense<0.000000e+00> : vector<12x128xf32>
    %2 = tpu.matmul %0, %1, %cst {dimension_numbers = #tpu.dot_dimension_numbers<[1], [0], [0], [1], [0, 0, 1, 1], [], []>} : vector<12x16xf32>, vector<16x128xf32>, vector<12x128xf32> -> vector<12x128xf32>
    %c0_3 = arith.constant 0 : index
    %c0_4 = arith.constant 0 : index
    %3 = vector.load %arg3[%c0_3, %c0_4] : memref<1x128xf32, #tpu.memory_space<vmem>>, vector<1x128xf32>
    %4 = vector.broadcast %3 : vector<1x128xf32> to vector<12x128xf32>
    %5 = arith.addf %2, %4 : vector<12x128xf32>
    %c0_5 = arith.constant 0 : index
    %c0_6 = arith.constant 0 : index
    %6 = vector.load %arg2[%c0_5, %c0_6] : memref<16x128xf32, #tpu.memory_space<vmem>>, vector<16x128xf32>
    %7 = vector.extract_strided_slice %6 {offsets = [0, 0], sizes = [16, 64], strides = [1, 1]} : vector<16x128xf32> to vector<16x64xf32>
    %8 = vector.extract_strided_slice %6 {offsets = [0, 64], sizes = [16, 64], strides = [1, 1]} : vector<16x128xf32> to vector<16x64xf32>
    %cst_7 = arith.constant 0.000000e+00 : f32
    %9 = vector.broadcast %cst_7 : f32 to vector<2x16xf32>
    %cst_8 = arith.constant 0.000000e+00 : f32
    %10 = vector.broadcast %cst_8 : f32 to vector<2x16xf32>
    %cst_9 = arith.constant 0.000000e+00 : f32
    %11 = vector.broadcast %cst_9 : f32 to vector<2x16xf32>
    %cst_10 = arith.constant 0.000000e+00 : f32
    %12 = vector.broadcast %cst_10 : f32 to vector<2x16xf32>
    %13 = vector.extract_strided_slice %5 {offsets = [0, 0], sizes = [2, 64], strides = [1, 1]} : vector<12x128xf32> to vector<2x64xf32>
    %cst_11 = arith.constant dense<0.000000e+00> : vector<2x64xf32>
    %14 = tpu.matmul %9, %7, %cst_11 {dimension_numbers = #tpu.dot_dimension_numbers<[1], [0], [0], [1], [0, 0, 1, 1], [], []>} : vector<2x16xf32>, vector<16x64xf32>, vector<2x64xf32> -> vector<2x64xf32>
    %15 = arith.addf %13, %14 : vector<2x64xf32>
    %16 = vector.extract_strided_slice %5 {offsets = [10, 64], sizes = [2, 64], strides = [1, 1]} : vector<12x128xf32> to vector<2x64xf32>
    %cst_12 = arith.constant dense<0.000000e+00> : vector<2x64xf32>
    %17 = tpu.matmul %10, %8, %cst_12 {dimension_numbers = #tpu.dot_dimension_numbers<[1], [0], [0], [1], [0, 0, 1, 1], [], []>} : vector<2x16xf32>, vector<16x64xf32>, vector<2x64xf32> -> vector<2x64xf32>
    %18 = arith.addf %16, %17 : vector<2x64xf32>
    %19 = arith.negf %15 : vector<2x64xf32>
    %20 = math.exp %19 : vector<2x64xf32>
    %cst_13 = arith.constant 1.000000e+00 : f32
    %21 = vector.broadcast %cst_13 : f32 to vector<2x64xf32>
    %22 = arith.addf %21, %20 : vector<2x64xf32>
    %23 = arith.divf %21, %22 : vector<2x64xf32>
    %24 = vector.extract_strided_slice %15 {offsets = [0, 32], sizes = [2, 16], strides = [1, 1]} : vector<2x64xf32> to vector<2x16xf32>
    %25 = math.tanh %24 : vector<2x16xf32>
    %26 = vector.extract_strided_slice %23 {offsets = [0, 16], sizes = [2, 16], strides = [1, 1]} : vector<2x64xf32> to vector<2x16xf32>
    %27 = arith.mulf %26, %11 : vector<2x16xf32>
    %28 = vector.extract_strided_slice %23 {offsets = [0, 0], sizes = [2, 16], strides = [1, 1]} : vector<2x64xf32> to vector<2x16xf32>
    %29 = arith.mulf %28, %25 : vector<2x16xf32>
    %30 = arith.addf %27, %29 : vector<2x16xf32>
    %31 = vector.extract_strided_slice %23 {offsets = [0, 48], sizes = [2, 16], strides = [1, 1]} : vector<2x64xf32> to vector<2x16xf32>
    %32 = math.tanh %30 : vector<2x16xf32>
    %33 = arith.mulf %31, %32 : vector<2x16xf32>
    %34 = arith.negf %18 : vector<2x64xf32>
    %35 = math.exp %34 : vector<2x64xf32>
    %cst_14 = arith.constant 1.000000e+00 : f32
    %36 = vector.broadcast %cst_14 : f32 to vector<2x64xf32>
    %37 = arith.addf %36, %35 : vector<2x64xf32>
    %38 = arith.divf %36, %37 : vector<2x64xf32>
    %39 = vector.extract_strided_slice %18 {offsets = [0, 32], sizes = [2, 16], strides = [1, 1]} : vector<2x64xf32> to vector<2x16xf32>
    %40 = math.tanh %39 : vector<2x16xf32>
    %41 = vector.extract_strided_slice %38 {offsets = [0, 16], sizes = [2, 16], strides = [1, 1]} : vector<2x64xf32> to vector<2x16xf32>
    %42 = arith.mulf %41, %12 : vector<2x16xf32>
    %43 = vector.extract_strided_slice %38 {offsets = [0, 0], sizes = [2, 16], strides = [1, 1]} : vector<2x64xf32> to vector<2x16xf32>
    %44 = arith.mulf %43, %40 : vector<2x16xf32>
    %45 = arith.addf %42, %44 : vector<2x16xf32>
    %46 = vector.extract_strided_slice %38 {offsets = [0, 48], sizes = [2, 16], strides = [1, 1]} : vector<2x64xf32> to vector<2x16xf32>
    %47 = math.tanh %45 : vector<2x16xf32>
    %48 = arith.mulf %46, %47 : vector<2x16xf32>
    %c0_15 = arith.constant 0 : index
    %c0_16 = arith.constant 0 : index
    %c0_17 = arith.constant 0 : index
    %49 = vector.load %arg4[%c0_15, %c0_16, %c0_17] : memref<6x2x32xf32, #tpu.memory_space<vmem>>, vector<1x2x16xf32>
    %50 = vector.shape_cast %49 : vector<1x2x16xf32> to vector<2x16xf32>
    %51 = vector.shape_cast %33 : vector<2x16xf32> to vector<1x2x16xf32>
    tpu.vector_store %arg4[%c0_15, %c0_16, %c0_17], %51 {strides = array<i32>} : memref<6x2x32xf32, #tpu.memory_space<vmem>>, vector<1x2x16xf32>,
    %c5 = arith.constant 5 : index
    %c0_18 = arith.constant 0 : index
    %c16 = arith.constant 16 : index
    %52 = vector.load %arg4[%c5, %c0_18, %c16] : memref<6x2x32xf32, #tpu.memory_space<vmem>>, vector<1x2x16xf32>
    %53 = vector.shape_cast %52 : vector<1x2x16xf32> to vector<2x16xf32>
    %54 = vector.shape_cast %48 : vector<2x16xf32> to vector<1x2x16xf32>
    tpu.vector_store %arg4[%c5, %c0_18, %c16], %54 {strides = array<i32>} : memref<6x2x32xf32, #tpu.memory_space<vmem>>, vector<1x2x16xf32>,
    %55 = vector.extract_strided_slice %5 {offsets = [2, 0], sizes = [2, 64], strides = [1, 1]} : vector<12x128xf32> to vector<2x64xf32>
    %cst_19 = arith.constant dense<0.000000e+00> : vector<2x64xf32>
    %56 = tpu.matmul %33, %7, %cst_19 {dimension_numbers = #tpu.dot_dimension_numbers<[1], [0], [0], [1], [0, 0, 1, 1], [], []>} : vector<2x16xf32>, vector<16x64xf32>, vector<2x64xf32> -> vector<2x64xf32>
    %57 = arith.addf %55, %56 : vector<2x64xf32>
    %58 = vector.extract_strided_slice %5 {offsets = [8, 64], sizes = [2, 64], strides = [1, 1]} : vector<12x128xf32> to vector<2x64xf32>
    %cst_20 = arith.constant dense<0.000000e+00> : vector<2x64xf32>
    %59 = tpu.matmul %48, %8, %cst_20 {dimension_numbers = #tpu.dot_dimension_numbers<[1], [0], [0], [1], [0, 0, 1, 1], [], []>} : vector<2x16xf32>, vector<16x64xf32>, vector<2x64xf32> -> vector<2x64xf32>
    %60 = arith.addf %58, %59 : vector<2x64xf32>
    %61 = arith.negf %57 : vector<2x64xf32>
    %62 = math.exp %61 : vector<2x64xf32>
    %cst_21 = arith.constant 1.000000e+00 : f32
    %63 = vector.broadcast %cst_21 : f32 to vector<2x64xf32>
    %64 = arith.addf %63, %62 : vector<2x64xf32>
    %65 = arith.divf %63, %64 : vector<2x64xf32>
    %66 = vector.extract_strided_slice %57 {offsets = [0, 32], sizes = [2, 16], strides = [1, 1]} : vector<2x64xf32> to vector<2x16xf32>
    %67 = math.tanh %66 : vector<2x16xf32>
    %68 = vector.extract_strided_slice %65 {offsets = [0, 16], sizes = [2, 16], strides = [1, 1]} : vector<2x64xf32> to vector<2x16xf32>
    %69 = arith.mulf %68, %30 : vector<2x16xf32>
    %70 = vector.extract_strided_slice %65 {offsets = [0, 0], sizes = [2, 16], strides = [1, 1]} : vector<2x64xf32> to vector<2x16xf32>
    %71 = arith.mulf %70, %67 : vector<2x16xf32>
    %72 = arith.addf %69, %71 : vector<2x16xf32>
    %73 = vector.extract_strided_slice %65 {offsets = [0, 48], sizes = [2, 16], strides = [1, 1]} : vector<2x64xf32> to vector<2x16xf32>
    %74 = math.tanh %72 : vector<2x16xf32>
    %75 = arith.mulf %73, %74 : vector<2x16xf32>
    %76 = arith.negf %60 : vector<2x64xf32>
    %77 = math.exp %76 : vector<2x64xf32>
    %cst_22 = arith.constant 1.000000e+00 : f32
    %78 = vector.broadcast %cst_22 : f32 to vector<2x64xf32>
    %79 = arith.addf %78, %77 : vector<2x64xf32>
    %80 = arith.divf %78, %79 : vector<2x64xf32>
    %81 = vector.extract_strided_slice %60 {offsets = [0, 32], sizes = [2, 16], strides = [1, 1]} : vector<2x64xf32> to vector<2x16xf32>
    %82 = math.tanh %81 : vector<2x16xf32>
    %83 = vector.extract_strided_slice %80 {offsets = [0, 16], sizes = [2, 16], strides = [1, 1]} : vector<2x64xf32> to vector<2x16xf32>
    %84 = arith.mulf %83, %45 : vector<2x16xf32>
    %85 = vector.extract_strided_slice %80 {offsets = [0, 0], sizes = [2, 16], strides = [1, 1]} : vector<2x64xf32> to vector<2x16xf32>
    %86 = arith.mulf %85, %82 : vector<2x16xf32>
    %87 = arith.addf %84, %86 : vector<2x16xf32>
    %88 = vector.extract_strided_slice %80 {offsets = [0, 48], sizes = [2, 16], strides = [1, 1]} : vector<2x64xf32> to vector<2x16xf32>
    %89 = math.tanh %87 : vector<2x16xf32>
    %90 = arith.mulf %88, %89 : vector<2x16xf32>
    %c1 = arith.constant 1 : index
    %c0_23 = arith.constant 0 : index
    %c0_24 = arith.constant 0 : index
    %91 = vector.load %arg4[%c1, %c0_23, %c0_24] : memref<6x2x32xf32, #tpu.memory_space<vmem>>, vector<1x2x16xf32>
    %92 = vector.shape_cast %91 : vector<1x2x16xf32> to vector<2x16xf32>
    %93 = vector.shape_cast %75 : vector<2x16xf32> to vector<1x2x16xf32>
    tpu.vector_store %arg4[%c1, %c0_23, %c0_24], %93 {strides = array<i32>} : memref<6x2x32xf32, #tpu.memory_space<vmem>>, vector<1x2x16xf32>,
    %c4 = arith.constant 4 : index
    %c0_25 = arith.constant 0 : index
    %c16_26 = arith.constant 16 : index
    %94 = vector.load %arg4[%c4, %c0_25, %c16_26] : memref<6x2x32xf32, #tpu.memory_space<vmem>>, vector<1x2x16xf32>
    %95 = vector.shape_cast %94 : vector<1x2x16xf32> to vector<2x16xf32>
    %96 = vector.shape_cast %90 : vector<2x16xf32> to vector<1x2x16xf32>
    tpu.vector_store %arg4[%c4, %c0_25, %c16_26], %96 {strides = array<i32>} : memref<6x2x32xf32, #tpu.memory_space<vmem>>, vector<1x2x16xf32>,
    %97 = vector.extract_strided_slice %5 {offsets = [4, 0], sizes = [2, 64], strides = [1, 1]} : vector<12x128xf32> to vector<2x64xf32>
    %cst_27 = arith.constant dense<0.000000e+00> : vector<2x64xf32>
    %98 = tpu.matmul %75, %7, %cst_27 {dimension_numbers = #tpu.dot_dimension_numbers<[1], [0], [0], [1], [0, 0, 1, 1], [], []>} : vector<2x16xf32>, vector<16x64xf32>, vector<2x64xf32> -> vector<2x64xf32>
    %99 = arith.addf %97, %98 : vector<2x64xf32>
    %100 = vector.extract_strided_slice %5 {offsets = [6, 64], sizes = [2, 64], strides = [1, 1]} : vector<12x128xf32> to vector<2x64xf32>
    %cst_28 = arith.constant dense<0.000000e+00> : vector<2x64xf32>
    %101 = tpu.matmul %90, %8, %cst_28 {dimension_numbers = #tpu.dot_dimension_numbers<[1], [0], [0], [1], [0, 0, 1, 1], [], []>} : vector<2x16xf32>, vector<16x64xf32>, vector<2x64xf32> -> vector<2x64xf32>
    %102 = arith.addf %100, %101 : vector<2x64xf32>
    %103 = arith.negf %99 : vector<2x64xf32>
    %104 = math.exp %103 : vector<2x64xf32>
    %cst_29 = arith.constant 1.000000e+00 : f32
    %105 = vector.broadcast %cst_29 : f32 to vector<2x64xf32>
    %106 = arith.addf %105, %104 : vector<2x64xf32>
    %107 = arith.divf %105, %106 : vector<2x64xf32>
    %108 = vector.extract_strided_slice %99 {offsets = [0, 32], sizes = [2, 16], strides = [1, 1]} : vector<2x64xf32> to vector<2x16xf32>
    %109 = math.tanh %108 : vector<2x16xf32>
    %110 = vector.extract_strided_slice %107 {offsets = [0, 16], sizes = [2, 16], strides = [1, 1]} : vector<2x64xf32> to vector<2x16xf32>
    %111 = arith.mulf %110, %72 : vector<2x16xf32>
    %112 = vector.extract_strided_slice %107 {offsets = [0, 0], sizes = [2, 16], strides = [1, 1]} : vector<2x64xf32> to vector<2x16xf32>
    %113 = arith.mulf %112, %109 : vector<2x16xf32>
    %114 = arith.addf %111, %113 : vector<2x16xf32>
    %115 = vector.extract_strided_slice %107 {offsets = [0, 48], sizes = [2, 16], strides = [1, 1]} : vector<2x64xf32> to vector<2x16xf32>
    %116 = math.tanh %114 : vector<2x16xf32>
    %117 = arith.mulf %115, %116 : vector<2x16xf32>
    %118 = arith.negf %102 : vector<2x64xf32>
    %119 = math.exp %118 : vector<2x64xf32>
    %cst_30 = arith.constant 1.000000e+00 : f32
    %120 = vector.broadcast %cst_30 : f32 to vector<2x64xf32>
    %121 = arith.addf %120, %119 : vector<2x64xf32>
    %122 = arith.divf %120, %121 : vector<2x64xf32>
    %123 = vector.extract_strided_slice %102 {offsets = [0, 32], sizes = [2, 16], strides = [1, 1]} : vector<2x64xf32> to vector<2x16xf32>
    %124 = math.tanh %123 : vector<2x16xf32>
    %125 = vector.extract_strided_slice %122 {offsets = [0, 16], sizes = [2, 16], strides = [1, 1]} : vector<2x64xf32> to vector<2x16xf32>
    %126 = arith.mulf %125, %87 : vector<2x16xf32>
    %127 = vector.extract_strided_slice %122 {offsets = [0, 0], sizes = [2, 16], strides = [1, 1]} : vector<2x64xf32> to vector<2x16xf32>
    %128 = arith.mulf %127, %124 : vector<2x16xf32>
    %129 = arith.addf %126, %128 : vector<2x16xf32>
    %130 = vector.extract_strided_slice %122 {offsets = [0, 48], sizes = [2, 16], strides = [1, 1]} : vector<2x64xf32> to vector<2x16xf32>
    %131 = math.tanh %129 : vector<2x16xf32>
    %132 = arith.mulf %130, %131 : vector<2x16xf32>
    %c2 = arith.constant 2 : index
    %c0_31 = arith.constant 0 : index
    %c0_32 = arith.constant 0 : index
    %133 = vector.load %arg4[%c2, %c0_31, %c0_32] : memref<6x2x32xf32, #tpu.memory_space<vmem>>, vector<1x2x16xf32>
    %134 = vector.shape_cast %133 : vector<1x2x16xf32> to vector<2x16xf32>
    %135 = vector.shape_cast %117 : vector<2x16xf32> to vector<1x2x16xf32>
    tpu.vector_store %arg4[%c2, %c0_31, %c0_32], %135 {strides = array<i32>} : memref<6x2x32xf32, #tpu.memory_space<vmem>>, vector<1x2x16xf32>,
    %c3 = arith.constant 3 : index
    %c0_33 = arith.constant 0 : index
    %c16_34 = arith.constant 16 : index
    %136 = vector.load %arg4[%c3, %c0_33, %c16_34] : memref<6x2x32xf32, #tpu.memory_space<vmem>>, vector<1x2x16xf32>
    %137 = vector.shape_cast %136 : vector<1x2x16xf32> to vector<2x16xf32>
    %138 = vector.shape_cast %132 : vector<2x16xf32> to vector<1x2x16xf32>
    tpu.vector_store %arg4[%c3, %c0_33, %c16_34], %138 {strides = array<i32>} : memref<6x2x32xf32, #tpu.memory_space<vmem>>, vector<1x2x16xf32>,
    %139 = vector.extract_strided_slice %5 {offsets = [6, 0], sizes = [2, 64], strides = [1, 1]} : vector<12x128xf32> to vector<2x64xf32>
    %cst_35 = arith.constant dense<0.000000e+00> : vector<2x64xf32>
    %140 = tpu.matmul %117, %7, %cst_35 {dimension_numbers = #tpu.dot_dimension_numbers<[1], [0], [0], [1], [0, 0, 1, 1], [], []>} : vector<2x16xf32>, vector<16x64xf32>, vector<2x64xf32> -> vector<2x64xf32>
    %141 = arith.addf %139, %140 : vector<2x64xf32>
    %142 = vector.extract_strided_slice %5 {offsets = [4, 64], sizes = [2, 64], strides = [1, 1]} : vector<12x128xf32> to vector<2x64xf32>
    %cst_36 = arith.constant dense<0.000000e+00> : vector<2x64xf32>
    %143 = tpu.matmul %132, %8, %cst_36 {dimension_numbers = #tpu.dot_dimension_numbers<[1], [0], [0], [1], [0, 0, 1, 1], [], []>} : vector<2x16xf32>, vector<16x64xf32>, vector<2x64xf32> -> vector<2x64xf32>
    %144 = arith.addf %142, %143 : vector<2x64xf32>
    %145 = arith.negf %141 : vector<2x64xf32>
    %146 = math.exp %145 : vector<2x64xf32>
    %cst_37 = arith.constant 1.000000e+00 : f32
    %147 = vector.broadcast %cst_37 : f32 to vector<2x64xf32>
    %148 = arith.addf %147, %146 : vector<2x64xf32>
    %149 = arith.divf %147, %148 : vector<2x64xf32>
    %150 = vector.extract_strided_slice %141 {offsets = [0, 32], sizes = [2, 16], strides = [1, 1]} : vector<2x64xf32> to vector<2x16xf32>
    %151 = math.tanh %150 : vector<2x16xf32>
    %152 = vector.extract_strided_slice %149 {offsets = [0, 16], sizes = [2, 16], strides = [1, 1]} : vector<2x64xf32> to vector<2x16xf32>
    %153 = arith.mulf %152, %114 : vector<2x16xf32>
    %154 = vector.extract_strided_slice %149 {offsets = [0, 0], sizes = [2, 16], strides = [1, 1]} : vector<2x64xf32> to vector<2x16xf32>
    %155 = arith.mulf %154, %151 : vector<2x16xf32>
    %156 = arith.addf %153, %155 : vector<2x16xf32>
    %157 = vector.extract_strided_slice %149 {offsets = [0, 48], sizes = [2, 16], strides = [1, 1]} : vector<2x64xf32> to vector<2x16xf32>
    %158 = math.tanh %156 : vector<2x16xf32>
    %159 = arith.mulf %157, %158 : vector<2x16xf32>
    %160 = arith.negf %144 : vector<2x64xf32>
    %161 = math.exp %160 : vector<2x64xf32>
    %cst_38 = arith.constant 1.000000e+00 : f32
    %162 = vector.broadcast %cst_38 : f32 to vector<2x64xf32>
    %163 = arith.addf %162, %161 : vector<2x64xf32>
    %164 = arith.divf %162, %163 : vector<2x64xf32>
    %165 = vector.extract_strided_slice %144 {offsets = [0, 32], sizes = [2, 16], strides = [1, 1]} : vector<2x64xf32> to vector<2x16xf32>
    %166 = math.tanh %165 : vector<2x16xf32>
    %167 = vector.extract_strided_slice %164 {offsets = [0, 16], sizes = [2, 16], strides = [1, 1]} : vector<2x64xf32> to vector<2x16xf32>
    %168 = arith.mulf %167, %129 : vector<2x16xf32>
    %169 = vector.extract_strided_slice %164 {offsets = [0, 0], sizes = [2, 16], strides = [1, 1]} : vector<2x64xf32> to vector<2x16xf32>
    %170 = arith.mulf %169, %166 : vector<2x16xf32>
    %171 = arith.addf %168, %170 : vector<2x16xf32>
    %172 = vector.extract_strided_slice %164 {offsets = [0, 48], sizes = [2, 16], strides = [1, 1]} : vector<2x64xf32> to vector<2x16xf32>
    %173 = math.tanh %171 : vector<2x16xf32>
    %174 = arith.mulf %172, %173 : vector<2x16xf32>
    %c3_39 = arith.constant 3 : index
    %c0_40 = arith.constant 0 : index
    %c0_41 = arith.constant 0 : index
    %175 = vector.load %arg4[%c3_39, %c0_40, %c0_41] : memref<6x2x32xf32, #tpu.memory_space<vmem>>, vector<1x2x16xf32>
    %176 = vector.shape_cast %175 : vector<1x2x16xf32> to vector<2x16xf32>
    %177 = vector.shape_cast %159 : vector<2x16xf32> to vector<1x2x16xf32>
    tpu.vector_store %arg4[%c3_39, %c0_40, %c0_41], %177 {strides = array<i32>} : memref<6x2x32xf32, #tpu.memory_space<vmem>>, vector<1x2x16xf32>,
    %c2_42 = arith.constant 2 : index
    %c0_43 = arith.constant 0 : index
    %c16_44 = arith.constant 16 : index
    %178 = vector.load %arg4[%c2_42, %c0_43, %c16_44] : memref<6x2x32xf32, #tpu.memory_space<vmem>>, vector<1x2x16xf32>
    %179 = vector.shape_cast %178 : vector<1x2x16xf32> to vector<2x16xf32>
    %180 = vector.shape_cast %174 : vector<2x16xf32> to vector<1x2x16xf32>
    tpu.vector_store %arg4[%c2_42, %c0_43, %c16_44], %180 {strides = array<i32>} : memref<6x2x32xf32, #tpu.memory_space<vmem>>, vector<1x2x16xf32>,
    %181 = vector.extract_strided_slice %5 {offsets = [8, 0], sizes = [2, 64], strides = [1, 1]} : vector<12x128xf32> to vector<2x64xf32>
    %cst_45 = arith.constant dense<0.000000e+00> : vector<2x64xf32>
    %182 = tpu.matmul %159, %7, %cst_45 {dimension_numbers = #tpu.dot_dimension_numbers<[1], [0], [0], [1], [0, 0, 1, 1], [], []>} : vector<2x16xf32>, vector<16x64xf32>, vector<2x64xf32> -> vector<2x64xf32>
    %183 = arith.addf %181, %182 : vector<2x64xf32>
    %184 = vector.extract_strided_slice %5 {offsets = [2, 64], sizes = [2, 64], strides = [1, 1]} : vector<12x128xf32> to vector<2x64xf32>
    %cst_46 = arith.constant dense<0.000000e+00> : vector<2x64xf32>
    %185 = tpu.matmul %174, %8, %cst_46 {dimension_numbers = #tpu.dot_dimension_numbers<[1], [0], [0], [1], [0, 0, 1, 1], [], []>} : vector<2x16xf32>, vector<16x64xf32>, vector<2x64xf32> -> vector<2x64xf32>
    %186 = arith.addf %184, %185 : vector<2x64xf32>
    %187 = arith.negf %183 : vector<2x64xf32>
    %188 = math.exp %187 : vector<2x64xf32>
    %cst_47 = arith.constant 1.000000e+00 : f32
    %189 = vector.broadcast %cst_47 : f32 to vector<2x64xf32>
    %190 = arith.addf %189, %188 : vector<2x64xf32>
    %191 = arith.divf %189, %190 : vector<2x64xf32>
    %192 = vector.extract_strided_slice %183 {offsets = [0, 32], sizes = [2, 16], strides = [1, 1]} : vector<2x64xf32> to vector<2x16xf32>
    %193 = math.tanh %192 : vector<2x16xf32>
    %194 = vector.extract_strided_slice %191 {offsets = [0, 16], sizes = [2, 16], strides = [1, 1]} : vector<2x64xf32> to vector<2x16xf32>
    %195 = arith.mulf %194, %156 : vector<2x16xf32>
    %196 = vector.extract_strided_slice %191 {offsets = [0, 0], sizes = [2, 16], strides = [1, 1]} : vector<2x64xf32> to vector<2x16xf32>
    %197 = arith.mulf %196, %193 : vector<2x16xf32>
    %198 = arith.addf %195, %197 : vector<2x16xf32>
    %199 = vector.extract_strided_slice %191 {offsets = [0, 48], sizes = [2, 16], strides = [1, 1]} : vector<2x64xf32> to vector<2x16xf32>
    %200 = math.tanh %198 : vector<2x16xf32>
    %201 = arith.mulf %199, %200 : vector<2x16xf32>
    %202 = arith.negf %186 : vector<2x64xf32>
    %203 = math.exp %202 : vector<2x64xf32>
    %cst_48 = arith.constant 1.000000e+00 : f32
    %204 = vector.broadcast %cst_48 : f32 to vector<2x64xf32>
    %205 = arith.addf %204, %203 : vector<2x64xf32>
    %206 = arith.divf %204, %205 : vector<2x64xf32>
    %207 = vector.extract_strided_slice %186 {offsets = [0, 32], sizes = [2, 16], strides = [1, 1]} : vector<2x64xf32> to vector<2x16xf32>
    %208 = math.tanh %207 : vector<2x16xf32>
    %209 = vector.extract_strided_slice %206 {offsets = [0, 16], sizes = [2, 16], strides = [1, 1]} : vector<2x64xf32> to vector<2x16xf32>
    %210 = arith.mulf %209, %171 : vector<2x16xf32>
    %211 = vector.extract_strided_slice %206 {offsets = [0, 0], sizes = [2, 16], strides = [1, 1]} : vector<2x64xf32> to vector<2x16xf32>
    %212 = arith.mulf %211, %208 : vector<2x16xf32>
    %213 = arith.addf %210, %212 : vector<2x16xf32>
    %214 = vector.extract_strided_slice %206 {offsets = [0, 48], sizes = [2, 16], strides = [1, 1]} : vector<2x64xf32> to vector<2x16xf32>
    %215 = math.tanh %213 : vector<2x16xf32>
    %216 = arith.mulf %214, %215 : vector<2x16xf32>
    %c4_49 = arith.constant 4 : index
    %c0_50 = arith.constant 0 : index
    %c0_51 = arith.constant 0 : index
    %217 = vector.load %arg4[%c4_49, %c0_50, %c0_51] : memref<6x2x32xf32, #tpu.memory_space<vmem>>, vector<1x2x16xf32>
    %218 = vector.shape_cast %217 : vector<1x2x16xf32> to vector<2x16xf32>
    %219 = vector.shape_cast %201 : vector<2x16xf32> to vector<1x2x16xf32>
    tpu.vector_store %arg4[%c4_49, %c0_50, %c0_51], %219 {strides = array<i32>} : memref<6x2x32xf32, #tpu.memory_space<vmem>>, vector<1x2x16xf32>,
    %c1_52 = arith.constant 1 : index
    %c0_53 = arith.constant 0 : index
    %c16_54 = arith.constant 16 : index
    %220 = vector.load %arg4[%c1_52, %c0_53, %c16_54] : memref<6x2x32xf32, #tpu.memory_space<vmem>>, vector<1x2x16xf32>
    %221 = vector.shape_cast %220 : vector<1x2x16xf32> to vector<2x16xf32>
    %222 = vector.shape_cast %216 : vector<2x16xf32> to vector<1x2x16xf32>
    tpu.vector_store %arg4[%c1_52, %c0_53, %c16_54], %222 {strides = array<i32>} : memref<6x2x32xf32, #tpu.memory_space<vmem>>, vector<1x2x16xf32>,
    %223 = vector.extract_strided_slice %5 {offsets = [10, 0], sizes = [2, 64], strides = [1, 1]} : vector<12x128xf32> to vector<2x64xf32>
    %cst_55 = arith.constant dense<0.000000e+00> : vector<2x64xf32>
    %224 = tpu.matmul %201, %7, %cst_55 {dimension_numbers = #tpu.dot_dimension_numbers<[1], [0], [0], [1], [0, 0, 1, 1], [], []>} : vector<2x16xf32>, vector<16x64xf32>, vector<2x64xf32> -> vector<2x64xf32>
    %225 = arith.addf %223, %224 : vector<2x64xf32>
    %226 = vector.extract_strided_slice %5 {offsets = [0, 64], sizes = [2, 64], strides = [1, 1]} : vector<12x128xf32> to vector<2x64xf32>
    %cst_56 = arith.constant dense<0.000000e+00> : vector<2x64xf32>
    %227 = tpu.matmul %216, %8, %cst_56 {dimension_numbers = #tpu.dot_dimension_numbers<[1], [0], [0], [1], [0, 0, 1, 1], [], []>} : vector<2x16xf32>, vector<16x64xf32>, vector<2x64xf32> -> vector<2x64xf32>
    %228 = arith.addf %226, %227 : vector<2x64xf32>
    %229 = arith.negf %225 : vector<2x64xf32>
    %230 = math.exp %229 : vector<2x64xf32>
    %cst_57 = arith.constant 1.000000e+00 : f32
    %231 = vector.broadcast %cst_57 : f32 to vector<2x64xf32>
    %232 = arith.addf %231, %230 : vector<2x64xf32>
    %233 = arith.divf %231, %232 : vector<2x64xf32>
    %234 = vector.extract_strided_slice %225 {offsets = [0, 32], sizes = [2, 16], strides = [1, 1]} : vector<2x64xf32> to vector<2x16xf32>
    %235 = math.tanh %234 : vector<2x16xf32>
    %236 = vector.extract_strided_slice %233 {offsets = [0, 16], sizes = [2, 16], strides = [1, 1]} : vector<2x64xf32> to vector<2x16xf32>
    %237 = arith.mulf %236, %198 : vector<2x16xf32>
    %238 = vector.extract_strided_slice %233 {offsets = [0, 0], sizes = [2, 16], strides = [1, 1]} : vector<2x64xf32> to vector<2x16xf32>
    %239 = arith.mulf %238, %235 : vector<2x16xf32>
    %240 = arith.addf %237, %239 : vector<2x16xf32>
    %241 = vector.extract_strided_slice %233 {offsets = [0, 48], sizes = [2, 16], strides = [1, 1]} : vector<2x64xf32> to vector<2x16xf32>
    %242 = math.tanh %240 : vector<2x16xf32>
    %243 = arith.mulf %241, %242 : vector<2x16xf32>
    %244 = arith.negf %228 : vector<2x64xf32>
    %245 = math.exp %244 : vector<2x64xf32>
    %cst_58 = arith.constant 1.000000e+00 : f32
    %246 = vector.broadcast %cst_58 : f32 to vector<2x64xf32>
    %247 = arith.addf %246, %245 : vector<2x64xf32>
    %248 = arith.divf %246, %247 : vector<2x64xf32>
    %249 = vector.extract_strided_slice %228 {offsets = [0, 32], sizes = [2, 16], strides = [1, 1]} : vector<2x64xf32> to vector<2x16xf32>
    %250 = math.tanh %249 : vector<2x16xf32>
    %251 = vector.extract_strided_slice %248 {offsets = [0, 16], sizes = [2, 16], strides = [1, 1]} : vector<2x64xf32> to vector<2x16xf32>
    %252 = arith.mulf %251, %213 : vector<2x16xf32>
    %253 = vector.extract_strided_slice %248 {offsets = [0, 0], sizes = [2, 16], strides = [1, 1]} : vector<2x64xf32> to vector<2x16xf32>
    %254 = arith.mulf %253, %250 : vector<2x16xf32>
    %255 = arith.addf %252, %254 : vector<2x16xf32>
    %256 = vector.extract_strided_slice %248 {offsets = [0, 48], sizes = [2, 16], strides = [1, 1]} : vector<2x64xf32> to vector<2x16xf32>
    %257 = math.tanh %255 : vector<2x16xf32>
    %258 = arith.mulf %256, %257 : vector<2x16xf32>
    %c5_59 = arith.constant 5 : index
    %c0_60 = arith.constant 0 : index
    %c0_61 = arith.constant 0 : index
    %259 = vector.load %arg4[%c5_59, %c0_60, %c0_61] : memref<6x2x32xf32, #tpu.memory_space<vmem>>, vector<1x2x16xf32>
    %260 = vector.shape_cast %259 : vector<1x2x16xf32> to vector<2x16xf32>
    %261 = vector.shape_cast %243 : vector<2x16xf32> to vector<1x2x16xf32>
    tpu.vector_store %arg4[%c5_59, %c0_60, %c0_61], %261 {strides = array<i32>} : memref<6x2x32xf32, #tpu.memory_space<vmem>>, vector<1x2x16xf32>,
    %c0_62 = arith.constant 0 : index
    %c0_63 = arith.constant 0 : index
    %c16_64 = arith.constant 16 : index
    %262 = vector.load %arg4[%c0_62, %c0_63, %c16_64] : memref<6x2x32xf32, #tpu.memory_space<vmem>>, vector<1x2x16xf32>
    %263 = vector.shape_cast %262 : vector<1x2x16xf32> to vector<2x16xf32>
    %264 = vector.shape_cast %258 : vector<2x16xf32> to vector<1x2x16xf32>
    tpu.vector_store %arg4[%c0_62, %c0_63, %c16_64], %264 {strides = array<i32>} : memref<6x2x32xf32, #tpu.memory_space<vmem>>, vector<1x2x16xf32>,
    return
  }
}

module attributes {stable_mosaic.version = 11 : i64} {
  func.func @_bilstm_kernel(%arg0: memref<16x32xf32, #tpu.memory_space<vmem>>, %arg1: memref<32x128xf32, #tpu.memory_space<vmem>>, %arg2: memref<16x128xf32, #tpu.memory_space<vmem>>, %arg3: memref<1x128xf32, #tpu.memory_space<vmem>>, %arg4: memref<2x64xf32, #tpu.memory_space<vmem>>) attributes {dimension_semantics = [], scalar_prefetch = 0 : i64, scratch_operands = 0 : i64, tpu.core_type = #tpu.core_type<tc>} {
    %c0 = arith.constant 0 : index
    %c0_0 = arith.constant 0 : index
    %0 = vector.load %arg0[%c0, %c0_0] : memref<16x32xf32, #tpu.memory_space<vmem>>, vector<16x32xf32>
    %c0_1 = arith.constant 0 : index
    %c0_2 = arith.constant 0 : index
    %1 = vector.load %arg1[%c0_1, %c0_2] : memref<32x128xf32, #tpu.memory_space<vmem>>, vector<32x128xf32>
    %cst = arith.constant dense<0.000000e+00> : vector<16x128xf32>
    %2 = tpu.matmul %0, %1, %cst {dimension_numbers = #tpu.dot_dimension_numbers<[1], [0], [0], [1], [0, 0, 1, 1], [], []>} : vector<16x32xf32>, vector<32x128xf32>, vector<16x128xf32> -> vector<16x128xf32>
    %c0_3 = arith.constant 0 : index
    %c0_4 = arith.constant 0 : index
    %3 = vector.load %arg3[%c0_3, %c0_4] : memref<1x128xf32, #tpu.memory_space<vmem>>, vector<1x128xf32>
    %4 = vector.broadcast %3 : vector<1x128xf32> to vector<16x128xf32>
    %5 = arith.addf %2, %4 : vector<16x128xf32>
    %c0_5 = arith.constant 0 : index
    %c0_6 = arith.constant 0 : index
    %6 = vector.load %arg2[%c0_5, %c0_6] : memref<16x128xf32, #tpu.memory_space<vmem>>, vector<16x128xf32>
    %7 = vector.extract_strided_slice %6 {offsets = [0, 0], sizes = [16, 64], strides = [1, 1]} : vector<16x128xf32> to vector<16x64xf32>
    %8 = vector.extract_strided_slice %6 {offsets = [0, 64], sizes = [16, 64], strides = [1, 1]} : vector<16x128xf32> to vector<16x64xf32>
    %cst_7 = arith.constant 0.000000e+00 : f32
    %9 = vector.broadcast %cst_7 : f32 to vector<2x16xf32>
    %cst_8 = arith.constant 0.000000e+00 : f32
    %10 = vector.broadcast %cst_8 : f32 to vector<2x16xf32>
    %cst_9 = arith.constant 0.000000e+00 : f32
    %11 = vector.broadcast %cst_9 : f32 to vector<2x16xf32>
    %cst_10 = arith.constant 0.000000e+00 : f32
    %12 = vector.broadcast %cst_10 : f32 to vector<2x16xf32>
    %cst_11 = arith.constant 0.000000e+00 : f32
    %13 = vector.broadcast %cst_11 : f32 to vector<2x16xf32>
    %cst_12 = arith.constant 0.000000e+00 : f32
    %14 = vector.broadcast %cst_12 : f32 to vector<2x16xf32>
    %cst_13 = arith.constant 0xFF800000 : f32
    %15 = vector.broadcast %cst_13 : f32 to vector<2x16xf32>
    %cst_14 = arith.constant 0xFF800000 : f32
    %16 = vector.broadcast %cst_14 : f32 to vector<2x16xf32>
    %17 = vector.extract_strided_slice %5 {offsets = [0, 0], sizes = [2, 64], strides = [1, 1]} : vector<16x128xf32> to vector<2x64xf32>
    %cst_15 = arith.constant dense<0.000000e+00> : vector<2x64xf32>
    %18 = tpu.matmul %9, %7, %cst_15 {dimension_numbers = #tpu.dot_dimension_numbers<[1], [0], [0], [1], [0, 0, 1, 1], [], []>} : vector<2x16xf32>, vector<16x64xf32>, vector<2x64xf32> -> vector<2x64xf32>
    %19 = arith.addf %17, %18 : vector<2x64xf32>
    %20 = vector.extract_strided_slice %5 {offsets = [14, 64], sizes = [2, 64], strides = [1, 1]} : vector<16x128xf32> to vector<2x64xf32>
    %cst_16 = arith.constant dense<0.000000e+00> : vector<2x64xf32>
    %21 = tpu.matmul %10, %8, %cst_16 {dimension_numbers = #tpu.dot_dimension_numbers<[1], [0], [0], [1], [0, 0, 1, 1], [], []>} : vector<2x16xf32>, vector<16x64xf32>, vector<2x64xf32> -> vector<2x64xf32>
    %22 = arith.addf %20, %21 : vector<2x64xf32>
    %23 = arith.negf %19 : vector<2x64xf32>
    %24 = math.exp %23 : vector<2x64xf32>
    %cst_17 = arith.constant 1.000000e+00 : f32
    %25 = vector.broadcast %cst_17 : f32 to vector<2x64xf32>
    %26 = arith.addf %25, %24 : vector<2x64xf32>
    %27 = arith.divf %25, %26 : vector<2x64xf32>
    %28 = vector.extract_strided_slice %19 {offsets = [0, 32], sizes = [2, 16], strides = [1, 1]} : vector<2x64xf32> to vector<2x16xf32>
    %29 = math.tanh %28 : vector<2x16xf32>
    %30 = vector.extract_strided_slice %27 {offsets = [0, 16], sizes = [2, 16], strides = [1, 1]} : vector<2x64xf32> to vector<2x16xf32>
    %31 = arith.mulf %30, %11 : vector<2x16xf32>
    %32 = vector.extract_strided_slice %27 {offsets = [0, 0], sizes = [2, 16], strides = [1, 1]} : vector<2x64xf32> to vector<2x16xf32>
    %33 = arith.mulf %32, %29 : vector<2x16xf32>
    %34 = arith.addf %31, %33 : vector<2x16xf32>
    %35 = vector.extract_strided_slice %27 {offsets = [0, 48], sizes = [2, 16], strides = [1, 1]} : vector<2x64xf32> to vector<2x16xf32>
    %36 = math.tanh %34 : vector<2x16xf32>
    %37 = arith.mulf %35, %36 : vector<2x16xf32>
    %38 = arith.negf %22 : vector<2x64xf32>
    %39 = math.exp %38 : vector<2x64xf32>
    %cst_18 = arith.constant 1.000000e+00 : f32
    %40 = vector.broadcast %cst_18 : f32 to vector<2x64xf32>
    %41 = arith.addf %40, %39 : vector<2x64xf32>
    %42 = arith.divf %40, %41 : vector<2x64xf32>
    %43 = vector.extract_strided_slice %22 {offsets = [0, 32], sizes = [2, 16], strides = [1, 1]} : vector<2x64xf32> to vector<2x16xf32>
    %44 = math.tanh %43 : vector<2x16xf32>
    %45 = vector.extract_strided_slice %42 {offsets = [0, 16], sizes = [2, 16], strides = [1, 1]} : vector<2x64xf32> to vector<2x16xf32>
    %46 = arith.mulf %45, %12 : vector<2x16xf32>
    %47 = vector.extract_strided_slice %42 {offsets = [0, 0], sizes = [2, 16], strides = [1, 1]} : vector<2x64xf32> to vector<2x16xf32>
    %48 = arith.mulf %47, %44 : vector<2x16xf32>
    %49 = arith.addf %46, %48 : vector<2x16xf32>
    %50 = vector.extract_strided_slice %42 {offsets = [0, 48], sizes = [2, 16], strides = [1, 1]} : vector<2x64xf32> to vector<2x16xf32>
    %51 = math.tanh %49 : vector<2x16xf32>
    %52 = arith.mulf %50, %51 : vector<2x16xf32>
    %53 = arith.addf %13, %37 : vector<2x16xf32>
    %54 = arith.addf %14, %52 : vector<2x16xf32>
    %55 = arith.maximumf %15, %37 : vector<2x16xf32>
    %56 = arith.maximumf %16, %52 : vector<2x16xf32>
    %57 = vector.extract_strided_slice %5 {offsets = [2, 0], sizes = [2, 64], strides = [1, 1]} : vector<16x128xf32> to vector<2x64xf32>
    %cst_19 = arith.constant dense<0.000000e+00> : vector<2x64xf32>
    %58 = tpu.matmul %37, %7, %cst_19 {dimension_numbers = #tpu.dot_dimension_numbers<[1], [0], [0], [1], [0, 0, 1, 1], [], []>} : vector<2x16xf32>, vector<16x64xf32>, vector<2x64xf32> -> vector<2x64xf32>
    %59 = arith.addf %57, %58 : vector<2x64xf32>
    %60 = vector.extract_strided_slice %5 {offsets = [12, 64], sizes = [2, 64], strides = [1, 1]} : vector<16x128xf32> to vector<2x64xf32>
    %cst_20 = arith.constant dense<0.000000e+00> : vector<2x64xf32>
    %61 = tpu.matmul %52, %8, %cst_20 {dimension_numbers = #tpu.dot_dimension_numbers<[1], [0], [0], [1], [0, 0, 1, 1], [], []>} : vector<2x16xf32>, vector<16x64xf32>, vector<2x64xf32> -> vector<2x64xf32>
    %62 = arith.addf %60, %61 : vector<2x64xf32>
    %63 = arith.negf %59 : vector<2x64xf32>
    %64 = math.exp %63 : vector<2x64xf32>
    %cst_21 = arith.constant 1.000000e+00 : f32
    %65 = vector.broadcast %cst_21 : f32 to vector<2x64xf32>
    %66 = arith.addf %65, %64 : vector<2x64xf32>
    %67 = arith.divf %65, %66 : vector<2x64xf32>
    %68 = vector.extract_strided_slice %59 {offsets = [0, 32], sizes = [2, 16], strides = [1, 1]} : vector<2x64xf32> to vector<2x16xf32>
    %69 = math.tanh %68 : vector<2x16xf32>
    %70 = vector.extract_strided_slice %67 {offsets = [0, 16], sizes = [2, 16], strides = [1, 1]} : vector<2x64xf32> to vector<2x16xf32>
    %71 = arith.mulf %70, %34 : vector<2x16xf32>
    %72 = vector.extract_strided_slice %67 {offsets = [0, 0], sizes = [2, 16], strides = [1, 1]} : vector<2x64xf32> to vector<2x16xf32>
    %73 = arith.mulf %72, %69 : vector<2x16xf32>
    %74 = arith.addf %71, %73 : vector<2x16xf32>
    %75 = vector.extract_strided_slice %67 {offsets = [0, 48], sizes = [2, 16], strides = [1, 1]} : vector<2x64xf32> to vector<2x16xf32>
    %76 = math.tanh %74 : vector<2x16xf32>
    %77 = arith.mulf %75, %76 : vector<2x16xf32>
    %78 = arith.negf %62 : vector<2x64xf32>
    %79 = math.exp %78 : vector<2x64xf32>
    %cst_22 = arith.constant 1.000000e+00 : f32
    %80 = vector.broadcast %cst_22 : f32 to vector<2x64xf32>
    %81 = arith.addf %80, %79 : vector<2x64xf32>
    %82 = arith.divf %80, %81 : vector<2x64xf32>
    %83 = vector.extract_strided_slice %62 {offsets = [0, 32], sizes = [2, 16], strides = [1, 1]} : vector<2x64xf32> to vector<2x16xf32>
    %84 = math.tanh %83 : vector<2x16xf32>
    %85 = vector.extract_strided_slice %82 {offsets = [0, 16], sizes = [2, 16], strides = [1, 1]} : vector<2x64xf32> to vector<2x16xf32>
    %86 = arith.mulf %85, %49 : vector<2x16xf32>
    %87 = vector.extract_strided_slice %82 {offsets = [0, 0], sizes = [2, 16], strides = [1, 1]} : vector<2x64xf32> to vector<2x16xf32>
    %88 = arith.mulf %87, %84 : vector<2x16xf32>
    %89 = arith.addf %86, %88 : vector<2x16xf32>
    %90 = vector.extract_strided_slice %82 {offsets = [0, 48], sizes = [2, 16], strides = [1, 1]} : vector<2x64xf32> to vector<2x16xf32>
    %91 = math.tanh %89 : vector<2x16xf32>
    %92 = arith.mulf %90, %91 : vector<2x16xf32>
    %93 = arith.addf %53, %77 : vector<2x16xf32>
    %94 = arith.addf %54, %92 : vector<2x16xf32>
    %95 = arith.maximumf %55, %77 : vector<2x16xf32>
    %96 = arith.maximumf %56, %92 : vector<2x16xf32>
    %97 = vector.extract_strided_slice %5 {offsets = [4, 0], sizes = [2, 64], strides = [1, 1]} : vector<16x128xf32> to vector<2x64xf32>
    %cst_23 = arith.constant dense<0.000000e+00> : vector<2x64xf32>
    %98 = tpu.matmul %77, %7, %cst_23 {dimension_numbers = #tpu.dot_dimension_numbers<[1], [0], [0], [1], [0, 0, 1, 1], [], []>} : vector<2x16xf32>, vector<16x64xf32>, vector<2x64xf32> -> vector<2x64xf32>
    %99 = arith.addf %97, %98 : vector<2x64xf32>
    %100 = vector.extract_strided_slice %5 {offsets = [10, 64], sizes = [2, 64], strides = [1, 1]} : vector<16x128xf32> to vector<2x64xf32>
    %cst_24 = arith.constant dense<0.000000e+00> : vector<2x64xf32>
    %101 = tpu.matmul %92, %8, %cst_24 {dimension_numbers = #tpu.dot_dimension_numbers<[1], [0], [0], [1], [0, 0, 1, 1], [], []>} : vector<2x16xf32>, vector<16x64xf32>, vector<2x64xf32> -> vector<2x64xf32>
    %102 = arith.addf %100, %101 : vector<2x64xf32>
    %103 = arith.negf %99 : vector<2x64xf32>
    %104 = math.exp %103 : vector<2x64xf32>
    %cst_25 = arith.constant 1.000000e+00 : f32
    %105 = vector.broadcast %cst_25 : f32 to vector<2x64xf32>
    %106 = arith.addf %105, %104 : vector<2x64xf32>
    %107 = arith.divf %105, %106 : vector<2x64xf32>
    %108 = vector.extract_strided_slice %99 {offsets = [0, 32], sizes = [2, 16], strides = [1, 1]} : vector<2x64xf32> to vector<2x16xf32>
    %109 = math.tanh %108 : vector<2x16xf32>
    %110 = vector.extract_strided_slice %107 {offsets = [0, 16], sizes = [2, 16], strides = [1, 1]} : vector<2x64xf32> to vector<2x16xf32>
    %111 = arith.mulf %110, %74 : vector<2x16xf32>
    %112 = vector.extract_strided_slice %107 {offsets = [0, 0], sizes = [2, 16], strides = [1, 1]} : vector<2x64xf32> to vector<2x16xf32>
    %113 = arith.mulf %112, %109 : vector<2x16xf32>
    %114 = arith.addf %111, %113 : vector<2x16xf32>
    %115 = vector.extract_strided_slice %107 {offsets = [0, 48], sizes = [2, 16], strides = [1, 1]} : vector<2x64xf32> to vector<2x16xf32>
    %116 = math.tanh %114 : vector<2x16xf32>
    %117 = arith.mulf %115, %116 : vector<2x16xf32>
    %118 = arith.negf %102 : vector<2x64xf32>
    %119 = math.exp %118 : vector<2x64xf32>
    %cst_26 = arith.constant 1.000000e+00 : f32
    %120 = vector.broadcast %cst_26 : f32 to vector<2x64xf32>
    %121 = arith.addf %120, %119 : vector<2x64xf32>
    %122 = arith.divf %120, %121 : vector<2x64xf32>
    %123 = vector.extract_strided_slice %102 {offsets = [0, 32], sizes = [2, 16], strides = [1, 1]} : vector<2x64xf32> to vector<2x16xf32>
    %124 = math.tanh %123 : vector<2x16xf32>
    %125 = vector.extract_strided_slice %122 {offsets = [0, 16], sizes = [2, 16], strides = [1, 1]} : vector<2x64xf32> to vector<2x16xf32>
    %126 = arith.mulf %125, %89 : vector<2x16xf32>
    %127 = vector.extract_strided_slice %122 {offsets = [0, 0], sizes = [2, 16], strides = [1, 1]} : vector<2x64xf32> to vector<2x16xf32>
    %128 = arith.mulf %127, %124 : vector<2x16xf32>
    %129 = arith.addf %126, %128 : vector<2x16xf32>
    %130 = vector.extract_strided_slice %122 {offsets = [0, 48], sizes = [2, 16], strides = [1, 1]} : vector<2x64xf32> to vector<2x16xf32>
    %131 = math.tanh %129 : vector<2x16xf32>
    %132 = arith.mulf %130, %131 : vector<2x16xf32>
    %133 = arith.addf %93, %117 : vector<2x16xf32>
    %134 = arith.addf %94, %132 : vector<2x16xf32>
    %135 = arith.maximumf %95, %117 : vector<2x16xf32>
    %136 = arith.maximumf %96, %132 : vector<2x16xf32>
    %137 = vector.extract_strided_slice %5 {offsets = [6, 0], sizes = [2, 64], strides = [1, 1]} : vector<16x128xf32> to vector<2x64xf32>
    %cst_27 = arith.constant dense<0.000000e+00> : vector<2x64xf32>
    %138 = tpu.matmul %117, %7, %cst_27 {dimension_numbers = #tpu.dot_dimension_numbers<[1], [0], [0], [1], [0, 0, 1, 1], [], []>} : vector<2x16xf32>, vector<16x64xf32>, vector<2x64xf32> -> vector<2x64xf32>
    %139 = arith.addf %137, %138 : vector<2x64xf32>
    %140 = vector.extract_strided_slice %5 {offsets = [8, 64], sizes = [2, 64], strides = [1, 1]} : vector<16x128xf32> to vector<2x64xf32>
    %cst_28 = arith.constant dense<0.000000e+00> : vector<2x64xf32>
    %141 = tpu.matmul %132, %8, %cst_28 {dimension_numbers = #tpu.dot_dimension_numbers<[1], [0], [0], [1], [0, 0, 1, 1], [], []>} : vector<2x16xf32>, vector<16x64xf32>, vector<2x64xf32> -> vector<2x64xf32>
    %142 = arith.addf %140, %141 : vector<2x64xf32>
    %143 = arith.negf %139 : vector<2x64xf32>
    %144 = math.exp %143 : vector<2x64xf32>
    %cst_29 = arith.constant 1.000000e+00 : f32
    %145 = vector.broadcast %cst_29 : f32 to vector<2x64xf32>
    %146 = arith.addf %145, %144 : vector<2x64xf32>
    %147 = arith.divf %145, %146 : vector<2x64xf32>
    %148 = vector.extract_strided_slice %139 {offsets = [0, 32], sizes = [2, 16], strides = [1, 1]} : vector<2x64xf32> to vector<2x16xf32>
    %149 = math.tanh %148 : vector<2x16xf32>
    %150 = vector.extract_strided_slice %147 {offsets = [0, 16], sizes = [2, 16], strides = [1, 1]} : vector<2x64xf32> to vector<2x16xf32>
    %151 = arith.mulf %150, %114 : vector<2x16xf32>
    %152 = vector.extract_strided_slice %147 {offsets = [0, 0], sizes = [2, 16], strides = [1, 1]} : vector<2x64xf32> to vector<2x16xf32>
    %153 = arith.mulf %152, %149 : vector<2x16xf32>
    %154 = arith.addf %151, %153 : vector<2x16xf32>
    %155 = vector.extract_strided_slice %147 {offsets = [0, 48], sizes = [2, 16], strides = [1, 1]} : vector<2x64xf32> to vector<2x16xf32>
    %156 = math.tanh %154 : vector<2x16xf32>
    %157 = arith.mulf %155, %156 : vector<2x16xf32>
    %158 = arith.negf %142 : vector<2x64xf32>
    %159 = math.exp %158 : vector<2x64xf32>
    %cst_30 = arith.constant 1.000000e+00 : f32
    %160 = vector.broadcast %cst_30 : f32 to vector<2x64xf32>
    %161 = arith.addf %160, %159 : vector<2x64xf32>
    %162 = arith.divf %160, %161 : vector<2x64xf32>
    %163 = vector.extract_strided_slice %142 {offsets = [0, 32], sizes = [2, 16], strides = [1, 1]} : vector<2x64xf32> to vector<2x16xf32>
    %164 = math.tanh %163 : vector<2x16xf32>
    %165 = vector.extract_strided_slice %162 {offsets = [0, 16], sizes = [2, 16], strides = [1, 1]} : vector<2x64xf32> to vector<2x16xf32>
    %166 = arith.mulf %165, %129 : vector<2x16xf32>
    %167 = vector.extract_strided_slice %162 {offsets = [0, 0], sizes = [2, 16], strides = [1, 1]} : vector<2x64xf32> to vector<2x16xf32>
    %168 = arith.mulf %167, %164 : vector<2x16xf32>
    %169 = arith.addf %166, %168 : vector<2x16xf32>
    %170 = vector.extract_strided_slice %162 {offsets = [0, 48], sizes = [2, 16], strides = [1, 1]} : vector<2x64xf32> to vector<2x16xf32>
    %171 = math.tanh %169 : vector<2x16xf32>
    %172 = arith.mulf %170, %171 : vector<2x16xf32>
    %173 = arith.addf %133, %157 : vector<2x16xf32>
    %174 = arith.addf %134, %172 : vector<2x16xf32>
    %175 = arith.maximumf %135, %157 : vector<2x16xf32>
    %176 = arith.maximumf %136, %172 : vector<2x16xf32>
    %177 = vector.extract_strided_slice %5 {offsets = [8, 0], sizes = [2, 64], strides = [1, 1]} : vector<16x128xf32> to vector<2x64xf32>
    %cst_31 = arith.constant dense<0.000000e+00> : vector<2x64xf32>
    %178 = tpu.matmul %157, %7, %cst_31 {dimension_numbers = #tpu.dot_dimension_numbers<[1], [0], [0], [1], [0, 0, 1, 1], [], []>} : vector<2x16xf32>, vector<16x64xf32>, vector<2x64xf32> -> vector<2x64xf32>
    %179 = arith.addf %177, %178 : vector<2x64xf32>
    %180 = vector.extract_strided_slice %5 {offsets = [6, 64], sizes = [2, 64], strides = [1, 1]} : vector<16x128xf32> to vector<2x64xf32>
    %cst_32 = arith.constant dense<0.000000e+00> : vector<2x64xf32>
    %181 = tpu.matmul %172, %8, %cst_32 {dimension_numbers = #tpu.dot_dimension_numbers<[1], [0], [0], [1], [0, 0, 1, 1], [], []>} : vector<2x16xf32>, vector<16x64xf32>, vector<2x64xf32> -> vector<2x64xf32>
    %182 = arith.addf %180, %181 : vector<2x64xf32>
    %183 = arith.negf %179 : vector<2x64xf32>
    %184 = math.exp %183 : vector<2x64xf32>
    %cst_33 = arith.constant 1.000000e+00 : f32
    %185 = vector.broadcast %cst_33 : f32 to vector<2x64xf32>
    %186 = arith.addf %185, %184 : vector<2x64xf32>
    %187 = arith.divf %185, %186 : vector<2x64xf32>
    %188 = vector.extract_strided_slice %179 {offsets = [0, 32], sizes = [2, 16], strides = [1, 1]} : vector<2x64xf32> to vector<2x16xf32>
    %189 = math.tanh %188 : vector<2x16xf32>
    %190 = vector.extract_strided_slice %187 {offsets = [0, 16], sizes = [2, 16], strides = [1, 1]} : vector<2x64xf32> to vector<2x16xf32>
    %191 = arith.mulf %190, %154 : vector<2x16xf32>
    %192 = vector.extract_strided_slice %187 {offsets = [0, 0], sizes = [2, 16], strides = [1, 1]} : vector<2x64xf32> to vector<2x16xf32>
    %193 = arith.mulf %192, %189 : vector<2x16xf32>
    %194 = arith.addf %191, %193 : vector<2x16xf32>
    %195 = vector.extract_strided_slice %187 {offsets = [0, 48], sizes = [2, 16], strides = [1, 1]} : vector<2x64xf32> to vector<2x16xf32>
    %196 = math.tanh %194 : vector<2x16xf32>
    %197 = arith.mulf %195, %196 : vector<2x16xf32>
    %198 = arith.negf %182 : vector<2x64xf32>
    %199 = math.exp %198 : vector<2x64xf32>
    %cst_34 = arith.constant 1.000000e+00 : f32
    %200 = vector.broadcast %cst_34 : f32 to vector<2x64xf32>
    %201 = arith.addf %200, %199 : vector<2x64xf32>
    %202 = arith.divf %200, %201 : vector<2x64xf32>
    %203 = vector.extract_strided_slice %182 {offsets = [0, 32], sizes = [2, 16], strides = [1, 1]} : vector<2x64xf32> to vector<2x16xf32>
    %204 = math.tanh %203 : vector<2x16xf32>
    %205 = vector.extract_strided_slice %202 {offsets = [0, 16], sizes = [2, 16], strides = [1, 1]} : vector<2x64xf32> to vector<2x16xf32>
    %206 = arith.mulf %205, %169 : vector<2x16xf32>
    %207 = vector.extract_strided_slice %202 {offsets = [0, 0], sizes = [2, 16], strides = [1, 1]} : vector<2x64xf32> to vector<2x16xf32>
    %208 = arith.mulf %207, %204 : vector<2x16xf32>
    %209 = arith.addf %206, %208 : vector<2x16xf32>
    %210 = vector.extract_strided_slice %202 {offsets = [0, 48], sizes = [2, 16], strides = [1, 1]} : vector<2x64xf32> to vector<2x16xf32>
    %211 = math.tanh %209 : vector<2x16xf32>
    %212 = arith.mulf %210, %211 : vector<2x16xf32>
    %213 = arith.addf %173, %197 : vector<2x16xf32>
    %214 = arith.addf %174, %212 : vector<2x16xf32>
    %215 = arith.maximumf %175, %197 : vector<2x16xf32>
    %216 = arith.maximumf %176, %212 : vector<2x16xf32>
    %217 = vector.extract_strided_slice %5 {offsets = [10, 0], sizes = [2, 64], strides = [1, 1]} : vector<16x128xf32> to vector<2x64xf32>
    %cst_35 = arith.constant dense<0.000000e+00> : vector<2x64xf32>
    %218 = tpu.matmul %197, %7, %cst_35 {dimension_numbers = #tpu.dot_dimension_numbers<[1], [0], [0], [1], [0, 0, 1, 1], [], []>} : vector<2x16xf32>, vector<16x64xf32>, vector<2x64xf32> -> vector<2x64xf32>
    %219 = arith.addf %217, %218 : vector<2x64xf32>
    %220 = vector.extract_strided_slice %5 {offsets = [4, 64], sizes = [2, 64], strides = [1, 1]} : vector<16x128xf32> to vector<2x64xf32>
    %cst_36 = arith.constant dense<0.000000e+00> : vector<2x64xf32>
    %221 = tpu.matmul %212, %8, %cst_36 {dimension_numbers = #tpu.dot_dimension_numbers<[1], [0], [0], [1], [0, 0, 1, 1], [], []>} : vector<2x16xf32>, vector<16x64xf32>, vector<2x64xf32> -> vector<2x64xf32>
    %222 = arith.addf %220, %221 : vector<2x64xf32>
    %223 = arith.negf %219 : vector<2x64xf32>
    %224 = math.exp %223 : vector<2x64xf32>
    %cst_37 = arith.constant 1.000000e+00 : f32
    %225 = vector.broadcast %cst_37 : f32 to vector<2x64xf32>
    %226 = arith.addf %225, %224 : vector<2x64xf32>
    %227 = arith.divf %225, %226 : vector<2x64xf32>
    %228 = vector.extract_strided_slice %219 {offsets = [0, 32], sizes = [2, 16], strides = [1, 1]} : vector<2x64xf32> to vector<2x16xf32>
    %229 = math.tanh %228 : vector<2x16xf32>
    %230 = vector.extract_strided_slice %227 {offsets = [0, 16], sizes = [2, 16], strides = [1, 1]} : vector<2x64xf32> to vector<2x16xf32>
    %231 = arith.mulf %230, %194 : vector<2x16xf32>
    %232 = vector.extract_strided_slice %227 {offsets = [0, 0], sizes = [2, 16], strides = [1, 1]} : vector<2x64xf32> to vector<2x16xf32>
    %233 = arith.mulf %232, %229 : vector<2x16xf32>
    %234 = arith.addf %231, %233 : vector<2x16xf32>
    %235 = vector.extract_strided_slice %227 {offsets = [0, 48], sizes = [2, 16], strides = [1, 1]} : vector<2x64xf32> to vector<2x16xf32>
    %236 = math.tanh %234 : vector<2x16xf32>
    %237 = arith.mulf %235, %236 : vector<2x16xf32>
    %238 = arith.negf %222 : vector<2x64xf32>
    %239 = math.exp %238 : vector<2x64xf32>
    %cst_38 = arith.constant 1.000000e+00 : f32
    %240 = vector.broadcast %cst_38 : f32 to vector<2x64xf32>
    %241 = arith.addf %240, %239 : vector<2x64xf32>
    %242 = arith.divf %240, %241 : vector<2x64xf32>
    %243 = vector.extract_strided_slice %222 {offsets = [0, 32], sizes = [2, 16], strides = [1, 1]} : vector<2x64xf32> to vector<2x16xf32>
    %244 = math.tanh %243 : vector<2x16xf32>
    %245 = vector.extract_strided_slice %242 {offsets = [0, 16], sizes = [2, 16], strides = [1, 1]} : vector<2x64xf32> to vector<2x16xf32>
    %246 = arith.mulf %245, %209 : vector<2x16xf32>
    %247 = vector.extract_strided_slice %242 {offsets = [0, 0], sizes = [2, 16], strides = [1, 1]} : vector<2x64xf32> to vector<2x16xf32>
    %248 = arith.mulf %247, %244 : vector<2x16xf32>
    %249 = arith.addf %246, %248 : vector<2x16xf32>
    %250 = vector.extract_strided_slice %242 {offsets = [0, 48], sizes = [2, 16], strides = [1, 1]} : vector<2x64xf32> to vector<2x16xf32>
    %251 = math.tanh %249 : vector<2x16xf32>
    %252 = arith.mulf %250, %251 : vector<2x16xf32>
    %253 = arith.addf %213, %237 : vector<2x16xf32>
    %254 = arith.addf %214, %252 : vector<2x16xf32>
    %255 = arith.maximumf %215, %237 : vector<2x16xf32>
    %256 = arith.maximumf %216, %252 : vector<2x16xf32>
    %257 = vector.extract_strided_slice %5 {offsets = [12, 0], sizes = [2, 64], strides = [1, 1]} : vector<16x128xf32> to vector<2x64xf32>
    %cst_39 = arith.constant dense<0.000000e+00> : vector<2x64xf32>
    %258 = tpu.matmul %237, %7, %cst_39 {dimension_numbers = #tpu.dot_dimension_numbers<[1], [0], [0], [1], [0, 0, 1, 1], [], []>} : vector<2x16xf32>, vector<16x64xf32>, vector<2x64xf32> -> vector<2x64xf32>
    %259 = arith.addf %257, %258 : vector<2x64xf32>
    %260 = vector.extract_strided_slice %5 {offsets = [2, 64], sizes = [2, 64], strides = [1, 1]} : vector<16x128xf32> to vector<2x64xf32>
    %cst_40 = arith.constant dense<0.000000e+00> : vector<2x64xf32>
    %261 = tpu.matmul %252, %8, %cst_40 {dimension_numbers = #tpu.dot_dimension_numbers<[1], [0], [0], [1], [0, 0, 1, 1], [], []>} : vector<2x16xf32>, vector<16x64xf32>, vector<2x64xf32> -> vector<2x64xf32>
    %262 = arith.addf %260, %261 : vector<2x64xf32>
    %263 = arith.negf %259 : vector<2x64xf32>
    %264 = math.exp %263 : vector<2x64xf32>
    %cst_41 = arith.constant 1.000000e+00 : f32
    %265 = vector.broadcast %cst_41 : f32 to vector<2x64xf32>
    %266 = arith.addf %265, %264 : vector<2x64xf32>
    %267 = arith.divf %265, %266 : vector<2x64xf32>
    %268 = vector.extract_strided_slice %259 {offsets = [0, 32], sizes = [2, 16], strides = [1, 1]} : vector<2x64xf32> to vector<2x16xf32>
    %269 = math.tanh %268 : vector<2x16xf32>
    %270 = vector.extract_strided_slice %267 {offsets = [0, 16], sizes = [2, 16], strides = [1, 1]} : vector<2x64xf32> to vector<2x16xf32>
    %271 = arith.mulf %270, %234 : vector<2x16xf32>
    %272 = vector.extract_strided_slice %267 {offsets = [0, 0], sizes = [2, 16], strides = [1, 1]} : vector<2x64xf32> to vector<2x16xf32>
    %273 = arith.mulf %272, %269 : vector<2x16xf32>
    %274 = arith.addf %271, %273 : vector<2x16xf32>
    %275 = vector.extract_strided_slice %267 {offsets = [0, 48], sizes = [2, 16], strides = [1, 1]} : vector<2x64xf32> to vector<2x16xf32>
    %276 = math.tanh %274 : vector<2x16xf32>
    %277 = arith.mulf %275, %276 : vector<2x16xf32>
    %278 = arith.negf %262 : vector<2x64xf32>
    %279 = math.exp %278 : vector<2x64xf32>
    %cst_42 = arith.constant 1.000000e+00 : f32
    %280 = vector.broadcast %cst_42 : f32 to vector<2x64xf32>
    %281 = arith.addf %280, %279 : vector<2x64xf32>
    %282 = arith.divf %280, %281 : vector<2x64xf32>
    %283 = vector.extract_strided_slice %262 {offsets = [0, 32], sizes = [2, 16], strides = [1, 1]} : vector<2x64xf32> to vector<2x16xf32>
    %284 = math.tanh %283 : vector<2x16xf32>
    %285 = vector.extract_strided_slice %282 {offsets = [0, 16], sizes = [2, 16], strides = [1, 1]} : vector<2x64xf32> to vector<2x16xf32>
    %286 = arith.mulf %285, %249 : vector<2x16xf32>
    %287 = vector.extract_strided_slice %282 {offsets = [0, 0], sizes = [2, 16], strides = [1, 1]} : vector<2x64xf32> to vector<2x16xf32>
    %288 = arith.mulf %287, %284 : vector<2x16xf32>
    %289 = arith.addf %286, %288 : vector<2x16xf32>
    %290 = vector.extract_strided_slice %282 {offsets = [0, 48], sizes = [2, 16], strides = [1, 1]} : vector<2x64xf32> to vector<2x16xf32>
    %291 = math.tanh %289 : vector<2x16xf32>
    %292 = arith.mulf %290, %291 : vector<2x16xf32>
    %293 = arith.addf %253, %277 : vector<2x16xf32>
    %294 = arith.addf %254, %292 : vector<2x16xf32>
    %295 = arith.maximumf %255, %277 : vector<2x16xf32>
    %296 = arith.maximumf %256, %292 : vector<2x16xf32>
    %297 = vector.extract_strided_slice %5 {offsets = [14, 0], sizes = [2, 64], strides = [1, 1]} : vector<16x128xf32> to vector<2x64xf32>
    %cst_43 = arith.constant dense<0.000000e+00> : vector<2x64xf32>
    %298 = tpu.matmul %277, %7, %cst_43 {dimension_numbers = #tpu.dot_dimension_numbers<[1], [0], [0], [1], [0, 0, 1, 1], [], []>} : vector<2x16xf32>, vector<16x64xf32>, vector<2x64xf32> -> vector<2x64xf32>
    %299 = arith.addf %297, %298 : vector<2x64xf32>
    %300 = vector.extract_strided_slice %5 {offsets = [0, 64], sizes = [2, 64], strides = [1, 1]} : vector<16x128xf32> to vector<2x64xf32>
    %cst_44 = arith.constant dense<0.000000e+00> : vector<2x64xf32>
    %301 = tpu.matmul %292, %8, %cst_44 {dimension_numbers = #tpu.dot_dimension_numbers<[1], [0], [0], [1], [0, 0, 1, 1], [], []>} : vector<2x16xf32>, vector<16x64xf32>, vector<2x64xf32> -> vector<2x64xf32>
    %302 = arith.addf %300, %301 : vector<2x64xf32>
    %303 = arith.negf %299 : vector<2x64xf32>
    %304 = math.exp %303 : vector<2x64xf32>
    %cst_45 = arith.constant 1.000000e+00 : f32
    %305 = vector.broadcast %cst_45 : f32 to vector<2x64xf32>
    %306 = arith.addf %305, %304 : vector<2x64xf32>
    %307 = arith.divf %305, %306 : vector<2x64xf32>
    %308 = vector.extract_strided_slice %299 {offsets = [0, 32], sizes = [2, 16], strides = [1, 1]} : vector<2x64xf32> to vector<2x16xf32>
    %309 = math.tanh %308 : vector<2x16xf32>
    %310 = vector.extract_strided_slice %307 {offsets = [0, 16], sizes = [2, 16], strides = [1, 1]} : vector<2x64xf32> to vector<2x16xf32>
    %311 = arith.mulf %310, %274 : vector<2x16xf32>
    %312 = vector.extract_strided_slice %307 {offsets = [0, 0], sizes = [2, 16], strides = [1, 1]} : vector<2x64xf32> to vector<2x16xf32>
    %313 = arith.mulf %312, %309 : vector<2x16xf32>
    %314 = arith.addf %311, %313 : vector<2x16xf32>
    %315 = vector.extract_strided_slice %307 {offsets = [0, 48], sizes = [2, 16], strides = [1, 1]} : vector<2x64xf32> to vector<2x16xf32>
    %316 = math.tanh %314 : vector<2x16xf32>
    %317 = arith.mulf %315, %316 : vector<2x16xf32>
    %318 = arith.negf %302 : vector<2x64xf32>
    %319 = math.exp %318 : vector<2x64xf32>
    %cst_46 = arith.constant 1.000000e+00 : f32
    %320 = vector.broadcast %cst_46 : f32 to vector<2x64xf32>
    %321 = arith.addf %320, %319 : vector<2x64xf32>
    %322 = arith.divf %320, %321 : vector<2x64xf32>
    %323 = vector.extract_strided_slice %302 {offsets = [0, 32], sizes = [2, 16], strides = [1, 1]} : vector<2x64xf32> to vector<2x16xf32>
    %324 = math.tanh %323 : vector<2x16xf32>
    %325 = vector.extract_strided_slice %322 {offsets = [0, 16], sizes = [2, 16], strides = [1, 1]} : vector<2x64xf32> to vector<2x16xf32>
    %326 = arith.mulf %325, %289 : vector<2x16xf32>
    %327 = vector.extract_strided_slice %322 {offsets = [0, 0], sizes = [2, 16], strides = [1, 1]} : vector<2x64xf32> to vector<2x16xf32>
    %328 = arith.mulf %327, %324 : vector<2x16xf32>
    %329 = arith.addf %326, %328 : vector<2x16xf32>
    %330 = vector.extract_strided_slice %322 {offsets = [0, 48], sizes = [2, 16], strides = [1, 1]} : vector<2x64xf32> to vector<2x16xf32>
    %331 = math.tanh %329 : vector<2x16xf32>
    %332 = arith.mulf %330, %331 : vector<2x16xf32>
    %333 = arith.addf %293, %317 : vector<2x16xf32>
    %334 = arith.addf %294, %332 : vector<2x16xf32>
    %335 = arith.maximumf %295, %317 : vector<2x16xf32>
    %336 = arith.maximumf %296, %332 : vector<2x16xf32>
    %cst_47 = arith.constant 1.562500e-02 : f32
    %337 = vector.broadcast %cst_47 : f32 to vector<2x16xf32>
    %338 = arith.mulf %333, %337 : vector<2x16xf32>
    %c0_48 = arith.constant 0 : index
    %c0_49 = arith.constant 0 : index
    %339 = vector.load %arg4[%c0_48, %c0_49] : memref<2x64xf32, #tpu.memory_space<vmem>>, vector<2x16xf32>
    tpu.vector_store %arg4[%c0_48, %c0_49], %338 {strides = array<i32>} : memref<2x64xf32, #tpu.memory_space<vmem>>, vector<2x16xf32>,
    %cst_50 = arith.constant 1.562500e-02 : f32
    %340 = vector.broadcast %cst_50 : f32 to vector<2x16xf32>
    %341 = arith.mulf %334, %340 : vector<2x16xf32>
    %c0_51 = arith.constant 0 : index
    %c16 = arith.constant 16 : index
    %342 = vector.load %arg4[%c0_51, %c16] : memref<2x64xf32, #tpu.memory_space<vmem>>, vector<2x16xf32>
    tpu.vector_store %arg4[%c0_51, %c16], %341 {strides = array<i32>} : memref<2x64xf32, #tpu.memory_space<vmem>>, vector<2x16xf32>,
    %c0_52 = arith.constant 0 : index
    %c32 = arith.constant 32 : index
    %343 = vector.load %arg4[%c0_52, %c32] : memref<2x64xf32, #tpu.memory_space<vmem>>, vector<2x16xf32>
    tpu.vector_store %arg4[%c0_52, %c32], %335 {strides = array<i32>} : memref<2x64xf32, #tpu.memory_space<vmem>>, vector<2x16xf32>,
    %c0_53 = arith.constant 0 : index
    %c48 = arith.constant 48 : index
    %344 = vector.load %arg4[%c0_53, %c48] : memref<2x64xf32, #tpu.memory_space<vmem>>, vector<2x16xf32>
    tpu.vector_store %arg4[%c0_53, %c48], %336 {strides = array<i32>} : memref<2x64xf32, #tpu.memory_space<vmem>>, vector<2x16xf32>,
    return
  }
}

module attributes {stable_mosaic.version = 11 : i64} {
  func.func @_esim_proj_kernel(%arg0: memref<12x32xf32, #tpu.memory_space<vmem>>, %arg1: memref<12x32xf32, #tpu.memory_space<vmem>>, %arg2: memref<32x32xf32, #tpu.memory_space<vmem>>, %arg3: memref<32x32xf32, #tpu.memory_space<vmem>>, %arg4: memref<32x32xf32, #tpu.memory_space<vmem>>, %arg5: memref<1x32xf32, #tpu.memory_space<vmem>>, %arg6: memref<12x32xf32, #tpu.memory_space<vmem>>) attributes {dimension_semantics = [], scalar_prefetch = 0 : i64, scratch_operands = 0 : i64, tpu.core_type = #tpu.core_type<tc>} {
    %c0 = arith.constant 0 : index
    %c0_0 = arith.constant 0 : index
    %0 = vector.load %arg0[%c0, %c0_0] : memref<12x32xf32, #tpu.memory_space<vmem>>, vector<12x32xf32>
    %c0_1 = arith.constant 0 : index
    %c0_2 = arith.constant 0 : index
    %1 = vector.load %arg1[%c0_1, %c0_2] : memref<12x32xf32, #tpu.memory_space<vmem>>, vector<12x32xf32>
    %c0_3 = arith.constant 0 : index
    %c0_4 = arith.constant 0 : index
    %2 = vector.load %arg2[%c0_3, %c0_4] : memref<32x32xf32, #tpu.memory_space<vmem>>, vector<32x32xf32>
    %cst = arith.constant dense<0.000000e+00> : vector<12x32xf32>
    %3 = tpu.matmul %0, %2, %cst {dimension_numbers = #tpu.dot_dimension_numbers<[1], [0], [0], [1], [0, 0, 1, 1], [], []>} : vector<12x32xf32>, vector<32x32xf32>, vector<12x32xf32> -> vector<12x32xf32>
    %c0_5 = arith.constant 0 : index
    %c0_6 = arith.constant 0 : index
    %4 = vector.load %arg3[%c0_5, %c0_6] : memref<32x32xf32, #tpu.memory_space<vmem>>, vector<32x32xf32>
    %cst_7 = arith.constant dense<0.000000e+00> : vector<12x32xf32>
    %5 = tpu.matmul %1, %4, %cst_7 {dimension_numbers = #tpu.dot_dimension_numbers<[1], [0], [0], [1], [0, 0, 1, 1], [], []>} : vector<12x32xf32>, vector<32x32xf32>, vector<12x32xf32> -> vector<12x32xf32>
    %6 = arith.addf %3, %5 : vector<12x32xf32>
    %7 = arith.mulf %0, %1 : vector<12x32xf32>
    %c0_8 = arith.constant 0 : index
    %c0_9 = arith.constant 0 : index
    %8 = vector.load %arg4[%c0_8, %c0_9] : memref<32x32xf32, #tpu.memory_space<vmem>>, vector<32x32xf32>
    %cst_10 = arith.constant dense<0.000000e+00> : vector<12x32xf32>
    %9 = tpu.matmul %7, %8, %cst_10 {dimension_numbers = #tpu.dot_dimension_numbers<[1], [0], [0], [1], [0, 0, 1, 1], [], []>} : vector<12x32xf32>, vector<32x32xf32>, vector<12x32xf32> -> vector<12x32xf32>
    %10 = arith.addf %6, %9 : vector<12x32xf32>
    %c0_11 = arith.constant 0 : index
    %c0_12 = arith.constant 0 : index
    %11 = vector.load %arg5[%c0_11, %c0_12] : memref<1x32xf32, #tpu.memory_space<vmem>>, vector<1x32xf32>
    %12 = vector.broadcast %11 : vector<1x32xf32> to vector<12x32xf32>
    %13 = arith.addf %10, %12 : vector<12x32xf32>
    %cst_13 = arith.constant 0.000000e+00 : f32
    %14 = vector.broadcast %cst_13 : f32 to vector<12x32xf32>
    %15 = arith.maximumf %13, %14 : vector<12x32xf32>
    %c0_14 = arith.constant 0 : index
    %c0_15 = arith.constant 0 : index
    %16 = vector.load %arg6[%c0_14, %c0_15] : memref<12x32xf32, #tpu.memory_space<vmem>>, vector<12x32xf32>
    tpu.vector_store %arg6[%c0_14, %c0_15], %15 {strides = array<i32>} : memref<12x32xf32, #tpu.memory_space<vmem>>, vector<12x32xf32>,
    return
  }
}

module attributes {stable_mosaic.version = 11 : i64} {
  func.func @_bilstm_kernel(%arg0: memref<12x32xf32, #tpu.memory_space<vmem>>, %arg1: memref<32x128xf32, #tpu.memory_space<vmem>>, %arg2: memref<16x128xf32, #tpu.memory_space<vmem>>, %arg3: memref<1x128xf32, #tpu.memory_space<vmem>>, %arg4: memref<2x64xf32, #tpu.memory_space<vmem>>) attributes {dimension_semantics = [], scalar_prefetch = 0 : i64, scratch_operands = 0 : i64, tpu.core_type = #tpu.core_type<tc>} {
    %c0 = arith.constant 0 : index
    %c0_0 = arith.constant 0 : index
    %0 = vector.load %arg0[%c0, %c0_0] : memref<12x32xf32, #tpu.memory_space<vmem>>, vector<12x32xf32>
    %c0_1 = arith.constant 0 : index
    %c0_2 = arith.constant 0 : index
    %1 = vector.load %arg1[%c0_1, %c0_2] : memref<32x128xf32, #tpu.memory_space<vmem>>, vector<32x128xf32>
    %cst = arith.constant dense<0.000000e+00> : vector<12x128xf32>
    %2 = tpu.matmul %0, %1, %cst {dimension_numbers = #tpu.dot_dimension_numbers<[1], [0], [0], [1], [0, 0, 1, 1], [], []>} : vector<12x32xf32>, vector<32x128xf32>, vector<12x128xf32> -> vector<12x128xf32>
    %c0_3 = arith.constant 0 : index
    %c0_4 = arith.constant 0 : index
    %3 = vector.load %arg3[%c0_3, %c0_4] : memref<1x128xf32, #tpu.memory_space<vmem>>, vector<1x128xf32>
    %4 = vector.broadcast %3 : vector<1x128xf32> to vector<12x128xf32>
    %5 = arith.addf %2, %4 : vector<12x128xf32>
    %c0_5 = arith.constant 0 : index
    %c0_6 = arith.constant 0 : index
    %6 = vector.load %arg2[%c0_5, %c0_6] : memref<16x128xf32, #tpu.memory_space<vmem>>, vector<16x128xf32>
    %7 = vector.extract_strided_slice %6 {offsets = [0, 0], sizes = [16, 64], strides = [1, 1]} : vector<16x128xf32> to vector<16x64xf32>
    %8 = vector.extract_strided_slice %6 {offsets = [0, 64], sizes = [16, 64], strides = [1, 1]} : vector<16x128xf32> to vector<16x64xf32>
    %cst_7 = arith.constant 0.000000e+00 : f32
    %9 = vector.broadcast %cst_7 : f32 to vector<2x16xf32>
    %cst_8 = arith.constant 0.000000e+00 : f32
    %10 = vector.broadcast %cst_8 : f32 to vector<2x16xf32>
    %cst_9 = arith.constant 0.000000e+00 : f32
    %11 = vector.broadcast %cst_9 : f32 to vector<2x16xf32>
    %cst_10 = arith.constant 0.000000e+00 : f32
    %12 = vector.broadcast %cst_10 : f32 to vector<2x16xf32>
    %cst_11 = arith.constant 0.000000e+00 : f32
    %13 = vector.broadcast %cst_11 : f32 to vector<2x16xf32>
    %cst_12 = arith.constant 0.000000e+00 : f32
    %14 = vector.broadcast %cst_12 : f32 to vector<2x16xf32>
    %cst_13 = arith.constant 0xFF800000 : f32
    %15 = vector.broadcast %cst_13 : f32 to vector<2x16xf32>
    %cst_14 = arith.constant 0xFF800000 : f32
    %16 = vector.broadcast %cst_14 : f32 to vector<2x16xf32>
    %17 = vector.extract_strided_slice %5 {offsets = [0, 0], sizes = [2, 64], strides = [1, 1]} : vector<12x128xf32> to vector<2x64xf32>
    %cst_15 = arith.constant dense<0.000000e+00> : vector<2x64xf32>
    %18 = tpu.matmul %9, %7, %cst_15 {dimension_numbers = #tpu.dot_dimension_numbers<[1], [0], [0], [1], [0, 0, 1, 1], [], []>} : vector<2x16xf32>, vector<16x64xf32>, vector<2x64xf32> -> vector<2x64xf32>
    %19 = arith.addf %17, %18 : vector<2x64xf32>
    %20 = vector.extract_strided_slice %5 {offsets = [10, 64], sizes = [2, 64], strides = [1, 1]} : vector<12x128xf32> to vector<2x64xf32>
    %cst_16 = arith.constant dense<0.000000e+00> : vector<2x64xf32>
    %21 = tpu.matmul %10, %8, %cst_16 {dimension_numbers = #tpu.dot_dimension_numbers<[1], [0], [0], [1], [0, 0, 1, 1], [], []>} : vector<2x16xf32>, vector<16x64xf32>, vector<2x64xf32> -> vector<2x64xf32>
    %22 = arith.addf %20, %21 : vector<2x64xf32>
    %23 = arith.negf %19 : vector<2x64xf32>
    %24 = math.exp %23 : vector<2x64xf32>
    %cst_17 = arith.constant 1.000000e+00 : f32
    %25 = vector.broadcast %cst_17 : f32 to vector<2x64xf32>
    %26 = arith.addf %25, %24 : vector<2x64xf32>
    %27 = arith.divf %25, %26 : vector<2x64xf32>
    %28 = vector.extract_strided_slice %19 {offsets = [0, 32], sizes = [2, 16], strides = [1, 1]} : vector<2x64xf32> to vector<2x16xf32>
    %29 = math.tanh %28 : vector<2x16xf32>
    %30 = vector.extract_strided_slice %27 {offsets = [0, 16], sizes = [2, 16], strides = [1, 1]} : vector<2x64xf32> to vector<2x16xf32>
    %31 = arith.mulf %30, %11 : vector<2x16xf32>
    %32 = vector.extract_strided_slice %27 {offsets = [0, 0], sizes = [2, 16], strides = [1, 1]} : vector<2x64xf32> to vector<2x16xf32>
    %33 = arith.mulf %32, %29 : vector<2x16xf32>
    %34 = arith.addf %31, %33 : vector<2x16xf32>
    %35 = vector.extract_strided_slice %27 {offsets = [0, 48], sizes = [2, 16], strides = [1, 1]} : vector<2x64xf32> to vector<2x16xf32>
    %36 = math.tanh %34 : vector<2x16xf32>
    %37 = arith.mulf %35, %36 : vector<2x16xf32>
    %38 = arith.negf %22 : vector<2x64xf32>
    %39 = math.exp %38 : vector<2x64xf32>
    %cst_18 = arith.constant 1.000000e+00 : f32
    %40 = vector.broadcast %cst_18 : f32 to vector<2x64xf32>
    %41 = arith.addf %40, %39 : vector<2x64xf32>
    %42 = arith.divf %40, %41 : vector<2x64xf32>
    %43 = vector.extract_strided_slice %22 {offsets = [0, 32], sizes = [2, 16], strides = [1, 1]} : vector<2x64xf32> to vector<2x16xf32>
    %44 = math.tanh %43 : vector<2x16xf32>
    %45 = vector.extract_strided_slice %42 {offsets = [0, 16], sizes = [2, 16], strides = [1, 1]} : vector<2x64xf32> to vector<2x16xf32>
    %46 = arith.mulf %45, %12 : vector<2x16xf32>
    %47 = vector.extract_strided_slice %42 {offsets = [0, 0], sizes = [2, 16], strides = [1, 1]} : vector<2x64xf32> to vector<2x16xf32>
    %48 = arith.mulf %47, %44 : vector<2x16xf32>
    %49 = arith.addf %46, %48 : vector<2x16xf32>
    %50 = vector.extract_strided_slice %42 {offsets = [0, 48], sizes = [2, 16], strides = [1, 1]} : vector<2x64xf32> to vector<2x16xf32>
    %51 = math.tanh %49 : vector<2x16xf32>
    %52 = arith.mulf %50, %51 : vector<2x16xf32>
    %53 = arith.addf %13, %37 : vector<2x16xf32>
    %54 = arith.addf %14, %52 : vector<2x16xf32>
    %55 = arith.maximumf %15, %37 : vector<2x16xf32>
    %56 = arith.maximumf %16, %52 : vector<2x16xf32>
    %57 = vector.extract_strided_slice %5 {offsets = [2, 0], sizes = [2, 64], strides = [1, 1]} : vector<12x128xf32> to vector<2x64xf32>
    %cst_19 = arith.constant dense<0.000000e+00> : vector<2x64xf32>
    %58 = tpu.matmul %37, %7, %cst_19 {dimension_numbers = #tpu.dot_dimension_numbers<[1], [0], [0], [1], [0, 0, 1, 1], [], []>} : vector<2x16xf32>, vector<16x64xf32>, vector<2x64xf32> -> vector<2x64xf32>
    %59 = arith.addf %57, %58 : vector<2x64xf32>
    %60 = vector.extract_strided_slice %5 {offsets = [8, 64], sizes = [2, 64], strides = [1, 1]} : vector<12x128xf32> to vector<2x64xf32>
    %cst_20 = arith.constant dense<0.000000e+00> : vector<2x64xf32>
    %61 = tpu.matmul %52, %8, %cst_20 {dimension_numbers = #tpu.dot_dimension_numbers<[1], [0], [0], [1], [0, 0, 1, 1], [], []>} : vector<2x16xf32>, vector<16x64xf32>, vector<2x64xf32> -> vector<2x64xf32>
    %62 = arith.addf %60, %61 : vector<2x64xf32>
    %63 = arith.negf %59 : vector<2x64xf32>
    %64 = math.exp %63 : vector<2x64xf32>
    %cst_21 = arith.constant 1.000000e+00 : f32
    %65 = vector.broadcast %cst_21 : f32 to vector<2x64xf32>
    %66 = arith.addf %65, %64 : vector<2x64xf32>
    %67 = arith.divf %65, %66 : vector<2x64xf32>
    %68 = vector.extract_strided_slice %59 {offsets = [0, 32], sizes = [2, 16], strides = [1, 1]} : vector<2x64xf32> to vector<2x16xf32>
    %69 = math.tanh %68 : vector<2x16xf32>
    %70 = vector.extract_strided_slice %67 {offsets = [0, 16], sizes = [2, 16], strides = [1, 1]} : vector<2x64xf32> to vector<2x16xf32>
    %71 = arith.mulf %70, %34 : vector<2x16xf32>
    %72 = vector.extract_strided_slice %67 {offsets = [0, 0], sizes = [2, 16], strides = [1, 1]} : vector<2x64xf32> to vector<2x16xf32>
    %73 = arith.mulf %72, %69 : vector<2x16xf32>
    %74 = arith.addf %71, %73 : vector<2x16xf32>
    %75 = vector.extract_strided_slice %67 {offsets = [0, 48], sizes = [2, 16], strides = [1, 1]} : vector<2x64xf32> to vector<2x16xf32>
    %76 = math.tanh %74 : vector<2x16xf32>
    %77 = arith.mulf %75, %76 : vector<2x16xf32>
    %78 = arith.negf %62 : vector<2x64xf32>
    %79 = math.exp %78 : vector<2x64xf32>
    %cst_22 = arith.constant 1.000000e+00 : f32
    %80 = vector.broadcast %cst_22 : f32 to vector<2x64xf32>
    %81 = arith.addf %80, %79 : vector<2x64xf32>
    %82 = arith.divf %80, %81 : vector<2x64xf32>
    %83 = vector.extract_strided_slice %62 {offsets = [0, 32], sizes = [2, 16], strides = [1, 1]} : vector<2x64xf32> to vector<2x16xf32>
    %84 = math.tanh %83 : vector<2x16xf32>
    %85 = vector.extract_strided_slice %82 {offsets = [0, 16], sizes = [2, 16], strides = [1, 1]} : vector<2x64xf32> to vector<2x16xf32>
    %86 = arith.mulf %85, %49 : vector<2x16xf32>
    %87 = vector.extract_strided_slice %82 {offsets = [0, 0], sizes = [2, 16], strides = [1, 1]} : vector<2x64xf32> to vector<2x16xf32>
    %88 = arith.mulf %87, %84 : vector<2x16xf32>
    %89 = arith.addf %86, %88 : vector<2x16xf32>
    %90 = vector.extract_strided_slice %82 {offsets = [0, 48], sizes = [2, 16], strides = [1, 1]} : vector<2x64xf32> to vector<2x16xf32>
    %91 = math.tanh %89 : vector<2x16xf32>
    %92 = arith.mulf %90, %91 : vector<2x16xf32>
    %93 = arith.addf %53, %77 : vector<2x16xf32>
    %94 = arith.addf %54, %92 : vector<2x16xf32>
    %95 = arith.maximumf %55, %77 : vector<2x16xf32>
    %96 = arith.maximumf %56, %92 : vector<2x16xf32>
    %97 = vector.extract_strided_slice %5 {offsets = [4, 0], sizes = [2, 64], strides = [1, 1]} : vector<12x128xf32> to vector<2x64xf32>
    %cst_23 = arith.constant dense<0.000000e+00> : vector<2x64xf32>
    %98 = tpu.matmul %77, %7, %cst_23 {dimension_numbers = #tpu.dot_dimension_numbers<[1], [0], [0], [1], [0, 0, 1, 1], [], []>} : vector<2x16xf32>, vector<16x64xf32>, vector<2x64xf32> -> vector<2x64xf32>
    %99 = arith.addf %97, %98 : vector<2x64xf32>
    %100 = vector.extract_strided_slice %5 {offsets = [6, 64], sizes = [2, 64], strides = [1, 1]} : vector<12x128xf32> to vector<2x64xf32>
    %cst_24 = arith.constant dense<0.000000e+00> : vector<2x64xf32>
    %101 = tpu.matmul %92, %8, %cst_24 {dimension_numbers = #tpu.dot_dimension_numbers<[1], [0], [0], [1], [0, 0, 1, 1], [], []>} : vector<2x16xf32>, vector<16x64xf32>, vector<2x64xf32> -> vector<2x64xf32>
    %102 = arith.addf %100, %101 : vector<2x64xf32>
    %103 = arith.negf %99 : vector<2x64xf32>
    %104 = math.exp %103 : vector<2x64xf32>
    %cst_25 = arith.constant 1.000000e+00 : f32
    %105 = vector.broadcast %cst_25 : f32 to vector<2x64xf32>
    %106 = arith.addf %105, %104 : vector<2x64xf32>
    %107 = arith.divf %105, %106 : vector<2x64xf32>
    %108 = vector.extract_strided_slice %99 {offsets = [0, 32], sizes = [2, 16], strides = [1, 1]} : vector<2x64xf32> to vector<2x16xf32>
    %109 = math.tanh %108 : vector<2x16xf32>
    %110 = vector.extract_strided_slice %107 {offsets = [0, 16], sizes = [2, 16], strides = [1, 1]} : vector<2x64xf32> to vector<2x16xf32>
    %111 = arith.mulf %110, %74 : vector<2x16xf32>
    %112 = vector.extract_strided_slice %107 {offsets = [0, 0], sizes = [2, 16], strides = [1, 1]} : vector<2x64xf32> to vector<2x16xf32>
    %113 = arith.mulf %112, %109 : vector<2x16xf32>
    %114 = arith.addf %111, %113 : vector<2x16xf32>
    %115 = vector.extract_strided_slice %107 {offsets = [0, 48], sizes = [2, 16], strides = [1, 1]} : vector<2x64xf32> to vector<2x16xf32>
    %116 = math.tanh %114 : vector<2x16xf32>
    %117 = arith.mulf %115, %116 : vector<2x16xf32>
    %118 = arith.negf %102 : vector<2x64xf32>
    %119 = math.exp %118 : vector<2x64xf32>
    %cst_26 = arith.constant 1.000000e+00 : f32
    %120 = vector.broadcast %cst_26 : f32 to vector<2x64xf32>
    %121 = arith.addf %120, %119 : vector<2x64xf32>
    %122 = arith.divf %120, %121 : vector<2x64xf32>
    %123 = vector.extract_strided_slice %102 {offsets = [0, 32], sizes = [2, 16], strides = [1, 1]} : vector<2x64xf32> to vector<2x16xf32>
    %124 = math.tanh %123 : vector<2x16xf32>
    %125 = vector.extract_strided_slice %122 {offsets = [0, 16], sizes = [2, 16], strides = [1, 1]} : vector<2x64xf32> to vector<2x16xf32>
    %126 = arith.mulf %125, %89 : vector<2x16xf32>
    %127 = vector.extract_strided_slice %122 {offsets = [0, 0], sizes = [2, 16], strides = [1, 1]} : vector<2x64xf32> to vector<2x16xf32>
    %128 = arith.mulf %127, %124 : vector<2x16xf32>
    %129 = arith.addf %126, %128 : vector<2x16xf32>
    %130 = vector.extract_strided_slice %122 {offsets = [0, 48], sizes = [2, 16], strides = [1, 1]} : vector<2x64xf32> to vector<2x16xf32>
    %131 = math.tanh %129 : vector<2x16xf32>
    %132 = arith.mulf %130, %131 : vector<2x16xf32>
    %133 = arith.addf %93, %117 : vector<2x16xf32>
    %134 = arith.addf %94, %132 : vector<2x16xf32>
    %135 = arith.maximumf %95, %117 : vector<2x16xf32>
    %136 = arith.maximumf %96, %132 : vector<2x16xf32>
    %137 = vector.extract_strided_slice %5 {offsets = [6, 0], sizes = [2, 64], strides = [1, 1]} : vector<12x128xf32> to vector<2x64xf32>
    %cst_27 = arith.constant dense<0.000000e+00> : vector<2x64xf32>
    %138 = tpu.matmul %117, %7, %cst_27 {dimension_numbers = #tpu.dot_dimension_numbers<[1], [0], [0], [1], [0, 0, 1, 1], [], []>} : vector<2x16xf32>, vector<16x64xf32>, vector<2x64xf32> -> vector<2x64xf32>
    %139 = arith.addf %137, %138 : vector<2x64xf32>
    %140 = vector.extract_strided_slice %5 {offsets = [4, 64], sizes = [2, 64], strides = [1, 1]} : vector<12x128xf32> to vector<2x64xf32>
    %cst_28 = arith.constant dense<0.000000e+00> : vector<2x64xf32>
    %141 = tpu.matmul %132, %8, %cst_28 {dimension_numbers = #tpu.dot_dimension_numbers<[1], [0], [0], [1], [0, 0, 1, 1], [], []>} : vector<2x16xf32>, vector<16x64xf32>, vector<2x64xf32> -> vector<2x64xf32>
    %142 = arith.addf %140, %141 : vector<2x64xf32>
    %143 = arith.negf %139 : vector<2x64xf32>
    %144 = math.exp %143 : vector<2x64xf32>
    %cst_29 = arith.constant 1.000000e+00 : f32
    %145 = vector.broadcast %cst_29 : f32 to vector<2x64xf32>
    %146 = arith.addf %145, %144 : vector<2x64xf32>
    %147 = arith.divf %145, %146 : vector<2x64xf32>
    %148 = vector.extract_strided_slice %139 {offsets = [0, 32], sizes = [2, 16], strides = [1, 1]} : vector<2x64xf32> to vector<2x16xf32>
    %149 = math.tanh %148 : vector<2x16xf32>
    %150 = vector.extract_strided_slice %147 {offsets = [0, 16], sizes = [2, 16], strides = [1, 1]} : vector<2x64xf32> to vector<2x16xf32>
    %151 = arith.mulf %150, %114 : vector<2x16xf32>
    %152 = vector.extract_strided_slice %147 {offsets = [0, 0], sizes = [2, 16], strides = [1, 1]} : vector<2x64xf32> to vector<2x16xf32>
    %153 = arith.mulf %152, %149 : vector<2x16xf32>
    %154 = arith.addf %151, %153 : vector<2x16xf32>
    %155 = vector.extract_strided_slice %147 {offsets = [0, 48], sizes = [2, 16], strides = [1, 1]} : vector<2x64xf32> to vector<2x16xf32>
    %156 = math.tanh %154 : vector<2x16xf32>
    %157 = arith.mulf %155, %156 : vector<2x16xf32>
    %158 = arith.negf %142 : vector<2x64xf32>
    %159 = math.exp %158 : vector<2x64xf32>
    %cst_30 = arith.constant 1.000000e+00 : f32
    %160 = vector.broadcast %cst_30 : f32 to vector<2x64xf32>
    %161 = arith.addf %160, %159 : vector<2x64xf32>
    %162 = arith.divf %160, %161 : vector<2x64xf32>
    %163 = vector.extract_strided_slice %142 {offsets = [0, 32], sizes = [2, 16], strides = [1, 1]} : vector<2x64xf32> to vector<2x16xf32>
    %164 = math.tanh %163 : vector<2x16xf32>
    %165 = vector.extract_strided_slice %162 {offsets = [0, 16], sizes = [2, 16], strides = [1, 1]} : vector<2x64xf32> to vector<2x16xf32>
    %166 = arith.mulf %165, %129 : vector<2x16xf32>
    %167 = vector.extract_strided_slice %162 {offsets = [0, 0], sizes = [2, 16], strides = [1, 1]} : vector<2x64xf32> to vector<2x16xf32>
    %168 = arith.mulf %167, %164 : vector<2x16xf32>
    %169 = arith.addf %166, %168 : vector<2x16xf32>
    %170 = vector.extract_strided_slice %162 {offsets = [0, 48], sizes = [2, 16], strides = [1, 1]} : vector<2x64xf32> to vector<2x16xf32>
    %171 = math.tanh %169 : vector<2x16xf32>
    %172 = arith.mulf %170, %171 : vector<2x16xf32>
    %173 = arith.addf %133, %157 : vector<2x16xf32>
    %174 = arith.addf %134, %172 : vector<2x16xf32>
    %175 = arith.maximumf %135, %157 : vector<2x16xf32>
    %176 = arith.maximumf %136, %172 : vector<2x16xf32>
    %177 = vector.extract_strided_slice %5 {offsets = [8, 0], sizes = [2, 64], strides = [1, 1]} : vector<12x128xf32> to vector<2x64xf32>
    %cst_31 = arith.constant dense<0.000000e+00> : vector<2x64xf32>
    %178 = tpu.matmul %157, %7, %cst_31 {dimension_numbers = #tpu.dot_dimension_numbers<[1], [0], [0], [1], [0, 0, 1, 1], [], []>} : vector<2x16xf32>, vector<16x64xf32>, vector<2x64xf32> -> vector<2x64xf32>
    %179 = arith.addf %177, %178 : vector<2x64xf32>
    %180 = vector.extract_strided_slice %5 {offsets = [2, 64], sizes = [2, 64], strides = [1, 1]} : vector<12x128xf32> to vector<2x64xf32>
    %cst_32 = arith.constant dense<0.000000e+00> : vector<2x64xf32>
    %181 = tpu.matmul %172, %8, %cst_32 {dimension_numbers = #tpu.dot_dimension_numbers<[1], [0], [0], [1], [0, 0, 1, 1], [], []>} : vector<2x16xf32>, vector<16x64xf32>, vector<2x64xf32> -> vector<2x64xf32>
    %182 = arith.addf %180, %181 : vector<2x64xf32>
    %183 = arith.negf %179 : vector<2x64xf32>
    %184 = math.exp %183 : vector<2x64xf32>
    %cst_33 = arith.constant 1.000000e+00 : f32
    %185 = vector.broadcast %cst_33 : f32 to vector<2x64xf32>
    %186 = arith.addf %185, %184 : vector<2x64xf32>
    %187 = arith.divf %185, %186 : vector<2x64xf32>
    %188 = vector.extract_strided_slice %179 {offsets = [0, 32], sizes = [2, 16], strides = [1, 1]} : vector<2x64xf32> to vector<2x16xf32>
    %189 = math.tanh %188 : vector<2x16xf32>
    %190 = vector.extract_strided_slice %187 {offsets = [0, 16], sizes = [2, 16], strides = [1, 1]} : vector<2x64xf32> to vector<2x16xf32>
    %191 = arith.mulf %190, %154 : vector<2x16xf32>
    %192 = vector.extract_strided_slice %187 {offsets = [0, 0], sizes = [2, 16], strides = [1, 1]} : vector<2x64xf32> to vector<2x16xf32>
    %193 = arith.mulf %192, %189 : vector<2x16xf32>
    %194 = arith.addf %191, %193 : vector<2x16xf32>
    %195 = vector.extract_strided_slice %187 {offsets = [0, 48], sizes = [2, 16], strides = [1, 1]} : vector<2x64xf32> to vector<2x16xf32>
    %196 = math.tanh %194 : vector<2x16xf32>
    %197 = arith.mulf %195, %196 : vector<2x16xf32>
    %198 = arith.negf %182 : vector<2x64xf32>
    %199 = math.exp %198 : vector<2x64xf32>
    %cst_34 = arith.constant 1.000000e+00 : f32
    %200 = vector.broadcast %cst_34 : f32 to vector<2x64xf32>
    %201 = arith.addf %200, %199 : vector<2x64xf32>
    %202 = arith.divf %200, %201 : vector<2x64xf32>
    %203 = vector.extract_strided_slice %182 {offsets = [0, 32], sizes = [2, 16], strides = [1, 1]} : vector<2x64xf32> to vector<2x16xf32>
    %204 = math.tanh %203 : vector<2x16xf32>
    %205 = vector.extract_strided_slice %202 {offsets = [0, 16], sizes = [2, 16], strides = [1, 1]} : vector<2x64xf32> to vector<2x16xf32>
    %206 = arith.mulf %205, %169 : vector<2x16xf32>
    %207 = vector.extract_strided_slice %202 {offsets = [0, 0], sizes = [2, 16], strides = [1, 1]} : vector<2x64xf32> to vector<2x16xf32>
    %208 = arith.mulf %207, %204 : vector<2x16xf32>
    %209 = arith.addf %206, %208 : vector<2x16xf32>
    %210 = vector.extract_strided_slice %202 {offsets = [0, 48], sizes = [2, 16], strides = [1, 1]} : vector<2x64xf32> to vector<2x16xf32>
    %211 = math.tanh %209 : vector<2x16xf32>
    %212 = arith.mulf %210, %211 : vector<2x16xf32>
    %213 = arith.addf %173, %197 : vector<2x16xf32>
    %214 = arith.addf %174, %212 : vector<2x16xf32>
    %215 = arith.maximumf %175, %197 : vector<2x16xf32>
    %216 = arith.maximumf %176, %212 : vector<2x16xf32>
    %217 = vector.extract_strided_slice %5 {offsets = [10, 0], sizes = [2, 64], strides = [1, 1]} : vector<12x128xf32> to vector<2x64xf32>
    %cst_35 = arith.constant dense<0.000000e+00> : vector<2x64xf32>
    %218 = tpu.matmul %197, %7, %cst_35 {dimension_numbers = #tpu.dot_dimension_numbers<[1], [0], [0], [1], [0, 0, 1, 1], [], []>} : vector<2x16xf32>, vector<16x64xf32>, vector<2x64xf32> -> vector<2x64xf32>
    %219 = arith.addf %217, %218 : vector<2x64xf32>
    %220 = vector.extract_strided_slice %5 {offsets = [0, 64], sizes = [2, 64], strides = [1, 1]} : vector<12x128xf32> to vector<2x64xf32>
    %cst_36 = arith.constant dense<0.000000e+00> : vector<2x64xf32>
    %221 = tpu.matmul %212, %8, %cst_36 {dimension_numbers = #tpu.dot_dimension_numbers<[1], [0], [0], [1], [0, 0, 1, 1], [], []>} : vector<2x16xf32>, vector<16x64xf32>, vector<2x64xf32> -> vector<2x64xf32>
    %222 = arith.addf %220, %221 : vector<2x64xf32>
    %223 = arith.negf %219 : vector<2x64xf32>
    %224 = math.exp %223 : vector<2x64xf32>
    %cst_37 = arith.constant 1.000000e+00 : f32
    %225 = vector.broadcast %cst_37 : f32 to vector<2x64xf32>
    %226 = arith.addf %225, %224 : vector<2x64xf32>
    %227 = arith.divf %225, %226 : vector<2x64xf32>
    %228 = vector.extract_strided_slice %219 {offsets = [0, 32], sizes = [2, 16], strides = [1, 1]} : vector<2x64xf32> to vector<2x16xf32>
    %229 = math.tanh %228 : vector<2x16xf32>
    %230 = vector.extract_strided_slice %227 {offsets = [0, 16], sizes = [2, 16], strides = [1, 1]} : vector<2x64xf32> to vector<2x16xf32>
    %231 = arith.mulf %230, %194 : vector<2x16xf32>
    %232 = vector.extract_strided_slice %227 {offsets = [0, 0], sizes = [2, 16], strides = [1, 1]} : vector<2x64xf32> to vector<2x16xf32>
    %233 = arith.mulf %232, %229 : vector<2x16xf32>
    %234 = arith.addf %231, %233 : vector<2x16xf32>
    %235 = vector.extract_strided_slice %227 {offsets = [0, 48], sizes = [2, 16], strides = [1, 1]} : vector<2x64xf32> to vector<2x16xf32>
    %236 = math.tanh %234 : vector<2x16xf32>
    %237 = arith.mulf %235, %236 : vector<2x16xf32>
    %238 = arith.negf %222 : vector<2x64xf32>
    %239 = math.exp %238 : vector<2x64xf32>
    %cst_38 = arith.constant 1.000000e+00 : f32
    %240 = vector.broadcast %cst_38 : f32 to vector<2x64xf32>
    %241 = arith.addf %240, %239 : vector<2x64xf32>
    %242 = arith.divf %240, %241 : vector<2x64xf32>
    %243 = vector.extract_strided_slice %222 {offsets = [0, 32], sizes = [2, 16], strides = [1, 1]} : vector<2x64xf32> to vector<2x16xf32>
    %244 = math.tanh %243 : vector<2x16xf32>
    %245 = vector.extract_strided_slice %242 {offsets = [0, 16], sizes = [2, 16], strides = [1, 1]} : vector<2x64xf32> to vector<2x16xf32>
    %246 = arith.mulf %245, %209 : vector<2x16xf32>
    %247 = vector.extract_strided_slice %242 {offsets = [0, 0], sizes = [2, 16], strides = [1, 1]} : vector<2x64xf32> to vector<2x16xf32>
    %248 = arith.mulf %247, %244 : vector<2x16xf32>
    %249 = arith.addf %246, %248 : vector<2x16xf32>
    %250 = vector.extract_strided_slice %242 {offsets = [0, 48], sizes = [2, 16], strides = [1, 1]} : vector<2x64xf32> to vector<2x16xf32>
    %251 = math.tanh %249 : vector<2x16xf32>
    %252 = arith.mulf %250, %251 : vector<2x16xf32>
    %253 = arith.addf %213, %237 : vector<2x16xf32>
    %254 = arith.addf %214, %252 : vector<2x16xf32>
    %255 = arith.maximumf %215, %237 : vector<2x16xf32>
    %256 = arith.maximumf %216, %252 : vector<2x16xf32>
    %cst_39 = arith.constant 0.027777778 : f32
    %257 = vector.broadcast %cst_39 : f32 to vector<2x16xf32>
    %258 = arith.mulf %253, %257 : vector<2x16xf32>
    %c0_40 = arith.constant 0 : index
    %c0_41 = arith.constant 0 : index
    %259 = vector.load %arg4[%c0_40, %c0_41] : memref<2x64xf32, #tpu.memory_space<vmem>>, vector<2x16xf32>
    tpu.vector_store %arg4[%c0_40, %c0_41], %258 {strides = array<i32>} : memref<2x64xf32, #tpu.memory_space<vmem>>, vector<2x16xf32>,
    %cst_42 = arith.constant 0.027777778 : f32
    %260 = vector.broadcast %cst_42 : f32 to vector<2x16xf32>
    %261 = arith.mulf %254, %260 : vector<2x16xf32>
    %c0_43 = arith.constant 0 : index
    %c16 = arith.constant 16 : index
    %262 = vector.load %arg4[%c0_43, %c16] : memref<2x64xf32, #tpu.memory_space<vmem>>, vector<2x16xf32>
    tpu.vector_store %arg4[%c0_43, %c16], %261 {strides = array<i32>} : memref<2x64xf32, #tpu.memory_space<vmem>>, vector<2x16xf32>,
    %c0_44 = arith.constant 0 : index
    %c32 = arith.constant 32 : index
    %263 = vector.load %arg4[%c0_44, %c32] : memref<2x64xf32, #tpu.memory_space<vmem>>, vector<2x16xf32>
    tpu.vector_store %arg4[%c0_44, %c32], %255 {strides = array<i32>} : memref<2x64xf32, #tpu.memory_space<vmem>>, vector<2x16xf32>,
    %c0_45 = arith.constant 0 : index
    %c48 = arith.constant 48 : index
    %264 = vector.load %arg4[%c0_45, %c48] : memref<2x64xf32, #tpu.memory_space<vmem>>, vector<2x16xf32>
    tpu.vector_store %arg4[%c0_45, %c48], %256 {strides = array<i32>} : memref<2x64xf32, #tpu.memory_space<vmem>>, vector<2x16xf32>,
    return
  }
}

module attributes {stable_mosaic.version = 11 : i64} {
  func.func @_pred_kernel(%arg0: memref<2x128xf32, #tpu.memory_space<vmem>>, %arg1: memref<128x32xf32, #tpu.memory_space<vmem>>, %arg2: memref<1x32xf32, #tpu.memory_space<vmem>>, %arg3: memref<32x3xf32, #tpu.memory_space<vmem>>, %arg4: memref<1x3xf32, #tpu.memory_space<vmem>>, %arg5: memref<2x3xf32, #tpu.memory_space<vmem>>) attributes {dimension_semantics = [], scalar_prefetch = 0 : i64, scratch_operands = 0 : i64, tpu.core_type = #tpu.core_type<tc>} {
    %c0 = arith.constant 0 : index
    %c0_0 = arith.constant 0 : index
    %0 = vector.load %arg0[%c0, %c0_0] : memref<2x128xf32, #tpu.memory_space<vmem>>, vector<2x128xf32>
    %c0_1 = arith.constant 0 : index
    %c0_2 = arith.constant 0 : index
    %1 = vector.load %arg1[%c0_1, %c0_2] : memref<128x32xf32, #tpu.memory_space<vmem>>, vector<128x32xf32>
    %cst = arith.constant dense<0.000000e+00> : vector<2x32xf32>
    %2 = tpu.matmul %0, %1, %cst {dimension_numbers = #tpu.dot_dimension_numbers<[1], [0], [0], [1], [0, 0, 1, 1], [], []>} : vector<2x128xf32>, vector<128x32xf32>, vector<2x32xf32> -> vector<2x32xf32>
    %c0_3 = arith.constant 0 : index
    %c0_4 = arith.constant 0 : index
    %3 = vector.load %arg2[%c0_3, %c0_4] : memref<1x32xf32, #tpu.memory_space<vmem>>, vector<1x32xf32>
    %4 = vector.broadcast %3 : vector<1x32xf32> to vector<2x32xf32>
    %5 = arith.addf %2, %4 : vector<2x32xf32>
    %6 = math.tanh %5 : vector<2x32xf32>
    %c0_5 = arith.constant 0 : index
    %c0_6 = arith.constant 0 : index
    %7 = vector.load %arg3[%c0_5, %c0_6] : memref<32x3xf32, #tpu.memory_space<vmem>>, vector<32x3xf32>
    %cst_7 = arith.constant dense<0.000000e+00> : vector<2x3xf32>
    %8 = tpu.matmul %6, %7, %cst_7 {dimension_numbers = #tpu.dot_dimension_numbers<[1], [0], [0], [1], [0, 0, 1, 1], [], []>} : vector<2x32xf32>, vector<32x3xf32>, vector<2x3xf32> -> vector<2x3xf32>
    %c0_8 = arith.constant 0 : index
    %c0_9 = arith.constant 0 : index
    %9 = vector.load %arg4[%c0_8, %c0_9] : memref<1x3xf32, #tpu.memory_space<vmem>>, vector<1x3xf32>
    %10 = vector.broadcast %9 : vector<1x3xf32> to vector<2x3xf32>
    %11 = arith.addf %8, %10 : vector<2x3xf32>
    %c0_10 = arith.constant 0 : index
    %c0_11 = arith.constant 0 : index
    %12 = vector.load %arg5[%c0_10, %c0_11] : memref<2x3xf32, #tpu.memory_space<vmem>>, vector<2x3xf32>
    tpu.vector_store %arg5[%c0_10, %c0_11], %11 {strides = array<i32>} : memref<2x3xf32, #tpu.memory_space<vmem>>, vector<2x3xf32>,
    return
  }
}

</mosaic_0001>

<bundles_post_ra>
// kernel: esim_forward.11
= control target key start
LH: loop header
LB: loop body
LE: loop exit
PB: predicated region body
PF: predicated region fallthrough
CT: control target
= control target key end

     0   :  { %vm35_vm0 = vcmask 261120   ;;  %s490_s2 = inlined_call_operand.vmem [shape: f32[32,32], index: 2, kind: input, shape index: {}]   ;;  %s491_s0 = inlined_call_operand.vmem [shape: f32[16,32], index: 0, kind: input, shape index: {}]   ;;  %s492_s3 = inlined_call_operand.vmem [shape: f32[32,32], index: 3, kind: input, shape index: {}]   ;;  %s493_s4 = inlined_call_operand.vmem [shape: f32[32,32], index: 4, kind: input, shape index: {}]   ;;  %s494_s1 = inlined_call_operand.vmem [shape: f32[16,32], index: 1, kind: input, shape index: {}]   ;;  %s495_s5 = inlined_call_operand.vmem [shape: f32[1,32], index: 5, kind: input, shape index: {}]   ;;  %s496_s6 = inlined_call_operand.vmem [shape: f32[16,32], index: 6, kind: output, shape index: {}]  }
   0x1   :  { %v27_v0 = vld [vmem:[%s490_s2] sm:$0xff]  ;;  %v28_v1 = vld [vmem:[%s490_s2 + $0x8] sm:$0xff]  ;;  %v29_v2 = vld [vmem:[%s490_s2 + $0x10] sm:$0xff] }
   0x2   :  { %v370_v3 = vpack.c.bf16 %v28_v1, %v27_v0  ;;  %v30_v4 = vld [vmem:[%s490_s2 + $0x18] sm:$0xff]  ;;  %v23_v5 = vld [vmem:[%s491_s0] sm:$0xff]  ;;  %v32_v8 = vld [vmem:[%s492_s3 + $0x8] sm:$0xff] }
   0x3   :  { %v374_v6 = vpack.c.bf16 %v30_v4, %v29_v2  ;;  %348 = vmatprep.mubr.msk.f32.mxu0 %vm35_vm0, %v23_v5  ;;  %v31_v7 = vld [vmem:[%s492_s3] sm:$0xff]  ;;  %v201_v11 = vld [vmem:[%s493_s4 + $0x8] sm:$0xff]  ;;  %v33_v12 = vld [vmem:[%s492_s3 + $0x10] sm:$0xff] }
   0x4   :  { %v200_v9 = vld [vmem:[%s493_s4] sm:$0xff]  ;;  %371 = vmatprep.subr.bf16.mxu0 %v370_v3  ;;  %v362_v10 = vpack.c.bf16 %v32_v8, %v31_v7  ;;  %v34_v13 = vld [vmem:[%s492_s3 + $0x18] sm:$0xff]  ;;  %v202_v17 = vld [vmem:[%s493_s4 + $0x10] sm:$0xff] }
   0x5   :  { %373 = vmatpush3.bf16.msra.mxu0 %v370_v3  ;;  %v366_v14 = vpack.c.bf16 %v34_v13, %v33_v12  ;;  %v25_v15 = vld [vmem:[%s494_s1] sm:$0xff]  ;;  %v378_v16 = vpack.c.bf16 %v201_v11, %v200_v9  ;;  %v203_v18 = vld [vmem:[%s493_s4 + $0x18] sm:$0xff]  ;;  %v24_v19 = vld [vmem:[%s491_s0 + $0x8] sm:$0xff] }
   0x6   :  { %375 = vmatprep.subr.bf16.mxu0 %v374_v6  ;;  %363 = vmatprep.subr.bf16.mxu1 %v362_v10  ;;  %v198_v20 = vmul.f32 %v25_v15, %v23_v5  ;;  %v382_v21 = vpack.c.bf16 %v203_v18, %v202_v17  ;;  %v26_v22 = vld [vmem:[%s494_s1 + $0x8] sm:$0xff]  ;;  %v310_v27 = vld [vmem:[%s495_s5] ss:$0 sm:$0xff] }
   0x7   :  { %365 = vmatpush3.bf16.msra.mxu1 %v362_v10  ;;  %337 = vmatprep.mubr.msk.f32.mxu1 %vm35_vm0, %v25_v15  ;;  %v199_v23 = vmul.f32 %v26_v22, %v24_v19 }
   0x8   :  { %367 = vmatprep.subr.bf16.mxu1 %v366_v14 }
   0x9   :  { %377 = vmatpush3.bf16.msra.mxu0 %v374_v6 }
   0xa   :  { %379 = vmatprep.subr.bf16.mxu0 %v378_v16 }
   0xb   :  { %369 = vmatpush3.bf16.msra.mxu1 %v366_v14 }
   0xc   :  { %349 = vmatmul.mubr.msk.f32.vlgmr.msra.gmra.mrb[0].mxu0 %vm35_vm0, %v24_v19 }
   0xd   :  { %381 = vmatpush3.bf16.msra.mxu0 %v378_v16  ;;  %359 = vmatprep.mubr.msk.f32.mxu0 %vm35_vm0, %v198_v20 }
   0xe   :  { %383 = vmatprep.subr.bf16.mxu0 %v382_v21  ;;  %338 = vmatmul.mubr.msk.f32.vlgmr.msra.gmra.mrb[0].mxu1 %vm35_vm0, %v26_v22 }
  0x11   :  { %385 = vmatpush3.bf16.msra.mxu0 %v382_v21 }
  0x14   :  { %360 = vmatmul.mubr.msk.f32.vlgmr.msra.gmra.mrb[0].mxu0 %vm35_vm0, %v199_v23 }
  0xe1   :  { %v339_v24 = vpop.f32.mrb[0].mxu1 }
  0xe2   :  { %v108_v25 = vpop.f32.mrb[1].mxu1 }
  0xe7   :  { %v361_v26 = vpop.f32.mrb[0].mxu0 }
  0xe8   :  { %v386_v28 = vadd.f32 %v361_v26, %v339_v24  ;;  %v276_v29 = vpop.f32.mrb[1].mxu0 }
  0xe9   :  { %v387_v30 = vadd.f32 %v276_v29, %v108_v25 }
  0xea   :  { %v295_v31 = vadd.f32 %v386_v28, %v310_v27 }
  0xeb   :  { %v294_v32 = vadd.f32 %v387_v30, %v310_v27 }
  0xec   :  { %v297_v33 = vmax.f32 %v295_v31, 0.0 }
  0xed   :  { %v296_v34 = vmax.f32 %v294_v32, 0.0 }
  0xee   :  { %299 = vst.msk [vmem:[%s496_s6 + $0x8] sm:$0xff] %vm35_vm0, %v297_v33 }
  0xef   :  { %298 = vst.msk [vmem:[%s496_s6] sm:$0xff] %vm35_vm0, %v296_v34 }

// kernel: esim_forward.10
= control target key start
LH: loop header
LB: loop body
LE: loop exit
PB: predicated region body
PF: predicated region fallthrough
CT: control target
= control target key end

     0   :  { %vm36_vm0 = vcmask 1041409   ;;  %vm39_vm1 = vcmask 1042434   ;;  %vm42_vm2 = vcmask 1043459   ;;  %v1015_v0 = vmov 0.0   ;;  %s1330_s1 = inlined_call_operand.vmem [shape: f32[6,2,32], index: 1, kind: input, shape index: {}]   ;;  %s1331_s0 = inlined_call_operand.vmem [shape: f32[8,2,32], index: 0, kind: input, shape index: {}]   ;;  %s1332_s2 = inlined_call_operand.vmem [shape: f32[8,2,32], index: 2, kind: output, shape index: {0}]   ;;  %s1333_s3 = inlined_call_operand.vmem [shape: f32[6,2,32], index: 3, kind: output, shape index: {1}]  }
   0x1   :  { %966 = vmatprep.subr.mxu0 %v1015_v0  ;;  %v21_v1 = vld [vmem:[%s1330_s1] sm:$0x1]  ;;  %v22_v2 = vld [vmem:[%s1330_s1 + $0x2] sm:$0x1]  ;;  %v23_v3 = vld [vmem:[%s1330_s1 + $0x4] sm:$0x1]  ;;  %971 = vmatprep.subr.mxu1 %v1015_v0 }
   0x2   :  { %v24_v4 = vld [vmem:[%s1330_s1 + $0x6] sm:$0x1]  ;;  %v25_v5 = vld [vmem:[%s1330_s1 + $0x8] sm:$0x1]  ;;  %v26_v6 = vld [vmem:[%s1330_s1 + $0xa] sm:$0x1] }
   0x3   :  { %vm45_vm3 = vcmask 1044484   ;;  %vm48_vm4 = vcmask 1045509   ;;  %v62_v7 = vrot.slane %v22_v2, 7  ;;  %v64_v8 = vrot.slane %v23_v3, 6  ;;  %v481_v9 = vld [vmem:[%s1331_s0 + $0x1] sm:$0x1] }
   0x4   :  { %v66_v10 = vrot.slane %v24_v4, 5  ;;  %v68_v11 = vrot.slane %v25_v5, 4  ;;  %v70_v12 = vrot.slane %v26_v6, 3  ;;  %vm72_vm5 = vcmask 261120   ;;  %v482_v13 = vld [vmem:[%s1331_s0 + $0x3] sm:$0x1] }
   0x5   :  { %v63_v14 = vsel %vm36_vm0, %v62_v7, %v21_v1  ;;  %v483_v15 = vld [vmem:[%s1331_s0 + $0x5] sm:$0x1]  ;;  %v484_v16 = vld [vmem:[%s1331_s0 + $0x7] sm:$0x1]  ;;  %v485_v17 = vld [vmem:[%s1331_s0 + $0x9] sm:$0x1] }
   0x6   :  { %v65_v18 = vsel %vm39_vm1, %v64_v8, %v63_v14  ;;  %v486_v19 = vld [vmem:[%s1331_s0 + $0xb] sm:$0x1]  ;;  %v503_v20 = vrot.slane %v482_v13, 7  ;;  %v505_v21 = vrot.slane %v483_v15, 6  ;;  %v507_v22 = vrot.slane %v484_v16, 5 }
   0x7   :  { %v67_v23 = vsel %vm42_vm2, %v66_v10, %v65_v18  ;;  %v509_v24 = vrot.slane %v485_v17, 4  ;;  %v511_v25 = vrot.slane %v486_v19, 3  ;;  %v13_v26 = vld [vmem:[%s1331_s0] sm:$0x1]  ;;  %vm1016_vm6 = vmmov 0  }
   0x8   :  { %v69_v27 = vsel %vm45_vm3, %v68_v11, %v67_v23  ;;  %v504_v28 = vsel %vm36_vm0, %v503_v20, %v481_v9  ;;  %968 = vmatprep.mubr.msk.f32.mxu0 %vm1016_vm6, %v1015_v0  ;;  %v14_v29 = vld [vmem:[%s1331_s0 + $0x2] sm:$0x1]  ;;  %v15_v30 = vld [vmem:[%s1331_s0 + $0x4] sm:$0x1]  ;;  %v16_v31 = vld [vmem:[%s1331_s0 + $0x6] sm:$0x1]  ;;  %973 = vmatprep.mubr.msk.f32.mxu1 %vm1016_vm6, %v1015_v0 }
   0x9   :  { %v1098_v32 = vsel %vm48_vm4, %v70_v12, %v69_v27  ;;  %v506_v33 = vsel %vm39_vm1, %v505_v21, %v504_v28  ;;  %v17_v34 = vld [vmem:[%s1331_s0 + $0x8] sm:$0x1]  ;;  %v18_v35 = vld [vmem:[%s1331_s0 + $0xa] sm:$0x1]  ;;  %v19_v36 = vld [vmem:[%s1331_s0 + $0xc] sm:$0x1] }
   0xa   :  { %967 = vmatpush3.xpose.msk.msra.mxu0 %vm72_vm5, %v1098_v32  ;;  %v508_v37 = vsel %vm42_vm2, %v507_v22, %v506_v33  ;;  %v20_v38 = vld [vmem:[%s1331_s0 + $0xe] sm:$0x1]  ;;  %v35_v39 = vrot.slane %v14_v29, 7  ;;  %v38_v40 = vrot.slane %v15_v30, 6  ;;  %v41_v41 = vrot.slane %v16_v31, 5 }
   0xb   :  { %v510_v42 = vsel %vm45_vm3, %v509_v24, %v508_v37  ;;  %v44_v43 = vrot.slane %v17_v34, 4  ;;  %v47_v44 = vrot.slane %v18_v35, 3  ;;  %981 = vmatprep.subr.mxu0 %v1015_v0  ;;  %v489_v45 = vld [vmem:[%s1330_s1 + $0x1] sm:$0x1]  ;;  %v50_v47 = vrot.slane %v19_v36, 2 }
   0xc   :  { %v37_v46 = vsel %vm36_vm0, %v35_v39, %v13_v26  ;;  %vm51_vm7 = vcmask 1046534   ;;  %v490_v48 = vld [vmem:[%s1330_s1 + $0x3] sm:$0x1]  ;;  %v491_v49 = vld [vmem:[%s1330_s1 + $0x5] sm:$0x1]  ;;  %v512_v50 = vsel %vm48_vm4, %v511_v25, %v510_v42  ;;  %v53_v52 = vrot.slane %v20_v38, 1 }
   0xd   :  { %v40_v51 = vsel %vm39_vm1, %v38_v40, %v37_v46  ;;  %v492_v53 = vld [vmem:[%s1330_s1 + $0x7] sm:$0x1]  ;;  %v493_v54 = vld [vmem:[%s1330_s1 + $0x9] sm:$0x1]  ;;  %v523_v55 = vrot.slane %v490_v48, 7  ;;  %v525_v58 = vrot.slane %v491_v49, 6 }
   0xe   :  { %v43_v56 = vsel %vm42_vm2, %v41_v41, %v40_v51  ;;  %v494_v57 = vld [vmem:[%s1330_s1 + $0xb] sm:$0x1]  ;;  %v527_v59 = vrot.slane %v492_v53, 5  ;;  %v529_v60 = vrot.slane %v493_v54, 4  ;;  %vm54_vm8 = vcmask 1047559  }
   0xf   :  { %v46_v61 = vsel %vm45_vm3, %v44_v43, %v43_v56  ;;  %v524_v62 = vsel %vm36_vm0, %v523_v55, %v489_v45  ;;  %v531_v63 = vrot.slane %v494_v57, 3  ;;  %v487_v1 = vld [vmem:[%s1331_s0 + $0xd] sm:$0x1]  ;;  %v488_v2 = vld [vmem:[%s1331_s0 + $0xf] sm:$0x1]  ;;  %vm147_vm9 = vcmask 48128  }
  0x10   :  { %v49_v3 = vsel %vm48_vm4, %v47_v44, %v46_v61  ;;  %v526_v4 = vsel %vm39_vm1, %v525_v58, %v524_v62  ;;  %v513_v5 = vrot.slane %v487_v1, 2  ;;  %v515_v6 = vrot.slane %v488_v2, 1 }
  0x11   :  { %v52_v7 = vsel %vm51_vm7, %v50_v47, %v49_v3  ;;  %v528_v8 = vsel %vm42_vm2, %v527_v59, %v526_v4  ;;  %vm334_vm10 = vcmask 62464   ;;  %vm162_vm11 = vcmask 1045504  }
  0x12   :  { %v1153_v9 = vsel %vm54_vm8, %v53_v52, %v52_v7  ;;  %v530_v10 = vsel %vm45_vm3, %v529_v60, %v528_v8  ;;  %v514_v11 = vsel %vm51_vm7, %v513_v5, %v512_v50  ;;  %972 = vmatpush3.msk.msra.mxu1 %vm162_vm11, %v1098_v32  ;;  %vm347_vm12 = vcmask 64512  }
  0x13   :  { %969 = vmatmul.mubr.msk.f32.vlgmr.msra.gmra.mrb[0].mxu0 %vm72_vm5, %v1153_v9  ;;  %v1160_v12 = vsel %vm48_vm4, %v531_v63, %v530_v10  ;;  %v516_v13 = vsel %vm54_vm8, %v515_v6, %v514_v11  ;;  %976 = vmatprep.subr.mxu1 %v1015_v0  ;;  %v1017_v56 = vmov 1966171168   ;;  %v240_v58 = vlaneseq }
  0x14   :  { %982 = vmatpush3.xpose.msk.msra.mxu0 %vm72_vm5, %v1160_v12  ;;  %983 = vmatprep.mubr.msk.f32.mxu0 %vm1016_vm6, %v1015_v0  ;;  %v238_v57 = vunpack.c.l.s4 %v1017_v56  ;;  %vm293_vm13 = vcmask 253952  }
  0x15   :  { %991 = vmatprep.subr.mxu0 %v1015_v0  ;;  %v241_v60 = vshrl.u32 %v240_v58, 7 }
  0x16   :  { %v239_v59 = vunpack.c.0.s8 %v238_v57 }
  0x17   :  { %984 = vmatmul.mubr.msk.f32.vlgmr.msra.gmra.mrb[2].mxu0 %vm72_vm5, %v516_v13 }
  0x18   :  { %992 = vmatpush3.msra.mxu0 %v516_v13  ;;  %993 = vmatprep.mubr.msk.f32.mxu0 %vm1016_vm6, %v1015_v0  ;;  %v1192_v61 = vsub.s32 %v239_v59, %v241_v60 }
  0xe6   :  { %v143_v14 = vpop.f32.mrb[0].mxu0 }
  0xe7   :  { %302 = vxpose.xlu0.b32.start.end [1/1] (short) (narrow) %v143_v14, 8  ;;  %v970_v15 = vpop.f32.mrb[1].mxu0  ;;  %v148_v16 = vsel %vm147_vm9, %v143_v14, -inf }
  0xe8   :  { %149 = vmax.xlane.f32.xlu1 %v148_v16 }
  0xea   :  { %v603_v17 = vpop.f32.mrb[2].mxu0 }
  0xeb   :  { %759 = vxpose.xlu0.b32.start.end [1/1] (short) (narrow) %v603_v17, 8  ;;  %v985_v18 = vpop.f32.mrb[3].mxu0  ;;  %v607_v19 = vsel %vm147_vm9, %v603_v17, -inf }
 0x118   :  { %608 = vmax.xlane.f32.xlu0 %v607_v19 }
 0x167   :  { %v318_v20 = vpop.trf.xlu0 }
 0x168   :  { %v335_v21 = vsel %vm334_vm10, %v318_v20, -inf }
 0x169   :  { %336 = vmax.xlane.f32.xlu1 %v335_v21 }
 0x16b   :  { %v775_v22 = vpop.trf.xlu0 }
 0x16c   :  { %v791_v23 = vsel %vm334_vm10, %v775_v22, -inf }
 0x16d   :  { %792 = vmax.xlane.f32.xlu1 %v791_v23 }
 0x175   :  { %v150_v24 = vpop.xlane.xlu1 %149 }
 0x176   :  { %v151_v25 = vsub.f32 %v143_v14, %v150_v24 }
 0x178   :  { %v152_v26 = vmul.f32 1.442695, %v151_v25 }
 0x17a   :  { %999 = vpow2.f32 %v152_v26 }
 0x184   :  { %v1000_v27 = vpop.eup %999 }
 0x185   :  { %v154_v28 = vsel %vm147_vm9, %v1000_v27, 0.0 }
 0x186   :  { %155 = vadd.xlane.f32.xlu1 %v154_v28 }
 0x1a5   :  { %v609_v29 = vpop.xlane.xlu0 %608 }
 0x1a6   :  { %v610_v30 = vsub.f32 %v603_v17, %v609_v29 }
 0x1a8   :  { %v611_v34 = vmul.f32 1.442695, %v610_v30 }
 0x1f6   :  { %v337_v31 = vpop.xlane.xlu1 %336 }
 0x1f7   :  { %v338_v33 = vsub.f32 %v318_v20, %v337_v31 }
 0x1f9   :  { %v339_v35 = vmul.f32 1.442695, %v338_v33 }
 0x1fa   :  { %v793_v36 = vpop.xlane.xlu1 %792 }
 0x1fb   :  { %1001 = vpow2.f32 %v339_v35  ;;  %v794_v37 = vsub.f32 %v775_v22, %v793_v36 }
 0x1fc   :  { %1003 = vpow2.f32 %v611_v34 }
 0x1fd   :  { %v795_v38 = vmul.f32 1.442695, %v794_v37 }
 0x1ff   :  { %1005 = vpow2.f32 %v795_v38 }
 0x205   :  { %v1002_v39 = vpop.eup %1001 }
 0x206   :  { %v341_v40 = vsel %vm334_vm10, %v1002_v39, 0.0  ;;  %v1004_v41 = vpop.eup %1003 }
 0x207   :  { %342 = vadd.xlane.f32.xlu1 %v341_v40  ;;  %v613_v32 = vsel %vm147_vm9, %v1004_v41, 0.0 }
 0x209   :  { %v1006_v42 = vpop.eup %1005 }
 0x20a   :  { %v797_v43 = vsel %vm334_vm10, %v1006_v42, 0.0 }
 0x20b   :  { %614 = vadd.xlane.f32.xlu1 %v613_v32 }
 0x20f   :  { %798 = vadd.xlane.f32.xlu1 %v797_v43 }
 0x213   :  { %v156_v44 = vpop.xlane.xlu1 %155 }
 0x214   :  { %1007 = vrcp.f32 %v156_v44 }
 0x21e   :  { %v1008_v45 = vpop.eup %1007 }
 0x21f   :  { %v158_v46 = vmul.f32 %v1008_v45, %v1000_v27 }
 0x221   :  { %974 = vmatmul.mubr.msk.f32.vlgmr.msra.gmra.mrb[0].mxu1 %vm147_vm9, %v158_v46 }
 0x222   :  { %977 = vmatpush3.msra.mxu1 %v1153_v9  ;;  %978 = vmatprep.mubr.msk.f32.mxu1 %vm1016_vm6, %v1015_v0 }
 0x223   :  { %986 = vmatprep.subr.mxu1 %v1015_v0 }
 0x294   :  { %v343_v47 = vpop.xlane.xlu1 %342 }
 0x295   :  { %1009 = vrcp.f32 %v343_v47 }
 0x298   :  { %v615_v48 = vpop.xlane.xlu1 %614 }
 0x299   :  { %1011 = vrcp.f32 %v615_v48 }
 0x29c   :  { %v799_v49 = vpop.xlane.xlu1 %798 }
 0x29d   :  { %1013 = vrcp.f32 %v799_v49 }
 0x29f   :  { %v1010_v50 = vpop.eup %1009 }
 0x2a0   :  { %v345_v51 = vmul.f32 %v1010_v50, %v1002_v39 }
 0x2a2   :  { %979 = vmatmul.mubr.msk.f32.vlgmr.msra.gmra.mrb[2].mxu1 %vm347_vm12, %v345_v51 }
 0x2a3   :  { %v1012_v52 = vpop.eup %1011  ;;  %987 = vmatpush3.msk.msra.mxu1 %vm162_vm11, %v1160_v12  ;;  %988 = vmatprep.mubr.msk.f32.mxu1 %vm1016_vm6, %v1015_v0 }
 0x2a4   :  { %v617_v53 = vmul.f32 %v1012_v52, %v1004_v41 }
 0x2a6   :  { %989 = vmatmul.mubr.msk.f32.vlgmr.msra.gmra.mrb[4].mxu1 %vm147_vm9, %v617_v53 }
 0x2a7   :  { %v1014_v54 = vpop.eup %1013 }
 0x2a8   :  { %v801_v55 = vmul.f32 %v1014_v54, %v1006_v42 }
 0x2aa   :  { %994 = vmatmul.mubr.msk.f32.vlgmr.msra.gmra.mrb[4].mxu0 %vm347_vm12, %v801_v55 }
 0x2f4   :  { %v231_v62 = vpop.f32.mrb[0].mxu1 }
 0x2f5   :  { %v236_v63 = vcombine.high %v231_v62, %v231_v62  ;;  %v243_v1 = vrot.slane %v231_v62, %v1192_v61  ;;  %v975_v2 = vpop.f32.mrb[1].mxu1 }
 0x2f7   :  { %v250_v0 = vrot.slane %v236_v63, %v1192_v61  ;;  %v251_v3 = vcombine.high %v243_v1, %v243_v1  ;;  %v259_v4 = vrot.slane %v243_v1, %v1192_v61 }
 0x2f9   :  { %v252_v5 = vcombine.high %v250_v0, %v250_v0  ;;  %v266_v6 = vrot.slane %v250_v0, %v1192_v61  ;;  %v273_v7 = vrot.slane %v251_v3, %v1192_v61  ;;  %v281_v8 = vcombine.high %v259_v4, %v259_v4  ;;  %294 = vst.msk [vmem:[%s1332_s2] sm:$0x1] %vm293_vm13, %v259_v4 }
 0x2fb   :  { %v280_v9 = vrot.slane %v252_v5, %v1192_v61  ;;  %v282_v10 = vcombine.high %v266_v6, %v266_v6  ;;  %v283_v11 = vcombine.high %v273_v7, %v273_v7  ;;  %295 = vst.msk [vmem:[%s1332_s2 + $0x2] sm:$0x1] %vm293_vm13, %v273_v7  ;;  %296 = vst.msk [vmem:[%s1332_s2 + $0x4] sm:$0x1] %vm293_vm13, %v281_v8 }
 0x2fc   :  { %298 = vst.msk [vmem:[%s1332_s2 + $0x8] sm:$0x1] %vm293_vm13, %v266_v6 }
 0x2fd   :  { %v284_v12 = vcombine.high %v280_v9, %v280_v9  ;;  %297 = vst.msk [vmem:[%s1332_s2 + $0x6] sm:$0x1] %vm293_vm13, %v283_v11  ;;  %299 = vst.msk [vmem:[%s1332_s2 + $0xa] sm:$0x1] %vm293_vm13, %v280_v9 }
 0x2fe   :  { %300 = vst.msk [vmem:[%s1332_s2 + $0xc] sm:$0x1] %vm293_vm13, %v282_v10 }
 0x2ff   :  { %301 = vst.msk [vmem:[%s1332_s2 + $0xe] sm:$0x1] %vm293_vm13, %v284_v12 }
 0x375   :  { %v417_v13 = vpop.f32.mrb[2].mxu1 }
 0x376   :  { %v422_v14 = vcombine.high %v417_v13, %v417_v13  ;;  %v429_v15 = vrot.slane %v417_v13, %v1192_v61  ;;  %v980_v16 = vpop.f32.mrb[3].mxu1 }
 0x378   :  { %v436_v17 = vrot.slane %v422_v14, %v1192_v61  ;;  %v437_v18 = vcombine.high %v429_v15, %v429_v15  ;;  %v445_v19 = vrot.slane %v429_v15, %v1192_v61 }
 0x379   :  { %v689_v20 = vpop.f32.mrb[4].mxu1 }
 0x37a   :  { %v438_v21 = vcombine.high %v436_v17, %v436_v17  ;;  %v452_v22 = vrot.slane %v436_v17, %v1192_v61  ;;  %v459_v23 = vrot.slane %v437_v18, %v1192_v61  ;;  %v467_v24 = vcombine.high %v445_v19, %v445_v19  ;;  %475 = vst.msk [vmem:[%s1333_s3] sm:$0x1] %vm293_vm13, %v445_v19  ;;  %v990_v25 = vpop.f32.mrb[5].mxu1 }
 0x37b   :  { %v694_v26 = vcombine.high %v689_v20, %v689_v20  ;;  %v701_v27 = vrot.slane %v689_v20, %v1192_v61 }
 0x37c   :  { %v466_v28 = vrot.slane %v438_v21, %v1192_v61  ;;  %v468_v29 = vcombine.high %v459_v23, %v459_v23  ;;  %476 = vst.msk [vmem:[%s1333_s3 + $0x2] sm:$0x1] %vm293_vm13, %v459_v23  ;;  %477 = vst.msk [vmem:[%s1333_s3 + $0x4] sm:$0x1] %vm293_vm13, %v467_v24 }
 0x37d   :  { %479 = vst.msk [vmem:[%s1333_s3 + $0x8] sm:$0x1] %vm293_vm13, %v452_v22  ;;  %v708_v30 = vrot.slane %v694_v26, %v1192_v61  ;;  %v709_v31 = vcombine.high %v701_v27, %v701_v27  ;;  %v717_v33 = vrot.slane %v701_v27, %v1192_v61  ;;  %v872_v34 = vpop.f32.mrb[4].mxu0 }
 0x37e   :  { %478 = vst.msk [vmem:[%s1333_s3 + $0x6] sm:$0x1] %vm293_vm13, %v468_v29  ;;  %480 = vst.msk [vmem:[%s1333_s3 + $0xa] sm:$0x1] %vm293_vm13, %v466_v28  ;;  %v877_v35 = vcombine.high %v872_v34, %v872_v34  ;;  %v884_v36 = vrot.slane %v872_v34, %v1192_v61  ;;  %v995_v37 = vpop.f32.mrb[5].mxu0 }
 0x37f   :  { %v710_v38 = vcombine.high %v708_v30, %v708_v30  ;;  %v724_v39 = vrot.slane %v708_v30, %v1192_v61  ;;  %v731_v40 = vrot.slane %v709_v31, %v1192_v61  ;;  %v739_v41 = vcombine.high %v717_v33, %v717_v33  ;;  %751 = vst.msk [vmem:[%s1332_s2 + $0x1] sm:$0x1] %vm293_vm13, %v717_v33 }
 0x380   :  { %v891_v32 = vrot.slane %v877_v35, %v1192_v61  ;;  %v892_v42 = vcombine.high %v884_v36, %v884_v36  ;;  %v900_v43 = vrot.slane %v884_v36, %v1192_v61 }
 0x381   :  { %v738_v44 = vrot.slane %v710_v38, %v1192_v61  ;;  %v740_v45 = vcombine.high %v724_v39, %v724_v39  ;;  %v741_v46 = vcombine.high %v731_v40, %v731_v40  ;;  %752 = vst.msk [vmem:[%s1332_s2 + $0x3] sm:$0x1] %vm293_vm13, %v731_v40  ;;  %753 = vst.msk [vmem:[%s1332_s2 + $0x5] sm:$0x1] %vm293_vm13, %v739_v41 }
 0x382   :  { %755 = vst.msk [vmem:[%s1332_s2 + $0x9] sm:$0x1] %vm293_vm13, %v724_v39  ;;  %v893_v47 = vcombine.high %v891_v32, %v891_v32  ;;  %v907_v48 = vrot.slane %v891_v32, %v1192_v61  ;;  %v914_v49 = vrot.slane %v892_v42, %v1192_v61  ;;  %v922_v50 = vcombine.high %v900_v43, %v900_v43 }
 0x383   :  { %930 = vst.msk [vmem:[%s1333_s3 + $0x1] sm:$0x1] %vm293_vm13, %v900_v43  ;;  %v742_v51 = vcombine.high %v738_v44, %v738_v44  ;;  %754 = vst.msk [vmem:[%s1332_s2 + $0x7] sm:$0x1] %vm293_vm13, %v741_v46 }
 0x384   :  { %756 = vst.msk [vmem:[%s1332_s2 + $0xb] sm:$0x1] %vm293_vm13, %v738_v44  ;;  %757 = vst.msk [vmem:[%s1332_s2 + $0xd] sm:$0x1] %vm293_vm13, %v740_v45  ;;  %v921_v52 = vrot.slane %v893_v47, %v1192_v61  ;;  %v923_v53 = vcombine.high %v914_v49, %v914_v49 }
 0x385   :  { %931 = vst.msk [vmem:[%s1333_s3 + $0x3] sm:$0x1] %vm293_vm13, %v914_v49  ;;  %932 = vst.msk [vmem:[%s1333_s3 + $0x5] sm:$0x1] %vm293_vm13, %v922_v50 }
 0x386   :  { %934 = vst.msk [vmem:[%s1333_s3 + $0x9] sm:$0x1] %vm293_vm13, %v907_v48  ;;  %758 = vst.msk [vmem:[%s1332_s2 + $0xf] sm:$0x1] %vm293_vm13, %v742_v51 }
 0x387   :  { %933 = vst.msk [vmem:[%s1333_s3 + $0x7] sm:$0x1] %vm293_vm13, %v923_v53  ;;  %935 = vst.msk [vmem:[%s1333_s3 + $0xb] sm:$0x1] %vm293_vm13, %v921_v52 }

// kernel: esim_forward.8
= control target key start
LH: loop header
LB: loop body
LE: loop exit
PB: predicated region body
PF: predicated region fallthrough
CT: control target
= control target key end

     0   :  { %vm28_vm0 = vcmask 130048   ;;  %v2314_v3 = vmov 0.0|0.0   ;;  %vm2315_vm1 = vmmov 0   ;;  %v2316_v4 = vmov 0.0   ;;  %s2317_s24 = smov 64   ;;  %s2318_s27 = smov 96   ;;  %s2705_s2 = inlined_call_operand.vmem [shape: f32[16,128], index: 2, kind: input, shape index: {}]   ;;  %s2706_s1 = inlined_call_operand.vmem [shape: f32[16,128], index: 1, kind: input, shape index: {}]   ;;  %s2707_s0 = inlined_call_operand.vmem [shape: f32[16,16], index: 0, kind: input, shape index: {}]   ;;  %s2708_s3 = inlined_call_operand.vmem [shape: f32[1,128], index: 3, kind: input, shape index: {}]   ;;  %s2709_s4 = inlined_call_operand.vmem [shape: f32[8,2,32], index: 4, kind: output, shape index: {}]  }
   0x1   :  { %v110_v0 = vld [vmem:[%s2705_s2] sm:$0xff]  ;;  %v111_v1 = vld [vmem:[%s2705_s2 + $0x8] sm:$0xff]  ;;  %2125 = vmatprep.subr.bf16.mxu1 %v2314_v3  ;;  %2013 = vmatprep.mubr.msk.f32.mxu1 %vm2315_vm1, %v2316_v4  ;;  %s2320_s28 = smov 32   ;;  %s2321_s29 = smov 80   ;;  %vm322_vm2 = vcmask 123904   ;;  %vm329_vm3 = vcmask 261254  }
   0x2   :  { %v19_v2 = vld [vmem:[%s2706_s1] sm:$0xff]  ;;  %v2181_v5 = vpack.i.bf16 %v111_v1, %v110_v0  ;;  %v2359_v6 = vpack.c.bf16 %v111_v1, %v110_v0  ;;  %v20_v7 = vld [vmem:[%s2706_s1 + $0x8] sm:$0xff]  ;;  %vm554_vm4 = vcmask 259204   ;;  %vm782_vm5 = vcmask 257154  }
   0x3   :  { %v17_v8 = vld [vmem:[%s2707_s0] sm:$0xff]  ;;  %v2121_v9 = vpack.c.bf16 %v20_v7, %v19_v2  ;;  %v18_v10 = vld [vmem:[%s2707_s0 + $0x8] sm:$0xff]  ;;  %vm1009_vm6 = vcmask 255104   ;;  %vm547_vm7 = vcmask 125954   ;;  %vm775_vm8 = vcmask 128004  }
   0x4   :  { %2006 = vmatprep.mubr.msk.f32.mxu0 %vm28_vm0, %v17_v8  ;;  %2182 = vrot.lane.b32.xlu0 %v2181_v5, %s2317_s24  ;;  %v1903_v16 = vld [vmem:[%s2708_s3] ss:$0 sm:$0xff]  ;;  %s2319_s3 = smov 16   ;;  %vm1002_vm9 = vcmask 130054  }
   0x5   :  { %2127 = vmatpush3.bf16.msra.mxu1 %v2359_v6  ;;  %2122 = vmatprep.subr.bf16.mxu0 %v2121_v9 }
   0x6   :  { %2131 = vmatprep.subr.bf16.mxu1 %v2314_v3  ;;  %2124 = vmatpush3.bf16.msra.mxu0 %v2121_v9 }
   0x7   :  { %2128 = vmatprep.subr.bf16.mxu0 %v2314_v3 }
   0x8   :  { %2014 = vmatmul.mubr.f32.vlgmr.msra.gmra.mrb[0].mxu1 %v2316_v4 }
   0x9   :  { %2133 = vmatpush3.bf16.msra.mxu1 %v2359_v6  ;;  %2027 = vmatprep.mubr.msk.f32.mxu1 %vm2315_vm1, %v2316_v4 }
   0xa   :  { %2007 = vmatmul.mubr.msk.f32.vlgmr.msra.gmra.mrb[0].mxu0 %vm28_vm0, %v18_v10  ;;  %2137 = vmatprep.subr.bf16.mxu1 %v2314_v3 }
   0xb   :  { %2020 = vmatprep.mubr.msk.f32.mxu0 %vm2315_vm1, %v2316_v4 }
  0x76   :  { %v2183_v11 = vpop.permute.xlu0 %2182 }
  0x77   :  { %v2185_v12 = vunpack.i.h.bf16 %v2183_v11  ;;  %v2184_v13 = vunpack.i.l.bf16 %v2183_v11 }
  0x79   :  { %v2383_v14 = vpack.c.bf16 %v2185_v12, %v2184_v13 }
  0x7b   :  { %2130 = vmatpush3.bf16.msra.mxu0 %v2383_v14 }
  0x7c   :  { %2134 = vmatprep.subr.bf16.mxu0 %v2314_v3 }
  0x7e   :  { %2021 = vmatmul.mubr.f32.vlgmr.msra.gmra.mrb[2].mxu0 %v2316_v4 }
  0x7f   :  { %2136 = vmatpush3.bf16.msra.mxu0 %v2383_v14  ;;  %2034 = vmatprep.mubr.msk.f32.mxu0 %vm2315_vm1, %v2316_v4 }
  0x80   :  { %2140 = vmatprep.subr.bf16.mxu0 %v2314_v3 }
  0xdb   :  { %v181_v15 = vpop.f32.mrb[0].mxu1 }
  0xdc   :  { %v2015_v17 = vpop.f32.mrb[1].mxu1 }
  0xdd   :  { %v2008_v18 = vpop.f32.mrb[0].mxu0 }
  0xde   :  { %v101_v19 = vpop.f32.mrb[1].mxu0  ;;  %v2398_v24 = vadd.f32 %v2008_v18, %v1903_v16 }
  0xdf   :  { %v2395_v20 = vadd.f32 %v1903_v16, %v101_v19 }
  0xe1   :  { %v185_v37 = vadd.f32 %v181_v15, %v2395_v20 }
  0xe3   :  { %v1906_v40 = vmul.f32 -1.442695, %v185_v37 }
 0x151   :  { %v260_v21 = vpop.f32.mrb[2].mxu0 }
 0x152   :  { %v265_v22 = vrot.slane %v260_v21, 2  ;;  %v2022_v23 = vpop.f32.mrb[3].mxu0 }
 0x154   :  { %266 = vrot.lane.b32.xlu0 %v265_v22, %s2317_s24 }
 0x1c6   :  { %v267_v25 = vpop.permute.xlu0 %266 }
 0x1c7   :  { %v269_v26 = vadd.f32 %v267_v25, %v2398_v24 }
 0x1c9   :  { %2186 = vtanh.f32 %v269_v26  ;;  %v1907_v28 = vmul.f32 -1.442695, %v269_v26 }
 0x1cb   :  { %2188 = vpow2.f32 %v1907_v28 }
 0x1d3   :  { %v2187_v27 = vpop.eup %2186 }
 0x1d4   :  { %303 = vrot.lane.b32.xlu1 %v2187_v27, %s2318_s27 }
 0x1d5   :  { %v2189_v29 = vpop.eup %2188 }
 0x1d6   :  { %v297_v30 = vadd.f32 1.0, %v2189_v29 }
 0x1d8   :  { %2190 = vrcp.f32 %v297_v30 }
 0x1e2   :  { %v2191_v31 = vpop.eup %2190 }
 0x1e3   :  { %v301_v34 = vmul.f32 0.0, %v2191_v31 }
 0x246   :  { %v304_v32 = vpop.permute.xlu1 %303 }
 0x247   :  { %v306_v33 = vmul.f32 %v2191_v31, %v304_v32 }
 0x249   :  { %308 = vrot.lane.b32.xlu1 %v306_v33, %s2319_s3 }
 0x2bb   :  { %v309_v35 = vpop.permute.xlu1 %308 }
 0x2bc   :  { %v2403_v36 = vadd.f32 %v309_v35, %v301_v34 }
 0x2be   :  { %2192 = vtanh.f32 %v2403_v36  ;;  %v523_v10 = vrot.slane %v2403_v36, 2 }
 0x2bf   :  { %2194 = vtanh.f32 %v185_v37 }
 0x2c0   :  { %2196 = vpow2.f32 %v1906_v40 }
 0x2c8   :  { %v2193_v38 = vpop.eup %2192 }
 0x2c9   :  { %314 = vrot.lane.b32.xlu0 %v2193_v38, %s2320_s28  ;;  %v2195_v39 = vpop.eup %2194 }
 0x2ca   :  { %v2197_v41 = vpop.eup %2196 }
 0x2cb   :  { %v273_v42 = vadd.f32 1.0, %v2197_v41 }
 0x2cd   :  { %279 = vrot.lane.b32.xlu0 %v2195_v39, %s2318_s27  ;;  %2198 = vrcp.f32 %v273_v42 }
 0x2d7   :  { %v2199_v46 = vpop.eup %2198 }
 0x2d8   :  { %v277_v50 = vmul.f32 0.0, %v2199_v46 }
 0x33b   :  { %v315_v43 = vpop.permute.xlu0 %314 }
 0x33c   :  { %v2409_v44 = vmul.f32 %v2191_v31, %v315_v43 }
 0x33e   :  { %v407_v45 = vrot.slane %v2409_v44, 6 }
 0x33f   :  { %v280_v47 = vpop.permute.xlu0 %279 }
 0x340   :  { %v282_v48 = vmul.f32 %v2199_v46, %v280_v47  ;;  %408 = vrot.lane.b32.xlu1 %v407_v45, %s2319_s3 }
 0x342   :  { %284 = vrot.lane.b32.xlu0 %v282_v48, %s2319_s3 }
 0x3b2   :  { %v409_v49 = vpop.permute.xlu1 %408 }
 0x3b3   :  { %2035 = vmatmul.mubr.msk.f32.vlgmr.msra.gmra.mrb[4].mxu0 %vm28_vm0, %v409_v49 }
 0x3b4   :  { %2142 = vmatpush3.bf16.msra.mxu0 %v2383_v14  ;;  %v285_v51 = vpop.permute.xlu0 %284  ;;  %2048 = vmatprep.mubr.msk.f32.mxu0 %vm2315_vm1, %v2316_v4 }
 0x3b5   :  { %v2418_v52 = vadd.f32 %v285_v51, %v277_v50  ;;  %2146 = vmatprep.subr.bf16.mxu0 %v2314_v3 }
 0x3b7   :  { %2200 = vtanh.f32 %v2418_v52  ;;  %v496_v31 = vrot.slane %v2418_v52, 6 }
 0x3c1   :  { %v2201_v53 = vpop.eup %2200 }
 0x3c2   :  { %290 = vrot.lane.b32.xlu0 %v2201_v53, %s2320_s28 }
 0x434   :  { %v291_v54 = vpop.permute.xlu0 %290 }
 0x435   :  { %v293_v55 = vmul.f32 %v2199_v46, %v291_v54 }
 0x437   :  { %319 = vrot.lane.b32.xlu0 %v293_v55, %s2321_s29 }
 0x486   :  { %v478_v56 = vpop.f32.mrb[4].mxu0 }
 0x487   :  { %v483_v57 = vrot.slane %v478_v56, 4  ;;  %v2036_v58 = vpop.f32.mrb[5].mxu0 }
 0x489   :  { %484 = vrot.lane.b32.xlu1 %v483_v57, %s2317_s24 }
 0x4a9   :  { %v320_v59 = vpop.permute.xlu0 %319 }
 0x4aa   :  { %323 = vst.msk [vmem:[%s2709_s4] sm:$0x3] %vm322_vm2, %v320_v59  ;;  %2028 = vmatmul.mubr.msk.f32.vlgmr.msra.gmra.mrb[2].mxu1 %vm28_vm0, %v320_v59 }
 0x4ab   :  { %2139 = vmatpush3.bf16.msra.mxu1 %v2359_v6  ;;  %2041 = vmatprep.mubr.msk.f32.mxu1 %vm2315_vm1, %v2316_v4 }
 0x4ac   :  { %2143 = vmatprep.subr.bf16.mxu1 %v2314_v3 }
 0x4fb   :  { %v485_v60 = vpop.permute.xlu1 %484 }
 0x4fc   :  { %v487_v61 = vadd.f32 %v485_v60, %v2398_v24 }
 0x4fe   :  { %2202 = vtanh.f32 %v487_v61  ;;  %v1912_v63 = vmul.f32 -1.442695, %v487_v61 }
 0x500   :  { %2204 = vpow2.f32 %v1912_v63 }
 0x508   :  { %v2203_v62 = vpop.eup %2202 }
 0x509   :  { %527 = vrot.lane.b32.xlu1 %v2203_v62, %s2318_s27 }
 0x50a   :  { %v2205_v0 = vpop.eup %2204 }
 0x50b   :  { %v518_v1 = vadd.f32 1.0, %v2205_v0 }
 0x50d   :  { %2206 = vrcp.f32 %v518_v1 }
 0x517   :  { %v2207_v2 = vpop.eup %2206 }
 0x518   :  { %v525_v12 = vmul.f32 %v2207_v2, %v523_v10 }
 0x57b   :  { %v528_v5 = vpop.permute.xlu1 %527 }
 0x57c   :  { %v530_v7 = vmul.f32 %v2207_v2, %v528_v5 }
 0x57d   :  { %v399_v8 = vpop.f32.mrb[2].mxu1 }
 0x57e   :  { %532 = vrot.lane.b32.xlu1 %v530_v7, %s2319_s3  ;;  %v2029_v9 = vpop.f32.mrb[3].mxu1  ;;  %v404_v11 = vrot.slane %v399_v8, 6 }
 0x580   :  { %v406_v16 = vadd.f32 %v404_v11, %v2395_v20 }
 0x582   :  { %v1911_v19 = vmul.f32 -1.442695, %v406_v16 }
 0x5f0   :  { %v533_v13 = vpop.permute.xlu1 %532 }
 0x5f1   :  { %v2438_v15 = vadd.f32 %v533_v13, %v525_v12 }
 0x5f3   :  { %2208 = vtanh.f32 %v2438_v15  ;;  %v751_v55 = vrot.slane %v2438_v15, 2 }
 0x5f4   :  { %2210 = vtanh.f32 %v406_v16 }
 0x5f5   :  { %2212 = vpow2.f32 %v1911_v19 }
 0x5fd   :  { %v2209_v17 = vpop.eup %2208 }
 0x5fe   :  { %538 = vrot.lane.b32.xlu1 %v2209_v17, %s2320_s28  ;;  %v2211_v18 = vpop.eup %2210 }
 0x5ff   :  { %v2213_v21 = vpop.eup %2212 }
 0x600   :  { %v491_v22 = vadd.f32 1.0, %v2213_v21 }
 0x602   :  { %500 = vrot.lane.b32.xlu1 %v2211_v18, %s2318_s27  ;;  %2214 = vrcp.f32 %v491_v22 }
 0x60c   :  { %v2215_v28 = vpop.eup %2214 }
 0x60d   :  { %v498_v32 = vmul.f32 %v2215_v28, %v496_v31 }
 0x670   :  { %v539_v23 = vpop.permute.xlu1 %538 }
 0x671   :  { %v2444_v25 = vmul.f32 %v2207_v2, %v539_v23 }
 0x673   :  { %v635_v26 = vrot.slane %v2444_v25, 4 }
 0x674   :  { %v501_v27 = vpop.permute.xlu1 %500 }
 0x675   :  { %636 = vrot.lane.b32.xlu0 %v635_v26, %s2319_s3  ;;  %v503_v29 = vmul.f32 %v2215_v28, %v501_v27 }
 0x679   :  { %505 = vrot.lane.b32.xlu0 %v503_v29, %s2319_s3 }
 0x6e7   :  { %v637_v30 = vpop.permute.xlu0 %636 }
 0x6e8   :  { %2049 = vmatmul.mubr.msk.f32.vlgmr.msra.gmra.mrb[6].mxu0 %vm28_vm0, %v637_v30 }
 0x6e9   :  { %2148 = vmatpush3.bf16.msra.mxu0 %v2383_v14  ;;  %2062 = vmatprep.mubr.msk.f32.mxu0 %vm2315_vm1, %v2316_v4 }
 0x6ea   :  { %2152 = vmatprep.subr.bf16.mxu0 %v2314_v3 }
 0x6eb   :  { %v506_v33 = vpop.permute.xlu0 %505 }
 0x6ec   :  { %v2455_v34 = vadd.f32 %v506_v33, %v498_v32 }
 0x6ee   :  { %2216 = vtanh.f32 %v2455_v34  ;;  %v724_v12 = vrot.slane %v2455_v34, 6 }
 0x6f8   :  { %v2217_v35 = vpop.eup %2216 }
 0x6f9   :  { %511 = vrot.lane.b32.xlu0 %v2217_v35, %s2320_s28 }
 0x76b   :  { %v512_v36 = vpop.permute.xlu0 %511 }
 0x76c   :  { %v2459_v37 = vmul.f32 %v2215_v28, %v512_v36 }
 0x76e   :  { %v556_v38 = vrot.slane %v2459_v37, 2 }
 0x770   :  { %557 = vrot.lane.b32.xlu0 %v556_v38, %s2321_s29 }
 0x7bb   :  { %v706_v39 = vpop.f32.mrb[6].mxu0 }
 0x7bc   :  { %v711_v40 = vrot.slane %v706_v39, 6  ;;  %v2050_v41 = vpop.f32.mrb[7].mxu0 }
 0x7be   :  { %712 = vrot.lane.b32.xlu1 %v711_v40, %s2317_s24 }
 0x7e2   :  { %v558_v42 = vpop.permute.xlu0 %557 }
 0x7e3   :  { %2042 = vmatmul.mubr.msk.f32.vlgmr.msra.gmra.mrb[4].mxu1 %vm28_vm0, %v558_v42 }
 0x7e4   :  { %2145 = vmatpush3.bf16.msra.mxu1 %v2359_v6  ;;  %2055 = vmatprep.mubr.msk.f32.mxu1 %vm2315_vm1, %v2316_v4 }
 0x7e5   :  { %2149 = vmatprep.subr.bf16.mxu1 %v2314_v3 }
 0x830   :  { %v713_v43 = vpop.permute.xlu1 %712 }
 0x831   :  { %v715_v45 = vadd.f32 %v713_v43, %v2398_v24 }
 0x833   :  { %2218 = vtanh.f32 %v715_v45  ;;  %v1918_v47 = vmul.f32 -1.442695, %v715_v45 }
 0x835   :  { %2220 = vpow2.f32 %v1918_v47 }
 0x83d   :  { %v2219_v46 = vpop.eup %2218 }
 0x83e   :  { %755 = vrot.lane.b32.xlu1 %v2219_v46, %s2318_s27 }
 0x83f   :  { %v2221_v48 = vpop.eup %2220 }
 0x840   :  { %v746_v49 = vadd.f32 1.0, %v2221_v48 }
 0x842   :  { %2222 = vrcp.f32 %v746_v49 }
 0x84c   :  { %v2223_v50 = vpop.eup %2222 }
 0x84d   :  { %v753_v57 = vmul.f32 %v2223_v50, %v751_v55 }
 0x8b0   :  { %v756_v51 = vpop.permute.xlu1 %755 }
 0x8b1   :  { %v758_v52 = vmul.f32 %v2223_v50, %v756_v51 }
 0x8b3   :  { %760 = vrot.lane.b32.xlu1 %v758_v52, %s2319_s3 }
 0x8b6   :  { %v627_v53 = vpop.f32.mrb[4].mxu1 }
 0x8b7   :  { %v2043_v54 = vpop.f32.mrb[5].mxu1  ;;  %v632_v56 = vrot.slane %v627_v53, 4 }
 0x8b9   :  { %v634_v60 = vadd.f32 %v632_v56, %v2395_v20 }
 0x8bb   :  { %v1917_v63 = vmul.f32 -1.442695, %v634_v60 }
 0x925   :  { %v761_v58 = vpop.permute.xlu1 %760 }
 0x926   :  { %v2473_v59 = vadd.f32 %v761_v58, %v753_v57 }
 0x928   :  { %2224 = vtanh.f32 %v2473_v59  ;;  %v978_v39 = vrot.slane %v2473_v59, 2 }
 0x929   :  { %2226 = vtanh.f32 %v634_v60 }
 0x92a   :  { %2228 = vpow2.f32 %v1917_v63 }
 0x932   :  { %v2225_v61 = vpop.eup %2224 }
 0x933   :  { %766 = vrot.lane.b32.xlu0 %v2225_v61, %s2320_s28  ;;  %v2227_v62 = vpop.eup %2226 }
 0x934   :  { %v2229_v0 = vpop.eup %2228 }
 0x935   :  { %v719_v1 = vadd.f32 1.0, %v2229_v0 }
 0x937   :  { %728 = vrot.lane.b32.xlu0 %v2227_v62, %s2318_s27  ;;  %2230 = vrcp.f32 %v719_v1 }
 0x941   :  { %v2231_v9 = vpop.eup %2230 }
 0x942   :  { %v726_v13 = vmul.f32 %v2231_v9, %v724_v12 }
 0x9a5   :  { %v767_v2 = vpop.permute.xlu0 %766 }
 0x9a6   :  { %v2479_v5 = vmul.f32 %v2223_v50, %v767_v2 }
 0x9a8   :  { %v863_v7 = vrot.slane %v2479_v5, 2 }
 0x9a9   :  { %v729_v8 = vpop.permute.xlu0 %728 }
 0x9aa   :  { %864 = vrot.lane.b32.xlu1 %v863_v7, %s2319_s3  ;;  %v731_v10 = vmul.f32 %v2231_v9, %v729_v8 }
 0x9ae   :  { %733 = vrot.lane.b32.xlu1 %v731_v10, %s2319_s3 }
 0xa1c   :  { %v865_v11 = vpop.permute.xlu1 %864 }
 0xa1d   :  { %2063 = vmatmul.mubr.msk.f32.vlgmr.msra.gmra.mrb[8].mxu0 %vm28_vm0, %v865_v11 }
 0xa1e   :  { %2154 = vmatpush3.bf16.msra.mxu0 %v2383_v14  ;;  %2076 = vmatprep.mubr.msk.f32.mxu0 %vm2315_vm1, %v2316_v4 }
 0xa1f   :  { %2158 = vmatprep.subr.bf16.mxu0 %v2314_v3 }
 0xa20   :  { %v734_v15 = vpop.permute.xlu1 %733 }
 0xa21   :  { %v736_v16 = vadd.f32 %v734_v15, %v726_v13 }
 0xa23   :  { %2232 = vtanh.f32 %v736_v16  ;;  %v951_v57 = vrot.slane %v736_v16, 6 }
 0xa2d   :  { %v2233_v17 = vpop.eup %2232 }
 0xa2e   :  { %739 = vrot.lane.b32.xlu0 %v2233_v17, %s2320_s28 }
 0xaa0   :  { %v740_v18 = vpop.permute.xlu0 %739 }
 0xaa1   :  { %v2491_v19 = vmul.f32 %v2231_v9, %v740_v18 }
 0xaa3   :  { %v784_v21 = vrot.slane %v2491_v19, 4 }
 0xaa5   :  { %785 = vrot.lane.b32.xlu0 %v784_v21, %s2321_s29 }
 0xaf0   :  { %v934_v22 = vpop.f32.mrb[8].mxu0 }
 0xaf1   :  { %v2064_v23 = vpop.f32.mrb[9].mxu0  ;;  %939 = vrot.lane.b32.xlu1 %v934_v22, %s2317_s24 }
 0xb17   :  { %v786_v26 = vpop.permute.xlu0 %785 }
 0xb18   :  { %2056 = vmatmul.mubr.msk.f32.vlgmr.msra.gmra.mrb[6].mxu1 %vm28_vm0, %v786_v26 }
 0xb19   :  { %2151 = vmatpush3.bf16.msra.mxu1 %v2359_v6  ;;  %2069 = vmatprep.mubr.msk.f32.mxu1 %vm2315_vm1, %v2316_v4 }
 0xb1a   :  { %2155 = vmatprep.subr.bf16.mxu1 %v2314_v3 }
 0xb63   :  { %v940_v27 = vpop.permute.xlu1 %939 }
 0xb64   :  { %v942_v28 = vadd.f32 %v940_v27, %v2398_v24 }
 0xb66   :  { %2234 = vtanh.f32 %v942_v28  ;;  %v1924_v30 = vmul.f32 -1.442695, %v942_v28 }
 0xb68   :  { %2236 = vpow2.f32 %v1924_v30 }
 0xb70   :  { %v2235_v29 = vpop.eup %2234 }
 0xb71   :  { %982 = vrot.lane.b32.xlu1 %v2235_v29, %s2318_s27 }
 0xb72   :  { %v2237_v31 = vpop.eup %2236 }
 0xb73   :  { %v973_v32 = vadd.f32 1.0, %v2237_v31 }
 0xb75   :  { %2238 = vrcp.f32 %v973_v32 }
 0xb7f   :  { %v2239_v33 = vpop.eup %2238 }
 0xb80   :  { %v980_v41 = vmul.f32 %v2239_v33, %v978_v39 }
 0xbe3   :  { %v983_v34 = vpop.permute.xlu1 %982 }
 0xbe4   :  { %v985_v35 = vmul.f32 %v2239_v33, %v983_v34 }
 0xbe6   :  { %987 = vrot.lane.b32.xlu0 %v985_v35, %s2319_s3 }
 0xbeb   :  { %v855_v36 = vpop.f32.mrb[6].mxu1 }
 0xbec   :  { %v2057_v38 = vpop.f32.mrb[7].mxu1  ;;  %v860_v40 = vrot.slane %v855_v36, 2 }
 0xbee   :  { %v862_v45 = vadd.f32 %v860_v40, %v2395_v20 }
 0xbf0   :  { %v1923_v48 = vmul.f32 -1.442695, %v862_v45 }
 0xc58   :  { %v988_v42 = vpop.permute.xlu0 %987 }
 0xc59   :  { %v2505_v43 = vadd.f32 %v988_v42, %v980_v41 }
 0xc5b   :  { %2240 = vtanh.f32 %v2505_v43  ;;  %v1202_v28 = vrot.slane %v2505_v43, 2 }
 0xc5c   :  { %2242 = vtanh.f32 %v862_v45 }
 0xc5d   :  { %2244 = vpow2.f32 %v1923_v48 }
 0xc65   :  { %v2241_v46 = vpop.eup %2240 }
 0xc66   :  { %993 = vrot.lane.b32.xlu1 %v2241_v46, %s2320_s28  ;;  %v2243_v47 = vpop.eup %2242 }
 0xc67   :  { %v2245_v49 = vpop.eup %2244 }
 0xc68   :  { %v946_v50 = vadd.f32 1.0, %v2245_v49 }
 0xc6a   :  { %955 = vrot.lane.b32.xlu1 %v2243_v47, %s2318_s27  ;;  %2246 = vrcp.f32 %v946_v50 }
 0xc74   :  { %v2247_v53 = vpop.eup %2246 }
 0xc75   :  { %v953_v58 = vmul.f32 %v2247_v53, %v951_v57 }
 0xcd8   :  { %v994_v51 = vpop.permute.xlu1 %993 }
 0xcd9   :  { %v2511_v52 = vmul.f32 %v2239_v33, %v994_v51 }
 0xcdb   :  { %1087 = vrot.lane.b32.xlu0 %v2511_v52, %s2319_s3 }
 0xcdc   :  { %v956_v54 = vpop.permute.xlu1 %955 }
 0xcdd   :  { %v958_v55 = vmul.f32 %v2247_v53, %v956_v54 }
 0xcdf   :  { %960 = vrot.lane.b32.xlu0 %v958_v55, %s2319_s3 }
 0xd4d   :  { %v1088_v56 = vpop.permute.xlu0 %1087 }
 0xd4e   :  { %2077 = vmatmul.mubr.msk.f32.vlgmr.msra.gmra.mrb[10].mxu0 %vm28_vm0, %v1088_v56 }
 0xd4f   :  { %2160 = vmatpush3.bf16.msra.mxu0 %v2383_v14  ;;  %2090 = vmatprep.mubr.msk.f32.mxu0 %vm2315_vm1, %v2316_v4 }
 0xd50   :  { %2164 = vmatprep.subr.bf16.mxu0 %v2314_v3 }
 0xd51   :  { %v961_v59 = vpop.permute.xlu0 %960 }
 0xd52   :  { %v963_v60 = vadd.f32 %v961_v59, %v953_v58 }
 0xd54   :  { %2248 = vtanh.f32 %v963_v60  ;;  %v1175_v41 = vrot.slane %v963_v60, 6 }
 0xd5e   :  { %v2249_v61 = vpop.eup %2248 }
 0xd5f   :  { %966 = vrot.lane.b32.xlu1 %v2249_v61, %s2320_s28 }
 0xdd1   :  { %v967_v62 = vpop.permute.xlu1 %966 }
 0xdd2   :  { %v2522_v63 = vmul.f32 %v2247_v53, %v967_v62 }
 0xdd4   :  { %v1011_v0 = vrot.slane %v2522_v63, 6 }
 0xdd6   :  { %1012 = vrot.lane.b32.xlu0 %v1011_v0, %s2321_s29 }
 0xe21   :  { %v1157_v1 = vpop.f32.mrb[10].mxu0 }
 0xe22   :  { %v1162_v2 = vrot.slane %v1157_v1, 2  ;;  %v2078_v7 = vpop.f32.mrb[11].mxu0 }
 0xe24   :  { %1163 = vrot.lane.b32.xlu1 %v1162_v2, %s2317_s24 }
 0xe48   :  { %v1013_v8 = vpop.permute.xlu0 %1012 }
 0xe49   :  { %2070 = vmatmul.mubr.msk.f32.vlgmr.msra.gmra.mrb[8].mxu1 %vm28_vm0, %v1013_v8 }
 0xe4a   :  { %2157 = vmatpush3.bf16.msra.mxu1 %v2359_v6  ;;  %2083 = vmatprep.mubr.msk.f32.mxu1 %vm2315_vm1, %v2316_v4 }
 0xe4b   :  { %2161 = vmatprep.subr.bf16.mxu1 %v2314_v3 }
 0xe96   :  { %v1164_v9 = vpop.permute.xlu1 %1163 }
 0xe97   :  { %v1166_v10 = vadd.f32 %v1164_v9, %v2395_v20 }
 0xe99   :  { %2250 = vtanh.f32 %v1166_v10  ;;  %v1930_v12 = vmul.f32 -1.442695, %v1166_v10 }
 0xe9b   :  { %2252 = vpow2.f32 %v1930_v12 }
 0xea3   :  { %v2251_v11 = vpop.eup %2250 }
 0xea4   :  { %1206 = vrot.lane.b32.xlu0 %v2251_v11, %s2318_s27 }
 0xea5   :  { %v2253_v13 = vpop.eup %2252 }
 0xea6   :  { %v1197_v15 = vadd.f32 1.0, %v2253_v13 }
 0xea8   :  { %2254 = vrcp.f32 %v1197_v15 }
 0xeb2   :  { %v2255_v16 = vpop.eup %2254 }
 0xeb3   :  { %v1204_v29 = vmul.f32 %v2255_v16, %v1202_v28 }
 0xf16   :  { %v1207_v17 = vpop.permute.xlu0 %1206 }
 0xf17   :  { %v1209_v18 = vmul.f32 %v2255_v16, %v1207_v17 }
 0xf19   :  { %1211 = vrot.lane.b32.xlu1 %v1209_v18, %s2319_s3 }
 0xf1c   :  { %v1082_v21 = vpop.f32.mrb[8].mxu1 }
 0xf1d   :  { %v1086_v22 = vadd.f32 %v1082_v21, %v2398_v24  ;;  %v2071_v23 = vpop.f32.mrb[9].mxu1 }
 0xf1f   :  { %2256 = vtanh.f32 %v1086_v22  ;;  %v1929_v27 = vmul.f32 -1.442695, %v1086_v22 }
 0xf21   :  { %2258 = vpow2.f32 %v1929_v27 }
 0xf29   :  { %v2257_v26 = vpop.eup %2256 }
 0xf2a   :  { %1179 = vrot.lane.b32.xlu1 %v2257_v26, %s2318_s27 }
 0xf2b   :  { %v2259_v30 = vpop.eup %2258 }
 0xf2c   :  { %v1170_v33 = vadd.f32 1.0, %v2259_v30 }
 0xf8b   :  { %v1212_v31 = vpop.permute.xlu1 %1211 }
 0xf8c   :  { %v2538_v32 = vadd.f32 %v1212_v31, %v1204_v29 }
 0xf8e   :  { %2260 = vtanh.f32 %v2538_v32  ;;  %v1423_v17 = vrot.slane %v2538_v32, 2 }
 0xf8f   :  { %2262 = vrcp.f32 %v1170_v33 }
 0xf98   :  { %v2261_v34 = vpop.eup %2260 }
 0xf99   :  { %1217 = vrot.lane.b32.xlu0 %v2261_v34, %s2320_s28  ;;  %v2263_v35 = vpop.eup %2262 }
 0xf9a   :  { %v1177_v43 = vmul.f32 %v2263_v35, %v1175_v41 }
 0xf9c   :  { %v1180_v36 = vpop.permute.xlu1 %1179 }
 0xf9d   :  { %v1182_v38 = vmul.f32 %v2263_v35, %v1180_v36 }
 0xf9f   :  { %1184 = vrot.lane.b32.xlu1 %v1182_v38, %s2319_s3 }
0x100b   :  { %v1218_v39 = vpop.permute.xlu0 %1217 }
0x100c   :  { %v2543_v40 = vmul.f32 %v2255_v16, %v1218_v39 }
0x100e   :  { %v1307_v42 = vrot.slane %v2543_v40, 6 }
0x1010   :  { %1308 = vrot.lane.b32.xlu0 %v1307_v42, %s2319_s3 }
0x1011   :  { %v1185_v45 = vpop.permute.xlu1 %1184 }
0x1012   :  { %v1187_v46 = vadd.f32 %v1185_v45, %v1177_v43 }
0x1014   :  { %2264 = vtanh.f32 %v1187_v46  ;;  %v1396_v26 = vrot.slane %v1187_v46, 6 }
0x101e   :  { %v2265_v47 = vpop.eup %2264 }
0x101f   :  { %1190 = vrot.lane.b32.xlu0 %v2265_v47, %s2320_s28 }
0x1082   :  { %v1309_v48 = vpop.permute.xlu0 %1308 }
0x1083   :  { %2091 = vmatmul.mubr.msk.f32.vlgmr.msra.gmra.mrb[12].mxu0 %vm28_vm0, %v1309_v48 }
0x1084   :  { %2166 = vmatpush3.bf16.msra.mxu0 %v2383_v14  ;;  %2104 = vmatprep.mubr.msk.f32.mxu0 %vm2315_vm1, %v2316_v4 }
0x1085   :  { %2170 = vmatprep.subr.bf16.mxu0 %v2314_v3 }
0x1091   :  { %v1191_v49 = vpop.permute.xlu0 %1190 }
0x1092   :  { %v1193_v50 = vmul.f32 %v2263_v35, %v1191_v49 }
0x1094   :  { %1222 = vrot.lane.b32.xlu1 %v1193_v50, %s2321_s29 }
0x1106   :  { %v2554_v51 = vpop.permute.xlu1 %1222 }
0x1107   :  { %2084 = vmatmul.mubr.msk.f32.vlgmr.msra.gmra.mrb[10].mxu1 %vm28_vm0, %v2554_v51 }
0x1108   :  { %2163 = vmatpush3.bf16.msra.mxu1 %v2359_v6  ;;  %2097 = vmatprep.mubr.msk.f32.mxu1 %vm2315_vm1, %v2316_v4 }
0x1109   :  { %2167 = vmatprep.subr.bf16.mxu1 %v2314_v3 }
0x1156   :  { %v1378_v53 = vpop.f32.mrb[12].mxu0 }
0x1157   :  { %v1383_v54 = vrot.slane %v1378_v53, 4  ;;  %v2092_v55 = vpop.f32.mrb[13].mxu0 }
0x1159   :  { %1384 = vrot.lane.b32.xlu0 %v1383_v54, %s2317_s24 }
0x11cb   :  { %v1385_v56 = vpop.permute.xlu0 %1384 }
0x11cc   :  { %v1387_v57 = vadd.f32 %v1385_v56, %v2395_v20 }
0x11ce   :  { %2266 = vtanh.f32 %v1387_v57  ;;  %v1936_v3 = vmul.f32 -1.442695, %v1387_v57 }
0x11d8   :  { %v2267_v58 = vpop.eup %2266 }
0x11d9   :  { %1427 = vrot.lane.b32.xlu1 %v2267_v58, %s2318_s27 }
0x11da   :  { %v1299_v59 = vpop.f32.mrb[10].mxu1 }
0x11db   :  { %v1304_v60 = vrot.slane %v1299_v59, 6  ;;  %v2085_v61 = vpop.f32.mrb[11].mxu1 }
0x11dd   :  { %v1306_v62 = vadd.f32 %v1304_v60, %v2398_v24 }
0x11df   :  { %2268 = vtanh.f32 %v1306_v62  ;;  %v1935_v7 = vmul.f32 -1.442695, %v1306_v62 }
0x11e0   :  { %2270 = vpow2.f32 %v1936_v3 }
0x11e9   :  { %v2269_v0 = vpop.eup %2268 }
0x11ea   :  { %1400 = vrot.lane.b32.xlu1 %v2269_v0, %s2318_s27  ;;  %v2271_v1 = vpop.eup %2270 }
0x11eb   :  { %v1418_v2 = vadd.f32 1.0, %v2271_v1 }
0x11ed   :  { %2272 = vrcp.f32 %v1418_v2 }
0x11ee   :  { %2274 = vpow2.f32 %v1935_v7 }
0x11f7   :  { %v2273_v8 = vpop.eup %2272 }
0x11f8   :  { %v2275_v9 = vpop.eup %2274  ;;  %v1425_v18 = vmul.f32 %v2273_v8, %v1423_v17 }
0x11f9   :  { %v1391_v12 = vadd.f32 1.0, %v2275_v9 }
0x11fb   :  { %2276 = vrcp.f32 %v1391_v12 }
0x1205   :  { %v2277_v13 = vpop.eup %2276 }
0x1206   :  { %v1398_v27 = vmul.f32 %v2277_v13, %v1396_v26 }
0x124b   :  { %v1428_v10 = vpop.permute.xlu1 %1427 }
0x124c   :  { %v1430_v11 = vmul.f32 %v2273_v8, %v1428_v10 }
0x124e   :  { %1432 = vrot.lane.b32.xlu0 %v1430_v11, %s2319_s3 }
0x125c   :  { %v1401_v15 = vpop.permute.xlu1 %1400 }
0x125d   :  { %v1403_v16 = vmul.f32 %v2277_v13, %v1401_v15 }
0x125f   :  { %1405 = vrot.lane.b32.xlu1 %v1403_v16, %s2319_s3 }
0x12c0   :  { %v1433_v21 = vpop.permute.xlu0 %1432 }
0x12c1   :  { %v2570_v22 = vadd.f32 %v1433_v21, %v1425_v18 }
0x12c3   :  { %2278 = vtanh.f32 %v2570_v22  ;;  %v1647_v9 = vrot.slane %v2570_v22, 2 }
0x12cd   :  { %v2279_v23 = vpop.eup %2278 }
0x12ce   :  { %1438 = vrot.lane.b32.xlu0 %v2279_v23, %s2320_s28 }
0x12d1   :  { %v1406_v28 = vpop.permute.xlu1 %1405 }
0x12d2   :  { %v1408_v29 = vadd.f32 %v1406_v28, %v1398_v27 }
0x12d4   :  { %2280 = vtanh.f32 %v1408_v29  ;;  %v1620_v3 = vrot.slane %v1408_v29, 6 }
0x12de   :  { %v2281_v30 = vpop.eup %2280 }
0x12df   :  { %1411 = vrot.lane.b32.xlu1 %v2281_v30, %s2320_s28 }
0x1340   :  { %v1439_v31 = vpop.permute.xlu0 %1438 }
0x1341   :  { %v2575_v33 = vmul.f32 %v2273_v8, %v1439_v31 }
0x1343   :  { %v1531_v32 = vrot.slane %v2575_v33, 4 }
0x1345   :  { %1532 = vrot.lane.b32.xlu0 %v1531_v32, %s2319_s3 }
0x1351   :  { %v1412_v34 = vpop.permute.xlu1 %1411 }
0x1352   :  { %v2579_v35 = vmul.f32 %v2277_v13, %v1412_v34 }
0x1354   :  { %v1452_v36 = vrot.slane %v2579_v35, 2 }
0x1356   :  { %1453 = vrot.lane.b32.xlu0 %v1452_v36, %s2321_s29 }
0x13b7   :  { %v1533_v38 = vpop.permute.xlu0 %1532 }
0x13b8   :  { %2105 = vmatmul.mubr.msk.f32.vlgmr.msra.gmra.mrb[14].mxu0 %vm28_vm0, %v1533_v38 }
0x13b9   :  { %2172 = vmatpush3.bf16.msra.mxu0 %v2383_v14  ;;  %2118 = vmatprep.mubr.msk.f32.mxu0 %vm2315_vm1, %v2316_v4 }
0x13c8   :  { %v1454_v39 = vpop.permute.xlu0 %1453 }
0x13c9   :  { %2098 = vmatmul.mubr.msk.f32.vlgmr.msra.gmra.mrb[12].mxu1 %vm28_vm0, %v1454_v39 }
0x13ca   :  { %2169 = vmatpush3.bf16.msra.mxu1 %v2359_v6  ;;  %2111 = vmatprep.mubr.msk.f32.mxu1 %vm2315_vm1, %v2316_v4 }
0x148b   :  { %v1602_v41 = vpop.f32.mrb[14].mxu0 }
0x148c   :  { %v1607_v42 = vrot.slane %v1602_v41, 6  ;;  %v2106_v43 = vpop.f32.mrb[15].mxu0 }
0x148e   :  { %1608 = vrot.lane.b32.xlu1 %v1607_v42, %s2317_s24 }
0x149c   :  { %v1523_v45 = vpop.f32.mrb[12].mxu1 }
0x149d   :  { %v1528_v46 = vrot.slane %v1523_v45, 4  ;;  %v2099_v47 = vpop.f32.mrb[13].mxu1 }
0x149f   :  { %v1530_v14 = vadd.f32 %v1528_v46, %v2398_v24 }
0x14a1   :  { %2282 = vtanh.f32 %v1530_v14  ;;  %v1941_v49 = vmul.f32 -1.442695, %v1530_v14 }
0x14a3   :  { %2284 = vpow2.f32 %v1941_v49 }
0x14ab   :  { %v2283_v48 = vpop.eup %2282 }
0x14ac   :  { %1624 = vrot.lane.b32.xlu1 %v2283_v48, %s2318_s27 }
0x14ad   :  { %v2285_v4 = vpop.eup %2284 }
0x14ae   :  { %v1615_v54 = vadd.f32 1.0, %v2285_v4 }
0x1500   :  { %v1609_v50 = vpop.permute.xlu1 %1608 }
0x1501   :  { %v1611_v6 = vadd.f32 %v1609_v50, %v2395_v20 }
0x1503   :  { %2286 = vtanh.f32 %v1611_v6  ;;  %v1942_v58 = vmul.f32 -1.442695, %v1611_v6 }
0x1504   :  { %2288 = vrcp.f32 %v1615_v54 }
0x1505   :  { %2290 = vpow2.f32 %v1942_v58 }
0x150d   :  { %v2287_v53 = vpop.eup %2286 }
0x150e   :  { %1651 = vrot.lane.b32.xlu0 %v2287_v53, %s2318_s27  ;;  %v2289_v55 = vpop.eup %2288 }
0x150f   :  { %v2291_v59 = vpop.eup %2290  ;;  %v1622_v1 = vmul.f32 %v2289_v55, %v1620_v3 }
0x1510   :  { %v1642_v60 = vadd.f32 1.0, %v2291_v59 }
0x1512   :  { %2292 = vrcp.f32 %v1642_v60 }
0x151c   :  { %v2293_v61 = vpop.eup %2292 }
0x151d   :  { %v1649_v10 = vmul.f32 %v2293_v61, %v1647_v9 }
0x151e   :  { %v1625_v56 = vpop.permute.xlu1 %1624 }
0x151f   :  { %v1627_v57 = vmul.f32 %v2289_v55, %v1625_v56 }
0x1521   :  { %1629 = vrot.lane.b32.xlu1 %v1627_v57, %s2319_s3 }
0x1580   :  { %v1652_v62 = vpop.permute.xlu0 %1651 }
0x1581   :  { %v1654_v0 = vmul.f32 %v2293_v61, %v1652_v62 }
0x1583   :  { %1656 = vrot.lane.b32.xlu0 %v1654_v0, %s2319_s3 }
0x1593   :  { %v1630_v2 = vpop.permute.xlu1 %1629 }
0x1594   :  { %v1632_v7 = vadd.f32 %v1630_v2, %v1622_v1 }
0x1596   :  { %2294 = vtanh.f32 %v1632_v7  ;;  %v1843_v47 = vrot.slane %v1632_v7, 6 }
0x15a0   :  { %v2295_v8 = vpop.eup %2294 }
0x15a1   :  { %1635 = vrot.lane.b32.xlu1 %v2295_v8, %s2320_s28 }
0x15f5   :  { %v1657_v11 = vpop.permute.xlu0 %1656 }
0x15f6   :  { %v2600_v12 = vadd.f32 %v1657_v11, %v1649_v10 }
0x15f8   :  { %2296 = vtanh.f32 %v2600_v12  ;;  %v1870_v59 = vrot.slane %v2600_v12, 2 }
0x1602   :  { %v2297_v13 = vpop.eup %2296 }
0x1603   :  { %1662 = vrot.lane.b32.xlu0 %v2297_v13, %s2320_s28 }
0x1613   :  { %v1636_v15 = vpop.permute.xlu1 %1635 }
0x1614   :  { %v1638_v16 = vmul.f32 %v2289_v55, %v1636_v15 }
0x1616   :  { %v1676_v17 = vrot.slane %v1638_v16, 4 }
0x1618   :  { %1677 = vrot.lane.b32.xlu1 %v1676_v17, %s2321_s29 }
0x1675   :  { %v1663_v18 = vpop.permute.xlu0 %1662 }
0x1676   :  { %v2605_v21 = vmul.f32 %v2293_v61, %v1663_v18 }
0x1678   :  { %v1755_v23 = vrot.slane %v2605_v21, 2 }
0x167a   :  { %1756 = vrot.lane.b32.xlu0 %v1755_v23, %s2319_s3 }
0x168a   :  { %v1678_v22 = vpop.permute.xlu1 %1677 }
0x168b   :  { %2112 = vmatmul.mubr.msk.f32.vlgmr.msra.gmra.mrb[14].mxu1 %vm28_vm0, %v1678_v22 }
0x16ec   :  { %v1757_v26 = vpop.permute.xlu0 %1756 }
0x16ed   :  { %2119 = vmatmul.mubr.msk.f32.vlgmr.msra.gmra.mrb[16].mxu0 %vm28_vm0, %v1757_v26 }
0x175e   :  { %v1747_v27 = vpop.f32.mrb[14].mxu1 }
0x175f   :  { %v1752_v28 = vrot.slane %v1747_v27, 2  ;;  %v2113_v29 = vpop.f32.mrb[15].mxu1 }
0x1761   :  { %v1754_v30 = vadd.f32 %v1752_v28, %v2398_v24 }
0x1763   :  { %2298 = vtanh.f32 %v1754_v30  ;;  %v1947_v34 = vmul.f32 -1.442695, %v1754_v30 }
0x1765   :  { %2300 = vpow2.f32 %v1947_v34 }
0x176d   :  { %v2299_v31 = vpop.eup %2298 }
0x176e   :  { %1847 = vrot.lane.b32.xlu1 %v2299_v31, %s2318_s27 }
0x176f   :  { %v2301_v38 = vpop.eup %2300 }
0x1770   :  { %v1838_v39 = vadd.f32 1.0, %v2301_v38 }
0x1772   :  { %2302 = vrcp.f32 %v1838_v39 }
0x177c   :  { %v2303_v41 = vpop.eup %2302 }
0x177d   :  { %v1845_v14 = vmul.f32 %v2303_v41, %v1843_v47 }
0x17c0   :  { %v1826_v32 = vpop.f32.mrb[16].mxu0 }
0x17c1   :  { %1831 = vrot.lane.b32.xlu0 %v1826_v32, %s2317_s24  ;;  %v2120_v36 = vpop.f32.mrb[17].mxu0 }
0x17e0   :  { %v1848_v42 = vpop.permute.xlu1 %1847 }
0x17e1   :  { %v1850_v43 = vmul.f32 %v2303_v41, %v1848_v42 }
0x17e3   :  { %1852 = vrot.lane.b32.xlu1 %v1850_v43, %s2319_s3 }
0x1833   :  { %v1832_v45 = vpop.permute.xlu0 %1831 }
0x1834   :  { %v1834_v24 = vadd.f32 %v1832_v45, %v2395_v20 }
0x1836   :  { %2304 = vtanh.f32 %v1834_v24  ;;  %v1948_v20 = vmul.f32 -1.442695, %v1834_v24 }
0x1840   :  { %v2305_v46 = vpop.eup %2304 }
0x1841   :  { %1874 = vrot.lane.b32.xlu0 %v2305_v46, %s2318_s27 }
0x1855   :  { %v1853_v48 = vpop.permute.xlu1 %1852 }
0x1856   :  { %v1855_v49 = vadd.f32 %v1853_v48, %v1845_v14 }
0x1858   :  { %2306 = vtanh.f32 %v1855_v49 }
0x1859   :  { %2308 = vpow2.f32 %v1948_v20 }
0x1862   :  { %v2307_v50 = vpop.eup %2306 }
0x1863   :  { %1858 = vrot.lane.b32.xlu1 %v2307_v50, %s2320_s28  ;;  %v2309_v6 = vpop.eup %2308 }
0x1864   :  { %v1865_v4 = vadd.f32 1.0, %v2309_v6 }
0x1866   :  { %2310 = vrcp.f32 %v1865_v4 }
0x1867   :  { %325 = vrot.lane.b32.xlu1 %v2409_v44, %s2320_s28 }
0x186b   :  { %550 = vrot.lane.b32.xlu1 %v2444_v25, %s2320_s28 }
0x186f   :  { %778 = vrot.lane.b32.xlu1 %v2479_v5, %s2320_s28 }
0x1870   :  { %v2311_v44 = vpop.eup %2310 }
0x1871   :  { %v1872_v60 = vmul.f32 %v2311_v44, %v1870_v59 }
0x1873   :  { %1005 = vrot.lane.b32.xlu1 %v2511_v52, %s2320_s28 }
0x1877   :  { %1443 = vrot.lane.b32.xlu1 %v2579_v35, %s2321_s29 }
0x187b   :  { %1667 = vrot.lane.b32.xlu1 %v1638_v16, %s2321_s29 }
0x18b3   :  { %v1875_v53 = vpop.permute.xlu0 %1874 }
0x18b4   :  { %v1877_v54 = vmul.f32 %v2311_v44, %v1875_v53 }
0x18b6   :  { %1879 = vrot.lane.b32.xlu0 %v1877_v54, %s2319_s3 }
0x18d5   :  { %v1859_v25 = vpop.permute.xlu1 %1858 }
0x18d6   :  { %v1861_v5 = vmul.f32 %v2303_v41, %v1859_v25 }
0x18d8   :  { %1890 = vrot.lane.b32.xlu1 %v1861_v5, %s2321_s29 }
0x18d9   :  { %v326_v52 = vpop.permute.xlu1 %325 }
0x18da   :  { %1908 = vst.msk [vmem:[%s2709_s4 + $0x8] sm:$0xc0] %vm329_vm3, %v326_v52 }
0x18dd   :  { %v551_v35 = vpop.permute.xlu1 %550 }
0x18de   :  { %1914 = vst.msk [vmem:[%s2709_s4 + $0x8] sm:$0x30] %vm554_vm4, %v551_v35 }
0x18e1   :  { %v779_v55 = vpop.permute.xlu1 %778 }
0x18e2   :  { %1920 = vst.msk [vmem:[%s2709_s4 + $0x8] sm:$0xc] %vm782_vm5, %v779_v55 }
0x18e5   :  { %v1006_v56 = vpop.permute.xlu1 %1005 }
0x18e6   :  { %1926 = vst.msk [vmem:[%s2709_s4 + $0x8] sm:$0x3] %vm1009_vm6, %v1006_v56 }
0x18e7   :  { %1931 = vst.msk [vmem:[%s2709_s4 + $0x8] sm:$0x3] %vm322_vm2, %v2554_v51 }
0x18e9   :  { %v1444_v57 = vpop.permute.xlu1 %1443 }
0x18ea   :  { %1937 = vst.msk [vmem:[%s2709_s4 + $0x8] sm:$0xc] %vm547_vm7, %v1444_v57 }
0x18ed   :  { %v1668_v58 = vpop.permute.xlu1 %1667 }
0x18ee   :  { %1943 = vst.msk [vmem:[%s2709_s4 + $0x8] sm:$0x30] %vm775_vm8, %v1668_v58 }
0x1928   :  { %v1880_v61 = vpop.permute.xlu0 %1879 }
0x1929   :  { %v1882_v62 = vadd.f32 %v1880_v61, %v1872_v60 }
0x192b   :  { %2312 = vtanh.f32 %v1882_v62 }
0x1935   :  { %v2313_v51 = vpop.eup %2312 }
0x1936   :  { %1885 = vrot.lane.b32.xlu0 %v2313_v51, %s2320_s28 }
0x193a   :  { %543 = vrot.lane.b32.xlu0 %v2459_v37, %s2321_s29 }
0x193e   :  { %771 = vrot.lane.b32.xlu0 %v2491_v19, %s2321_s29 }
0x1942   :  { %998 = vrot.lane.b32.xlu0 %v2522_v63, %s2321_s29 }
0x1946   :  { %1227 = vrot.lane.b32.xlu0 %v2543_v40, %s2320_s28 }
0x194a   :  { %v1891_v0 = vpop.permute.xlu1 %1890  ;;  %1448 = vrot.lane.b32.xlu0 %v2575_v33, %s2320_s28 }
0x194b   :  { %1949 = vst.msk [vmem:[%s2709_s4 + $0x8] sm:$0xc0] %vm1002_vm9, %v1891_v0 }
0x194e   :  { %1672 = vrot.lane.b32.xlu0 %v2605_v21, %s2320_s28 }
0x19a8   :  { %v1886_v37 = vpop.permute.xlu0 %1885 }
0x19a9   :  { %v1888_v19 = vmul.f32 %v2311_v44, %v1886_v37 }
0x19ab   :  { %1895 = vrot.lane.b32.xlu0 %v1888_v19, %s2320_s28 }
0x19ac   :  { %v544_v63 = vpop.permute.xlu0 %543 }
0x19ad   :  { %1913 = vst.msk [vmem:[%s2709_s4] sm:$0xc] %vm547_vm7, %v544_v63 }
0x19b0   :  { %v772_v40 = vpop.permute.xlu0 %771 }
0x19b1   :  { %1919 = vst.msk [vmem:[%s2709_s4] sm:$0x30] %vm775_vm8, %v772_v40 }
0x19b4   :  { %v999_v33 = vpop.permute.xlu0 %998 }
0x19b5   :  { %1925 = vst.msk [vmem:[%s2709_s4] sm:$0xc0] %vm1002_vm9, %v999_v33 }
0x19b8   :  { %v1228_v3 = vpop.permute.xlu0 %1227 }
0x19b9   :  { %1932 = vst.msk [vmem:[%s2709_s4] sm:$0xc0] %vm329_vm3, %v1228_v3 }
0x19bc   :  { %v1449_v1 = vpop.permute.xlu0 %1448 }
0x19bd   :  { %1938 = vst.msk [vmem:[%s2709_s4] sm:$0x30] %vm554_vm4, %v1449_v1 }
0x19c0   :  { %v1673_v2 = vpop.permute.xlu0 %1672 }
0x19c1   :  { %1944 = vst.msk [vmem:[%s2709_s4] sm:$0xc] %vm782_vm5, %v1673_v2 }
0x1a1d   :  { %v1896_v7 = vpop.permute.xlu0 %1895 }
0x1a1e   :  { %1898 = vst.msk [vmem:[%s2709_s4] sm:$0x3] %vm1009_vm6, %v1896_v7 }

// kernel: esim_forward.9
= control target key start
LH: loop header
LB: loop body
LE: loop exit
PB: predicated region body
PF: predicated region fallthrough
CT: control target
= control target key end

     0   :  { %vm28_vm0 = vcmask 130048   ;;  %v1768_v3 = vmov 0.0|0.0   ;;  %vm1769_vm1 = vmmov 0   ;;  %v1770_v4 = vmov 0.0   ;;  %s1771_s24 = smov 64   ;;  %s1772_s27 = smov 96   ;;  %s2065_s2 = inlined_call_operand.vmem [shape: f32[16,128], index: 2, kind: input, shape index: {}]   ;;  %s2066_s1 = inlined_call_operand.vmem [shape: f32[16,128], index: 1, kind: input, shape index: {}]   ;;  %s2067_s0 = inlined_call_operand.vmem [shape: f32[12,16], index: 0, kind: input, shape index: {}]   ;;  %s2068_s3 = inlined_call_operand.vmem [shape: f32[1,128], index: 3, kind: input, shape index: {}]   ;;  %s2069_s4 = inlined_call_operand.vmem [shape: f32[6,2,32], index: 4, kind: output, shape index: {}]  }
   0x1   :  { %v110_v0 = vld [vmem:[%s2065_s2] sm:$0xff]  ;;  %v111_v1 = vld [vmem:[%s2065_s2 + $0x8] sm:$0xff]  ;;  %1623 = vmatprep.subr.bf16.mxu1 %v1768_v3  ;;  %1539 = vmatprep.mubr.msk.f32.mxu1 %vm1769_vm1, %v1770_v4  ;;  %s1774_s28 = smov 32   ;;  %s1775_s29 = smov 80   ;;  %vm322_vm2 = vcmask 123904   ;;  %vm329_vm3 = vcmask 257154  }
   0x2   :  { %v19_v2 = vld [vmem:[%s2066_s1] sm:$0xff]  ;;  %v1667_v5 = vpack.i.bf16 %v111_v1, %v110_v0  ;;  %v1813_v6 = vpack.c.bf16 %v111_v1, %v110_v0  ;;  %v20_v7 = vld [vmem:[%s2066_s1 + $0x8] sm:$0xff]  ;;  %vm553_vm4 = vcmask 255104   ;;  %vm780_vm5 = vcmask 261254  }
   0x3   :  { %v17_v8 = vld [vmem:[%s2067_s0] sm:$0xff]  ;;  %v1619_v9 = vpack.c.bf16 %v20_v7, %v19_v2  ;;  %v18_v10 = vld [vmem:[%s2067_s0 + $0x8] sm:$0xf]  ;;  %vm546_vm6 = vcmask 125954   ;;  %vm773_vm7 = vcmask 128004   ;;  %vm1006_vm8 = vcmask 259204  }
   0x4   :  { %1532 = vmatprep.mubr.msk.f32.mxu0 %vm28_vm0, %v17_v8  ;;  %1668 = vrot.lane.b32.xlu0 %v1667_v5, %s1771_s24  ;;  %v1453_v16 = vld [vmem:[%s2068_s3] ss:$0 sm:$0xff]  ;;  %s1773_s3 = smov 16   ;;  %vm1000_vm9 = vcmask 130054  }
   0x5   :  { %1625 = vmatpush3.bf16.msra.mxu1 %v1813_v6  ;;  %1620 = vmatprep.subr.bf16.mxu0 %v1619_v9 }
   0x6   :  { %1629 = vmatprep.subr.bf16.mxu1 %v1768_v3  ;;  %1622 = vmatpush3.bf16.msra.mxu0 %v1619_v9 }
   0x7   :  { %1626 = vmatprep.subr.bf16.mxu0 %v1768_v3 }
   0x8   :  { %1540 = vmatmul.mubr.f32.vlgmr.msra.gmra.mrb[0].mxu1 %v1770_v4 }
   0x9   :  { %1631 = vmatpush3.bf16.msra.mxu1 %v1813_v6  ;;  %1553 = vmatprep.mubr.msk.f32.mxu1 %vm1769_vm1, %v1770_v4 }
   0xa   :  { %1533 = vmatmul.mubr.msk.f32.vlgmr.msra.gmra.mrb[0].mxu0 %vm28_vm0, %v18_v10  ;;  %1635 = vmatprep.subr.bf16.mxu1 %v1768_v3 }
   0xb   :  { %1546 = vmatprep.mubr.msk.f32.mxu0 %vm1769_vm1, %v1770_v4 }
  0x76   :  { %v1669_v11 = vpop.permute.xlu0 %1668 }
  0x77   :  { %v1671_v12 = vunpack.i.h.bf16 %v1669_v11  ;;  %v1670_v13 = vunpack.i.l.bf16 %v1669_v11 }
  0x79   :  { %v1837_v14 = vpack.c.bf16 %v1671_v12, %v1670_v13 }
  0x7b   :  { %1628 = vmatpush3.bf16.msra.mxu0 %v1837_v14 }
  0x7c   :  { %1632 = vmatprep.subr.bf16.mxu0 %v1768_v3 }
  0x7e   :  { %1547 = vmatmul.mubr.f32.vlgmr.msra.gmra.mrb[2].mxu0 %v1770_v4 }
  0x7f   :  { %1634 = vmatpush3.bf16.msra.mxu0 %v1837_v14  ;;  %1560 = vmatprep.mubr.msk.f32.mxu0 %vm1769_vm1, %v1770_v4 }
  0x80   :  { %1638 = vmatprep.subr.bf16.mxu0 %v1768_v3 }
  0xdb   :  { %v181_v15 = vpop.f32.mrb[0].mxu1 }
  0xdc   :  { %v1541_v17 = vpop.f32.mrb[1].mxu1 }
  0xdd   :  { %v1534_v18 = vpop.f32.mrb[0].mxu0 }
  0xde   :  { %v101_v19 = vpop.f32.mrb[1].mxu0  ;;  %v1852_v24 = vadd.f32 %v1534_v18, %v1453_v16 }
  0xdf   :  { %v1849_v20 = vadd.f32 %v1453_v16, %v101_v19 }
  0xe1   :  { %v185_v37 = vadd.f32 %v181_v15, %v1849_v20 }
  0xe3   :  { %v1456_v40 = vmul.f32 -1.442695, %v185_v37 }
 0x151   :  { %v260_v21 = vpop.f32.mrb[2].mxu0 }
 0x152   :  { %v265_v22 = vrot.slane %v260_v21, 6  ;;  %v1548_v23 = vpop.f32.mrb[3].mxu0 }
 0x154   :  { %266 = vrot.lane.b32.xlu0 %v265_v22, %s1771_s24 }
 0x1c6   :  { %v267_v25 = vpop.permute.xlu0 %266 }
 0x1c7   :  { %v269_v26 = vadd.f32 %v267_v25, %v1852_v24 }
 0x1c9   :  { %1672 = vtanh.f32 %v269_v26  ;;  %v1457_v28 = vmul.f32 -1.442695, %v269_v26 }
 0x1cb   :  { %1674 = vpow2.f32 %v1457_v28 }
 0x1d3   :  { %v1673_v27 = vpop.eup %1672 }
 0x1d4   :  { %303 = vrot.lane.b32.xlu1 %v1673_v27, %s1772_s27 }
 0x1d5   :  { %v1675_v29 = vpop.eup %1674 }
 0x1d6   :  { %v297_v30 = vadd.f32 1.0, %v1675_v29 }
 0x1d8   :  { %1676 = vrcp.f32 %v297_v30 }
 0x1e2   :  { %v1677_v31 = vpop.eup %1676 }
 0x1e3   :  { %v301_v34 = vmul.f32 0.0, %v1677_v31 }
 0x246   :  { %v304_v32 = vpop.permute.xlu1 %303 }
 0x247   :  { %v306_v33 = vmul.f32 %v1677_v31, %v304_v32 }
 0x249   :  { %308 = vrot.lane.b32.xlu1 %v306_v33, %s1773_s3 }
 0x2bb   :  { %v309_v35 = vpop.permute.xlu1 %308 }
 0x2bc   :  { %v1857_v36 = vadd.f32 %v309_v35, %v301_v34 }
 0x2be   :  { %1678 = vtanh.f32 %v1857_v36  ;;  %v522_v9 = vrot.slane %v1857_v36, 2 }
 0x2bf   :  { %1680 = vtanh.f32 %v185_v37 }
 0x2c0   :  { %1682 = vpow2.f32 %v1456_v40 }
 0x2c8   :  { %v1679_v38 = vpop.eup %1678 }
 0x2c9   :  { %314 = vrot.lane.b32.xlu0 %v1679_v38, %s1774_s28  ;;  %v1681_v39 = vpop.eup %1680 }
 0x2ca   :  { %v1683_v41 = vpop.eup %1682 }
 0x2cb   :  { %v273_v42 = vadd.f32 1.0, %v1683_v41 }
 0x2cd   :  { %279 = vrot.lane.b32.xlu0 %v1681_v39, %s1772_s27  ;;  %1684 = vrcp.f32 %v273_v42 }
 0x2d7   :  { %v1685_v47 = vpop.eup %1684 }
 0x2d8   :  { %v277_v50 = vmul.f32 0.0, %v1685_v47 }
 0x33b   :  { %v315_v43 = vpop.permute.xlu0 %314 }
 0x33c   :  { %v1863_v44 = vmul.f32 %v1677_v31, %v315_v43 }
 0x33e   :  { %v407_v45 = vrot.slane %v1863_v44, 2 }
 0x33f   :  { %v280_v46 = vpop.permute.xlu0 %279 }
 0x340   :  { %408 = vrot.lane.b32.xlu1 %v407_v45, %s1773_s3  ;;  %v282_v48 = vmul.f32 %v1685_v47, %v280_v46 }
 0x344   :  { %284 = vrot.lane.b32.xlu1 %v282_v48, %s1773_s3 }
 0x3b2   :  { %v409_v49 = vpop.permute.xlu1 %408 }
 0x3b3   :  { %1561 = vmatmul.mubr.msk.f32.vlgmr.msra.gmra.mrb[4].mxu0 %vm28_vm0, %v409_v49 }
 0x3b4   :  { %1640 = vmatpush3.bf16.msra.mxu0 %v1837_v14  ;;  %1574 = vmatprep.mubr.msk.f32.mxu0 %vm1769_vm1, %v1770_v4 }
 0x3b5   :  { %1644 = vmatprep.subr.bf16.mxu0 %v1768_v3 }
 0x3b6   :  { %v285_v51 = vpop.permute.xlu1 %284 }
 0x3b7   :  { %v1873_v52 = vadd.f32 %v285_v51, %v277_v50 }
 0x3b9   :  { %1686 = vtanh.f32 %v1873_v52  ;;  %v495_v29 = vrot.slane %v1873_v52, 6 }
 0x3c3   :  { %v1687_v53 = vpop.eup %1686 }
 0x3c4   :  { %290 = vrot.lane.b32.xlu0 %v1687_v53, %s1774_s28 }
 0x436   :  { %v291_v54 = vpop.permute.xlu0 %290 }
 0x437   :  { %v293_v55 = vmul.f32 %v1685_v47, %v291_v54 }
 0x439   :  { %319 = vrot.lane.b32.xlu0 %v293_v55, %s1775_s29 }
 0x486   :  { %v478_v56 = vpop.f32.mrb[4].mxu0 }
 0x487   :  { %v1562_v57 = vpop.f32.mrb[5].mxu0  ;;  %483 = vrot.lane.b32.xlu1 %v478_v56, %s1771_s24 }
 0x4ab   :  { %v320_v58 = vpop.permute.xlu0 %319 }
 0x4ac   :  { %323 = vst.msk [vmem:[%s2069_s4] sm:$0x3] %vm322_vm2, %v320_v58  ;;  %1554 = vmatmul.mubr.msk.f32.vlgmr.msra.gmra.mrb[2].mxu1 %vm28_vm0, %v320_v58 }
 0x4ad   :  { %1637 = vmatpush3.bf16.msra.mxu1 %v1813_v6  ;;  %1567 = vmatprep.mubr.msk.f32.mxu1 %vm1769_vm1, %v1770_v4 }
 0x4ae   :  { %1641 = vmatprep.subr.bf16.mxu1 %v1768_v3 }
 0x4f9   :  { %v484_v59 = vpop.permute.xlu1 %483 }
 0x4fa   :  { %v486_v60 = vadd.f32 %v484_v59, %v1852_v24 }
 0x4fc   :  { %1688 = vtanh.f32 %v486_v60  ;;  %v1462_v62 = vmul.f32 -1.442695, %v486_v60 }
 0x4fe   :  { %1690 = vpow2.f32 %v1462_v62 }
 0x506   :  { %v1689_v61 = vpop.eup %1688 }
 0x507   :  { %526 = vrot.lane.b32.xlu1 %v1689_v61, %s1772_s27 }
 0x508   :  { %v1691_v63 = vpop.eup %1690 }
 0x509   :  { %v517_v0 = vadd.f32 1.0, %v1691_v63 }
 0x50b   :  { %1692 = vrcp.f32 %v517_v0 }
 0x515   :  { %v1693_v1 = vpop.eup %1692 }
 0x516   :  { %v524_v11 = vmul.f32 %v1693_v1, %v522_v9 }
 0x579   :  { %v527_v2 = vpop.permute.xlu1 %526 }
 0x57a   :  { %v529_v5 = vmul.f32 %v1693_v1, %v527_v2 }
 0x57c   :  { %531 = vrot.lane.b32.xlu0 %v529_v5, %s1773_s3 }
 0x57f   :  { %v399_v7 = vpop.f32.mrb[2].mxu1 }
 0x580   :  { %v1555_v8 = vpop.f32.mrb[3].mxu1  ;;  %v404_v10 = vrot.slane %v399_v7, 6 }
 0x582   :  { %v406_v15 = vadd.f32 %v404_v10, %v1849_v20 }
 0x584   :  { %v1461_v18 = vmul.f32 -1.442695, %v406_v15 }
 0x5ee   :  { %v532_v12 = vpop.permute.xlu0 %531 }
 0x5ef   :  { %v1892_v13 = vadd.f32 %v532_v12, %v524_v11 }
 0x5f1   :  { %1694 = vtanh.f32 %v1892_v13  ;;  %v749_v57 = vrot.slane %v1892_v13, 2 }
 0x5f2   :  { %1696 = vtanh.f32 %v406_v15 }
 0x5f3   :  { %1698 = vpow2.f32 %v1461_v18 }
 0x5fb   :  { %v1695_v16 = vpop.eup %1694 }
 0x5fc   :  { %537 = vrot.lane.b32.xlu1 %v1695_v16, %s1774_s28  ;;  %v1697_v17 = vpop.eup %1696 }
 0x5fd   :  { %v1699_v19 = vpop.eup %1698 }
 0x5fe   :  { %v490_v21 = vadd.f32 1.0, %v1699_v19 }
 0x600   :  { %499 = vrot.lane.b32.xlu1 %v1697_v17, %s1772_s27  ;;  %1700 = vrcp.f32 %v490_v21 }
 0x60a   :  { %v1701_v25 = vpop.eup %1700 }
 0x60b   :  { %v497_v30 = vmul.f32 %v1701_v25, %v495_v29 }
 0x66e   :  { %v538_v22 = vpop.permute.xlu1 %537 }
 0x66f   :  { %v1898_v23 = vmul.f32 %v1693_v1, %v538_v22 }
 0x671   :  { %634 = vrot.lane.b32.xlu0 %v1898_v23, %s1773_s3 }
 0x672   :  { %v500_v26 = vpop.permute.xlu1 %499 }
 0x673   :  { %v502_v27 = vmul.f32 %v1701_v25, %v500_v26 }
 0x675   :  { %504 = vrot.lane.b32.xlu0 %v502_v27, %s1773_s3 }
 0x6e3   :  { %v635_v28 = vpop.permute.xlu0 %634 }
 0x6e4   :  { %1575 = vmatmul.mubr.msk.f32.vlgmr.msra.gmra.mrb[6].mxu0 %vm28_vm0, %v635_v28 }
 0x6e5   :  { %1646 = vmatpush3.bf16.msra.mxu0 %v1837_v14  ;;  %1588 = vmatprep.mubr.msk.f32.mxu0 %vm1769_vm1, %v1770_v4 }
 0x6e6   :  { %1650 = vmatprep.subr.bf16.mxu0 %v1768_v3 }
 0x6e7   :  { %v505_v31 = vpop.permute.xlu0 %504 }
 0x6e8   :  { %v507_v32 = vadd.f32 %v505_v31, %v497_v30 }
 0x6ea   :  { %1702 = vtanh.f32 %v507_v32  ;;  %v722_v9 = vrot.slane %v507_v32, 6 }
 0x6f4   :  { %v1703_v33 = vpop.eup %1702 }
 0x6f5   :  { %510 = vrot.lane.b32.xlu1 %v1703_v33, %s1774_s28 }
 0x767   :  { %v511_v34 = vpop.permute.xlu1 %510 }
 0x768   :  { %v1910_v35 = vmul.f32 %v1701_v25, %v511_v34 }
 0x76a   :  { %v555_v36 = vrot.slane %v1910_v35, 2 }
 0x76c   :  { %556 = vrot.lane.b32.xlu0 %v555_v36, %s1775_s29 }
 0x7b7   :  { %v704_v37 = vpop.f32.mrb[6].mxu0 }
 0x7b8   :  { %v709_v38 = vrot.slane %v704_v37, 2  ;;  %v1576_v39 = vpop.f32.mrb[7].mxu0 }
 0x7ba   :  { %710 = vrot.lane.b32.xlu1 %v709_v38, %s1771_s24 }
 0x7de   :  { %v557_v40 = vpop.permute.xlu0 %556 }
 0x7df   :  { %1568 = vmatmul.mubr.msk.f32.vlgmr.msra.gmra.mrb[4].mxu1 %vm28_vm0, %v557_v40 }
 0x7e0   :  { %1643 = vmatpush3.bf16.msra.mxu1 %v1813_v6  ;;  %1581 = vmatprep.mubr.msk.f32.mxu1 %vm1769_vm1, %v1770_v4 }
 0x7e1   :  { %1647 = vmatprep.subr.bf16.mxu1 %v1768_v3 }
 0x82c   :  { %v711_v41 = vpop.permute.xlu1 %710 }
 0x82d   :  { %v713_v42 = vadd.f32 %v711_v41, %v1849_v20 }
 0x82f   :  { %1704 = vtanh.f32 %v713_v42  ;;  %v1468_v45 = vmul.f32 -1.442695, %v713_v42 }
 0x831   :  { %1706 = vpow2.f32 %v1468_v45 }
 0x839   :  { %v1705_v43 = vpop.eup %1704 }
 0x83a   :  { %753 = vrot.lane.b32.xlu0 %v1705_v43, %s1772_s27 }
 0x83b   :  { %v1707_v46 = vpop.eup %1706 }
 0x83c   :  { %v744_v47 = vadd.f32 1.0, %v1707_v46 }
 0x83e   :  { %1708 = vrcp.f32 %v744_v47 }
 0x848   :  { %v1709_v48 = vpop.eup %1708 }
 0x849   :  { %v751_v58 = vmul.f32 %v1709_v48, %v749_v57 }
 0x8ac   :  { %v754_v49 = vpop.permute.xlu0 %753 }
 0x8ad   :  { %v756_v50 = vmul.f32 %v1709_v48, %v754_v49 }
 0x8af   :  { %758 = vrot.lane.b32.xlu1 %v756_v50, %s1773_s3 }
 0x8b2   :  { %v626_v51 = vpop.f32.mrb[4].mxu1 }
 0x8b3   :  { %v631_v52 = vrot.slane %v626_v51, 4  ;;  %v1569_v53 = vpop.f32.mrb[5].mxu1 }
 0x8b5   :  { %v633_v54 = vadd.f32 %v631_v52, %v1849_v20 }
 0x8b7   :  { %1710 = vtanh.f32 %v633_v54  ;;  %v1467_v56 = vmul.f32 -1.442695, %v633_v54 }
 0x8b9   :  { %1712 = vpow2.f32 %v1467_v56 }
 0x8c1   :  { %v1711_v55 = vpop.eup %1710 }
 0x8c2   :  { %726 = vrot.lane.b32.xlu1 %v1711_v55, %s1772_s27 }
 0x8c3   :  { %v1713_v61 = vpop.eup %1712 }
 0x8c4   :  { %v717_v62 = vadd.f32 1.0, %v1713_v61 }
 0x921   :  { %v759_v59 = vpop.permute.xlu1 %758 }
 0x922   :  { %v1926_v60 = vadd.f32 %v759_v59, %v751_v58 }
 0x924   :  { %1714 = vtanh.f32 %v1926_v60  ;;  %v977_v47 = vrot.slane %v1926_v60, 2 }
 0x925   :  { %1716 = vrcp.f32 %v717_v62 }
 0x92e   :  { %v1715_v63 = vpop.eup %1714 }
 0x92f   :  { %764 = vrot.lane.b32.xlu0 %v1715_v63, %s1774_s28  ;;  %v1717_v0 = vpop.eup %1716 }
 0x930   :  { %v724_v10 = vmul.f32 %v1717_v0, %v722_v9 }
 0x934   :  { %v727_v1 = vpop.permute.xlu1 %726 }
 0x935   :  { %v729_v2 = vmul.f32 %v1717_v0, %v727_v1 }
 0x937   :  { %731 = vrot.lane.b32.xlu1 %v729_v2, %s1773_s3 }
 0x9a1   :  { %v765_v5 = vpop.permute.xlu0 %764 }
 0x9a2   :  { %v1931_v7 = vmul.f32 %v1709_v48, %v765_v5 }
 0x9a4   :  { %v861_v8 = vrot.slane %v1931_v7, 6 }
 0x9a6   :  { %862 = vrot.lane.b32.xlu0 %v861_v8, %s1773_s3 }
 0x9a9   :  { %v732_v11 = vpop.permute.xlu1 %731 }
 0x9aa   :  { %v734_v12 = vadd.f32 %v732_v11, %v724_v10 }
 0x9ac   :  { %1718 = vtanh.f32 %v734_v12  ;;  %v950_v52 = vrot.slane %v734_v12, 6 }
 0x9b6   :  { %v1719_v13 = vpop.eup %1718 }
 0x9b7   :  { %737 = vrot.lane.b32.xlu0 %v1719_v13, %s1774_s28 }
 0xa18   :  { %v863_v15 = vpop.permute.xlu0 %862 }
 0xa19   :  { %1589 = vmatmul.mubr.msk.f32.vlgmr.msra.gmra.mrb[8].mxu0 %vm28_vm0, %v863_v15 }
 0xa1a   :  { %1652 = vmatpush3.bf16.msra.mxu0 %v1837_v14  ;;  %1602 = vmatprep.mubr.msk.f32.mxu0 %vm1769_vm1, %v1770_v4 }
 0xa1b   :  { %1656 = vmatprep.subr.bf16.mxu0 %v1768_v3 }
 0xa29   :  { %v738_v16 = vpop.permute.xlu0 %737 }
 0xa2a   :  { %v1941_v17 = vmul.f32 %v1717_v0, %v738_v16 }
 0xa2c   :  { %v782_v18 = vrot.slane %v1941_v17, 4 }
 0xa2e   :  { %783 = vrot.lane.b32.xlu1 %v782_v18, %s1775_s29 }
 0xaa0   :  { %v784_v19 = vpop.permute.xlu1 %783 }
 0xaa1   :  { %1582 = vmatmul.mubr.msk.f32.vlgmr.msra.gmra.mrb[6].mxu1 %vm28_vm0, %v784_v19 }
 0xaa2   :  { %1649 = vmatpush3.bf16.msra.mxu1 %v1813_v6  ;;  %1595 = vmatprep.mubr.msk.f32.mxu1 %vm1769_vm1, %v1770_v4 }
 0xaa3   :  { %1653 = vmatprep.subr.bf16.mxu1 %v1768_v3 }
 0xaec   :  { %v932_v21 = vpop.f32.mrb[8].mxu0 }
 0xaed   :  { %v937_v22 = vrot.slane %v932_v21, 4  ;;  %v1590_v25 = vpop.f32.mrb[9].mxu0 }
 0xaef   :  { %938 = vrot.lane.b32.xlu0 %v937_v22, %s1771_s24 }
 0xb61   :  { %v939_v26 = vpop.permute.xlu0 %938 }
 0xb62   :  { %v941_v27 = vadd.f32 %v939_v26, %v1849_v20 }
 0xb64   :  { %1720 = vtanh.f32 %v941_v27  ;;  %v1474_v3 = vmul.f32 -1.442695, %v941_v27 }
 0xb6e   :  { %v1721_v28 = vpop.eup %1720 }
 0xb6f   :  { %981 = vrot.lane.b32.xlu1 %v1721_v28, %s1772_s27 }
 0xb74   :  { %v853_v29 = vpop.f32.mrb[6].mxu1 }
 0xb75   :  { %v858_v30 = vrot.slane %v853_v29, 2  ;;  %v1583_v31 = vpop.f32.mrb[7].mxu1 }
 0xb77   :  { %v860_v32 = vadd.f32 %v858_v30, %v1849_v20 }
 0xb79   :  { %1722 = vtanh.f32 %v860_v32  ;;  %v1473_v37 = vmul.f32 -1.442695, %v860_v32 }
 0xb7a   :  { %1724 = vpow2.f32 %v1474_v3 }
 0xb83   :  { %v1723_v33 = vpop.eup %1722 }
 0xb84   :  { %954 = vrot.lane.b32.xlu1 %v1723_v33, %s1772_s27  ;;  %v1725_v34 = vpop.eup %1724 }
 0xb85   :  { %v972_v36 = vadd.f32 1.0, %v1725_v34 }
 0xb87   :  { %1726 = vrcp.f32 %v972_v36 }
 0xb88   :  { %1728 = vpow2.f32 %v1473_v37 }
 0xb91   :  { %v1727_v38 = vpop.eup %1726 }
 0xb92   :  { %v1729_v41 = vpop.eup %1728  ;;  %v979_v48 = vmul.f32 %v1727_v38, %v977_v47 }
 0xb93   :  { %v945_v42 = vadd.f32 1.0, %v1729_v41 }
 0xb95   :  { %1730 = vrcp.f32 %v945_v42 }
 0xb9f   :  { %v1731_v43 = vpop.eup %1730 }
 0xba0   :  { %v952_v53 = vmul.f32 %v1731_v43, %v950_v52 }
 0xbe1   :  { %v982_v39 = vpop.permute.xlu1 %981 }
 0xbe2   :  { %v984_v40 = vmul.f32 %v1727_v38, %v982_v39 }
 0xbe4   :  { %986 = vrot.lane.b32.xlu0 %v984_v40, %s1773_s3 }
 0xbf6   :  { %v955_v45 = vpop.permute.xlu1 %954 }
 0xbf7   :  { %v957_v46 = vmul.f32 %v1731_v43, %v955_v45 }
 0xbf9   :  { %959 = vrot.lane.b32.xlu1 %v957_v46, %s1773_s3 }
 0xc56   :  { %v987_v49 = vpop.permute.xlu0 %986 }
 0xc57   :  { %v1958_v50 = vadd.f32 %v987_v49, %v979_v48 }
 0xc59   :  { %1732 = vtanh.f32 %v1958_v50  ;;  %v1200_v3 = vrot.slane %v1958_v50, 2 }
 0xc63   :  { %v1733_v51 = vpop.eup %1732 }
 0xc64   :  { %992 = vrot.lane.b32.xlu0 %v1733_v51, %s1774_s28 }
 0xc6b   :  { %v960_v54 = vpop.permute.xlu1 %959 }
 0xc6c   :  { %v962_v55 = vadd.f32 %v960_v54, %v952_v53 }
 0xc6e   :  { %1734 = vtanh.f32 %v962_v55  ;;  %v1173_v29 = vrot.slane %v962_v55, 6 }
 0xc78   :  { %v1735_v56 = vpop.eup %1734 }
 0xc79   :  { %965 = vrot.lane.b32.xlu1 %v1735_v56, %s1774_s28 }
 0xcd6   :  { %v993_v57 = vpop.permute.xlu0 %992 }
 0xcd7   :  { %v1963_v58 = vmul.f32 %v1727_v38, %v993_v57 }
 0xcd9   :  { %v1084_v59 = vrot.slane %v1963_v58, 4 }
 0xcdb   :  { %1085 = vrot.lane.b32.xlu0 %v1084_v59, %s1773_s3 }
 0xceb   :  { %v966_v60 = vpop.permute.xlu1 %965 }
 0xcec   :  { %v1967_v61 = vmul.f32 %v1731_v43, %v966_v60 }
 0xcee   :  { %v1008_v62 = vrot.slane %v1967_v61, 6 }
 0xcf0   :  { %1009 = vrot.lane.b32.xlu0 %v1008_v62, %s1775_s29 }
 0xd4d   :  { %v1086_v63 = vpop.permute.xlu0 %1085 }
 0xd4e   :  { %1603 = vmatmul.mubr.msk.f32.vlgmr.msra.gmra.mrb[10].mxu0 %vm28_vm0, %v1086_v63 }
 0xd4f   :  { %1658 = vmatpush3.bf16.msra.mxu0 %v1837_v14  ;;  %1616 = vmatprep.mubr.msk.f32.mxu0 %vm1769_vm1, %v1770_v4 }
 0xd62   :  { %v1010_v0 = vpop.permute.xlu0 %1009 }
 0xd63   :  { %1596 = vmatmul.mubr.msk.f32.vlgmr.msra.gmra.mrb[8].mxu1 %vm28_vm0, %v1010_v0 }
 0xd64   :  { %1655 = vmatpush3.bf16.msra.mxu1 %v1813_v6  ;;  %1609 = vmatprep.mubr.msk.f32.mxu1 %vm1769_vm1, %v1770_v4 }
 0xe21   :  { %v1155_v1 = vpop.f32.mrb[10].mxu0 }
 0xe22   :  { %v1160_v2 = vrot.slane %v1155_v1, 6  ;;  %v1604_v5 = vpop.f32.mrb[11].mxu0 }
 0xe24   :  { %1161 = vrot.lane.b32.xlu1 %v1160_v2, %s1771_s24 }
 0xe36   :  { %v1079_v8 = vpop.f32.mrb[8].mxu1 }
 0xe37   :  { %v1083_v9 = vadd.f32 %v1079_v8, %v1852_v24  ;;  %v1597_v14 = vpop.f32.mrb[9].mxu1 }
 0xe39   :  { %1736 = vtanh.f32 %v1083_v9  ;;  %v1479_v12 = vmul.f32 -1.442695, %v1083_v9 }
 0xe43   :  { %v1737_v10 = vpop.eup %1736 }
 0xe44   :  { %1177 = vrot.lane.b32.xlu1 %v1737_v10, %s1772_s27 }
 0xe96   :  { %v1162_v11 = vpop.permute.xlu1 %1161 }
 0xe97   :  { %v1164_v6 = vadd.f32 %v1162_v11, %v1849_v20 }
 0xe99   :  { %1738 = vtanh.f32 %v1164_v6  ;;  %v1480_v21 = vmul.f32 -1.442695, %v1164_v6 }
 0xe9a   :  { %1740 = vpow2.f32 %v1479_v12 }
 0xea3   :  { %v1739_v4 = vpop.eup %1738 }
 0xea4   :  { %1204 = vrot.lane.b32.xlu0 %v1739_v4, %s1772_s27  ;;  %v1741_v13 = vpop.eup %1740 }
 0xea5   :  { %v1168_v15 = vadd.f32 1.0, %v1741_v13 }
 0xea7   :  { %1742 = vrcp.f32 %v1168_v15 }
 0xea8   :  { %1744 = vpow2.f32 %v1480_v21 }
 0xeb1   :  { %v1743_v16 = vpop.eup %1742 }
 0xeb2   :  { %v1745_v22 = vpop.eup %1744  ;;  %v1175_v30 = vmul.f32 %v1743_v16, %v1173_v29 }
 0xeb3   :  { %v1195_v25 = vadd.f32 1.0, %v1745_v22 }
 0xeb5   :  { %1746 = vrcp.f32 %v1195_v25 }
 0xeb6   :  { %v1178_v18 = vpop.permute.xlu1 %1177 }
 0xeb7   :  { %v1180_v19 = vmul.f32 %v1743_v16, %v1178_v18 }
 0xeb9   :  { %1182 = vrot.lane.b32.xlu1 %v1180_v19, %s1773_s3 }
 0xebf   :  { %v1747_v26 = vpop.eup %1746 }
 0xec0   :  { %v1202_v34 = vmul.f32 %v1747_v26, %v1200_v3 }
 0xf16   :  { %v1205_v27 = vpop.permute.xlu0 %1204 }
 0xf17   :  { %v1207_v28 = vmul.f32 %v1747_v26, %v1205_v27 }
 0xf19   :  { %1209 = vrot.lane.b32.xlu0 %v1207_v28, %s1773_s3 }
 0xf2b   :  { %v1183_v31 = vpop.permute.xlu1 %1182 }
 0xf2c   :  { %v1185_v32 = vadd.f32 %v1183_v31, %v1175_v30 }
 0xf2e   :  { %1748 = vtanh.f32 %v1185_v32  ;;  %v1393_v0 = vrot.slane %v1185_v32, 6 }
 0xf38   :  { %v1749_v33 = vpop.eup %1748 }
 0xf39   :  { %1188 = vrot.lane.b32.xlu1 %v1749_v33, %s1774_s28 }
 0xf8b   :  { %v1210_v36 = vpop.permute.xlu0 %1209 }
 0xf8c   :  { %v1988_v37 = vadd.f32 %v1210_v36, %v1202_v34 }
 0xf8e   :  { %1750 = vtanh.f32 %v1988_v37  ;;  %v1420_v4 = vrot.slane %v1988_v37, 2 }
 0xf98   :  { %v1751_v38 = vpop.eup %1750 }
 0xf99   :  { %1215 = vrot.lane.b32.xlu0 %v1751_v38, %s1774_s28 }
 0xfab   :  { %v1189_v39 = vpop.permute.xlu1 %1188 }
 0xfac   :  { %v1191_v40 = vmul.f32 %v1743_v16, %v1189_v39 }
 0xfae   :  { %1220 = vrot.lane.b32.xlu1 %v1191_v40, %s1775_s29 }
0x100b   :  { %v1216_v41 = vpop.permute.xlu0 %1215 }
0x100c   :  { %v1993_v42 = vmul.f32 %v1747_v26, %v1216_v41 }
0x100e   :  { %v1305_v43 = vrot.slane %v1993_v42, 2 }
0x1010   :  { %1306 = vrot.lane.b32.xlu0 %v1305_v43, %s1773_s3 }
0x1020   :  { %v1221_v45 = vpop.permute.xlu1 %1220 }
0x1021   :  { %1610 = vmatmul.mubr.msk.f32.vlgmr.msra.gmra.mrb[10].mxu1 %vm28_vm0, %v1221_v45 }
0x1082   :  { %v1307_v46 = vpop.permute.xlu0 %1306 }
0x1083   :  { %1617 = vmatmul.mubr.msk.f32.vlgmr.msra.gmra.mrb[12].mxu0 %vm28_vm0, %v1307_v46 }
0x10f4   :  { %v1297_v47 = vpop.f32.mrb[10].mxu1 }
0x10f5   :  { %v1302_v48 = vrot.slane %v1297_v47, 6  ;;  %v1611_v49 = vpop.f32.mrb[11].mxu1 }
0x10f7   :  { %v1304_v50 = vadd.f32 %v1302_v48, %v1852_v24 }
0x10f9   :  { %1752 = vtanh.f32 %v1304_v50  ;;  %v1485_v53 = vmul.f32 -1.442695, %v1304_v50 }
0x10fb   :  { %1754 = vpow2.f32 %v1485_v53 }
0x1103   :  { %v1753_v51 = vpop.eup %1752 }
0x1104   :  { %1397 = vrot.lane.b32.xlu1 %v1753_v51, %s1772_s27 }
0x1105   :  { %v1755_v55 = vpop.eup %1754 }
0x1106   :  { %v1388_v56 = vadd.f32 1.0, %v1755_v55 }
0x1108   :  { %1756 = vrcp.f32 %v1388_v56 }
0x1112   :  { %v1757_v57 = vpop.eup %1756 }
0x1113   :  { %v1395_v1 = vmul.f32 %v1757_v57, %v1393_v0 }
0x1156   :  { %v1376_v52 = vpop.f32.mrb[12].mxu0 }
0x1157   :  { %1381 = vrot.lane.b32.xlu0 %v1376_v52, %s1771_s24  ;;  %v1618_v54 = vpop.f32.mrb[13].mxu0 }
0x1176   :  { %v1398_v59 = vpop.permute.xlu1 %1397 }
0x1177   :  { %v1400_v60 = vmul.f32 %v1757_v57, %v1398_v59 }
0x1179   :  { %1402 = vrot.lane.b32.xlu1 %v1400_v60, %s1773_s3 }
0x11c9   :  { %v1382_v62 = vpop.permute.xlu0 %1381 }
0x11ca   :  { %v1384_v24 = vadd.f32 %v1382_v62, %v1849_v20 }
0x11cc   :  { %1758 = vtanh.f32 %v1384_v24  ;;  %v1486_v20 = vmul.f32 -1.442695, %v1384_v24 }
0x11d6   :  { %v1759_v63 = vpop.eup %1758 }
0x11d7   :  { %1424 = vrot.lane.b32.xlu0 %v1759_v63, %s1772_s27 }
0x11eb   :  { %v1403_v2 = vpop.permute.xlu1 %1402 }
0x11ec   :  { %v1405_v5 = vadd.f32 %v1403_v2, %v1395_v1 }
0x11ee   :  { %1760 = vtanh.f32 %v1405_v5 }
0x11ef   :  { %1762 = vpow2.f32 %v1486_v20 }
0x11f8   :  { %v1761_v8 = vpop.eup %1760 }
0x11f9   :  { %1408 = vrot.lane.b32.xlu1 %v1761_v8, %s1774_s28  ;;  %v1763_v9 = vpop.eup %1762 }
0x11fa   :  { %v1415_v14 = vadd.f32 1.0, %v1763_v9 }
0x11fc   :  { %1764 = vrcp.f32 %v1415_v14 }
0x11fd   :  { %325 = vrot.lane.b32.xlu1 %v1863_v44, %s1774_s28 }
0x1201   :  { %549 = vrot.lane.b32.xlu1 %v1898_v23, %s1774_s28 }
0x1205   :  { %776 = vrot.lane.b32.xlu1 %v1931_v7, %s1774_s28 }
0x1206   :  { %v1765_v10 = vpop.eup %1764 }
0x1207   :  { %v1422_v13 = vmul.f32 %v1765_v10, %v1420_v4 }
0x1209   :  { %1003 = vrot.lane.b32.xlu1 %v1963_v58, %s1774_s28 }
0x1249   :  { %v1425_v11 = vpop.permute.xlu0 %1424 }
0x124a   :  { %v1427_v12 = vmul.f32 %v1765_v10, %v1425_v11 }
0x124c   :  { %1429 = vrot.lane.b32.xlu0 %v1427_v12, %s1773_s3 }
0x126b   :  { %v1409_v44 = vpop.permute.xlu1 %1408 }
0x126c   :  { %v1411_v6 = vmul.f32 %v1757_v57, %v1409_v44 }
0x126e   :  { %1440 = vrot.lane.b32.xlu1 %v1411_v6, %s1775_s29 }
0x126f   :  { %v326_v23 = vpop.permute.xlu1 %325 }
0x1270   :  { %1458 = vst.msk [vmem:[%s2069_s4 + $0x8] sm:$0xc] %vm329_vm3, %v326_v23 }
0x1273   :  { %v550_v7 = vpop.permute.xlu1 %549 }
0x1274   :  { %1464 = vst.msk [vmem:[%s2069_s4 + $0x8] sm:$0x3] %vm553_vm4, %v550_v7 }
0x1275   :  { %1481 = vst.msk [vmem:[%s2069_s4 + $0x8] sm:$0x3] %vm322_vm2, %v1221_v45 }
0x1277   :  { %v777_v58 = vpop.permute.xlu1 %776 }
0x1278   :  { %1470 = vst.msk [vmem:[%s2069_s4] sm:$0xc0] %vm780_vm5, %v777_v58 }
0x127b   :  { %v1004_v19 = vpop.permute.xlu1 %1003 }
0x12be   :  { %v1430_v15 = vpop.permute.xlu0 %1429 }
0x12bf   :  { %v1432_v16 = vadd.f32 %v1430_v15, %v1422_v13 }
0x12c1   :  { %1766 = vtanh.f32 %v1432_v16 }
0x12cb   :  { %v1767_v18 = vpop.eup %1766 }
0x12cc   :  { %1435 = vrot.lane.b32.xlu0 %v1767_v18, %s1774_s28 }
0x12d0   :  { %542 = vrot.lane.b32.xlu0 %v1910_v35, %s1775_s29 }
0x12d4   :  { %769 = vrot.lane.b32.xlu0 %v1941_v17, %s1775_s29 }
0x12d8   :  { %997 = vrot.lane.b32.xlu0 %v1967_v61, %s1775_s29 }
0x12dc   :  { %1225 = vrot.lane.b32.xlu0 %v1993_v42, %s1774_s28 }
0x12e0   :  { %v1441_v21 = vpop.permute.xlu1 %1440 }
0x12e1   :  { %1487 = vst.msk [vmem:[%s2069_s4 + $0x8] sm:$0xc] %vm546_vm6, %v1441_v21 }
0x133e   :  { %v1436_v22 = vpop.permute.xlu0 %1435 }
0x133f   :  { %v1438_v25 = vmul.f32 %v1765_v10, %v1436_v22 }
0x1341   :  { %1445 = vrot.lane.b32.xlu0 %v1438_v25, %s1774_s28 }
0x1342   :  { %v543_v35 = vpop.permute.xlu0 %542 }
0x1343   :  { %1463 = vst.msk [vmem:[%s2069_s4] sm:$0xc] %vm546_vm6, %v543_v35 }
0x1346   :  { %v770_v17 = vpop.permute.xlu0 %769 }
0x1347   :  { %1469 = vst.msk [vmem:[%s2069_s4] sm:$0x30] %vm773_vm7, %v770_v17 }
0x1348   :  { %1476 = vst.msk [vmem:[%s2069_s4] sm:$0x30] %vm1006_vm8, %v1004_v19 }
0x134a   :  { %v998_v61 = vpop.permute.xlu0 %997 }
0x134b   :  { %1475 = vst.msk [vmem:[%s2069_s4] sm:$0xc0] %vm1000_vm9, %v998_v61 }
0x134e   :  { %v1226_v26 = vpop.permute.xlu0 %1225 }
0x134f   :  { %1482 = vst.msk [vmem:[%s2069_s4] sm:$0xc] %vm329_vm3, %v1226_v26 }
0x13b3   :  { %v1446_v27 = vpop.permute.xlu0 %1445 }
0x13b4   :  { %1448 = vst.msk [vmem:[%s2069_s4] sm:$0x3] %vm553_vm4, %v1446_v27 }

// kernel: esim_forward.12
= control target key start
LH: loop header
LB: loop body
LE: loop exit
PB: predicated region body
PF: predicated region fallthrough
CT: control target
= control target key end

     0   :  { %vm35_vm0 = vcmask 261120   ;;  %vm299_vm1 = vcmask 257024   ;;  %s490_s2 = inlined_call_operand.vmem [shape: f32[32,32], index: 2, kind: input, shape index: {}]   ;;  %s491_s0 = inlined_call_operand.vmem [shape: f32[12,32], index: 0, kind: input, shape index: {}]   ;;  %s492_s3 = inlined_call_operand.vmem [shape: f32[32,32], index: 3, kind: input, shape index: {}]   ;;  %s493_s4 = inlined_call_operand.vmem [shape: f32[32,32], index: 4, kind: input, shape index: {}]   ;;  %s494_s1 = inlined_call_operand.vmem [shape: f32[12,32], index: 1, kind: input, shape index: {}]   ;;  %s495_s5 = inlined_call_operand.vmem [shape: f32[1,32], index: 5, kind: input, shape index: {}]   ;;  %s496_s6 = inlined_call_operand.vmem [shape: f32[12,32], index: 6, kind: output, shape index: {}]  }
   0x1   :  { %v27_v0 = vld [vmem:[%s490_s2] sm:$0xff]  ;;  %v28_v1 = vld [vmem:[%s490_s2 + $0x8] sm:$0xff]  ;;  %v29_v2 = vld [vmem:[%s490_s2 + $0x10] sm:$0xff] }
   0x2   :  { %v371_v3 = vpack.c.bf16 %v28_v1, %v27_v0  ;;  %v30_v4 = vld [vmem:[%s490_s2 + $0x18] sm:$0xff]  ;;  %v23_v5 = vld [vmem:[%s491_s0] sm:$0xff]  ;;  %v32_v8 = vld [vmem:[%s492_s3 + $0x8] sm:$0xff] }
   0x3   :  { %v375_v6 = vpack.c.bf16 %v30_v4, %v29_v2  ;;  %349 = vmatprep.mubr.msk.f32.mxu0 %vm35_vm0, %v23_v5  ;;  %v31_v7 = vld [vmem:[%s492_s3] sm:$0xff]  ;;  %v201_v11 = vld [vmem:[%s493_s4 + $0x8] sm:$0xff]  ;;  %v33_v12 = vld [vmem:[%s492_s3 + $0x10] sm:$0xff] }
   0x4   :  { %v200_v9 = vld [vmem:[%s493_s4] sm:$0xff]  ;;  %372 = vmatprep.subr.bf16.mxu0 %v371_v3  ;;  %v363_v10 = vpack.c.bf16 %v32_v8, %v31_v7  ;;  %v34_v13 = vld [vmem:[%s492_s3 + $0x18] sm:$0xff]  ;;  %v202_v17 = vld [vmem:[%s493_s4 + $0x10] sm:$0xff] }
   0x5   :  { %374 = vmatpush3.bf16.msra.mxu0 %v371_v3  ;;  %v367_v14 = vpack.c.bf16 %v34_v13, %v33_v12  ;;  %v25_v15 = vld [vmem:[%s494_s1] sm:$0xff]  ;;  %v379_v16 = vpack.c.bf16 %v201_v11, %v200_v9  ;;  %v203_v18 = vld [vmem:[%s493_s4 + $0x18] sm:$0xff]  ;;  %v24_v19 = vld [vmem:[%s491_s0 + $0x8] sm:$0xf] }
   0x6   :  { %376 = vmatprep.subr.bf16.mxu0 %v375_v6  ;;  %364 = vmatprep.subr.bf16.mxu1 %v363_v10  ;;  %v198_v20 = vmul.f32 %v25_v15, %v23_v5  ;;  %v383_v21 = vpack.c.bf16 %v203_v18, %v202_v17  ;;  %v26_v22 = vld [vmem:[%s494_s1 + $0x8] sm:$0xf]  ;;  %v311_v27 = vld [vmem:[%s495_s5] ss:$0 sm:$0xff] }
   0x7   :  { %366 = vmatpush3.bf16.msra.mxu1 %v363_v10  ;;  %338 = vmatprep.mubr.msk.f32.mxu1 %vm35_vm0, %v25_v15  ;;  %v199_v23 = vmul.f32 %v26_v22, %v24_v19 }
   0x8   :  { %368 = vmatprep.subr.bf16.mxu1 %v367_v14 }
   0x9   :  { %378 = vmatpush3.bf16.msra.mxu0 %v375_v6 }
   0xa   :  { %380 = vmatprep.subr.bf16.mxu0 %v379_v16 }
   0xb   :  { %370 = vmatpush3.bf16.msra.mxu1 %v367_v14 }
   0xc   :  { %350 = vmatmul.mubr.msk.f32.vlgmr.msra.gmra.mrb[0].mxu0 %vm35_vm0, %v24_v19 }
   0xd   :  { %382 = vmatpush3.bf16.msra.mxu0 %v379_v16  ;;  %360 = vmatprep.mubr.msk.f32.mxu0 %vm35_vm0, %v198_v20 }
   0xe   :  { %384 = vmatprep.subr.bf16.mxu0 %v383_v21  ;;  %339 = vmatmul.mubr.msk.f32.vlgmr.msra.gmra.mrb[0].mxu1 %vm35_vm0, %v26_v22 }
  0x11   :  { %386 = vmatpush3.bf16.msra.mxu0 %v383_v21 }
  0x14   :  { %361 = vmatmul.mubr.msk.f32.vlgmr.msra.gmra.mrb[0].mxu0 %vm35_vm0, %v199_v23 }
  0xe1   :  { %v340_v24 = vpop.f32.mrb[0].mxu1 }
  0xe2   :  { %v108_v25 = vpop.f32.mrb[1].mxu1 }
  0xe7   :  { %v362_v26 = vpop.f32.mrb[0].mxu0 }
  0xe8   :  { %v387_v28 = vadd.f32 %v362_v26, %v340_v24  ;;  %v276_v29 = vpop.f32.mrb[1].mxu0 }
  0xe9   :  { %v388_v30 = vadd.f32 %v276_v29, %v108_v25 }
  0xea   :  { %v295_v31 = vadd.f32 %v387_v28, %v311_v27 }
  0xeb   :  { %v294_v32 = vadd.f32 %v388_v30, %v311_v27 }
  0xec   :  { %v297_v33 = vmax.f32 %v295_v31, 0.0 }
  0xed   :  { %v296_v34 = vmax.f32 %v294_v32, 0.0 }
  0xee   :  { %300 = vst.msk [vmem:[%s496_s6 + $0x8] sm:$0xf] %vm299_vm1, %v297_v33 }
  0xef   :  { %298 = vst.msk [vmem:[%s496_s6] sm:$0xff] %vm35_vm0, %v296_v34 }

// kernel: esim_forward.14
= control target key start
LH: loop header
LB: loop body
LE: loop exit
PB: predicated region body
PF: predicated region fallthrough
CT: control target
= control target key end

     0   :  { %v1776_v3 = vmov 0.0|0.0   ;;  %vm30_vm0 = vcmask 261120   ;;  %vm1777_vm1 = vmmov 0   ;;  %v1778_v4 = vmov 0.0   ;;  %s1779_s28 = smov 64   ;;  %s1780_s5 = smov 96   ;;  %s2068_s2 = inlined_call_operand.vmem [shape: f32[16,128], index: 2, kind: input, shape index: {}]   ;;  %s2069_s1 = inlined_call_operand.vmem [shape: f32[32,128], index: 1, kind: input, shape index: {}]   ;;  %s2070_s0 = inlined_call_operand.vmem [shape: f32[12,32], index: 0, kind: input, shape index: {}]   ;;  %s2071_s3 = inlined_call_operand.vmem [shape: f32[1,128], index: 3, kind: input, shape index: {}]   ;;  %s2072_s4 = inlined_call_operand.vmem [shape: f32[2,64], index: 4, kind: output, shape index: {}]  }
   0x1   :  { %v112_v0 = vld [vmem:[%s2068_s2] sm:$0xff]  ;;  %v113_v1 = vld [vmem:[%s2068_s2 + $0x8] sm:$0xff]  ;;  %1630 = vmatprep.subr.bf16.mxu1 %v1776_v3  ;;  %1542 = vmatprep.mubr.msk.f32.mxu1 %vm1777_vm1, %v1778_v4  ;;  %v21_v8 = vld [vmem:[%s2069_s1 + $0x10] sm:$0xff]  ;;  %s1782_s6 = smov 32   ;;  %vm114_vm2 = vcmask 130048   ;;  %s1783_s7 = smov 80  }
   0x2   :  { %v19_v2 = vld [vmem:[%s2069_s1] sm:$0xff]  ;;  %v1675_v5 = vpack.i.bf16 %v113_v1, %v112_v0  ;;  %v1822_v6 = vpack.c.bf16 %v113_v1, %v112_v0  ;;  %v20_v7 = vld [vmem:[%s2069_s1 + $0x8] sm:$0xff]  ;;  %v22_v9 = vld [vmem:[%s2069_s1 + $0x18] sm:$0xff]  ;;  %s1784_s8 = smov 112   ;;  %vm1435_vm3 = vcmask 123904   ;;  %vm1442_vm4 = vcmask 257154  }
   0x3   :  { %v1622_v10 = vpack.c.bf16 %v20_v7, %v19_v2  ;;  %v1626_v11 = vpack.c.bf16 %v22_v9, %v21_v8  ;;  %v17_v12 = vld [vmem:[%s2070_s0] sm:$0xff]  ;;  %v18_v13 = vld [vmem:[%s2070_s0 + $0x8] sm:$0xf]  ;;  %vm1448_vm5 = vcmask 386304   ;;  %vm1454_vm6 = vcmask 519554  }
   0x4   :  { %1676 = vrot.lane.b32.xlu0 %v1675_v5, %s1779_s28  ;;  %1535 = vmatprep.mubr.msk.f32.mxu0 %vm30_vm0, %v17_v12  ;;  %v1460_v20 = vld [vmem:[%s2071_s3] ss:$0 sm:$0xff]  ;;  %s1781_s3 = smov 16  }
   0x5   :  { %1623 = vmatprep.subr.bf16.mxu0 %v1622_v10  ;;  %1632 = vmatpush3.bf16.msra.mxu1 %v1822_v6 }
   0x6   :  { %1625 = vmatpush3.bf16.msra.mxu0 %v1622_v10  ;;  %1633 = vmatprep.subr.bf16.mxu1 %v1776_v3 }
   0x7   :  { %1627 = vmatprep.subr.bf16.mxu0 %v1626_v11 }
   0x8   :  { %1543 = vmatmul.mubr.f32.vlgmr.msra.gmra.mrb[0].mxu1 %v1778_v4 }
   0x9   :  { %1549 = vmatprep.mubr.msk.f32.mxu1 %vm1777_vm1, %v1778_v4 }
   0xa   :  { %1629 = vmatpush3.bf16.msra.mxu0 %v1626_v11 }
   0xb   :  { %1636 = vmatprep.subr.bf16.mxu0 %v1776_v3 }
   0xd   :  { %1536 = vmatmul.mubr.msk.f32.vlgmr.msra.gmra.mrb[0].mxu0 %vm30_vm0, %v18_v13 }
   0xe   :  { %1638 = vmatpush3.bf16.msra.mxu0 %v1822_v6  ;;  %1556 = vmatprep.mubr.msk.f32.mxu0 %vm1777_vm1, %v1778_v4 }
   0xf   :  { %1642 = vmatprep.subr.bf16.mxu0 %v1776_v3 }
  0x76   :  { %v1677_v14 = vpop.permute.xlu0 %1676 }
  0x77   :  { %v1679_v15 = vunpack.i.h.bf16 %v1677_v14  ;;  %v1678_v16 = vunpack.i.l.bf16 %v1677_v14 }
  0x79   :  { %v1852_v17 = vpack.c.bf16 %v1679_v15, %v1678_v16 }
  0x7b   :  { %1635 = vmatpush3.bf16.msra.mxu1 %v1852_v17 }
  0x7c   :  { %1639 = vmatprep.subr.bf16.mxu1 %v1776_v3 }
  0x7e   :  { %1550 = vmatmul.mubr.f32.vlgmr.msra.gmra.mrb[2].mxu1 %v1778_v4 }
  0x7f   :  { %1641 = vmatpush3.bf16.msra.mxu1 %v1852_v17  ;;  %1563 = vmatprep.mubr.msk.f32.mxu1 %vm1777_vm1, %v1778_v4 }
  0x80   :  { %1645 = vmatprep.subr.bf16.mxu1 %v1776_v3 }
  0xdb   :  { %v184_v18 = vpop.f32.mrb[0].mxu1 }
  0xdc   :  { %v1544_v19 = vpop.f32.mrb[1].mxu1 }
  0xe0   :  { %v1537_v21 = vpop.f32.mrb[0].mxu0 }
  0xe1   :  { %v103_v22 = vpop.f32.mrb[1].mxu0  ;;  %v1867_v27 = vadd.f32 %v1537_v21, %v1460_v20 }
  0xe2   :  { %v1864_v23 = vadd.f32 %v1460_v20, %v103_v22 }
  0xe4   :  { %v188_v40 = vadd.f32 %v184_v18, %v1864_v23 }
  0xe6   :  { %v1463_v43 = vmul.f32 -1.442695, %v188_v40 }
 0x151   :  { %v263_v24 = vpop.f32.mrb[2].mxu1 }
 0x152   :  { %v268_v25 = vrot.slane %v263_v24, 6  ;;  %v1551_v26 = vpop.f32.mrb[3].mxu1 }
 0x154   :  { %269 = vrot.lane.b32.xlu0 %v268_v25, %s1779_s28 }
 0x1c6   :  { %v270_v28 = vpop.permute.xlu0 %269 }
 0x1c7   :  { %v272_v29 = vadd.f32 %v270_v28, %v1867_v27 }
 0x1c9   :  { %1680 = vtanh.f32 %v272_v29  ;;  %v1464_v31 = vmul.f32 -1.442695, %v272_v29 }
 0x1cb   :  { %1682 = vpow2.f32 %v1464_v31 }
 0x1d3   :  { %v1681_v30 = vpop.eup %1680 }
 0x1d4   :  { %306 = vrot.lane.b32.xlu1 %v1681_v30, %s1780_s5 }
 0x1d5   :  { %v1683_v32 = vpop.eup %1682 }
 0x1d6   :  { %v300_v33 = vadd.f32 1.0, %v1683_v32 }
 0x1d8   :  { %1684 = vrcp.f32 %v300_v33 }
 0x1e2   :  { %v1685_v34 = vpop.eup %1684 }
 0x1e3   :  { %v304_v37 = vmul.f32 0.0, %v1685_v34 }
 0x246   :  { %v307_v35 = vpop.permute.xlu1 %306 }
 0x247   :  { %v309_v36 = vmul.f32 %v1685_v34, %v307_v35 }
 0x249   :  { %311 = vrot.lane.b32.xlu1 %v309_v36, %s1781_s3 }
 0x2bb   :  { %v312_v38 = vpop.permute.xlu1 %311 }
 0x2bc   :  { %v1872_v39 = vadd.f32 %v312_v38, %v304_v37 }
 0x2be   :  { %1686 = vtanh.f32 %v1872_v39  ;;  %v518_v12 = vrot.slane %v1872_v39, 2 }
 0x2bf   :  { %1688 = vtanh.f32 %v188_v40 }
 0x2c0   :  { %1690 = vpow2.f32 %v1463_v43 }
 0x2c8   :  { %v1687_v41 = vpop.eup %1686 }
 0x2c9   :  { %317 = vrot.lane.b32.xlu0 %v1687_v41, %s1782_s6  ;;  %v1689_v42 = vpop.eup %1688 }
 0x2ca   :  { %v1691_v44 = vpop.eup %1690 }
 0x2cb   :  { %v276_v45 = vadd.f32 1.0, %v1691_v44 }
 0x2cd   :  { %282 = vrot.lane.b32.xlu0 %v1689_v42, %s1780_s5  ;;  %1692 = vrcp.f32 %v276_v45 }
 0x2d7   :  { %v1693_v50 = vpop.eup %1692 }
 0x2d8   :  { %v280_v53 = vmul.f32 0.0, %v1693_v50 }
 0x33b   :  { %v318_v46 = vpop.permute.xlu0 %317 }
 0x33c   :  { %v1878_v47 = vmul.f32 %v1685_v34, %v318_v46 }
 0x33e   :  { %v403_v48 = vrot.slane %v1878_v47, 2 }
 0x33f   :  { %v283_v49 = vpop.permute.xlu0 %282 }
 0x340   :  { %404 = vrot.lane.b32.xlu1 %v403_v48, %s1781_s3  ;;  %v285_v51 = vmul.f32 %v1693_v50, %v283_v49 }
 0x344   :  { %287 = vrot.lane.b32.xlu1 %v285_v51, %s1781_s3 }
 0x3b2   :  { %v405_v52 = vpop.permute.xlu1 %404 }
 0x3b3   :  { %1564 = vmatmul.mubr.msk.f32.vlgmr.msra.gmra.mrb[4].mxu1 %vm114_vm2, %v405_v52 }
 0x3b4   :  { %1647 = vmatpush3.bf16.msra.mxu1 %v1852_v17  ;;  %1577 = vmatprep.mubr.msk.f32.mxu1 %vm1777_vm1, %v1778_v4 }
 0x3b5   :  { %1651 = vmatprep.subr.bf16.mxu1 %v1776_v3 }
 0x3b6   :  { %v288_v54 = vpop.permute.xlu1 %287 }
 0x3b7   :  { %v290_v55 = vadd.f32 %v288_v54, %v280_v53 }
 0x3b9   :  { %1694 = vtanh.f32 %v290_v55  ;;  %v491_v32 = vrot.slane %v290_v55, 6 }
 0x3c3   :  { %v1695_v56 = vpop.eup %1694 }
 0x3c4   :  { %293 = vrot.lane.b32.xlu0 %v1695_v56, %s1782_s6 }
 0x436   :  { %v294_v57 = vpop.permute.xlu0 %293 }
 0x437   :  { %v1889_v58 = vmul.f32 %v1693_v50, %v294_v57 }
 0x439   :  { %324 = vrot.lane.b32.xlu0 %v1889_v58, %s1783_s7 }
 0x486   :  { %v474_v59 = vpop.f32.mrb[4].mxu1 }
 0x487   :  { %v1565_v60 = vpop.f32.mrb[5].mxu1  ;;  %479 = vrot.lane.b32.xlu1 %v474_v59, %s1779_s28 }
 0x4ab   :  { %v325_v61 = vpop.permute.xlu0 %324 }
 0x4ac   :  { %1557 = vmatmul.mubr.msk.f32.vlgmr.msra.gmra.mrb[2].mxu0 %vm114_vm2, %v325_v61 }
 0x4ad   :  { %1644 = vmatpush3.bf16.msra.mxu0 %v1822_v6  ;;  %1570 = vmatprep.mubr.msk.f32.mxu0 %vm1777_vm1, %v1778_v4 }
 0x4ae   :  { %1648 = vmatprep.subr.bf16.mxu0 %v1776_v3 }
 0x4f9   :  { %v480_v62 = vpop.permute.xlu1 %479 }
 0x4fa   :  { %v482_v63 = vadd.f32 %v480_v62, %v1867_v27 }
 0x4fc   :  { %1696 = vtanh.f32 %v482_v63  ;;  %v1468_v1 = vmul.f32 -1.442695, %v482_v63 }
 0x4fe   :  { %1698 = vpow2.f32 %v1468_v1 }
 0x506   :  { %v1697_v0 = vpop.eup %1696 }
 0x507   :  { %522 = vrot.lane.b32.xlu1 %v1697_v0, %s1780_s5 }
 0x508   :  { %v1699_v2 = vpop.eup %1698 }
 0x509   :  { %v513_v5 = vadd.f32 1.0, %v1699_v2 }
 0x50b   :  { %1700 = vrcp.f32 %v513_v5 }
 0x515   :  { %v1701_v7 = vpop.eup %1700 }
 0x516   :  { %v520_v14 = vmul.f32 %v1701_v7, %v518_v12 }
 0x579   :  { %v523_v8 = vpop.permute.xlu1 %522 }
 0x57a   :  { %v525_v9 = vmul.f32 %v1701_v7, %v523_v8 }
 0x57c   :  { %527 = vrot.lane.b32.xlu0 %v525_v9, %s1781_s3 }
 0x57f   :  { %v394_v10 = vpop.f32.mrb[2].mxu0 }
 0x580   :  { %v1558_v11 = vpop.f32.mrb[3].mxu0  ;;  %v399_v13 = vrot.slane %v394_v10, 6 }
 0x582   :  { %v401_v18 = vadd.f32 %v399_v13, %v1864_v23 }
 0x584   :  { %v1467_v21 = vmul.f32 -1.442695, %v401_v18 }
 0x5ee   :  { %v528_v15 = vpop.permute.xlu0 %527 }
 0x5ef   :  { %v1903_v16 = vadd.f32 %v528_v15, %v520_v14 }
 0x5f1   :  { %1702 = vtanh.f32 %v1903_v16  ;;  %v740_v61 = vrot.slane %v1903_v16, 2 }
 0x5f2   :  { %1704 = vtanh.f32 %v401_v18 }
 0x5f3   :  { %1706 = vpow2.f32 %v1467_v21 }
 0x5fb   :  { %v1703_v19 = vpop.eup %1702 }
 0x5fc   :  { %533 = vrot.lane.b32.xlu1 %v1703_v19, %s1782_s6  ;;  %v1705_v20 = vpop.eup %1704 }
 0x5fd   :  { %v1707_v22 = vpop.eup %1706 }
 0x5fe   :  { %v486_v24 = vadd.f32 1.0, %v1707_v22 }
 0x600   :  { %495 = vrot.lane.b32.xlu1 %v1705_v20, %s1780_s5  ;;  %1708 = vrcp.f32 %v486_v24 }
 0x60a   :  { %v1709_v28 = vpop.eup %1708 }
 0x60b   :  { %v493_v33 = vmul.f32 %v1709_v28, %v491_v32 }
 0x66e   :  { %v534_v25 = vpop.permute.xlu1 %533 }
 0x66f   :  { %v1909_v26 = vmul.f32 %v1701_v7, %v534_v25 }
 0x671   :  { %625 = vrot.lane.b32.xlu0 %v1909_v26, %s1781_s3  ;;  %v542_v10 = vrot.slane %v1909_v26, 6 }
 0x672   :  { %v496_v29 = vpop.permute.xlu1 %495 }
 0x673   :  { %v498_v30 = vmul.f32 %v1709_v28, %v496_v29  ;;  %v544_v13 = vadd.f32 %v542_v10, %v1878_v47  ;;  %v546_v14 = vmax.f32 %v1878_v47, %v542_v10 }
 0x675   :  { %500 = vrot.lane.b32.xlu0 %v498_v30, %s1781_s3 }
 0x6e3   :  { %v626_v31 = vpop.permute.xlu0 %625 }
 0x6e4   :  { %1578 = vmatmul.mubr.msk.f32.vlgmr.msra.gmra.mrb[6].mxu1 %vm114_vm2, %v626_v31 }
 0x6e5   :  { %1653 = vmatpush3.bf16.msra.mxu1 %v1852_v17  ;;  %1591 = vmatprep.mubr.msk.f32.mxu1 %vm1777_vm1, %v1778_v4 }
 0x6e6   :  { %1657 = vmatprep.subr.bf16.mxu1 %v1776_v3 }
 0x6e7   :  { %v501_v34 = vpop.permute.xlu0 %500 }
 0x6e8   :  { %v1919_v35 = vadd.f32 %v501_v34, %v493_v33 }
 0x6ea   :  { %1710 = vtanh.f32 %v1919_v35  ;;  %v713_v18 = vrot.slane %v1919_v35, 6 }
 0x6f4   :  { %v1711_v36 = vpop.eup %1710 }
 0x6f5   :  { %506 = vrot.lane.b32.xlu1 %v1711_v36, %s1782_s6 }
 0x767   :  { %v507_v37 = vpop.permute.xlu1 %506 }
 0x768   :  { %v509_v38 = vmul.f32 %v1709_v28, %v507_v37 }
 0x76a   :  { %v1923_v39 = vrot.slane %v509_v38, 2 }
 0x76c   :  { %547 = vrot.lane.b32.xlu0 %v1923_v39, %s1783_s7  ;;  %v540_v29 = vadd.f32 %v1923_v39, %v1889_v58  ;;  %v545_v30 = vmax.f32 %v1889_v58, %v1923_v39 }
 0x7b7   :  { %v695_v40 = vpop.f32.mrb[6].mxu1 }
 0x7b8   :  { %v700_v41 = vrot.slane %v695_v40, 2  ;;  %v1579_v42 = vpop.f32.mrb[7].mxu1 }
 0x7ba   :  { %701 = vrot.lane.b32.xlu1 %v700_v41, %s1779_s28 }
 0x7de   :  { %v548_v43 = vpop.permute.xlu0 %547 }
 0x7df   :  { %1571 = vmatmul.mubr.msk.f32.vlgmr.msra.gmra.mrb[4].mxu0 %vm114_vm2, %v548_v43 }
 0x7e0   :  { %1650 = vmatpush3.bf16.msra.mxu0 %v1822_v6  ;;  %1584 = vmatprep.mubr.msk.f32.mxu0 %vm1777_vm1, %v1778_v4 }
 0x7e1   :  { %1654 = vmatprep.subr.bf16.mxu0 %v1776_v3 }
 0x82c   :  { %v702_v44 = vpop.permute.xlu1 %701 }
 0x82d   :  { %v704_v45 = vadd.f32 %v702_v44, %v1864_v23 }
 0x82f   :  { %1712 = vtanh.f32 %v704_v45  ;;  %v1472_v48 = vmul.f32 -1.442695, %v704_v45 }
 0x831   :  { %1714 = vpow2.f32 %v1472_v48 }
 0x839   :  { %v1713_v46 = vpop.eup %1712 }
 0x83a   :  { %744 = vrot.lane.b32.xlu0 %v1713_v46, %s1780_s5 }
 0x83b   :  { %v1715_v49 = vpop.eup %1714 }
 0x83c   :  { %v735_v50 = vadd.f32 1.0, %v1715_v49 }
 0x83e   :  { %1716 = vrcp.f32 %v735_v50 }
 0x848   :  { %v1717_v51 = vpop.eup %1716 }
 0x849   :  { %v742_v62 = vmul.f32 %v1717_v51, %v740_v61 }
 0x8ac   :  { %v745_v52 = vpop.permute.xlu0 %744 }
 0x8ad   :  { %v747_v53 = vmul.f32 %v1717_v51, %v745_v52 }
 0x8af   :  { %749 = vrot.lane.b32.xlu1 %v747_v53, %s1781_s3 }
 0x8b2   :  { %v617_v54 = vpop.f32.mrb[4].mxu0 }
 0x8b3   :  { %v622_v55 = vrot.slane %v617_v54, 4  ;;  %v1572_v56 = vpop.f32.mrb[5].mxu0 }
 0x8b5   :  { %v624_v57 = vadd.f32 %v622_v55, %v1864_v23 }
 0x8b7   :  { %1718 = vtanh.f32 %v624_v57  ;;  %v1471_v60 = vmul.f32 -1.442695, %v624_v57 }
 0x8b9   :  { %1720 = vpow2.f32 %v1471_v60 }
 0x8c1   :  { %v1719_v59 = vpop.eup %1718 }
 0x8c2   :  { %717 = vrot.lane.b32.xlu1 %v1719_v59, %s1780_s5 }
 0x8c3   :  { %v1721_v1 = vpop.eup %1720 }
 0x8c4   :  { %v708_v2 = vadd.f32 1.0, %v1721_v1 }
 0x921   :  { %v750_v63 = vpop.permute.xlu1 %749 }
 0x922   :  { %v1939_v0 = vadd.f32 %v750_v63, %v742_v62 }
 0x924   :  { %1722 = vtanh.f32 %v1939_v0  ;;  %v963_v57 = vrot.slane %v1939_v0, 2 }
 0x925   :  { %1724 = vrcp.f32 %v708_v2 }
 0x92e   :  { %v1723_v5 = vpop.eup %1722 }
 0x92f   :  { %755 = vrot.lane.b32.xlu0 %v1723_v5, %s1782_s6  ;;  %v1725_v7 = vpop.eup %1724 }
 0x930   :  { %v715_v21 = vmul.f32 %v1725_v7, %v713_v18 }
 0x934   :  { %v718_v8 = vpop.permute.xlu1 %717 }
 0x935   :  { %v720_v9 = vmul.f32 %v1725_v7, %v718_v8 }
 0x937   :  { %722 = vrot.lane.b32.xlu1 %v720_v9, %s1781_s3 }
 0x9a1   :  { %v756_v11 = vpop.permute.xlu0 %755 }
 0x9a2   :  { %v758_v12 = vmul.f32 %v1717_v51, %v756_v11 }
 0x9a4   :  { %v764_v15 = vrot.slane %v758_v12, 4  ;;  %v847_v16 = vrot.slane %v758_v12, 6 }
 0x9a6   :  { %v1948_v19 = vadd.f32 %v764_v15, %v544_v13  ;;  %v1950_v20 = vmax.f32 %v546_v14, %v764_v15  ;;  %848 = vrot.lane.b32.xlu0 %v847_v16, %s1781_s3 }
 0x9a9   :  { %v723_v22 = vpop.permute.xlu1 %722 }
 0x9aa   :  { %v1953_v24 = vadd.f32 %v723_v22, %v715_v21 }
 0x9ac   :  { %1726 = vtanh.f32 %v1953_v24  ;;  %v936_v63 = vrot.slane %v1953_v24, 6 }
 0x9b6   :  { %v1727_v25 = vpop.eup %1726 }
 0x9b7   :  { %728 = vrot.lane.b32.xlu0 %v1727_v25, %s1782_s6 }
 0xa18   :  { %v849_v47 = vpop.permute.xlu0 %848 }
 0xa19   :  { %1592 = vmatmul.mubr.msk.f32.vlgmr.msra.gmra.mrb[8].mxu1 %vm114_vm2, %v849_v47 }
 0xa1a   :  { %1659 = vmatpush3.bf16.msra.mxu1 %v1852_v17  ;;  %1605 = vmatprep.mubr.msk.f32.mxu1 %vm1777_vm1, %v1778_v4 }
 0xa1b   :  { %1663 = vmatprep.subr.bf16.mxu1 %v1776_v3 }
 0xa29   :  { %v729_v26 = vpop.permute.xlu0 %728 }
 0xa2a   :  { %v731_v28 = vmul.f32 %v1725_v7, %v729_v26 }
 0xa2c   :  { %v760_v31 = vrot.slane %v731_v28, 4 }
 0xa2e   :  { %v1966_v32 = vadd.f32 %v760_v31, %v540_v29  ;;  %v1968_v33 = vmax.f32 %v545_v30, %v760_v31  ;;  %769 = vrot.lane.b32.xlu1 %v760_v31, %s1783_s7 }
 0xaa0   :  { %v770_v34 = vpop.permute.xlu1 %769 }
 0xaa1   :  { %1585 = vmatmul.mubr.msk.f32.vlgmr.msra.gmra.mrb[6].mxu0 %vm114_vm2, %v770_v34 }
 0xaa2   :  { %1656 = vmatpush3.bf16.msra.mxu0 %v1822_v6  ;;  %1598 = vmatprep.mubr.msk.f32.mxu0 %vm1777_vm1, %v1778_v4 }
 0xaa3   :  { %1660 = vmatprep.subr.bf16.mxu0 %v1776_v3 }
 0xaec   :  { %v918_v35 = vpop.f32.mrb[8].mxu1 }
 0xaed   :  { %v923_v36 = vrot.slane %v918_v35, 4  ;;  %v1593_v58 = vpop.f32.mrb[9].mxu1 }
 0xaef   :  { %924 = vrot.lane.b32.xlu0 %v923_v36, %s1779_s28 }
 0xb61   :  { %v925_v37 = vpop.permute.xlu0 %924 }
 0xb62   :  { %v927_v38 = vadd.f32 %v925_v37, %v1864_v23 }
 0xb64   :  { %1728 = vtanh.f32 %v927_v38  ;;  %v1476_v3 = vmul.f32 -1.442695, %v927_v38 }
 0xb6e   :  { %v1729_v39 = vpop.eup %1728 }
 0xb6f   :  { %967 = vrot.lane.b32.xlu1 %v1729_v39, %s1780_s5 }
 0xb74   :  { %v839_v40 = vpop.f32.mrb[6].mxu0 }
 0xb75   :  { %v844_v41 = vrot.slane %v839_v40, 2  ;;  %v1586_v42 = vpop.f32.mrb[7].mxu0 }
 0xb77   :  { %v846_v43 = vadd.f32 %v844_v41, %v1864_v23 }
 0xb79   :  { %1730 = vtanh.f32 %v846_v43  ;;  %v1475_v48 = vmul.f32 -1.442695, %v846_v43 }
 0xb7a   :  { %1732 = vpow2.f32 %v1476_v3 }
 0xb83   :  { %v1731_v44 = vpop.eup %1730 }
 0xb84   :  { %940 = vrot.lane.b32.xlu1 %v1731_v44, %s1780_s5  ;;  %v1733_v45 = vpop.eup %1732 }
 0xb85   :  { %v958_v46 = vadd.f32 1.0, %v1733_v45 }
 0xb87   :  { %1734 = vrcp.f32 %v958_v46 }
 0xb88   :  { %1736 = vpow2.f32 %v1475_v48 }
 0xb91   :  { %v1735_v49 = vpop.eup %1734 }
 0xb92   :  { %v1737_v52 = vpop.eup %1736  ;;  %v965_v59 = vmul.f32 %v1735_v49, %v963_v57 }
 0xb93   :  { %v931_v53 = vadd.f32 1.0, %v1737_v52 }
 0xb95   :  { %1738 = vrcp.f32 %v931_v53 }
 0xb9f   :  { %v1739_v54 = vpop.eup %1738 }
 0xba0   :  { %v938_v1 = vmul.f32 %v1739_v54, %v936_v63 }
 0xbe1   :  { %v968_v50 = vpop.permute.xlu1 %967 }
 0xbe2   :  { %v970_v51 = vmul.f32 %v1735_v49, %v968_v50 }
 0xbe4   :  { %972 = vrot.lane.b32.xlu0 %v970_v51, %s1781_s3 }
 0xbf6   :  { %v941_v55 = vpop.permute.xlu1 %940 }
 0xbf7   :  { %v943_v56 = vmul.f32 %v1739_v54, %v941_v55 }
 0xbf9   :  { %945 = vrot.lane.b32.xlu1 %v943_v56, %s1781_s3 }
 0xc56   :  { %v973_v60 = vpop.permute.xlu0 %972 }
 0xc57   :  { %v1984_v61 = vadd.f32 %v973_v60, %v965_v59 }
 0xc59   :  { %1740 = vtanh.f32 %v1984_v61  ;;  %v1183_v3 = vrot.slane %v1984_v61, 2 }
 0xc63   :  { %v1741_v62 = vpop.eup %1740 }
 0xc64   :  { %978 = vrot.lane.b32.xlu0 %v1741_v62, %s1782_s6 }
 0xc6b   :  { %v946_v2 = vpop.permute.xlu1 %945 }
 0xc6c   :  { %v948_v5 = vadd.f32 %v946_v2, %v938_v1 }
 0xc6e   :  { %1742 = vtanh.f32 %v948_v5  ;;  %v1156_v40 = vrot.slane %v948_v5, 6 }
 0xc78   :  { %v1743_v7 = vpop.eup %1742 }
 0xc79   :  { %951 = vrot.lane.b32.xlu1 %v1743_v7, %s1782_s6 }
 0xcd6   :  { %v979_v8 = vpop.permute.xlu0 %978 }
 0xcd7   :  { %v981_v0 = vmul.f32 %v1735_v49, %v979_v8 }
 0xcd9   :  { %v987_v9 = vrot.slane %v981_v0, 2  ;;  %v1067_v10 = vrot.slane %v981_v0, 4 }
 0xcdb   :  { %v1991_v11 = vadd.f32 %v987_v9, %v1948_v19  ;;  %v1994_v12 = vmax.f32 %v1950_v20, %v987_v9  ;;  %1068 = vrot.lane.b32.xlu0 %v1067_v10, %s1781_s3 }
 0xceb   :  { %v952_v13 = vpop.permute.xlu1 %951 }
 0xcec   :  { %v954_v14 = vmul.f32 %v1739_v54, %v952_v13 }
 0xcee   :  { %v1997_v15 = vrot.slane %v954_v14, 6 }
 0xcf0   :  { %v985_v16 = vadd.f32 %v1997_v15, %v1966_v32  ;;  %v990_v18 = vmax.f32 %v1968_v33, %v1997_v15  ;;  %992 = vrot.lane.b32.xlu0 %v1997_v15, %s1783_s7 }
 0xd4d   :  { %v1069_v19 = vpop.permute.xlu0 %1068 }
 0xd4e   :  { %1606 = vmatmul.mubr.msk.f32.vlgmr.msra.gmra.mrb[10].mxu1 %vm114_vm2, %v1069_v19 }
 0xd4f   :  { %1665 = vmatpush3.bf16.msra.mxu1 %v1852_v17  ;;  %1619 = vmatprep.mubr.msk.f32.mxu1 %vm1777_vm1, %v1778_v4 }
 0xd62   :  { %v993_v20 = vpop.permute.xlu0 %992 }
 0xd63   :  { %1599 = vmatmul.mubr.msk.f32.vlgmr.msra.gmra.mrb[8].mxu0 %vm114_vm2, %v993_v20 }
 0xd64   :  { %1662 = vmatpush3.bf16.msra.mxu0 %v1822_v6  ;;  %1612 = vmatprep.mubr.msk.f32.mxu0 %vm1777_vm1, %v1778_v4 }
 0xe21   :  { %v1138_v21 = vpop.f32.mrb[10].mxu1 }
 0xe22   :  { %v1143_v22 = vrot.slane %v1138_v21, 6  ;;  %v1607_v24 = vpop.f32.mrb[11].mxu1 }
 0xe24   :  { %1144 = vrot.lane.b32.xlu1 %v1143_v22, %s1779_s28 }
 0xe36   :  { %v1062_v25 = vpop.f32.mrb[8].mxu0 }
 0xe37   :  { %v1066_v47 = vadd.f32 %v1062_v25, %v1867_v27  ;;  %v1600_v17 = vpop.f32.mrb[9].mxu0 }
 0xe39   :  { %1744 = vtanh.f32 %v1066_v47  ;;  %v1479_v29 = vmul.f32 -1.442695, %v1066_v47 }
 0xe43   :  { %v1745_v26 = vpop.eup %1744 }
 0xe44   :  { %1160 = vrot.lane.b32.xlu1 %v1745_v26, %s1780_s5 }
 0xe96   :  { %v1145_v28 = vpop.permute.xlu1 %1144 }
 0xe97   :  { %v1147_v6 = vadd.f32 %v1145_v28, %v1864_v23 }
 0xe99   :  { %1746 = vtanh.f32 %v1147_v6  ;;  %v1480_v35 = vmul.f32 -1.442695, %v1147_v6 }
 0xe9a   :  { %1748 = vpow2.f32 %v1479_v29 }
 0xea3   :  { %v1747_v4 = vpop.eup %1746 }
 0xea4   :  { %1187 = vrot.lane.b32.xlu0 %v1747_v4, %s1780_s5  ;;  %v1749_v30 = vpop.eup %1748 }
 0xea5   :  { %v1151_v31 = vadd.f32 1.0, %v1749_v30 }
 0xea7   :  { %1750 = vrcp.f32 %v1151_v31 }
 0xea8   :  { %1752 = vpow2.f32 %v1480_v35 }
 0xeb1   :  { %v1751_v32 = vpop.eup %1750 }
 0xeb2   :  { %v1753_v36 = vpop.eup %1752  ;;  %v1158_v41 = vmul.f32 %v1751_v32, %v1156_v40 }
 0xeb3   :  { %v1178_v58 = vadd.f32 1.0, %v1753_v36 }
 0xeb5   :  { %1754 = vrcp.f32 %v1178_v58 }
 0xeb6   :  { %v1161_v33 = vpop.permute.xlu1 %1160 }
 0xeb7   :  { %v1163_v34 = vmul.f32 %v1751_v32, %v1161_v33 }
 0xeb9   :  { %1165 = vrot.lane.b32.xlu1 %v1163_v34, %s1781_s3 }
 0xebf   :  { %v1755_v37 = vpop.eup %1754 }
 0xec0   :  { %v1185_v45 = vmul.f32 %v1755_v37, %v1183_v3 }
 0xf16   :  { %v1188_v38 = vpop.permute.xlu0 %1187 }
 0xf17   :  { %v1190_v39 = vmul.f32 %v1755_v37, %v1188_v38 }
 0xf19   :  { %1192 = vrot.lane.b32.xlu0 %v1190_v39, %s1781_s3 }
 0xf2b   :  { %v1166_v42 = vpop.permute.xlu1 %1165 }
 0xf2c   :  { %v1168_v43 = vadd.f32 %v1166_v42, %v1158_v41 }
 0xf2e   :  { %1756 = vtanh.f32 %v1168_v43 }
 0xf38   :  { %v1757_v44 = vpop.eup %1756 }
 0xf39   :  { %1171 = vrot.lane.b32.xlu1 %v1757_v44, %s1782_s6 }
 0xf8b   :  { %v1193_v46 = vpop.permute.xlu0 %1192 }
 0xf8c   :  { %v2022_v48 = vadd.f32 %v1193_v46, %v1185_v45 }
 0xf8e   :  { %1758 = vtanh.f32 %v2022_v48 }
 0xf98   :  { %v1759_v49 = vpop.eup %1758 }
 0xf99   :  { %1198 = vrot.lane.b32.xlu0 %v1759_v49, %s1782_s6 }
 0xfab   :  { %v1172_v50 = vpop.permute.xlu1 %1171 }
 0xfac   :  { %v1174_v51 = vmul.f32 %v1751_v32, %v1172_v50  ;;  %v1401_v32 = vrot.slane %v2022_v48, 2 }
 0xfae   :  { %1207 = vrot.lane.b32.xlu1 %v1174_v51, %s1783_s7  ;;  %v1202_v52 = vadd.f32 %v1174_v51, %v985_v16  ;;  %v1204_v53 = vmax.f32 %v990_v18, %v1174_v51  ;;  %v1374_v18 = vrot.slane %v1168_v43, 6 }
0x100b   :  { %v1199_v54 = vpop.permute.xlu0 %1198 }
0x100c   :  { %v2027_v55 = vmul.f32 %v1755_v37, %v1199_v54 }
0x100e   :  { %v1286_v56 = vrot.slane %v2027_v55, 2  ;;  %v2032_v57 = vadd.f32 %v2027_v55, %v1991_v11  ;;  %v1205_v59 = vmax.f32 %v1994_v12, %v2027_v55 }
0x1010   :  { %1287 = vrot.lane.b32.xlu0 %v1286_v56, %s1781_s3 }
0x1020   :  { %v1208_v60 = vpop.permute.xlu1 %1207 }
0x1021   :  { %1613 = vmatmul.mubr.msk.f32.vlgmr.msra.gmra.mrb[10].mxu0 %vm114_vm2, %v1208_v60 }
0x1082   :  { %v1288_v61 = vpop.permute.xlu0 %1287 }
0x1083   :  { %1620 = vmatmul.mubr.msk.f32.vlgmr.msra.gmra.mrb[12].mxu1 %vm114_vm2, %v1288_v61 }
0x10f4   :  { %v1277_v62 = vpop.f32.mrb[10].mxu0 }
0x10f5   :  { %v1282_v63 = vrot.slane %v1277_v62, 6  ;;  %v1614_v1 = vpop.f32.mrb[11].mxu0 }
0x10f7   :  { %v1284_v2 = vadd.f32 %v1282_v63, %v1867_v27 }
0x10f9   :  { %1760 = vtanh.f32 %v1284_v2  ;;  %v1483_v8 = vmul.f32 -1.442695, %v1284_v2 }
0x10fb   :  { %1762 = vpow2.f32 %v1483_v8 }
0x1103   :  { %v1761_v5 = vpop.eup %1760 }
0x1104   :  { %1378 = vrot.lane.b32.xlu1 %v1761_v5, %s1780_s5 }
0x1105   :  { %v1763_v9 = vpop.eup %1762 }
0x1106   :  { %v1369_v10 = vadd.f32 1.0, %v1763_v9 }
0x1108   :  { %1764 = vrcp.f32 %v1369_v10 }
0x1112   :  { %v1765_v11 = vpop.eup %1764 }
0x1113   :  { %v1376_v19 = vmul.f32 %v1765_v11, %v1374_v18 }
0x1156   :  { %v1357_v7 = vpop.f32.mrb[12].mxu1 }
0x1157   :  { %1362 = vrot.lane.b32.xlu0 %v1357_v7, %s1779_s28  ;;  %v1621_v0 = vpop.f32.mrb[13].mxu1 }
0x1176   :  { %v1379_v13 = vpop.permute.xlu1 %1378 }
0x1177   :  { %v1381_v14 = vmul.f32 %v1765_v11, %v1379_v13 }
0x1179   :  { %1383 = vrot.lane.b32.xlu1 %v1381_v14, %s1781_s3 }
0x11c9   :  { %v1363_v15 = vpop.permute.xlu0 %1362 }
0x11ca   :  { %v1365_v27 = vadd.f32 %v1363_v15, %v1864_v23 }
0x11cc   :  { %1766 = vtanh.f32 %v1365_v27  ;;  %v1484_v24 = vmul.f32 -1.442695, %v1365_v27 }
0x11d6   :  { %v1767_v16 = vpop.eup %1766 }
0x11d7   :  { %1405 = vrot.lane.b32.xlu0 %v1767_v16, %s1780_s5 }
0x11eb   :  { %v1384_v20 = vpop.permute.xlu1 %1383 }
0x11ec   :  { %v1386_v21 = vadd.f32 %v1384_v20, %v1376_v19 }
0x11ee   :  { %1768 = vtanh.f32 %v1386_v21 }
0x11ef   :  { %1770 = vpow2.f32 %v1484_v24 }
0x11f8   :  { %v1769_v22 = vpop.eup %1768 }
0x11f9   :  { %1389 = vrot.lane.b32.xlu1 %v1769_v22, %s1782_s6  ;;  %v1771_v25 = vpop.eup %1770 }
0x11fa   :  { %v1396_v47 = vadd.f32 1.0, %v1771_v25 }
0x11fc   :  { %1772 = vrcp.f32 %v1396_v47 }
0x1206   :  { %v1773_v17 = vpop.eup %1772 }
0x1207   :  { %v1403_v33 = vmul.f32 %v1773_v17, %v1401_v32 }
0x1249   :  { %v1406_v26 = vpop.permute.xlu0 %1405 }
0x124a   :  { %v1408_v23 = vmul.f32 %v1773_v17, %v1406_v26 }
0x124c   :  { %1410 = vrot.lane.b32.xlu0 %v1408_v23, %s1781_s3 }
0x126b   :  { %v1390_v28 = vpop.permute.xlu1 %1389 }
0x126c   :  { %v1392_v29 = vmul.f32 %v1765_v11, %v1390_v28 }
0x126e   :  { %v1421_v6 = vrot.slane %v1392_v29, 2 }
0x1270   :  { %v1423_v4 = vadd.f32 %v1421_v6, %v1202_v52  ;;  %v1428_v31 = vmax.f32 %v1204_v53, %v1421_v6 }
0x1272   :  { %v1430_v30 = vmul.f32 0.027777778, %v1423_v4 }
0x1274   :  { %1432 = vrot.lane.b32.xlu1 %v1430_v30, %s1783_s7 }
0x1278   :  { %1445 = vrot.lane.b32.xlu1 %v1428_v31, %s1784_s8 }
0x12be   :  { %v1411_v34 = vpop.permute.xlu0 %1410 }
0x12bf   :  { %v1413_v35 = vadd.f32 %v1411_v34, %v1403_v33 }
0x12c1   :  { %1774 = vtanh.f32 %v1413_v35 }
0x12cb   :  { %v1775_v36 = vpop.eup %1774 }
0x12cc   :  { %1416 = vrot.lane.b32.xlu0 %v1775_v36, %s1782_s6 }
0x12e6   :  { %v1433_v58 = vpop.permute.xlu1 %1432 }
0x12e7   :  { %1436 = vst.msk [vmem:[%s2072_s4] sm:$0x3] %vm1435_vm3, %v1433_v58 }
0x12ea   :  { %v1446_v44 = vpop.permute.xlu1 %1445 }
0x133e   :  { %v1417_v37 = vpop.permute.xlu0 %1416 }
0x133f   :  { %v1419_v38 = vmul.f32 %v1773_v17, %v1417_v37 }
0x1341   :  { %v1425_v39 = vrot.slane %v1419_v38, 6 }
0x1343   :  { %v1427_v40 = vadd.f32 %v1425_v39, %v2032_v57  ;;  %v1429_v42 = vmax.f32 %v1205_v59, %v1425_v39 }
0x1345   :  { %v1437_v41 = vmul.f32 0.027777778, %v1427_v40 }
0x1347   :  { %1439 = vrot.lane.b32.xlu0 %v1437_v41, %s1782_s6 }
0x134b   :  { %1451 = vrot.lane.b32.xlu0 %v1429_v42, %s1779_s28 }
0x13b9   :  { %v1440_v43 = vpop.permute.xlu0 %1439 }
0x13ba   :  { %1443 = vst.msk [vmem:[%s2072_s4 - $0x2] sm:$0xc] %vm1442_vm4, %v1440_v43 }
0x13bb   :  { %1449 = vst.msk [vmem:[%s2072_s4] sm:$0x3] %vm1448_vm5, %v1446_v44 }
0x13bd   :  { %v1452_v3 = vpop.permute.xlu0 %1451 }
0x13be   :  { %1455 = vst.msk [vmem:[%s2072_s4 - $0x2] sm:$0xc] %vm1454_vm6, %v1452_v3 }

// kernel: esim_forward.15
= control target key start
LH: loop header
LB: loop body
LE: loop exit
PB: predicated region body
PF: predicated region fallthrough
CT: control target
= control target key end

     0   :  { %v348_v3 = vmov 0.0|0.0   ;;  %vm349_vm0 = vmmov 0   ;;  %v350_v6 = vmov 0.0   ;;  %s463_s0 = inlined_call_operand.vmem [shape: f32[2,128], index: 0, kind: input, shape index: {}]   ;;  %s464_s1 = inlined_call_operand.vmem [shape: f32[128,32], index: 1, kind: input, shape index: {}]   ;;  %s465_s2 = inlined_call_operand.vmem [shape: f32[1,32], index: 2, kind: input, shape index: {}]   ;;  %s466_s3 = inlined_call_operand.vmem [shape: f32[32,3], index: 3, kind: input, shape index: {}]   ;;  %s467_s4 = inlined_call_operand.vmem [shape: f32[1,3], index: 4, kind: input, shape index: {}]   ;;  %s468_s5 = inlined_call_operand.hbm [shape: f32[2,3], index: 5, kind: output, shape index: {}]  }
   0x1   :  { %v22_v0 = vld [vmem:[%s464_s1] sm:$0xff]  ;;  %v23_v1 = vld [vmem:[%s464_s1 + $0x8] sm:$0xff]  ;;  %v24_v2 = vld [vmem:[%s464_s1 + $0x10] sm:$0xff]  ;;  %288 = vmatprep.subr.bf16.mxu0 %v348_v3  ;;  %274 = vmatprep.mubr.msk.f32.mxu0 %vm349_vm0, %v350_v6 }
   0x2   :  { %v289_v4 = vpack.c.bf16 %v23_v1, %v22_v0  ;;  %v25_v5 = vld [vmem:[%s464_s1 + $0x18] sm:$0xff]  ;;  %312 = vmatprep.subr.bf16.mxu1 %v348_v3  ;;  %285 = vmatprep.mubr.msk.f32.mxu1 %vm349_vm0, %v350_v6  ;;  %v26_v8 = vld [vmem:[%s464_s1 + $0x20] sm:$0xff]  ;;  %v27_v9 = vld [vmem:[%s464_s1 + $0x28] sm:$0xff] }
   0x3   :  { %v292_v7 = vpack.c.bf16 %v25_v5, %v24_v2 }
   0x4   :  { %290 = vmatpush3.bf16.msra.mxu0 %v289_v4 }
   0x5   :  { %291 = vmatprep.subr.bf16.mxu0 %v348_v3 }
   0x6   :  { %10 = vsyncpa [#allocation3], 0  ;;  %v295_v10 = vpack.c.bf16 %v27_v9, %v26_v8  ;;  %v28_v11 = vld [vmem:[%s464_s1 + $0x30] sm:$0xff]  ;;  %v29_v12 = vld [vmem:[%s464_s1 + $0x38] sm:$0xff]  ;;  %vm127_vm1 = vcmask 261120   ;;  %vm201_vm2 = vcmask 17408  }
   0x7   :  { %v298_v13 = vpack.c.bf16 %v29_v12, %v28_v11  ;;  %v30_v14 = vld [vmem:[%s464_s1 + $0x40] sm:$0xff]  ;;  %v31_v15 = vld [vmem:[%s464_s1 + $0x48] sm:$0xff]  ;;  %v32_v17 = vld [vmem:[%s464_s1 + $0x50] sm:$0xff] }
   0x8   :  { %293 = vmatpush3.bf16.msra.mxu0 %v292_v7  ;;  %v301_v16 = vpack.c.bf16 %v31_v15, %v30_v14  ;;  %v33_v18 = vld [vmem:[%s464_s1 + $0x58] sm:$0xff]  ;;  %v34_v20 = vld [vmem:[%s464_s1 + $0x60] sm:$0xff]  ;;  %v35_v21 = vld [vmem:[%s464_s1 + $0x68] sm:$0xff] }
   0x9   :  { %294 = vmatprep.subr.bf16.mxu0 %v348_v3  ;;  %v304_v19 = vpack.c.bf16 %v33_v18, %v32_v17  ;;  %v307_v22 = vpack.c.bf16 %v35_v21, %v34_v20  ;;  %v36_v23 = vld [vmem:[%s464_s1 + $0x70] sm:$0xff]  ;;  %v37_v24 = vld [vmem:[%s464_s1 + $0x78] sm:$0xff]  ;;  %v21_v26 = vld [vmem:[%s463_s0] sm:$0x3] }
   0xa   :  { %v310_v25 = vpack.c.bf16 %v37_v24, %v36_v23  ;;  %v116_v27 = vld [vmem:[%s466_s3] sm:$0xff]  ;;  %v117_v28 = vld [vmem:[%s466_s3 + $0x8] sm:$0xff]  ;;  %v118_v29 = vld [vmem:[%s466_s3 + $0x10] sm:$0xff] }
   0xb   :  { %v313_v30 = vpack.c.bf16 %v117_v28, %v116_v27  ;;  %v119_v31 = vld [vmem:[%s466_s3 + $0x18] sm:$0xff]  ;;  %v217_v33 = vld [vmem:[%s465_s2] ss:$0 sm:$0xff]  ;;  %s351_s3 = smov [#allocation2]  }
   0xc   :  { %296 = vmatpush3.bf16.msra.mxu0 %v295_v10  ;;  %v316_v32 = vpack.c.bf16 %v119_v31, %v118_v29  ;;  %v218_v38 = vld [vmem:[%s467_s4] ss:$0 sm:$0xff]  ;;  %s209_s12 = sshll.u32 %s351_s3, 4  ;;  %s210_s12 = int_to_ptr.vmem [resolvable:$true] %s209_s12 }
   0xd   :  { %297 = vmatprep.subr.bf16.mxu0 %v348_v3  ;;  %314 = vmatpush3.bf16.msra.mxu1 %v313_v30  ;;  %s324_s2 = scalar_lea.vmem %s210_s12, 32  ;;  %p329_p1 = scmp.lt.s32.totalorder %s210_s12, %s210_s12 }
   0xe   :  { %315 = vmatprep.subr.bf16.mxu1 %v348_v3  ;;  %p325_p0 = scmp.ne.s32.totalorder %s210_s12, %s324_s2  ;;  %p330_p2 = scmp.lt.s32.totalorder %s324_s2, %s324_s2 }
  0x10   :  { %299 = vmatpush3.bf16.msra.mxu0 %v298_v13  ;;  %p331_p3 = por %p330_p2, %p329_p1 }
  0x11   :  { %300 = vmatprep.subr.bf16.mxu0 %v348_v3  ;;  %317 = vmatpush3.bf16.msra.mxu1 %v316_v32 }
  0x12   :  { %p332_p4 = pnand %p331_p3, %p325_p0 }
  0x14   :  { %302 = vmatpush3.bf16.msra.mxu0 %v301_v16 }
  0x15   :  { %303 = vmatprep.subr.bf16.mxu0 %v348_v3 }
  0x18   :  { %305 = vmatpush3.bf16.msra.mxu0 %v304_v19 }
  0x19   :  { %306 = vmatprep.subr.bf16.mxu0 %v348_v3 }
  0x1c   :  { %308 = vmatpush3.bf16.msra.mxu0 %v307_v22 }
  0x1d   :  { %309 = vmatprep.subr.bf16.mxu0 %v348_v3 }
  0x20   :  { %311 = vmatpush3.bf16.msra.mxu0 %v310_v25 }
  0x23   :  { %275 = vmatmul.mubr.f32.vlgmr.msra.gmra.mrb[0].mxu0 %v21_v26 }
  0xf6   :  { %v111_v34 = vpop.f32.mrb[0].mxu0 }
  0xf7   :  { %v112_v35 = vadd.f32 %v217_v33, %v111_v34  ;;  %v276_v36 = vpop.f32.mrb[1].mxu0 }
  0xf9   :  { %322 = vtanh.f32 %v112_v35 }
 0x103   :  { %v323_v37 = vpop.eup %322 }
 0x104   :  { %286 = vmatmul.mubr.msk.f32.vlgmr.msra.gmra.mrb[0].mxu1 %vm127_vm1, %v323_v37 }
 0x1d7   :  { %v197_v39 = vpop.f32.mrb[0].mxu1 }
 0x1d8   :  { %v198_v40 = vadd.f32 %v218_v38, %v197_v39  ;;  %v287_v41 = vpop.f32.mrb[1].mxu1 }
 0x1da   :  { %202 = vst.msk [vmem:[#allocation2] sm:$0x3] %vm201_vm2, %v198_v40 }
 0x1db   :  { %335 = shalt.err (!%p332_p4)
}
 0x1dc   :  { %s336_s15 = scalar_lea.hbm %s468_s5, 32 }
 0x1dd   :  { %p337_p5 = scmp.ne.s32.totalorder %s468_s5, %s336_s15  ;;  %p340_p6 = scmp.lt.u32.totalorder %s336_s15, %s468_s5 }
 0x1df   :  { %p342_p7 = pnand %p340_p6, %p337_p5 }
 0x1e1   :  { %345 = shalt.err (!%p342_p7)
}
 0x1e2   :  { %212 = dma.vmem_to_hbm [thread:$0]  %s210_s12, 32, %s468_s5, [#allocation3]  }
 0x1e3   :  { %346 = dma.done.wait [#allocation3], 32  }
 0x1e4   :  { %347 = vsyncadd [#allocation3], 4294967264 }
 0x1e5   :  { %216 = vsyncpa [#allocation3], 1 }

// kernel: esim_forward.13
= control target key start
LH: loop header
LB: loop body
LE: loop exit
PB: predicated region body
PF: predicated region fallthrough
CT: control target
= control target key end

     0   :  { %v2314_v3 = vmov 0.0|0.0   ;;  %vm30_vm0 = vcmask 261120   ;;  %vm2315_vm1 = vmmov 0   ;;  %v2316_v4 = vmov 0.0   ;;  %s2317_s28 = smov 64   ;;  %s2318_s5 = smov 96   ;;  %s2699_s2 = inlined_call_operand.vmem [shape: f32[16,128], index: 2, kind: input, shape index: {}]   ;;  %s2700_s1 = inlined_call_operand.vmem [shape: f32[32,128], index: 1, kind: input, shape index: {}]   ;;  %s2701_s0 = inlined_call_operand.vmem [shape: f32[16,32], index: 0, kind: input, shape index: {}]   ;;  %s2702_s3 = inlined_call_operand.vmem [shape: f32[1,128], index: 3, kind: input, shape index: {}]   ;;  %s2703_s4 = inlined_call_operand.vmem [shape: f32[2,64], index: 4, kind: output, shape index: {}]  }
   0x1   :  { %v112_v0 = vld [vmem:[%s2699_s2] sm:$0xff]  ;;  %v113_v1 = vld [vmem:[%s2699_s2 + $0x8] sm:$0xff]  ;;  %2124 = vmatprep.subr.bf16.mxu1 %v2314_v3  ;;  %2008 = vmatprep.mubr.msk.f32.mxu1 %vm2315_vm1, %v2316_v4  ;;  %v21_v8 = vld [vmem:[%s2700_s1 + $0x10] sm:$0xff]  ;;  %s2320_s6 = smov 32   ;;  %vm114_vm2 = vcmask 130048   ;;  %s2321_s7 = smov 80  }
   0x2   :  { %v19_v2 = vld [vmem:[%s2700_s1] sm:$0xff]  ;;  %v2181_v5 = vpack.i.bf16 %v113_v1, %v112_v0  ;;  %v2360_v6 = vpack.c.bf16 %v113_v1, %v112_v0  ;;  %v20_v7 = vld [vmem:[%s2700_s1 + $0x8] sm:$0xff]  ;;  %v22_v9 = vld [vmem:[%s2700_s1 + $0x18] sm:$0xff]  ;;  %s2322_s8 = smov 112   ;;  %vm1881_vm3 = vcmask 123904   ;;  %vm1888_vm4 = vcmask 261254  }
   0x3   :  { %v2116_v10 = vpack.c.bf16 %v20_v7, %v19_v2  ;;  %v2120_v11 = vpack.c.bf16 %v22_v9, %v21_v8  ;;  %v17_v12 = vld [vmem:[%s2701_s0] sm:$0xff]  ;;  %v18_v13 = vld [vmem:[%s2701_s0 + $0x8] sm:$0xff]  ;;  %vm1894_vm5 = vcmask 386304   ;;  %vm1900_vm6 = vcmask 523654  }
   0x4   :  { %2182 = vrot.lane.b32.xlu0 %v2181_v5, %s2317_s28  ;;  %2001 = vmatprep.mubr.msk.f32.mxu0 %vm30_vm0, %v17_v12  ;;  %v1906_v20 = vld [vmem:[%s2702_s3] ss:$0 sm:$0xff]  ;;  %s2319_s3 = smov 16  }
   0x5   :  { %2117 = vmatprep.subr.bf16.mxu0 %v2116_v10  ;;  %2126 = vmatpush3.bf16.msra.mxu1 %v2360_v6 }
   0x6   :  { %2119 = vmatpush3.bf16.msra.mxu0 %v2116_v10  ;;  %2127 = vmatprep.subr.bf16.mxu1 %v2314_v3 }
   0x7   :  { %2121 = vmatprep.subr.bf16.mxu0 %v2120_v11 }
   0x8   :  { %2009 = vmatmul.mubr.f32.vlgmr.msra.gmra.mrb[0].mxu1 %v2316_v4 }
   0x9   :  { %2015 = vmatprep.mubr.msk.f32.mxu1 %vm2315_vm1, %v2316_v4 }
   0xa   :  { %2123 = vmatpush3.bf16.msra.mxu0 %v2120_v11 }
   0xb   :  { %2130 = vmatprep.subr.bf16.mxu0 %v2314_v3 }
   0xd   :  { %2002 = vmatmul.mubr.msk.f32.vlgmr.msra.gmra.mrb[0].mxu0 %vm30_vm0, %v18_v13 }
   0xe   :  { %2132 = vmatpush3.bf16.msra.mxu0 %v2360_v6  ;;  %2022 = vmatprep.mubr.msk.f32.mxu0 %vm2315_vm1, %v2316_v4 }
   0xf   :  { %2136 = vmatprep.subr.bf16.mxu0 %v2314_v3 }
  0x76   :  { %v2183_v14 = vpop.permute.xlu0 %2182 }
  0x77   :  { %v2185_v15 = vunpack.i.h.bf16 %v2183_v14  ;;  %v2184_v16 = vunpack.i.l.bf16 %v2183_v14 }
  0x79   :  { %v2390_v17 = vpack.c.bf16 %v2185_v15, %v2184_v16 }
  0x7b   :  { %2129 = vmatpush3.bf16.msra.mxu1 %v2390_v17 }
  0x7c   :  { %2133 = vmatprep.subr.bf16.mxu1 %v2314_v3 }
  0x7e   :  { %2016 = vmatmul.mubr.f32.vlgmr.msra.gmra.mrb[2].mxu1 %v2316_v4 }
  0x7f   :  { %2135 = vmatpush3.bf16.msra.mxu1 %v2390_v17  ;;  %2029 = vmatprep.mubr.msk.f32.mxu1 %vm2315_vm1, %v2316_v4 }
  0x80   :  { %2139 = vmatprep.subr.bf16.mxu1 %v2314_v3 }
  0xdb   :  { %v184_v18 = vpop.f32.mrb[0].mxu1 }
  0xdc   :  { %v2010_v19 = vpop.f32.mrb[1].mxu1 }
  0xe0   :  { %v2003_v21 = vpop.f32.mrb[0].mxu0 }
  0xe1   :  { %v103_v22 = vpop.f32.mrb[1].mxu0  ;;  %v2405_v27 = vadd.f32 %v2003_v21, %v1906_v20 }
  0xe2   :  { %v2402_v23 = vadd.f32 %v1906_v20, %v103_v22 }
  0xe4   :  { %v188_v40 = vadd.f32 %v184_v18, %v2402_v23 }
  0xe6   :  { %v1909_v43 = vmul.f32 -1.442695, %v188_v40 }
 0x151   :  { %v263_v24 = vpop.f32.mrb[2].mxu1 }
 0x152   :  { %v268_v25 = vrot.slane %v263_v24, 2  ;;  %v2017_v26 = vpop.f32.mrb[3].mxu1 }
 0x154   :  { %269 = vrot.lane.b32.xlu0 %v268_v25, %s2317_s28 }
 0x1c6   :  { %v270_v28 = vpop.permute.xlu0 %269 }
 0x1c7   :  { %v272_v29 = vadd.f32 %v270_v28, %v2405_v27 }
 0x1c9   :  { %2186 = vtanh.f32 %v272_v29  ;;  %v1910_v31 = vmul.f32 -1.442695, %v272_v29 }
 0x1cb   :  { %2188 = vpow2.f32 %v1910_v31 }
 0x1d3   :  { %v2187_v30 = vpop.eup %2186 }
 0x1d4   :  { %306 = vrot.lane.b32.xlu1 %v2187_v30, %s2318_s5 }
 0x1d5   :  { %v2189_v32 = vpop.eup %2188 }
 0x1d6   :  { %v300_v33 = vadd.f32 1.0, %v2189_v32 }
 0x1d8   :  { %2190 = vrcp.f32 %v300_v33 }
 0x1e2   :  { %v2191_v34 = vpop.eup %2190 }
 0x1e3   :  { %v304_v37 = vmul.f32 0.0, %v2191_v34 }
 0x246   :  { %v307_v35 = vpop.permute.xlu1 %306 }
 0x247   :  { %v309_v36 = vmul.f32 %v2191_v34, %v307_v35 }
 0x249   :  { %311 = vrot.lane.b32.xlu1 %v309_v36, %s2319_s3 }
 0x2bb   :  { %v312_v38 = vpop.permute.xlu1 %311 }
 0x2bc   :  { %v2410_v39 = vadd.f32 %v312_v38, %v304_v37 }
 0x2be   :  { %2192 = vtanh.f32 %v2410_v39  ;;  %v519_v13 = vrot.slane %v2410_v39, 2 }
 0x2bf   :  { %2194 = vtanh.f32 %v188_v40 }
 0x2c0   :  { %2196 = vpow2.f32 %v1909_v43 }
 0x2c8   :  { %v2193_v41 = vpop.eup %2192 }
 0x2c9   :  { %317 = vrot.lane.b32.xlu0 %v2193_v41, %s2320_s6  ;;  %v2195_v42 = vpop.eup %2194 }
 0x2ca   :  { %v2197_v44 = vpop.eup %2196 }
 0x2cb   :  { %v276_v45 = vadd.f32 1.0, %v2197_v44 }
 0x2cd   :  { %282 = vrot.lane.b32.xlu0 %v2195_v42, %s2318_s5  ;;  %2198 = vrcp.f32 %v276_v45 }
 0x2d7   :  { %v2199_v50 = vpop.eup %2198 }
 0x2d8   :  { %v280_v53 = vmul.f32 0.0, %v2199_v50 }
 0x33b   :  { %v318_v46 = vpop.permute.xlu0 %317 }
 0x33c   :  { %v2416_v47 = vmul.f32 %v2191_v34, %v318_v46 }
 0x33e   :  { %v403_v48 = vrot.slane %v2416_v47, 6 }
 0x33f   :  { %v283_v49 = vpop.permute.xlu0 %282 }
 0x340   :  { %404 = vrot.lane.b32.xlu1 %v403_v48, %s2319_s3  ;;  %v285_v51 = vmul.f32 %v2199_v50, %v283_v49 }
 0x344   :  { %287 = vrot.lane.b32.xlu1 %v285_v51, %s2319_s3 }
 0x3b2   :  { %v405_v52 = vpop.permute.xlu1 %404 }
 0x3b3   :  { %2030 = vmatmul.mubr.msk.f32.vlgmr.msra.gmra.mrb[4].mxu1 %vm114_vm2, %v405_v52 }
 0x3b4   :  { %2141 = vmatpush3.bf16.msra.mxu1 %v2390_v17  ;;  %2043 = vmatprep.mubr.msk.f32.mxu1 %vm2315_vm1, %v2316_v4 }
 0x3b5   :  { %2145 = vmatprep.subr.bf16.mxu1 %v2314_v3 }
 0x3b6   :  { %v288_v54 = vpop.permute.xlu1 %287 }
 0x3b7   :  { %v2426_v55 = vadd.f32 %v288_v54, %v280_v53 }
 0x3b9   :  { %2200 = vtanh.f32 %v2426_v55  ;;  %v492_v34 = vrot.slane %v2426_v55, 6 }
 0x3c3   :  { %v2201_v56 = vpop.eup %2200 }
 0x3c4   :  { %293 = vrot.lane.b32.xlu1 %v2201_v56, %s2320_s6 }
 0x436   :  { %v294_v57 = vpop.permute.xlu1 %293 }
 0x437   :  { %v2430_v58 = vmul.f32 %v2199_v50, %v294_v57 }
 0x439   :  { %324 = vrot.lane.b32.xlu1 %v2430_v58, %s2321_s7 }
 0x486   :  { %v474_v59 = vpop.f32.mrb[4].mxu1 }
 0x487   :  { %v479_v60 = vrot.slane %v474_v59, 4  ;;  %v2031_v61 = vpop.f32.mrb[5].mxu1 }
 0x489   :  { %480 = vrot.lane.b32.xlu0 %v479_v60, %s2317_s28 }
 0x4ab   :  { %v325_v62 = vpop.permute.xlu1 %324 }
 0x4ac   :  { %2023 = vmatmul.mubr.msk.f32.vlgmr.msra.gmra.mrb[2].mxu0 %vm114_vm2, %v325_v62 }
 0x4ad   :  { %2138 = vmatpush3.bf16.msra.mxu0 %v2360_v6  ;;  %2036 = vmatprep.mubr.msk.f32.mxu0 %vm2315_vm1, %v2316_v4 }
 0x4ae   :  { %2142 = vmatprep.subr.bf16.mxu0 %v2314_v3 }
 0x4fb   :  { %v481_v63 = vpop.permute.xlu0 %480 }
 0x4fc   :  { %v483_v0 = vadd.f32 %v481_v63, %v2405_v27 }
 0x4fe   :  { %2202 = vtanh.f32 %v483_v0  ;;  %v1914_v2 = vmul.f32 -1.442695, %v483_v0 }
 0x500   :  { %2204 = vpow2.f32 %v1914_v2 }
 0x508   :  { %v2203_v1 = vpop.eup %2202 }
 0x509   :  { %523 = vrot.lane.b32.xlu0 %v2203_v1, %s2318_s5 }
 0x50a   :  { %v2205_v5 = vpop.eup %2204 }
 0x50b   :  { %v514_v7 = vadd.f32 1.0, %v2205_v5 }
 0x50d   :  { %2206 = vrcp.f32 %v514_v7 }
 0x517   :  { %v2207_v8 = vpop.eup %2206 }
 0x518   :  { %v521_v15 = vmul.f32 %v2207_v8, %v519_v13 }
 0x57b   :  { %v524_v9 = vpop.permute.xlu0 %523 }
 0x57c   :  { %v526_v10 = vmul.f32 %v2207_v8, %v524_v9 }
 0x57e   :  { %528 = vrot.lane.b32.xlu0 %v526_v10, %s2319_s3 }
 0x57f   :  { %v394_v11 = vpop.f32.mrb[2].mxu0 }
 0x580   :  { %v2024_v12 = vpop.f32.mrb[3].mxu0  ;;  %v399_v14 = vrot.slane %v394_v11, 6 }
 0x582   :  { %v401_v19 = vadd.f32 %v399_v14, %v2402_v23 }
 0x584   :  { %v1913_v22 = vmul.f32 -1.442695, %v401_v19 }
 0x5f0   :  { %v529_v16 = vpop.permute.xlu0 %528 }
 0x5f1   :  { %v2444_v18 = vadd.f32 %v529_v16, %v521_v15 }
 0x5f3   :  { %2208 = vtanh.f32 %v2444_v18  ;;  %v742_v59 = vrot.slane %v2444_v18, 2 }
 0x5f4   :  { %2210 = vtanh.f32 %v401_v19 }
 0x5f5   :  { %2212 = vpow2.f32 %v1913_v22 }
 0x5fd   :  { %v2209_v20 = vpop.eup %2208 }
 0x5fe   :  { %534 = vrot.lane.b32.xlu1 %v2209_v20, %s2320_s6  ;;  %v2211_v21 = vpop.eup %2210 }
 0x5ff   :  { %v2213_v24 = vpop.eup %2212 }
 0x600   :  { %v487_v25 = vadd.f32 1.0, %v2213_v24 }
 0x602   :  { %496 = vrot.lane.b32.xlu1 %v2211_v21, %s2318_s5  ;;  %2214 = vrcp.f32 %v487_v25 }
 0x60c   :  { %v2215_v31 = vpop.eup %2214 }
 0x60d   :  { %v494_v35 = vmul.f32 %v2215_v31, %v492_v34 }
 0x670   :  { %v535_v26 = vpop.permute.xlu1 %534 }
 0x671   :  { %v2450_v28 = vmul.f32 %v2207_v8, %v535_v26 }
 0x673   :  { %v626_v29 = vrot.slane %v2450_v28, 4  ;;  %v543_v9 = vrot.slane %v2450_v28, 6 }
 0x674   :  { %v497_v30 = vpop.permute.xlu1 %496 }
 0x675   :  { %627 = vrot.lane.b32.xlu0 %v626_v29, %s2319_s3  ;;  %v499_v32 = vmul.f32 %v2215_v31, %v497_v30  ;;  %v545_v12 = vadd.f32 %v543_v9, %v2416_v47  ;;  %v547_v13 = vmax.f32 %v2416_v47, %v543_v9 }
 0x679   :  { %501 = vrot.lane.b32.xlu0 %v499_v32, %s2319_s3 }
 0x6e7   :  { %v628_v33 = vpop.permute.xlu0 %627 }
 0x6e8   :  { %2044 = vmatmul.mubr.msk.f32.vlgmr.msra.gmra.mrb[6].mxu1 %vm114_vm2, %v628_v33 }
 0x6e9   :  { %2147 = vmatpush3.bf16.msra.mxu1 %v2390_v17  ;;  %2057 = vmatprep.mubr.msk.f32.mxu1 %vm2315_vm1, %v2316_v4 }
 0x6ea   :  { %2151 = vmatprep.subr.bf16.mxu1 %v2314_v3 }
 0x6eb   :  { %v502_v36 = vpop.permute.xlu0 %501 }
 0x6ec   :  { %v2461_v37 = vadd.f32 %v502_v36, %v494_v35 }
 0x6ee   :  { %2216 = vtanh.f32 %v2461_v37  ;;  %v715_v24 = vrot.slane %v2461_v37, 6 }
 0x6f8   :  { %v2217_v38 = vpop.eup %2216 }
 0x6f9   :  { %507 = vrot.lane.b32.xlu0 %v2217_v38, %s2320_s6 }
 0x76b   :  { %v508_v39 = vpop.permute.xlu0 %507 }
 0x76c   :  { %v510_v40 = vmul.f32 %v2215_v31, %v508_v39 }
 0x76e   :  { %v2465_v41 = vrot.slane %v510_v40, 2 }
 0x770   :  { %548 = vrot.lane.b32.xlu0 %v2465_v41, %s2321_s7  ;;  %v541_v31 = vadd.f32 %v2465_v41, %v2430_v58  ;;  %v546_v32 = vmax.f32 %v2430_v58, %v2465_v41 }
 0x7bb   :  { %v697_v42 = vpop.f32.mrb[6].mxu1 }
 0x7bc   :  { %v702_v43 = vrot.slane %v697_v42, 6  ;;  %v2045_v44 = vpop.f32.mrb[7].mxu1 }
 0x7be   :  { %703 = vrot.lane.b32.xlu1 %v702_v43, %s2317_s28 }
 0x7e2   :  { %v549_v45 = vpop.permute.xlu0 %548 }
 0x7e3   :  { %2037 = vmatmul.mubr.msk.f32.vlgmr.msra.gmra.mrb[4].mxu0 %vm114_vm2, %v549_v45 }
 0x7e4   :  { %2144 = vmatpush3.bf16.msra.mxu0 %v2360_v6  ;;  %2050 = vmatprep.mubr.msk.f32.mxu0 %vm2315_vm1, %v2316_v4 }
 0x7e5   :  { %2148 = vmatprep.subr.bf16.mxu0 %v2314_v3 }
 0x830   :  { %v704_v46 = vpop.permute.xlu1 %703 }
 0x831   :  { %v706_v48 = vadd.f32 %v704_v46, %v2405_v27 }
 0x833   :  { %2218 = vtanh.f32 %v706_v48  ;;  %v1918_v50 = vmul.f32 -1.442695, %v706_v48 }
 0x835   :  { %2220 = vpow2.f32 %v1918_v50 }
 0x83d   :  { %v2219_v49 = vpop.eup %2218 }
 0x83e   :  { %746 = vrot.lane.b32.xlu1 %v2219_v49, %s2318_s5 }
 0x83f   :  { %v2221_v51 = vpop.eup %2220 }
 0x840   :  { %v737_v52 = vadd.f32 1.0, %v2221_v51 }
 0x842   :  { %2222 = vrcp.f32 %v737_v52 }
 0x84c   :  { %v2223_v53 = vpop.eup %2222 }
 0x84d   :  { %v744_v61 = vmul.f32 %v2223_v53, %v742_v59 }
 0x8b0   :  { %v747_v54 = vpop.permute.xlu1 %746 }
 0x8b1   :  { %v749_v55 = vmul.f32 %v2223_v53, %v747_v54 }
 0x8b3   :  { %751 = vrot.lane.b32.xlu1 %v749_v55, %s2319_s3 }
 0x8b6   :  { %v618_v56 = vpop.f32.mrb[4].mxu0 }
 0x8b7   :  { %v2038_v57 = vpop.f32.mrb[5].mxu0  ;;  %v623_v60 = vrot.slane %v618_v56, 4 }
 0x8b9   :  { %v625_v0 = vadd.f32 %v623_v60, %v2402_v23 }
 0x8bb   :  { %v1917_v5 = vmul.f32 -1.442695, %v625_v0 }
 0x925   :  { %v752_v62 = vpop.permute.xlu1 %751 }
 0x926   :  { %v2479_v63 = vadd.f32 %v752_v62, %v744_v61 }
 0x928   :  { %2224 = vtanh.f32 %v2479_v63  ;;  %v964_v50 = vrot.slane %v2479_v63, 2 }
 0x929   :  { %2226 = vtanh.f32 %v625_v0 }
 0x92a   :  { %2228 = vpow2.f32 %v1917_v5 }
 0x932   :  { %v2225_v1 = vpop.eup %2224 }
 0x933   :  { %757 = vrot.lane.b32.xlu0 %v2225_v1, %s2320_s6  ;;  %v2227_v2 = vpop.eup %2226 }
 0x934   :  { %v2229_v7 = vpop.eup %2228 }
 0x935   :  { %v710_v8 = vadd.f32 1.0, %v2229_v7 }
 0x937   :  { %719 = vrot.lane.b32.xlu0 %v2227_v2, %s2318_s5  ;;  %2230 = vrcp.f32 %v710_v8 }
 0x941   :  { %v2231_v20 = vpop.eup %2230 }
 0x942   :  { %v717_v47 = vmul.f32 %v2231_v20, %v715_v24 }
 0x9a5   :  { %v758_v10 = vpop.permute.xlu0 %757 }
 0x9a6   :  { %v760_v11 = vmul.f32 %v2223_v53, %v758_v10 }
 0x9a8   :  { %v766_v14 = vrot.slane %v760_v11, 4  ;;  %v849_v15 = vrot.slane %v760_v11, 2 }
 0x9a9   :  { %v720_v16 = vpop.permute.xlu0 %719 }
 0x9aa   :  { %v2488_v18 = vadd.f32 %v766_v14, %v545_v12  ;;  %v2490_v19 = vmax.f32 %v547_v13, %v766_v14  ;;  %850 = vrot.lane.b32.xlu1 %v849_v15, %s2319_s3  ;;  %v722_v21 = vmul.f32 %v2231_v20, %v720_v16 }
 0x9ae   :  { %724 = vrot.lane.b32.xlu1 %v722_v21, %s2319_s3 }
 0xa1c   :  { %v851_v22 = vpop.permute.xlu1 %850 }
 0xa1d   :  { %2058 = vmatmul.mubr.msk.f32.vlgmr.msra.gmra.mrb[8].mxu1 %vm114_vm2, %v851_v22 }
 0xa1e   :  { %2153 = vmatpush3.bf16.msra.mxu1 %v2390_v17  ;;  %2071 = vmatprep.mubr.msk.f32.mxu1 %vm2315_vm1, %v2316_v4 }
 0xa1f   :  { %2157 = vmatprep.subr.bf16.mxu1 %v2314_v3 }
 0xa20   :  { %v725_v25 = vpop.permute.xlu1 %724 }
 0xa21   :  { %v2500_v26 = vadd.f32 %v725_v25, %v717_v47 }
 0xa23   :  { %2232 = vtanh.f32 %v2500_v26  ;;  %v937_v10 = vrot.slane %v2500_v26, 6 }
 0xa2d   :  { %v2233_v28 = vpop.eup %2232 }
 0xa2e   :  { %730 = vrot.lane.b32.xlu0 %v2233_v28, %s2320_s6 }
 0xaa0   :  { %v731_v29 = vpop.permute.xlu0 %730 }
 0xaa1   :  { %v733_v30 = vmul.f32 %v2231_v20, %v731_v29 }
 0xaa3   :  { %v762_v33 = vrot.slane %v733_v30, 4 }
 0xaa5   :  { %v2508_v34 = vadd.f32 %v762_v33, %v541_v31  ;;  %v2510_v35 = vmax.f32 %v546_v32, %v762_v33  ;;  %771 = vrot.lane.b32.xlu0 %v762_v33, %s2321_s7 }
 0xaf0   :  { %v920_v36 = vpop.f32.mrb[8].mxu1 }
 0xaf1   :  { %v2059_v37 = vpop.f32.mrb[9].mxu1  ;;  %925 = vrot.lane.b32.xlu1 %v920_v36, %s2317_s28 }
 0xb17   :  { %v772_v38 = vpop.permute.xlu0 %771 }
 0xb18   :  { %2051 = vmatmul.mubr.msk.f32.vlgmr.msra.gmra.mrb[6].mxu0 %vm114_vm2, %v772_v38 }
 0xb19   :  { %2150 = vmatpush3.bf16.msra.mxu0 %v2360_v6  ;;  %2064 = vmatprep.mubr.msk.f32.mxu0 %vm2315_vm1, %v2316_v4 }
 0xb1a   :  { %2154 = vmatprep.subr.bf16.mxu0 %v2314_v3 }
 0xb63   :  { %v926_v58 = vpop.permute.xlu1 %925 }
 0xb64   :  { %v928_v39 = vadd.f32 %v926_v58, %v2405_v27 }
 0xb66   :  { %2234 = vtanh.f32 %v928_v39  ;;  %v1922_v41 = vmul.f32 -1.442695, %v928_v39 }
 0xb68   :  { %2236 = vpow2.f32 %v1922_v41 }
 0xb70   :  { %v2235_v40 = vpop.eup %2234 }
 0xb71   :  { %968 = vrot.lane.b32.xlu1 %v2235_v40, %s2318_s5 }
 0xb72   :  { %v2237_v42 = vpop.eup %2236 }
 0xb73   :  { %v959_v43 = vadd.f32 1.0, %v2237_v42 }
 0xb75   :  { %2238 = vrcp.f32 %v959_v43 }
 0xb7f   :  { %v2239_v44 = vpop.eup %2238 }
 0xb80   :  { %v966_v52 = vmul.f32 %v2239_v44, %v964_v50 }
 0xbe3   :  { %v969_v45 = vpop.permute.xlu1 %968 }
 0xbe4   :  { %v971_v46 = vmul.f32 %v2239_v44, %v969_v45 }
 0xbe6   :  { %973 = vrot.lane.b32.xlu0 %v971_v46, %s2319_s3 }
 0xbeb   :  { %v841_v48 = vpop.f32.mrb[6].mxu0 }
 0xbec   :  { %v2052_v49 = vpop.f32.mrb[7].mxu0  ;;  %v846_v51 = vrot.slane %v841_v48, 2 }
 0xbee   :  { %v848_v55 = vadd.f32 %v846_v51, %v2402_v23 }
 0xbf0   :  { %v1921_v59 = vmul.f32 -1.442695, %v848_v55 }
 0xc58   :  { %v974_v53 = vpop.permute.xlu0 %973 }
 0xc59   :  { %v2523_v54 = vadd.f32 %v974_v53, %v966_v52 }
 0xc5b   :  { %2240 = vtanh.f32 %v2523_v54  ;;  %v1183_v40 = vrot.slane %v2523_v54, 2 }
 0xc5c   :  { %2242 = vtanh.f32 %v848_v55 }
 0xc5d   :  { %2244 = vpow2.f32 %v1921_v59 }
 0xc65   :  { %v2241_v56 = vpop.eup %2240 }
 0xc66   :  { %979 = vrot.lane.b32.xlu1 %v2241_v56, %s2320_s6  ;;  %v2243_v57 = vpop.eup %2242 }
 0xc67   :  { %v2245_v60 = vpop.eup %2244 }
 0xc68   :  { %v932_v61 = vadd.f32 1.0, %v2245_v60 }
 0xc6a   :  { %941 = vrot.lane.b32.xlu1 %v2243_v57, %s2318_s5  ;;  %2246 = vrcp.f32 %v932_v61 }
 0xc74   :  { %v2247_v1 = vpop.eup %2246 }
 0xc75   :  { %v939_v11 = vmul.f32 %v2247_v1, %v937_v10 }
 0xcd8   :  { %v980_v62 = vpop.permute.xlu1 %979 }
 0xcd9   :  { %v982_v63 = vmul.f32 %v2239_v44, %v980_v62 }
 0xcdb   :  { %v988_v0 = vrot.slane %v982_v63, 2  ;;  %1068 = vrot.lane.b32.xlu0 %v982_v63, %s2319_s3 }
 0xcdc   :  { %v942_v2 = vpop.permute.xlu1 %941 }
 0xcdd   :  { %v2531_v5 = vadd.f32 %v988_v0, %v2488_v18  ;;  %v2534_v7 = vmax.f32 %v2490_v19, %v988_v0  ;;  %v944_v8 = vmul.f32 %v2247_v1, %v942_v2 }
 0xcdf   :  { %946 = vrot.lane.b32.xlu0 %v944_v8, %s2319_s3 }
 0xd4d   :  { %v1069_v9 = vpop.permute.xlu0 %1068 }
 0xd4e   :  { %2072 = vmatmul.mubr.msk.f32.vlgmr.msra.gmra.mrb[10].mxu1 %vm114_vm2, %v1069_v9 }
 0xd4f   :  { %2159 = vmatpush3.bf16.msra.mxu1 %v2390_v17  ;;  %2085 = vmatprep.mubr.msk.f32.mxu1 %vm2315_vm1, %v2316_v4 }
 0xd50   :  { %2163 = vmatprep.subr.bf16.mxu1 %v2314_v3 }
 0xd51   :  { %v947_v12 = vpop.permute.xlu0 %946 }
 0xd52   :  { %v2543_v13 = vadd.f32 %v947_v12, %v939_v11 }
 0xd54   :  { %2248 = vtanh.f32 %v2543_v13  ;;  %v1156_v53 = vrot.slane %v2543_v13, 6 }
 0xd5e   :  { %v2249_v14 = vpop.eup %2248 }
 0xd5f   :  { %952 = vrot.lane.b32.xlu1 %v2249_v14, %s2320_s6 }
 0xdd1   :  { %v953_v15 = vpop.permute.xlu1 %952 }
 0xdd2   :  { %v955_v16 = vmul.f32 %v2247_v1, %v953_v15 }
 0xdd4   :  { %v2547_v18 = vrot.slane %v955_v16, 6 }
 0xdd6   :  { %v2551_v19 = vadd.f32 %v2547_v18, %v2508_v34  ;;  %v991_v20 = vmax.f32 %v2510_v35, %v2547_v18  ;;  %993 = vrot.lane.b32.xlu0 %v2547_v18, %s2321_s7 }
 0xe21   :  { %v1138_v21 = vpop.f32.mrb[10].mxu1 }
 0xe22   :  { %v1143_v22 = vrot.slane %v1138_v21, 2  ;;  %v2073_v24 = vpop.f32.mrb[11].mxu1 }
 0xe24   :  { %1144 = vrot.lane.b32.xlu1 %v1143_v22, %s2317_s28 }
 0xe48   :  { %v994_v47 = vpop.permute.xlu0 %993 }
 0xe49   :  { %2065 = vmatmul.mubr.msk.f32.vlgmr.msra.gmra.mrb[8].mxu0 %vm114_vm2, %v994_v47 }
 0xe4a   :  { %2156 = vmatpush3.bf16.msra.mxu0 %v2360_v6  ;;  %2078 = vmatprep.mubr.msk.f32.mxu0 %vm2315_vm1, %v2316_v4 }
 0xe4b   :  { %2160 = vmatprep.subr.bf16.mxu0 %v2314_v3 }
 0xe96   :  { %v1145_v25 = vpop.permute.xlu1 %1144 }
 0xe97   :  { %v1147_v26 = vadd.f32 %v1145_v25, %v2402_v23 }
 0xe99   :  { %2250 = vtanh.f32 %v1147_v26  ;;  %v1926_v29 = vmul.f32 -1.442695, %v1147_v26 }
 0xe9b   :  { %2252 = vpow2.f32 %v1926_v29 }
 0xea3   :  { %v2251_v28 = vpop.eup %2250 }
 0xea4   :  { %1187 = vrot.lane.b32.xlu0 %v2251_v28, %s2318_s5 }
 0xea5   :  { %v2253_v30 = vpop.eup %2252 }
 0xea6   :  { %v1178_v31 = vadd.f32 1.0, %v2253_v30 }
 0xea8   :  { %2254 = vrcp.f32 %v1178_v31 }
 0xeb2   :  { %v2255_v32 = vpop.eup %2254 }
 0xeb3   :  { %v1185_v41 = vmul.f32 %v2255_v32, %v1183_v40 }
 0xf16   :  { %v1188_v33 = vpop.permute.xlu0 %1187 }
 0xf17   :  { %v1190_v34 = vmul.f32 %v2255_v32, %v1188_v33 }
 0xf19   :  { %1192 = vrot.lane.b32.xlu1 %v1190_v34, %s2319_s3 }
 0xf1c   :  { %v1063_v36 = vpop.f32.mrb[8].mxu0 }
 0xf1d   :  { %v1067_v37 = vadd.f32 %v1063_v36, %v2405_v27  ;;  %v2066_v38 = vpop.f32.mrb[9].mxu0 }
 0xf1f   :  { %2256 = vtanh.f32 %v1067_v37  ;;  %v1925_v39 = vmul.f32 -1.442695, %v1067_v37 }
 0xf21   :  { %2258 = vpow2.f32 %v1925_v39 }
 0xf29   :  { %v2257_v58 = vpop.eup %2256 }
 0xf2a   :  { %1160 = vrot.lane.b32.xlu1 %v2257_v58, %s2318_s5 }
 0xf2b   :  { %v2259_v42 = vpop.eup %2258 }
 0xf2c   :  { %v1151_v45 = vadd.f32 1.0, %v2259_v42 }
 0xf8b   :  { %v1193_v43 = vpop.permute.xlu1 %1192 }
 0xf8c   :  { %v2569_v44 = vadd.f32 %v1193_v43, %v1185_v41 }
 0xf8e   :  { %2260 = vtanh.f32 %v2569_v44  ;;  %v1402_v31 = vrot.slane %v2569_v44, 2 }
 0xf8f   :  { %2262 = vrcp.f32 %v1151_v45 }
 0xf98   :  { %v2261_v46 = vpop.eup %2260 }
 0xf99   :  { %1198 = vrot.lane.b32.xlu0 %v2261_v46, %s2320_s6  ;;  %v2263_v48 = vpop.eup %2262 }
 0xf9a   :  { %v1158_v57 = vmul.f32 %v2263_v48, %v1156_v53 }
 0xf9c   :  { %v1161_v49 = vpop.permute.xlu1 %1160 }
 0xf9d   :  { %v1163_v50 = vmul.f32 %v2263_v48, %v1161_v49 }
 0xf9f   :  { %1165 = vrot.lane.b32.xlu1 %v1163_v50, %s2319_s3 }
0x100b   :  { %v1199_v51 = vpop.permute.xlu0 %1198 }
0x100c   :  { %v2574_v52 = vmul.f32 %v2255_v32, %v1199_v51 }
0x100e   :  { %v2579_v54 = vadd.f32 %v2574_v52, %v2531_v5  ;;  %v1205_v55 = vmax.f32 %v2534_v7, %v2574_v52  ;;  %v1286_v56 = vrot.slane %v2574_v52, 6 }
0x1010   :  { %1287 = vrot.lane.b32.xlu0 %v1286_v56, %s2319_s3 }
0x1011   :  { %v1166_v59 = vpop.permute.xlu1 %1165 }
0x1012   :  { %v1168_v60 = vadd.f32 %v1166_v59, %v1158_v57 }
0x1014   :  { %2264 = vtanh.f32 %v1168_v60  ;;  %v1375_v37 = vrot.slane %v1168_v60, 6 }
0x101e   :  { %v2265_v61 = vpop.eup %2264 }
0x101f   :  { %1171 = vrot.lane.b32.xlu0 %v2265_v61, %s2320_s6 }
0x1082   :  { %v1288_v62 = vpop.permute.xlu0 %1287 }
0x1083   :  { %2086 = vmatmul.mubr.msk.f32.vlgmr.msra.gmra.mrb[12].mxu1 %vm114_vm2, %v1288_v62 }
0x1084   :  { %2165 = vmatpush3.bf16.msra.mxu1 %v2390_v17  ;;  %2099 = vmatprep.mubr.msk.f32.mxu1 %vm2315_vm1, %v2316_v4 }
0x1085   :  { %2169 = vmatprep.subr.bf16.mxu1 %v2314_v3 }
0x1091   :  { %v1172_v63 = vpop.permute.xlu0 %1171 }
0x1092   :  { %v1174_v0 = vmul.f32 %v2263_v48, %v1172_v63 }
0x1094   :  { %v2592_v1 = vadd.f32 %v1174_v0, %v2551_v19  ;;  %v2597_v2 = vmax.f32 %v991_v20, %v1174_v0  ;;  %1207 = vrot.lane.b32.xlu1 %v1174_v0, %s2321_s7 }
0x1106   :  { %v1208_v5 = vpop.permute.xlu1 %1207 }
0x1107   :  { %2079 = vmatmul.mubr.msk.f32.vlgmr.msra.gmra.mrb[10].mxu0 %vm114_vm2, %v1208_v5 }
0x1108   :  { %2162 = vmatpush3.bf16.msra.mxu0 %v2360_v6  ;;  %2092 = vmatprep.mubr.msk.f32.mxu0 %vm2315_vm1, %v2316_v4 }
0x1109   :  { %2166 = vmatprep.subr.bf16.mxu0 %v2314_v3 }
0x1156   :  { %v1357_v8 = vpop.f32.mrb[12].mxu1 }
0x1157   :  { %v1362_v9 = vrot.slane %v1357_v8, 4  ;;  %v2087_v10 = vpop.f32.mrb[13].mxu1 }
0x1159   :  { %1363 = vrot.lane.b32.xlu0 %v1362_v9, %s2317_s28 }
0x11cb   :  { %v1364_v35 = vpop.permute.xlu0 %1363 }
0x11cc   :  { %v1366_v11 = vadd.f32 %v1364_v35, %v2402_v23 }
0x11ce   :  { %2266 = vtanh.f32 %v1366_v11  ;;  %v1930_v3 = vmul.f32 -1.442695, %v1366_v11 }
0x11d8   :  { %v2267_v12 = vpop.eup %2266 }
0x11d9   :  { %1406 = vrot.lane.b32.xlu1 %v2267_v12, %s2318_s5 }
0x11da   :  { %v1277_v13 = vpop.f32.mrb[10].mxu0 }
0x11db   :  { %v1282_v14 = vrot.slane %v1277_v13, 6  ;;  %v2080_v15 = vpop.f32.mrb[11].mxu0 }
0x11dd   :  { %v1284_v16 = vadd.f32 %v1282_v14, %v2405_v27 }
0x11df   :  { %2268 = vtanh.f32 %v1284_v16  ;;  %v1929_v21 = vmul.f32 -1.442695, %v1284_v16 }
0x11e0   :  { %2270 = vpow2.f32 %v1930_v3 }
0x11e9   :  { %v2269_v18 = vpop.eup %2268 }
0x11ea   :  { %1379 = vrot.lane.b32.xlu1 %v2269_v18, %s2318_s5  ;;  %v2271_v19 = vpop.eup %2270 }
0x11eb   :  { %v1397_v20 = vadd.f32 1.0, %v2271_v19 }
0x11ed   :  { %2272 = vrcp.f32 %v1397_v20 }
0x11ee   :  { %2274 = vpow2.f32 %v1929_v21 }
0x11f7   :  { %v2273_v22 = vpop.eup %2272 }
0x11f8   :  { %v2275_v24 = vpop.eup %2274  ;;  %v1404_v32 = vmul.f32 %v2273_v22, %v1402_v31 }
0x11f9   :  { %v1370_v26 = vadd.f32 1.0, %v2275_v24 }
0x11fb   :  { %2276 = vrcp.f32 %v1370_v26 }
0x1205   :  { %v2277_v28 = vpop.eup %2276 }
0x1206   :  { %v1377_v38 = vmul.f32 %v2277_v28, %v1375_v37 }
0x124b   :  { %v1407_v47 = vpop.permute.xlu1 %1406 }
0x124c   :  { %v1409_v25 = vmul.f32 %v2273_v22, %v1407_v47 }
0x124e   :  { %1411 = vrot.lane.b32.xlu0 %v1409_v25, %s2319_s3 }
0x125c   :  { %v1380_v29 = vpop.permute.xlu1 %1379 }
0x125d   :  { %v1382_v30 = vmul.f32 %v2277_v28, %v1380_v29 }
0x125f   :  { %1384 = vrot.lane.b32.xlu1 %v1382_v30, %s2319_s3 }
0x12c0   :  { %v1412_v33 = vpop.permute.xlu0 %1411 }
0x12c1   :  { %v2613_v34 = vadd.f32 %v1412_v33, %v1404_v32 }
0x12c3   :  { %2278 = vtanh.f32 %v2613_v34  ;;  %v1625_v20 = vrot.slane %v2613_v34, 2 }
0x12cd   :  { %v2279_v36 = vpop.eup %2278 }
0x12ce   :  { %1417 = vrot.lane.b32.xlu0 %v2279_v36, %s2320_s6 }
0x12d1   :  { %v1385_v58 = vpop.permute.xlu1 %1384 }
0x12d2   :  { %v1387_v39 = vadd.f32 %v1385_v58, %v1377_v38 }
0x12d4   :  { %2280 = vtanh.f32 %v1387_v39  ;;  %v1598_v15 = vrot.slane %v1387_v39, 6 }
0x12de   :  { %v2281_v40 = vpop.eup %2280 }
0x12df   :  { %1390 = vrot.lane.b32.xlu1 %v2281_v40, %s2320_s6 }
0x1340   :  { %v1418_v41 = vpop.permute.xlu0 %1417 }
0x1341   :  { %v1420_v42 = vmul.f32 %v2273_v22, %v1418_v41 }
0x1343   :  { %v1426_v43 = vrot.slane %v1420_v42, 6  ;;  %v1509_v44 = vrot.slane %v1420_v42, 4 }
0x1345   :  { %v2619_v45 = vadd.f32 %v1426_v43, %v2579_v54  ;;  %v2624_v46 = vmax.f32 %v1205_v55, %v1426_v43  ;;  %1510 = vrot.lane.b32.xlu0 %v1509_v44, %s2319_s3 }
0x1351   :  { %v1391_v48 = vpop.permute.xlu1 %1390 }
0x1352   :  { %v1393_v49 = vmul.f32 %v2277_v28, %v1391_v48 }
0x1354   :  { %v2627_v50 = vrot.slane %v1393_v49, 2 }
0x1356   :  { %v2631_v51 = vadd.f32 %v2627_v50, %v2592_v1  ;;  %v1429_v53 = vmax.f32 %v2597_v2, %v2627_v50  ;;  %1431 = vrot.lane.b32.xlu0 %v2627_v50, %s2321_s7 }
0x13b7   :  { %v1511_v54 = vpop.permute.xlu0 %1510 }
0x13b8   :  { %2100 = vmatmul.mubr.msk.f32.vlgmr.msra.gmra.mrb[14].mxu1 %vm114_vm2, %v1511_v54 }
0x13b9   :  { %2171 = vmatpush3.bf16.msra.mxu1 %v2390_v17  ;;  %2113 = vmatprep.mubr.msk.f32.mxu1 %vm2315_vm1, %v2316_v4 }
0x13c8   :  { %v1432_v7 = vpop.permute.xlu0 %1431 }
0x13c9   :  { %2093 = vmatmul.mubr.msk.f32.vlgmr.msra.gmra.mrb[12].mxu0 %vm114_vm2, %v1432_v7 }
0x13ca   :  { %2168 = vmatpush3.bf16.msra.mxu0 %v2360_v6  ;;  %2106 = vmatprep.mubr.msk.f32.mxu0 %vm2315_vm1, %v2316_v4 }
0x148b   :  { %v1580_v52 = vpop.f32.mrb[14].mxu1 }
0x148c   :  { %v1585_v55 = vrot.slane %v1580_v52, 6  ;;  %v2101_v56 = vpop.f32.mrb[15].mxu1 }
0x148e   :  { %1586 = vrot.lane.b32.xlu1 %v1585_v55, %s2317_s28 }
0x149c   :  { %v1501_v57 = vpop.f32.mrb[12].mxu0 }
0x149d   :  { %v1506_v59 = vrot.slane %v1501_v57, 4  ;;  %v2094_v60 = vpop.f32.mrb[13].mxu0 }
0x149f   :  { %v1508_v17 = vadd.f32 %v1506_v59, %v2405_v27 }
0x14a1   :  { %2282 = vtanh.f32 %v1508_v17  ;;  %v1933_v62 = vmul.f32 -1.442695, %v1508_v17 }
0x14a3   :  { %2284 = vpow2.f32 %v1933_v62 }
0x14ab   :  { %v2283_v61 = vpop.eup %2282 }
0x14ac   :  { %1602 = vrot.lane.b32.xlu1 %v2283_v61, %s2318_s5 }
0x14ad   :  { %v2285_v4 = vpop.eup %2284 }
0x14ae   :  { %v1593_v1 = vadd.f32 1.0, %v2285_v4 }
0x1500   :  { %v1587_v63 = vpop.permute.xlu1 %1586 }
0x1501   :  { %v1589_v6 = vadd.f32 %v1587_v63, %v2402_v23 }
0x1503   :  { %2286 = vtanh.f32 %v1589_v6  ;;  %v1934_v10 = vmul.f32 -1.442695, %v1589_v6 }
0x1504   :  { %2288 = vrcp.f32 %v1593_v1 }
0x1505   :  { %2290 = vpow2.f32 %v1934_v10 }
0x150d   :  { %v2287_v0 = vpop.eup %2286 }
0x150e   :  { %1629 = vrot.lane.b32.xlu0 %v2287_v0, %s2318_s5  ;;  %v2289_v5 = vpop.eup %2288 }
0x150f   :  { %v2291_v35 = vpop.eup %2290  ;;  %v1600_v16 = vmul.f32 %v2289_v5, %v1598_v15 }
0x1510   :  { %v1620_v11 = vadd.f32 1.0, %v2291_v35 }
0x1512   :  { %2292 = vrcp.f32 %v1620_v11 }
0x151c   :  { %v2293_v12 = vpop.eup %2292 }
0x151d   :  { %v1627_v21 = vmul.f32 %v2293_v12, %v1625_v20 }
0x151e   :  { %v1603_v8 = vpop.permute.xlu1 %1602 }
0x151f   :  { %v1605_v9 = vmul.f32 %v2289_v5, %v1603_v8 }
0x1521   :  { %1607 = vrot.lane.b32.xlu1 %v1605_v9, %s2319_s3 }
0x1580   :  { %v1630_v13 = vpop.permute.xlu0 %1629 }
0x1581   :  { %v1632_v14 = vmul.f32 %v2293_v12, %v1630_v13 }
0x1583   :  { %1634 = vrot.lane.b32.xlu0 %v1632_v14, %s2319_s3 }
0x1593   :  { %v1608_v18 = vpop.permute.xlu1 %1607 }
0x1594   :  { %v1610_v3 = vadd.f32 %v1608_v18, %v1600_v16 }
0x1596   :  { %2294 = vtanh.f32 %v1610_v3  ;;  %v1820_v7 = vrot.slane %v1610_v3, 6 }
0x15a0   :  { %v2295_v19 = vpop.eup %2294 }
0x15a1   :  { %1613 = vrot.lane.b32.xlu1 %v2295_v19, %s2320_s6 }
0x15f5   :  { %v1635_v22 = vpop.permute.xlu0 %1634 }
0x15f6   :  { %v2654_v24 = vadd.f32 %v1635_v22, %v1627_v21 }
0x15f8   :  { %2296 = vtanh.f32 %v2654_v24  ;;  %v1847_v8 = vrot.slane %v2654_v24, 2 }
0x1602   :  { %v2297_v47 = vpop.eup %2296 }
0x1603   :  { %1640 = vrot.lane.b32.xlu0 %v2297_v47, %s2320_s6 }
0x1613   :  { %v1614_v25 = vpop.permute.xlu1 %1613 }
0x1614   :  { %v1616_v26 = vmul.f32 %v2289_v5, %v1614_v25 }
0x1616   :  { %v1645_v28 = vrot.slane %v1616_v26, 4 }
0x1618   :  { %1654 = vrot.lane.b32.xlu1 %v1645_v28, %s2321_s7  ;;  %v1647_v29 = vadd.f32 %v1645_v28, %v2631_v51  ;;  %v1652_v30 = vmax.f32 %v1429_v53, %v1645_v28 }
0x1675   :  { %v1641_v31 = vpop.permute.xlu0 %1640 }
0x1676   :  { %v1643_v32 = vmul.f32 %v2293_v12, %v1641_v31 }
0x1678   :  { %v1649_v33 = vrot.slane %v1643_v32, 4  ;;  %v1732_v34 = vrot.slane %v1643_v32, 2 }
0x167a   :  { %v2664_v36 = vadd.f32 %v1649_v33, %v2619_v45  ;;  %v2667_v37 = vmax.f32 %v2624_v46, %v1649_v33  ;;  %1733 = vrot.lane.b32.xlu0 %v1732_v34, %s2319_s3 }
0x168a   :  { %v1655_v38 = vpop.permute.xlu1 %1654 }
0x168b   :  { %2107 = vmatmul.mubr.msk.f32.vlgmr.msra.gmra.mrb[14].mxu0 %vm114_vm2, %v1655_v38 }
0x16ec   :  { %v1734_v58 = vpop.permute.xlu0 %1733 }
0x16ed   :  { %2114 = vmatmul.mubr.msk.f32.vlgmr.msra.gmra.mrb[16].mxu1 %vm114_vm2, %v1734_v58 }
0x175e   :  { %v1724_v2 = vpop.f32.mrb[14].mxu0 }
0x175f   :  { %v1729_v39 = vrot.slane %v1724_v2, 2  ;;  %v2108_v40 = vpop.f32.mrb[15].mxu0 }
0x1761   :  { %v1731_v41 = vadd.f32 %v1729_v39, %v2405_v27 }
0x1763   :  { %2298 = vtanh.f32 %v1731_v41  ;;  %v1937_v44 = vmul.f32 -1.442695, %v1731_v41 }
0x1765   :  { %2300 = vpow2.f32 %v1937_v44 }
0x176d   :  { %v2299_v42 = vpop.eup %2298 }
0x176e   :  { %1824 = vrot.lane.b32.xlu1 %v2299_v42, %s2318_s5 }
0x176f   :  { %v2301_v46 = vpop.eup %2300 }
0x1770   :  { %v1815_v48 = vadd.f32 1.0, %v2301_v46 }
0x1772   :  { %2302 = vrcp.f32 %v1815_v48 }
0x177c   :  { %v2303_v49 = vpop.eup %2302 }
0x177d   :  { %v1822_v52 = vmul.f32 %v2303_v49, %v1820_v7 }
0x17c0   :  { %v1803_v43 = vpop.f32.mrb[16].mxu1 }
0x17c1   :  { %1808 = vrot.lane.b32.xlu0 %v1803_v43, %s2317_s28  ;;  %v2115_v45 = vpop.f32.mrb[17].mxu1 }
0x17e0   :  { %v1825_v50 = vpop.permute.xlu1 %1824 }
0x17e1   :  { %v1827_v51 = vmul.f32 %v2303_v49, %v1825_v50 }
0x17e3   :  { %1829 = vrot.lane.b32.xlu1 %v1827_v51, %s2319_s3 }
0x1833   :  { %v1809_v53 = vpop.permute.xlu0 %1808 }
0x1834   :  { %v1811_v27 = vadd.f32 %v1809_v53, %v2402_v23 }
0x1836   :  { %2304 = vtanh.f32 %v1811_v27  ;;  %v1938_v59 = vmul.f32 -1.442695, %v1811_v27 }
0x1840   :  { %v2305_v54 = vpop.eup %2304 }
0x1841   :  { %1851 = vrot.lane.b32.xlu0 %v2305_v54, %s2318_s5 }
0x1855   :  { %v1830_v55 = vpop.permute.xlu1 %1829 }
0x1856   :  { %v1832_v56 = vadd.f32 %v1830_v55, %v1822_v52 }
0x1858   :  { %2306 = vtanh.f32 %v1832_v56 }
0x1859   :  { %2308 = vpow2.f32 %v1938_v59 }
0x1862   :  { %v2307_v57 = vpop.eup %2306 }
0x1863   :  { %1835 = vrot.lane.b32.xlu1 %v2307_v57, %s2320_s6  ;;  %v2309_v60 = vpop.eup %2308 }
0x1864   :  { %v1842_v17 = vadd.f32 1.0, %v2309_v60 }
0x1866   :  { %2310 = vrcp.f32 %v1842_v17 }
0x1870   :  { %v2311_v61 = vpop.eup %2310 }
0x1871   :  { %v1849_v9 = vmul.f32 %v2311_v61, %v1847_v8 }
0x18b3   :  { %v1852_v62 = vpop.permute.xlu0 %1851 }
0x18b4   :  { %v1854_v23 = vmul.f32 %v2311_v61, %v1852_v62 }
0x18b6   :  { %1856 = vrot.lane.b32.xlu0 %v1854_v23, %s2319_s3 }
0x18d5   :  { %v1836_v63 = vpop.permute.xlu1 %1835 }
0x18d6   :  { %v1838_v6 = vmul.f32 %v2303_v49, %v1836_v63 }
0x18d8   :  { %v1867_v4 = vrot.slane %v1838_v6, 6 }
0x18da   :  { %v1869_v0 = vadd.f32 %v1867_v4, %v1647_v29  ;;  %v1874_v5 = vmax.f32 %v1652_v30, %v1867_v4 }
0x18dc   :  { %v1876_v1 = vmul.f32 0.015625, %v1869_v0 }
0x18de   :  { %1878 = vrot.lane.b32.xlu1 %v1876_v1, %s2321_s7 }
0x18e2   :  { %1891 = vrot.lane.b32.xlu1 %v1874_v5, %s2322_s8 }
0x1928   :  { %v1857_v10 = vpop.permute.xlu0 %1856 }
0x1929   :  { %v1859_v35 = vadd.f32 %v1857_v10, %v1849_v9 }
0x192b   :  { %2312 = vtanh.f32 %v1859_v35 }
0x1935   :  { %v2313_v11 = vpop.eup %2312 }
0x1936   :  { %1862 = vrot.lane.b32.xlu0 %v2313_v11, %s2320_s6 }
0x1950   :  { %v1879_v12 = vpop.permute.xlu1 %1878 }
0x1951   :  { %1882 = vst.msk [vmem:[%s2703_s4] sm:$0x3] %vm1881_vm3, %v1879_v12 }
0x1954   :  { %v1892_v20 = vpop.permute.xlu1 %1891 }
0x19a8   :  { %v1863_v13 = vpop.permute.xlu0 %1862 }
0x19a9   :  { %v1865_v14 = vmul.f32 %v2311_v61, %v1863_v13 }
0x19ab   :  { %v1871_v15 = vrot.slane %v1865_v14, 2 }
0x19ad   :  { %v1873_v16 = vadd.f32 %v1871_v15, %v2664_v36  ;;  %v1875_v3 = vmax.f32 %v2667_v37, %v1871_v15 }
0x19af   :  { %v1883_v18 = vmul.f32 0.015625, %v1873_v16 }
0x19b1   :  { %1885 = vrot.lane.b32.xlu0 %v1883_v18, %s2320_s6 }
0x19b5   :  { %1897 = vrot.lane.b32.xlu0 %v1875_v3, %s2317_s28 }
0x1a23   :  { %v1886_v19 = vpop.permute.xlu0 %1885 }
0x1a24   :  { %1889 = vst.msk [vmem:[%s2703_s4 - $0x6] sm:$0xc0] %vm1888_vm4, %v1886_v19 }
0x1a25   :  { %1895 = vst.msk [vmem:[%s2703_s4] sm:$0x3] %vm1894_vm5, %v1892_v20 }
0x1a27   :  { %v1898_v21 = vpop.permute.xlu0 %1897 }
0x1a28   :  { %1901 = vst.msk [vmem:[%s2703_s4 - $0x6] sm:$0xc0] %vm1900_vm6, %v1898_v21 }

</bundles_post_ra>
